<compile_context>
chip_gen: v7x
topology: tpu7x:2x2x1
jax: 0.10.0
libtpu: 0.0.40
codegen_flags: <defaults>
</compile_context>

<pallas_src>
import functools
import math

import jax
import jax.numpy as jnp
from jax import lax
from jax.experimental import pallas as pl
from jax.experimental.pallas import tpu as pltpu

_VMEM_LIMIT = 48 * 1024 * 1024  # below v7x's 64 MiB physical VMEM, generous for v5e/v6e
_EPS = 1e-5
_BF16 = jnp.bfloat16


def _fit(dim, pref):
    """Largest tile in {pref,512,256,128} that divides dim; else the whole dim."""
    for t in (pref, 512, 256, 128):
        if t <= dim and dim % t == 0:
            return t
    return dim


def _heads_per_block(n_heads, dh):
    """Smallest head group G (dividing n_heads) so G*dh is lane-aligned (%128)."""
    for g in range(1, n_heads + 1):
        if n_heads % g == 0 and (g * dh) % 128 == 0:
            return g
    raise ValueError(f"cannot tile heads: n_heads={n_heads}, head_dim={dh}")


# ----------------------------------------------------------------------------
# Tiled matmul + bias  (q/k/v projections).  bf16 MXU, f32 accumulate.
# ----------------------------------------------------------------------------
def _mm_bias_kernel(x_ref, w_ref, b_ref, o_ref, acc_ref):
    k = pl.program_id(2)

    @pl.when(k == 0)
    def _():
        acc_ref[...] = jnp.zeros_like(acc_ref)

    acc_ref[...] += jnp.dot(x_ref[...].astype(_BF16), w_ref[...],
                            preferred_element_type=jnp.float32)

    @pl.when(k == pl.num_programs(2) - 1)
    def _():
        o_ref[...] = (acc_ref[...] + b_ref[...]).astype(o_ref.dtype)


def matmul_bias(x2d, w, b, *, tm=512, tn=512, tk=512, out_dtype=None):
    M, K = x2d.shape
    K2, N = w.shape
    assert K == K2
    out_dtype = out_dtype or x2d.dtype
    tm, tn, tk = _fit(M, tm), _fit(N, tn), _fit(K, tk)
    return pl.pallas_call(
        _mm_bias_kernel,
        out_shape=jax.ShapeDtypeStruct((M, N), out_dtype),
        grid_spec=pltpu.PrefetchScalarGridSpec(
            num_scalar_prefetch=0,
            grid=(M // tm, N // tn, K // tk),
            in_specs=[
                pl.BlockSpec((tm, tk), lambda i, j, k: (i, k)),
                pl.BlockSpec((tk, tn), lambda i, j, k: (k, j)),
                pl.BlockSpec((1, tn), lambda i, j, k: (0, j)),
            ],
            out_specs=pl.BlockSpec((tm, tn), lambda i, j, k: (i, j)),
            scratch_shapes=[pltpu.VMEM((tm, tn), jnp.float32)],
        ),
        compiler_params=pltpu.CompilerParams(
            dimension_semantics=("parallel", "parallel", "arbitrary"),
            vmem_limit_bytes=_VMEM_LIMIT,
        ),
    )(x2d, w, b.reshape(1, N))


# ----------------------------------------------------------------------------
# Tiled matmul + bias + residual + LayerNorm  (attention out-projection epilogue)
# bf16 MXU, f32 accumulate, f32 LN statistics.
# ----------------------------------------------------------------------------
def _proj_add_ln_kernel(a_ref, w_ref, b_ref, res_ref, g_ref, beta_ref,
                        o_ref, acc_ref, *, eps):
    k = pl.program_id(1)

    @pl.when(k == 0)
    def _():
        acc_ref[...] = jnp.zeros_like(acc_ref)

    acc_ref[...] += jnp.dot(a_ref[...].astype(_BF16), w_ref[...],
                            preferred_element_type=jnp.float32)

    @pl.when(k == pl.num_programs(1) - 1)
    def _():
        z = acc_ref[...] + b_ref[...] + res_ref[...].astype(jnp.float32)
        mu = jnp.mean(z, axis=-1, keepdims=True)
        zc = z - mu
        var = jnp.mean(zc * zc, axis=-1, keepdims=True)
        y = (zc * lax.rsqrt(var + eps)) * g_ref[...] + beta_ref[...]
        o_ref[...] = y.astype(o_ref.dtype)


def proj_add_ln(a2d, w, b, res2d, gamma, beta, *, tm=512, tk=512, eps=_EPS):
    M, K = a2d.shape
    K2, D = w.shape
    assert K == K2
    tk = _fit(K, tk)
    # VMEM heuristic (important on v7x's 64 MiB part): acc(f32) + double-buffered
    # residual/out(f32) + bf16 A tiles per row, plus double-buffered bf16 W tiles.
    w_bytes = 2 * (tk * D * 2)
    row_bytes = 4 * D + 2 * 4 * D + 2 * 4 * D + 2 * 2 * tk
    t = tm
    while t > 128 and w_bytes + t * row_bytes > _VMEM_LIMIT:
        t //= 2
    tm = _fit(M, t)
    return pl.pallas_call(
        functools.partial(_proj_add_ln_kernel, eps=eps),
        out_shape=jax.ShapeDtypeStruct((M, D), res2d.dtype),
        grid_spec=pltpu.PrefetchScalarGridSpec(
            num_scalar_prefetch=0,
            grid=(M // tm, K // tk),
            in_specs=[
                pl.BlockSpec((tm, tk), lambda i, k: (i, k)),   # attention output
                pl.BlockSpec((tk, D), lambda i, k: (k, 0)),    # W_o tile (bf16)
                pl.BlockSpec((1, D), lambda i, k: (0, 0)),     # b_o
                pl.BlockSpec((tm, D), lambda i, k: (i, 0)),    # residual (f32)
                pl.BlockSpec((1, D), lambda i, k: (0, 0)),     # gamma
                pl.BlockSpec((1, D), lambda i, k: (0, 0)),     # beta
            ],
            out_specs=pl.BlockSpec((tm, D), lambda i, k: (i, 0)),
            scratch_shapes=[pltpu.VMEM((tm, D), jnp.float32)],
        ),
        compiler_params=pltpu.CompilerParams(
            dimension_semantics=("parallel", "arbitrary"),
            vmem_limit_bytes=_VMEM_LIMIT,
        ),
    )(a2d, w, b.reshape(1, D), res2d, gamma.reshape(1, D), beta.reshape(1, D))


# ----------------------------------------------------------------------------
# Fused FFN: conv2(relu(conv1(x))) + residual + LayerNorm, d_ff tiled in VMEM.
# bf16 MXU, f32 accumulate, f32 ReLU/LN math.
# ----------------------------------------------------------------------------
def _ffn_ln_kernel(x_ref, w1_ref, b1_ref, w2_ref, b2_ref, g_ref, beta_ref,
                   o_ref, acc_ref, *, eps):
    f = pl.program_id(1)

    @pl.when(f == 0)
    def _():
        acc_ref[...] = jnp.zeros_like(acc_ref)

    h = jnp.dot(x_ref[...].astype(_BF16), w1_ref[...],
                preferred_element_type=jnp.float32)
    h = jnp.maximum(h + b1_ref[...], 0.0)                        # relu(conv1), f32
    acc_ref[...] += jnp.dot(h.astype(_BF16), w2_ref[...],
                            preferred_element_type=jnp.float32)  # conv2 partial

    @pl.when(f == pl.num_programs(1) - 1)
    def _():
        z = acc_ref[...] + b2_ref[...] + x_ref[...].astype(jnp.float32)
        mu = jnp.mean(z, axis=-1, keepdims=True)
        zc = z - mu
        var = jnp.mean(zc * zc, axis=-1, keepdims=True)
        y = (zc * lax.rsqrt(var + eps)) * g_ref[...] + beta_ref[...]
        o_ref[...] = y.astype(o_ref.dtype)


def ffn_ln(x2d, w1, b1, w2, b2, gamma, beta, *, tm=512, tf=512, eps=_EPS):
    M, D = x2d.shape
    Dff = w1.shape[1]
    # Shrink tf first so the two double-buffered bf16 weight tiles stay small
    # (v7x suggestion: tf generation-aware / VMEM-budget derived).
    t_f = tf
    while t_f > 128 and 2 * (D * t_f * 2) + 2 * (t_f * D * 2) > _VMEM_LIMIT // 2:
        t_f //= 2
    tf = _fit(Dff, t_f)
    # Then shrink tm: x(f32, 2 buf) + acc(f32) + out(f32, 2 buf) + h(f32) per row.
    w_bytes = 2 * (D * tf * 2) + 2 * (tf * D * 2)
    row_bytes = 2 * 4 * D + 4 * D + 2 * 4 * D + 4 * tf
    t_m = tm
    while t_m > 128 and w_bytes + t_m * row_bytes > _VMEM_LIMIT:
        t_m //= 2
    tm = _fit(M, t_m)
    return pl.pallas_call(
        functools.partial(_ffn_ln_kernel, eps=eps),
        out_shape=jax.ShapeDtypeStruct((M, D), x2d.dtype),
        grid_spec=pltpu.PrefetchScalarGridSpec(
            num_scalar_prefetch=0,
            grid=(M // tm, Dff // tf),
            in_specs=[
                pl.BlockSpec((tm, D), lambda i, f: (i, 0)),   # x (input + residual, f32)
                pl.BlockSpec((D, tf), lambda i, f: (0, f)),   # conv1 weight tile (bf16)
                pl.BlockSpec((1, tf), lambda i, f: (0, f)),   # conv1 bias tile
                pl.BlockSpec((tf, D), lambda i, f: (f, 0)),   # conv2 weight tile (bf16)
                pl.BlockSpec((1, D), lambda i, f: (0, 0)),    # conv2 bias
                pl.BlockSpec((1, D), lambda i, f: (0, 0)),    # norm3 gamma
                pl.BlockSpec((1, D), lambda i, f: (0, 0)),    # norm3 beta
            ],
            out_specs=pl.BlockSpec((tm, D), lambda i, f: (i, 0)),
            scratch_shapes=[pltpu.VMEM((tm, D), jnp.float32)],
        ),
        compiler_params=pltpu.CompilerParams(
            dimension_semantics=("parallel", "arbitrary"),
            vmem_limit_bytes=_VMEM_LIMIT,
        ),
    )(x2d, w1, b1.reshape(1, Dff), w2, b2.reshape(1, D),
      gamma.reshape(1, D), beta.reshape(1, D))


# ----------------------------------------------------------------------------
# Attention core: heads selected via BlockSpec index_map (no XLA transposes).
# bf16 QK^T / PV matmuls, f32 softmax statistics, normalize AFTER PV.
# ----------------------------------------------------------------------------
def _attn_kernel(q_ref, k_ref, v_ref, o_ref, *, heads_per_block, scale):
    G = heads_per_block
    hb = q_ref.shape[-1]
    dh = hb // G
    for g in range(G):
        lo = g * dh
        q = q_ref[0, :, lo:lo + dh] * scale                  # (L, dh) bf16, scale folded
        k = k_ref[0, :, lo:lo + dh]                          # (S, dh) bf16
        v = v_ref[0, :, lo:lo + dh]                          # (S, dh) bf16
        # Contract on dim 1 of both operands: no explicit K transpose through the XLU.
        s = lax.dot_general(q, k, (((1,), (1,)), ((), ())),
                            preferred_element_type=jnp.float32)   # (L, S) f32
        m = jnp.max(s, axis=-1, keepdims=True)
        p = jnp.exp(s - m)
        denom = jnp.sum(p, axis=-1, keepdims=True)
        o = jnp.dot(p.astype(_BF16), v, preferred_element_type=jnp.float32)
        o = o * pl.reciprocal(denom, approx=True)            # (L, dh) normalize post-PV
        o_ref[0, :, lo:lo + dh] = o.astype(o_ref.dtype)      # per-head store, no concat
    # TODO(synk): switch to flash-style online softmax (S-tiled grid axis) for long S,
    #             required on v7x at realistic sequence lengths.


def attention_core(q_arr, kv_arr, *, n_heads, d_model, kv_includes_q):
    # q_arr : (B, L, *) with q occupying the first d_model columns.
    # kv_arr: (B, S, *) with [q|]k|v regions of width d_model each.
    B, L, _ = q_arr.shape
    S = kv_arr.shape[1]
    dh = d_model // n_heads
    G = _heads_per_block(n_heads, dh)
    hb = G * dh
    nhb = n_heads // G
    k_off = nhb if kv_includes_q else 0
    v_off = k_off + nhb
    scale = 1.0 / math.sqrt(dh)
    return pl.pallas_call(
        functools.partial(_attn_kernel, heads_per_block=G, scale=scale),
        out_shape=jax.ShapeDtypeStruct((B, L, d_model), q_arr.dtype),
        grid_spec=pltpu.PrefetchScalarGridSpec(
            num_scalar_prefetch=0,
            grid=(B, nhb),
            in_specs=[
                pl.BlockSpec((1, L, hb), lambda b, j: (b, 0, j)),
                pl.BlockSpec((1, S, hb), lambda b, j: (b, 0, k_off + j)),
                pl.BlockSpec((1, S, hb), lambda b, j: (b, 0, v_off + j)),
            ],
            out_specs=pl.BlockSpec((1, L, hb), lambda b, j: (b, 0, j)),
        ),
        compiler_params=pltpu.CompilerParams(
            dimension_semantics=("parallel", "parallel"),
            vmem_limit_bytes=_VMEM_LIMIT,
        ),
    )(q_arr, kv_arr, kv_arr)


# ----------------------------------------------------------------------------
# DecoderLayer forward (DCSP=False)
# ----------------------------------------------------------------------------
def decoder_layer(x, cross, params, n_heads):
    B, L, D = x.shape
    S = cross.shape[1]
    out_dtype = x.dtype
    x2 = x.reshape(B * L, D)               # residual stream kept in f32
    cross2 = cross.reshape(B * S, D)

    bf = lambda a: a.astype(_BF16)         # bf16 weights: halves weight HBM traffic

    # x = norm1(x + self_attention(x, x, x))
    qkv = matmul_bias(x2, bf(params["sa_w_qkv"]), params["sa_b_qkv"],
                      out_dtype=_BF16)                                   # (M, 3D) bf16
    qkv3 = qkv.reshape(B, L, 3 * D)
    a = attention_core(qkv3, qkv3, n_heads=n_heads, d_model=D,
                       kv_includes_q=True)                               # (B, L, D) bf16
    x2 = proj_add_ln(a.reshape(B * L, D), bf(params["sa_wo"]), params["sa_bo"],
                     x2, params["norm1_g"], params["norm1_b"])           # (M, D) f32

    # x = norm2(x + cross_attention(x, cross, cross))
    q = matmul_bias(x2, bf(params["ca_wq"]), params["ca_bq"],
                    out_dtype=_BF16)                                     # (M, D) bf16
    kv = matmul_bias(cross2, bf(params["ca_w_kv"]), params["ca_b_kv"],
                     out_dtype=_BF16)                                    # (Mc, 2D) bf16
    a = attention_core(q.reshape(B, L, D), kv.reshape(B, S, 2 * D),
                       n_heads=n_heads, d_model=D, kv_includes_q=False)
    x2 = proj_add_ln(a.reshape(B * L, D), bf(params["ca_wo"]), params["ca_bo"],
                     x2, params["norm2_g"], params["norm2_b"])

    # return norm3(x + conv2(relu(conv1(x))))   (kernel_size=1 convs)
    out = ffn_ln(x2, bf(params["conv1_w"]), params["conv1_b"],
                 bf(params["conv2_w"]), params["conv2_b"],
                 params["norm3_g"], params["norm3_b"])
    return out.reshape(B, L, D).astype(out_dtype)


# ----------------------------------------------------------------------------
# Deterministic parameter init (q/k/v fused along the output axis)
# ----------------------------------------------------------------------------
def init_params(key, d_model, d_ff, dtype=jnp.float32):
    def attn_weights(k):
        ks = jax.random.split(k, 4)
        return [0.02 * jax.random.normal(ks[i], (d_model, d_model), dtype)
                for i in range(4)]

    k_sa, k_ca, k_c1, k_c2 = jax.random.split(key, 4)
    sa_wq, sa_wk, sa_wv, sa_wo = attn_weights(k_sa)
    ca_wq, ca_wk, ca_wv, ca_wo = attn_weights(k_ca)
    zeros = lambda n: jnp.zeros((n,), dtype)
    ones = lambda n: jnp.ones((n,), dtype)
    return {
        "sa_w_qkv": jnp.concatenate([sa_wq, sa_wk, sa_wv], axis=1),
        "sa_b_qkv": zeros(3 * d_model),
        "sa_wo": sa_wo, "sa_bo": zeros(d_model),
        "ca_wq": ca_wq, "ca_bq": zeros(d_model),
        "ca_w_kv": jnp.concatenate([ca_wk, ca_wv], axis=1),
        "ca_b_kv": zeros(2 * d_model),
        "ca_wo": ca_wo, "ca_bo": zeros(d_model),
        "conv1_w": 0.02 * jax.random.normal(k_c1, (d_model, d_ff), dtype),
        "conv1_b": zeros(d_ff),
        "conv2_w": 0.02 * jax.random.normal(k_c2, (d_ff, d_model), dtype),
        "conv2_b": zeros(d_model),
        "norm1_g": ones(d_model), "norm1_b": zeros(d_model),
        "norm2_g": ones(d_model), "norm2_b": zeros(d_model),
        "norm3_g": ones(d_model), "norm3_b": zeros(d_model),
    }


if __name__ == "__main__":
    # Small but lane/sublane-aligned shapes: head_dim = 256/2 = 128.
    B, L, S, D, H = 2, 128, 128, 256, 2
    D_FF = 4 * D

    key = jax.random.PRNGKey(0)
    kx, kc, kp = jax.random.split(key, 3)
    x = jax.random.normal(kx, (B, L, D), jnp.float32)
    cross = jax.random.normal(kc, (B, S, D), jnp.float32)
    params = init_params(kp, D, D_FF)

    out = jax.jit(functools.partial(decoder_layer, n_heads=H))(x, cross, params)
    out = jax.block_until_ready(out)
    assert out.shape == (B, L, D)
    assert bool(jnp.all(jnp.isfinite(out)))
    print("KERNEL_OK")
</pallas_src>

<mosaic_0001>
module attributes {stable_mosaic.version = 11 : i64} {
  func.func @_mm_bias_kernel(%arg0: i32, %arg1: i32, %arg2: i32, %arg3: memref<256x256xf32, #tpu.memory_space<vmem>>, %arg4: memref<256x256xbf16, #tpu.memory_space<vmem>>, %arg5: memref<1x256xf32, #tpu.memory_space<vmem>>, %arg6: memref<256x256xbf16, #tpu.memory_space<vmem>>, %arg7: memref<256x256xf32, #tpu.memory_space<vmem>>) attributes {dimension_semantics = [#tpu.dimension_semantics<parallel>, #tpu.dimension_semantics<parallel>, #tpu.dimension_semantics<arbitrary>], iteration_bounds = array<i64: 1, 3, 1>, scalar_prefetch = 0 : i64, scratch_operands = 1 : i64, tpu.core_type = #tpu.core_type<tc>, window_params = [{transform_indices = @transform_0, window_bounds = array<i64: 256, 256>}, {transform_indices = @transform_1, window_bounds = array<i64: 256, 256>}, {transform_indices = @transform_2, window_bounds = array<i64: 1, 256>}, {transform_indices = @transform_3, window_bounds = array<i64: 256, 256>}]} {
    %c0_i32 = arith.constant 0 : i32
    %0 = arith.cmpi eq, %arg2, %c0_i32 : i32
    %1 = arith.extui %0 : i1 to i32
    %c0_i32_0 = arith.constant 0 : i32
    %2 = arith.cmpi ne, %1, %c0_i32_0 : i32
    scf.if %2 {
      %cst_10 = arith.constant 0.000000e+00 : f32
      %13 = vector.broadcast %cst_10 : f32 to vector<256x256xf32>
      %c0_11 = arith.constant 0 : index
      %c0_12 = arith.constant 0 : index
      %14 = vector.load %arg7[%c0_11, %c0_12] : memref<256x256xf32, #tpu.memory_space<vmem>>, vector<256x256xf32>
      tpu.vector_store %arg7[%c0_11, %c0_12], %13 {strides = array<i32>} : memref<256x256xf32, #tpu.memory_space<vmem>>, vector<256x256xf32>,
    } else {
    }
    %c0 = arith.constant 0 : index
    %c0_1 = arith.constant 0 : index
    %3 = vector.load %arg7[%c0, %c0_1] : memref<256x256xf32, #tpu.memory_space<vmem>>, vector<256x256xf32>
    %c0_2 = arith.constant 0 : index
    %c0_3 = arith.constant 0 : index
    %4 = vector.load %arg3[%c0_2, %c0_3] : memref<256x256xf32, #tpu.memory_space<vmem>>, vector<256x256xf32>
    %5 = arith.truncf %4 : vector<256x256xf32> to vector<256x256xbf16>
    %c0_4 = arith.constant 0 : index
    %c0_5 = arith.constant 0 : index
    %6 = vector.load %arg4[%c0_4, %c0_5] : memref<256x256xbf16, #tpu.memory_space<vmem>>, vector<256x256xbf16>
    %cst = arith.constant dense<0.000000e+00> : vector<256x256xf32>
    %7 = tpu.matmul %5, %6, %cst {dimension_numbers = #tpu.dot_dimension_numbers<[1], [0], [0], [1], [0, 0, 1, 1], [], []>} : vector<256x256xbf16>, vector<256x256xbf16>, vector<256x256xf32> -> vector<256x256xf32>
    %8 = arith.addf %3, %7 : vector<256x256xf32>
    %c0_6 = arith.constant 0 : index
    %c0_7 = arith.constant 0 : index
    %9 = vector.load %arg7[%c0_6, %c0_7] : memref<256x256xf32, #tpu.memory_space<vmem>>, vector<256x256xf32>
    tpu.vector_store %arg7[%c0_6, %c0_7], %8 {strides = array<i32>} : memref<256x256xf32, #tpu.memory_space<vmem>>, vector<256x256xf32>,
    %c0_i32_8 = arith.constant 0 : i32
    %10 = arith.cmpi eq, %arg2, %c0_i32_8 : i32
    %11 = arith.extui %10 : i1 to i32
    %c0_i32_9 = arith.constant 0 : i32
    %12 = arith.cmpi ne, %11, %c0_i32_9 : i32
    scf.if %12 {
      %c0_10 = arith.constant 0 : index
      %c0_11 = arith.constant 0 : index
      %13 = vector.load %arg7[%c0_10, %c0_11] : memref<256x256xf32, #tpu.memory_space<vmem>>, vector<256x256xf32>
      %c0_12 = arith.constant 0 : index
      %c0_13 = arith.constant 0 : index
      %14 = vector.load %arg5[%c0_12, %c0_13] : memref<1x256xf32, #tpu.memory_space<vmem>>, vector<1x256xf32>
      %15 = vector.broadcast %14 : vector<1x256xf32> to vector<256x256xf32>
      %16 = arith.addf %13, %15 : vector<256x256xf32>
      %17 = arith.truncf %16 : vector<256x256xf32> to vector<256x256xbf16>
      %c0_14 = arith.constant 0 : index
      %c0_15 = arith.constant 0 : index
      %18 = vector.load %arg6[%c0_14, %c0_15] : memref<256x256xbf16, #tpu.memory_space<vmem>>, vector<256x256xbf16>
      tpu.vector_store %arg6[%c0_14, %c0_15], %17 {strides = array<i32>} : memref<256x256xbf16, #tpu.memory_space<vmem>>, vector<256x256xbf16>,
    } else {
    }
    return
  }
  func.func @transform_0(%arg0: i32, %arg1: i32, %arg2: i32) -> (i32, i32) {
    %c0_i32 = arith.constant 0 : i32
    return %arg0, %arg2 : i32, i32
  }
  func.func @transform_1(%arg0: i32, %arg1: i32, %arg2: i32) -> (i32, i32) {
    %c0_i32 = arith.constant 0 : i32
    return %arg2, %arg1 : i32, i32
  }
  func.func @transform_2(%arg0: i32, %arg1: i32, %arg2: i32) -> (i32, i32) {
    %c0_i32 = arith.constant 0 : i32
    %c0_i32_0 = arith.constant 0 : i32
    return %c0_i32, %arg1 : i32, i32
  }
  func.func @transform_3(%arg0: i32, %arg1: i32, %arg2: i32) -> (i32, i32) {
    %c0_i32 = arith.constant 0 : i32
    return %arg0, %arg1 : i32, i32
  }
}

module attributes {stable_mosaic.version = 11 : i64} {
  func.func @_mm_bias_kernel(%arg0: i32, %arg1: i32, %arg2: i32, %arg3: memref<256x256xf32, #tpu.memory_space<vmem>>, %arg4: memref<256x512xbf16, #tpu.memory_space<vmem>>, %arg5: memref<1x512xf32, #tpu.memory_space<vmem>>, %arg6: memref<256x512xbf16, #tpu.memory_space<vmem>>, %arg7: memref<256x512xf32, #tpu.memory_space<vmem>>) attributes {dimension_semantics = [#tpu.dimension_semantics<parallel>, #tpu.dimension_semantics<parallel>, #tpu.dimension_semantics<arbitrary>], iteration_bounds = array<i64: 1, 1, 1>, scalar_prefetch = 0 : i64, scratch_operands = 1 : i64, tpu.core_type = #tpu.core_type<tc>, window_params = [{transform_indices = @transform_0, window_bounds = array<i64: 256, 256>}, {transform_indices = @transform_1, window_bounds = array<i64: 256, 512>}, {transform_indices = @transform_2, window_bounds = array<i64: 1, 512>}, {transform_indices = @transform_3, window_bounds = array<i64: 256, 512>}]} {
    %c0_i32 = arith.constant 0 : i32
    %0 = arith.cmpi eq, %arg2, %c0_i32 : i32
    %1 = arith.extui %0 : i1 to i32
    %c0_i32_0 = arith.constant 0 : i32
    %2 = arith.cmpi ne, %1, %c0_i32_0 : i32
    scf.if %2 {
      %cst_10 = arith.constant 0.000000e+00 : f32
      %13 = vector.broadcast %cst_10 : f32 to vector<256x512xf32>
      %c0_11 = arith.constant 0 : index
      %c0_12 = arith.constant 0 : index
      %14 = vector.load %arg7[%c0_11, %c0_12] : memref<256x512xf32, #tpu.memory_space<vmem>>, vector<256x512xf32>
      tpu.vector_store %arg7[%c0_11, %c0_12], %13 {strides = array<i32>} : memref<256x512xf32, #tpu.memory_space<vmem>>, vector<256x512xf32>,
    } else {
    }
    %c0 = arith.constant 0 : index
    %c0_1 = arith.constant 0 : index
    %3 = vector.load %arg7[%c0, %c0_1] : memref<256x512xf32, #tpu.memory_space<vmem>>, vector<256x512xf32>
    %c0_2 = arith.constant 0 : index
    %c0_3 = arith.constant 0 : index
    %4 = vector.load %arg3[%c0_2, %c0_3] : memref<256x256xf32, #tpu.memory_space<vmem>>, vector<256x256xf32>
    %5 = arith.truncf %4 : vector<256x256xf32> to vector<256x256xbf16>
    %c0_4 = arith.constant 0 : index
    %c0_5 = arith.constant 0 : index
    %6 = vector.load %arg4[%c0_4, %c0_5] : memref<256x512xbf16, #tpu.memory_space<vmem>>, vector<256x512xbf16>
    %cst = arith.constant dense<0.000000e+00> : vector<256x512xf32>
    %7 = tpu.matmul %5, %6, %cst {dimension_numbers = #tpu.dot_dimension_numbers<[1], [0], [0], [1], [0, 0, 1, 1], [], []>} : vector<256x256xbf16>, vector<256x512xbf16>, vector<256x512xf32> -> vector<256x512xf32>
    %8 = arith.addf %3, %7 : vector<256x512xf32>
    %c0_6 = arith.constant 0 : index
    %c0_7 = arith.constant 0 : index
    %9 = vector.load %arg7[%c0_6, %c0_7] : memref<256x512xf32, #tpu.memory_space<vmem>>, vector<256x512xf32>
    tpu.vector_store %arg7[%c0_6, %c0_7], %8 {strides = array<i32>} : memref<256x512xf32, #tpu.memory_space<vmem>>, vector<256x512xf32>,
    %c0_i32_8 = arith.constant 0 : i32
    %10 = arith.cmpi eq, %arg2, %c0_i32_8 : i32
    %11 = arith.extui %10 : i1 to i32
    %c0_i32_9 = arith.constant 0 : i32
    %12 = arith.cmpi ne, %11, %c0_i32_9 : i32
    scf.if %12 {
      %c0_10 = arith.constant 0 : index
      %c0_11 = arith.constant 0 : index
      %13 = vector.load %arg7[%c0_10, %c0_11] : memref<256x512xf32, #tpu.memory_space<vmem>>, vector<256x512xf32>
      %c0_12 = arith.constant 0 : index
      %c0_13 = arith.constant 0 : index
      %14 = vector.load %arg5[%c0_12, %c0_13] : memref<1x512xf32, #tpu.memory_space<vmem>>, vector<1x512xf32>
      %15 = vector.broadcast %14 : vector<1x512xf32> to vector<256x512xf32>
      %16 = arith.addf %13, %15 : vector<256x512xf32>
      %17 = arith.truncf %16 : vector<256x512xf32> to vector<256x512xbf16>
      %c0_14 = arith.constant 0 : index
      %c0_15 = arith.constant 0 : index
      %18 = vector.load %arg6[%c0_14, %c0_15] : memref<256x512xbf16, #tpu.memory_space<vmem>>, vector<256x512xbf16>
      tpu.vector_store %arg6[%c0_14, %c0_15], %17 {strides = array<i32>} : memref<256x512xbf16, #tpu.memory_space<vmem>>, vector<256x512xbf16>,
    } else {
    }
    return
  }
  func.func @transform_0(%arg0: i32, %arg1: i32, %arg2: i32) -> (i32, i32) {
    %c0_i32 = arith.constant 0 : i32
    return %arg0, %arg2 : i32, i32
  }
  func.func @transform_1(%arg0: i32, %arg1: i32, %arg2: i32) -> (i32, i32) {
    %c0_i32 = arith.constant 0 : i32
    return %arg2, %arg1 : i32, i32
  }
  func.func @transform_2(%arg0: i32, %arg1: i32, %arg2: i32) -> (i32, i32) {
    %c0_i32 = arith.constant 0 : i32
    %c0_i32_0 = arith.constant 0 : i32
    return %c0_i32, %arg1 : i32, i32
  }
  func.func @transform_3(%arg0: i32, %arg1: i32, %arg2: i32) -> (i32, i32) {
    %c0_i32 = arith.constant 0 : i32
    return %arg0, %arg1 : i32, i32
  }
}

module attributes {stable_mosaic.version = 11 : i64} {
  func.func @_attn_kernel(%arg0: i32, %arg1: i32, %arg2: memref<1x128x128xbf16, #tpu.memory_space<vmem>>, %arg3: memref<1x128x128xbf16, #tpu.memory_space<vmem>>, %arg4: memref<1x128x128xbf16, #tpu.memory_space<vmem>>, %arg5: memref<1x128x128xbf16, #tpu.memory_space<vmem>>) attributes {dimension_semantics = [#tpu.dimension_semantics<parallel>, #tpu.dimension_semantics<parallel>], iteration_bounds = array<i64: 2, 2>, scalar_prefetch = 0 : i64, scratch_operands = 0 : i64, tpu.core_type = #tpu.core_type<tc>, window_params = [{transform_indices = @transform_0, window_bounds = array<i64: 1, 128, 128>}, {transform_indices = @transform_1, window_bounds = array<i64: 1, 128, 128>}, {transform_indices = @transform_2, window_bounds = array<i64: 1, 128, 128>}, {transform_indices = @transform_3, window_bounds = array<i64: 1, 128, 128>}]} {
    %c0 = arith.constant 0 : index
    %c0_0 = arith.constant 0 : index
    %c0_1 = arith.constant 0 : index
    %0 = vector.load %arg2[%c0, %c0_0, %c0_1] : memref<1x128x128xbf16, #tpu.memory_space<vmem>>, vector<1x128x128xbf16>
    %1 = vector.shape_cast %0 : vector<1x128x128xbf16> to vector<128x128xbf16>
    %cst = arith.constant 8.837890e-02 : bf16
    %2 = vector.broadcast %cst : bf16 to vector<128x128xbf16>
    %3 = arith.mulf %1, %2 : vector<128x128xbf16>
    %c0_2 = arith.constant 0 : index
    %c0_3 = arith.constant 0 : index
    %c0_4 = arith.constant 0 : index
    %4 = vector.load %arg3[%c0_2, %c0_3, %c0_4] : memref<1x128x128xbf16, #tpu.memory_space<vmem>>, vector<1x128x128xbf16>
    %5 = vector.shape_cast %4 : vector<1x128x128xbf16> to vector<128x128xbf16>
    %c0_5 = arith.constant 0 : index
    %c0_6 = arith.constant 0 : index
    %c0_7 = arith.constant 0 : index
    %6 = vector.load %arg4[%c0_5, %c0_6, %c0_7] : memref<1x128x128xbf16, #tpu.memory_space<vmem>>, vector<1x128x128xbf16>
    %7 = vector.shape_cast %6 : vector<1x128x128xbf16> to vector<128x128xbf16>
    %cst_8 = arith.constant dense<0.000000e+00> : vector<128x128xf32>
    %8 = tpu.matmul %3, %5, %cst_8 {dimension_numbers = #tpu.dot_dimension_numbers<[1], [1], [0], [0], [0, 0, 1, 0], [], []>} : vector<128x128xbf16>, vector<128x128xbf16>, vector<128x128xf32> -> vector<128x128xf32>
    %cst_9 = arith.constant dense<0xFF800000> : vector<128xf32>
    %9 = vector.multi_reduction <maximumf>, %8, %cst_9 [1] : vector<128x128xf32> to vector<128xf32>
    %10 = vector.shape_cast %9 : vector<128xf32> to vector<128x1xf32>
    %11 = vector.broadcast %10 : vector<128x1xf32> to vector<128x128xf32>
    %12 = arith.subf %8, %11 : vector<128x128xf32>
    %13 = math.exp %12 : vector<128x128xf32>
    %cst_10 = arith.constant dense<0.000000e+00> : vector<128xf32>
    %14 = vector.multi_reduction <add>, %13, %cst_10 [1] : vector<128x128xf32> to vector<128xf32>
    %15 = vector.shape_cast %14 : vector<128xf32> to vector<128x1xf32>
    %16 = arith.truncf %13 : vector<128x128xf32> to vector<128x128xbf16>
    %cst_11 = arith.constant dense<0.000000e+00> : vector<128x128xf32>
    %17 = tpu.matmul %16, %7, %cst_11 {dimension_numbers = #tpu.dot_dimension_numbers<[1], [0], [0], [1], [0, 0, 1, 1], [], []>} : vector<128x128xbf16>, vector<128x128xbf16>, vector<128x128xf32> -> vector<128x128xf32>
    %18 = tpu.reciprocal %15 {approx = true} : vector<128x1xf32> -> vector<128x1xf32>
    %19 = vector.broadcast %18 : vector<128x1xf32> to vector<128x128xf32>
    %20 = arith.mulf %17, %19 : vector<128x128xf32>
    %21 = arith.truncf %20 : vector<128x128xf32> to vector<128x128xbf16>
    %c0_12 = arith.constant 0 : index
    %c0_13 = arith.constant 0 : index
    %c0_14 = arith.constant 0 : index
    %22 = vector.load %arg5[%c0_12, %c0_13, %c0_14] : memref<1x128x128xbf16, #tpu.memory_space<vmem>>, vector<1x128x128xbf16>
    %23 = vector.shape_cast %22 : vector<1x128x128xbf16> to vector<128x128xbf16>
    %24 = vector.shape_cast %21 : vector<128x128xbf16> to vector<1x128x128xbf16>
    tpu.vector_store %arg5[%c0_12, %c0_13, %c0_14], %24 {strides = array<i32>} : memref<1x128x128xbf16, #tpu.memory_space<vmem>>, vector<1x128x128xbf16>,
    return
  }
  func.func @transform_0(%arg0: i32, %arg1: i32) -> (i32, i32, i32) {
    %c0_i32 = arith.constant 0 : i32
    %c0_i32_0 = arith.constant 0 : i32
    return %arg0, %c0_i32, %arg1 : i32, i32, i32
  }
  func.func @transform_1(%arg0: i32, %arg1: i32) -> (i32, i32, i32) {
    %c2_i32 = arith.constant 2 : i32
    %0 = arith.addi %c2_i32, %arg1 : i32
    %c0_i32 = arith.constant 0 : i32
    %c0_i32_0 = arith.constant 0 : i32
    return %arg0, %c0_i32, %0 : i32, i32, i32
  }
  func.func @transform_2(%arg0: i32, %arg1: i32) -> (i32, i32, i32) {
    %c4_i32 = arith.constant 4 : i32
    %0 = arith.addi %c4_i32, %arg1 : i32
    %c0_i32 = arith.constant 0 : i32
    %c0_i32_0 = arith.constant 0 : i32
    return %arg0, %c0_i32, %0 : i32, i32, i32
  }
  func.func @transform_3(%arg0: i32, %arg1: i32) -> (i32, i32, i32) {
    %c0_i32 = arith.constant 0 : i32
    %c0_i32_0 = arith.constant 0 : i32
    return %arg0, %c0_i32, %arg1 : i32, i32, i32
  }
}

module attributes {stable_mosaic.version = 11 : i64} {
  func.func @_proj_add_ln_kernel(%arg0: i32, %arg1: i32, %arg2: memref<256x256xbf16, #tpu.memory_space<vmem>>, %arg3: memref<256x256xbf16, #tpu.memory_space<vmem>>, %arg4: memref<1x256xf32, #tpu.memory_space<vmem>>, %arg5: memref<256x256xf32, #tpu.memory_space<vmem>>, %arg6: memref<1x256xf32, #tpu.memory_space<vmem>>, %arg7: memref<1x256xf32, #tpu.memory_space<vmem>>, %arg8: memref<256x256xf32, #tpu.memory_space<vmem>>, %arg9: memref<256x256xf32, #tpu.memory_space<vmem>>) attributes {dimension_semantics = [#tpu.dimension_semantics<parallel>, #tpu.dimension_semantics<arbitrary>], iteration_bounds = array<i64: 1, 1>, scalar_prefetch = 0 : i64, scratch_operands = 1 : i64, tpu.core_type = #tpu.core_type<tc>, window_params = [{transform_indices = @transform_0, window_bounds = array<i64: 256, 256>}, {transform_indices = @transform_1, window_bounds = array<i64: 256, 256>}, {pipeline_mode = #tpu.pipeline_mode<synchronous>, transform_indices = @transform_2, window_bounds = array<i64: 1, 256>}, {transform_indices = @transform_3, window_bounds = array<i64: 256, 256>}, {pipeline_mode = #tpu.pipeline_mode<synchronous>, transform_indices = @transform_4, window_bounds = array<i64: 1, 256>}, {pipeline_mode = #tpu.pipeline_mode<synchronous>, transform_indices = @transform_5, window_bounds = array<i64: 1, 256>}, {transform_indices = @transform_6, window_bounds = array<i64: 256, 256>}]} {
    %c0_i32 = arith.constant 0 : i32
    %0 = arith.cmpi eq, %arg1, %c0_i32 : i32
    %1 = arith.extui %0 : i1 to i32
    %c0_i32_0 = arith.constant 0 : i32
    %2 = arith.cmpi ne, %1, %c0_i32_0 : i32
    scf.if %2 {
      %cst_10 = arith.constant 0.000000e+00 : f32
      %12 = vector.broadcast %cst_10 : f32 to vector<256x256xf32>
      %c0_11 = arith.constant 0 : index
      %c0_12 = arith.constant 0 : index
      %13 = vector.load %arg9[%c0_11, %c0_12] : memref<256x256xf32, #tpu.memory_space<vmem>>, vector<256x256xf32>
      tpu.vector_store %arg9[%c0_11, %c0_12], %12 {strides = array<i32>} : memref<256x256xf32, #tpu.memory_space<vmem>>, vector<256x256xf32>,
    } else {
    }
    %c0 = arith.constant 0 : index
    %c0_1 = arith.constant 0 : index
    %3 = vector.load %arg9[%c0, %c0_1] : memref<256x256xf32, #tpu.memory_space<vmem>>, vector<256x256xf32>
    %c0_2 = arith.constant 0 : index
    %c0_3 = arith.constant 0 : index
    %4 = vector.load %arg2[%c0_2, %c0_3] : memref<256x256xbf16, #tpu.memory_space<vmem>>, vector<256x256xbf16>
    %c0_4 = arith.constant 0 : index
    %c0_5 = arith.constant 0 : index
    %5 = vector.load %arg3[%c0_4, %c0_5] : memref<256x256xbf16, #tpu.memory_space<vmem>>, vector<256x256xbf16>
    %cst = arith.constant dense<0.000000e+00> : vector<256x256xf32>
    %6 = tpu.matmul %4, %5, %cst {dimension_numbers = #tpu.dot_dimension_numbers<[1], [0], [0], [1], [0, 0, 1, 1], [], []>} : vector<256x256xbf16>, vector<256x256xbf16>, vector<256x256xf32> -> vector<256x256xf32>
    %7 = arith.addf %3, %6 : vector<256x256xf32>
    %c0_6 = arith.constant 0 : index
    %c0_7 = arith.constant 0 : index
    %8 = vector.load %arg9[%c0_6, %c0_7] : memref<256x256xf32, #tpu.memory_space<vmem>>, vector<256x256xf32>
    tpu.vector_store %arg9[%c0_6, %c0_7], %7 {strides = array<i32>} : memref<256x256xf32, #tpu.memory_space<vmem>>, vector<256x256xf32>,
    %c0_i32_8 = arith.constant 0 : i32
    %9 = arith.cmpi eq, %arg1, %c0_i32_8 : i32
    %10 = arith.extui %9 : i1 to i32
    %c0_i32_9 = arith.constant 0 : i32
    %11 = arith.cmpi ne, %10, %c0_i32_9 : i32
    scf.if %11 {
      %c0_10 = arith.constant 0 : index
      %c0_11 = arith.constant 0 : index
      %12 = vector.load %arg9[%c0_10, %c0_11] : memref<256x256xf32, #tpu.memory_space<vmem>>, vector<256x256xf32>
      %c0_12 = arith.constant 0 : index
      %c0_13 = arith.constant 0 : index
      %13 = vector.load %arg4[%c0_12, %c0_13] : memref<1x256xf32, #tpu.memory_space<vmem>>, vector<1x256xf32>
      %14 = vector.broadcast %13 : vector<1x256xf32> to vector<256x256xf32>
      %15 = arith.addf %12, %14 : vector<256x256xf32>
      %c0_14 = arith.constant 0 : index
      %c0_15 = arith.constant 0 : index
      %16 = vector.load %arg5[%c0_14, %c0_15] : memref<256x256xf32, #tpu.memory_space<vmem>>, vector<256x256xf32>
      %17 = arith.addf %15, %16 : vector<256x256xf32>
      %cst_16 = arith.constant dense<0.000000e+00> : vector<256xf32>
      %18 = vector.multi_reduction <add>, %17, %cst_16 [1] : vector<256x256xf32> to vector<256xf32>
      %19 = vector.shape_cast %18 : vector<256xf32> to vector<256x1xf32>
      %cst_17 = arith.constant 2.560000e+02 : f32
      %20 = vector.broadcast %cst_17 : f32 to vector<256x1xf32>
      %21 = arith.divf %19, %20 : vector<256x1xf32>
      %22 = vector.broadcast %21 : vector<256x1xf32> to vector<256x256xf32>
      %23 = arith.subf %17, %22 : vector<256x256xf32>
      %24 = arith.mulf %23, %23 : vector<256x256xf32>
      %cst_18 = arith.constant dense<0.000000e+00> : vector<256xf32>
      %25 = vector.multi_reduction <add>, %24, %cst_18 [1] : vector<256x256xf32> to vector<256xf32>
      %26 = vector.shape_cast %25 : vector<256xf32> to vector<256x1xf32>
      %cst_19 = arith.constant 2.560000e+02 : f32
      %27 = vector.broadcast %cst_19 : f32 to vector<256x1xf32>
      %28 = arith.divf %26, %27 : vector<256x1xf32>
      %cst_20 = arith.constant 9.99999974E-6 : f32
      %29 = vector.broadcast %cst_20 : f32 to vector<256x1xf32>
      %30 = arith.addf %28, %29 : vector<256x1xf32>
      %31 = math.rsqrt %30 : vector<256x1xf32>
      %32 = vector.broadcast %31 : vector<256x1xf32> to vector<256x256xf32>
      %33 = arith.mulf %23, %32 : vector<256x256xf32>
      %c0_21 = arith.constant 0 : index
      %c0_22 = arith.constant 0 : index
      %34 = vector.load %arg6[%c0_21, %c0_22] : memref<1x256xf32, #tpu.memory_space<vmem>>, vector<1x256xf32>
      %35 = vector.broadcast %34 : vector<1x256xf32> to vector<256x256xf32>
      %36 = arith.mulf %33, %35 : vector<256x256xf32>
      %c0_23 = arith.constant 0 : index
      %c0_24 = arith.constant 0 : index
      %37 = vector.load %arg7[%c0_23, %c0_24] : memref<1x256xf32, #tpu.memory_space<vmem>>, vector<1x256xf32>
      %38 = vector.broadcast %37 : vector<1x256xf32> to vector<256x256xf32>
      %39 = arith.addf %36, %38 : vector<256x256xf32>
      %c0_25 = arith.constant 0 : index
      %c0_26 = arith.constant 0 : index
      %40 = vector.load %arg8[%c0_25, %c0_26] : memref<256x256xf32, #tpu.memory_space<vmem>>, vector<256x256xf32>
      tpu.vector_store %arg8[%c0_25, %c0_26], %39 {strides = array<i32>} : memref<256x256xf32, #tpu.memory_space<vmem>>, vector<256x256xf32>,
    } else {
    }
    return
  }
  func.func @transform_0(%arg0: i32, %arg1: i32) -> (i32, i32) {
    %c0_i32 = arith.constant 0 : i32
    return %arg0, %arg1 : i32, i32
  }
  func.func @transform_1(%arg0: i32, %arg1: i32) -> (i32, i32) {
    %c0_i32 = arith.constant 0 : i32
    %c0_i32_0 = arith.constant 0 : i32
    return %arg1, %c0_i32 : i32, i32
  }
  func.func @transform_2(%arg0: i32, %arg1: i32) -> (i32, i32) {
    %c0_i32 = arith.constant 0 : i32
    %c0_i32_0 = arith.constant 0 : i32
    %c0_i32_1 = arith.constant 0 : i32
    return %c0_i32, %c0_i32_0 : i32, i32
  }
  func.func @transform_3(%arg0: i32, %arg1: i32) -> (i32, i32) {
    %c0_i32 = arith.constant 0 : i32
    %c0_i32_0 = arith.constant 0 : i32
    return %arg0, %c0_i32 : i32, i32
  }
  func.func @transform_4(%arg0: i32, %arg1: i32) -> (i32, i32) {
    %c0_i32 = arith.constant 0 : i32
    %c0_i32_0 = arith.constant 0 : i32
    %c0_i32_1 = arith.constant 0 : i32
    return %c0_i32, %c0_i32_0 : i32, i32
  }
  func.func @transform_5(%arg0: i32, %arg1: i32) -> (i32, i32) {
    %c0_i32 = arith.constant 0 : i32
    %c0_i32_0 = arith.constant 0 : i32
    %c0_i32_1 = arith.constant 0 : i32
    return %c0_i32, %c0_i32_0 : i32, i32
  }
  func.func @transform_6(%arg0: i32, %arg1: i32) -> (i32, i32) {
    %c0_i32 = arith.constant 0 : i32
    %c0_i32_0 = arith.constant 0 : i32
    return %arg0, %c0_i32 : i32, i32
  }
}

module attributes {stable_mosaic.version = 11 : i64} {
  func.func @_mm_bias_kernel(%arg0: i32, %arg1: i32, %arg2: i32, %arg3: memref<256x256xf32, #tpu.memory_space<vmem>>, %arg4: memref<256x256xbf16, #tpu.memory_space<vmem>>, %arg5: memref<1x256xf32, #tpu.memory_space<vmem>>, %arg6: memref<256x256xbf16, #tpu.memory_space<vmem>>, %arg7: memref<256x256xf32, #tpu.memory_space<vmem>>) attributes {dimension_semantics = [#tpu.dimension_semantics<parallel>, #tpu.dimension_semantics<parallel>, #tpu.dimension_semantics<arbitrary>], iteration_bounds = array<i64: 1, 1, 1>, scalar_prefetch = 0 : i64, scratch_operands = 1 : i64, tpu.core_type = #tpu.core_type<tc>, window_params = [{transform_indices = @transform_0, window_bounds = array<i64: 256, 256>}, {transform_indices = @transform_1, window_bounds = array<i64: 256, 256>}, {transform_indices = @transform_2, window_bounds = array<i64: 1, 256>}, {transform_indices = @transform_3, window_bounds = array<i64: 256, 256>}]} {
    %c0_i32 = arith.constant 0 : i32
    %0 = arith.cmpi eq, %arg2, %c0_i32 : i32
    %1 = arith.extui %0 : i1 to i32
    %c0_i32_0 = arith.constant 0 : i32
    %2 = arith.cmpi ne, %1, %c0_i32_0 : i32
    scf.if %2 {
      %cst_10 = arith.constant 0.000000e+00 : f32
      %13 = vector.broadcast %cst_10 : f32 to vector<256x256xf32>
      %c0_11 = arith.constant 0 : index
      %c0_12 = arith.constant 0 : index
      %14 = vector.load %arg7[%c0_11, %c0_12] : memref<256x256xf32, #tpu.memory_space<vmem>>, vector<256x256xf32>
      tpu.vector_store %arg7[%c0_11, %c0_12], %13 {strides = array<i32>} : memref<256x256xf32, #tpu.memory_space<vmem>>, vector<256x256xf32>,
    } else {
    }
    %c0 = arith.constant 0 : index
    %c0_1 = arith.constant 0 : index
    %3 = vector.load %arg7[%c0, %c0_1] : memref<256x256xf32, #tpu.memory_space<vmem>>, vector<256x256xf32>
    %c0_2 = arith.constant 0 : index
    %c0_3 = arith.constant 0 : index
    %4 = vector.load %arg3[%c0_2, %c0_3] : memref<256x256xf32, #tpu.memory_space<vmem>>, vector<256x256xf32>
    %5 = arith.truncf %4 : vector<256x256xf32> to vector<256x256xbf16>
    %c0_4 = arith.constant 0 : index
    %c0_5 = arith.constant 0 : index
    %6 = vector.load %arg4[%c0_4, %c0_5] : memref<256x256xbf16, #tpu.memory_space<vmem>>, vector<256x256xbf16>
    %cst = arith.constant dense<0.000000e+00> : vector<256x256xf32>
    %7 = tpu.matmul %5, %6, %cst {dimension_numbers = #tpu.dot_dimension_numbers<[1], [0], [0], [1], [0, 0, 1, 1], [], []>} : vector<256x256xbf16>, vector<256x256xbf16>, vector<256x256xf32> -> vector<256x256xf32>
    %8 = arith.addf %3, %7 : vector<256x256xf32>
    %c0_6 = arith.constant 0 : index
    %c0_7 = arith.constant 0 : index
    %9 = vector.load %arg7[%c0_6, %c0_7] : memref<256x256xf32, #tpu.memory_space<vmem>>, vector<256x256xf32>
    tpu.vector_store %arg7[%c0_6, %c0_7], %8 {strides = array<i32>} : memref<256x256xf32, #tpu.memory_space<vmem>>, vector<256x256xf32>,
    %c0_i32_8 = arith.constant 0 : i32
    %10 = arith.cmpi eq, %arg2, %c0_i32_8 : i32
    %11 = arith.extui %10 : i1 to i32
    %c0_i32_9 = arith.constant 0 : i32
    %12 = arith.cmpi ne, %11, %c0_i32_9 : i32
    scf.if %12 {
      %c0_10 = arith.constant 0 : index
      %c0_11 = arith.constant 0 : index
      %13 = vector.load %arg7[%c0_10, %c0_11] : memref<256x256xf32, #tpu.memory_space<vmem>>, vector<256x256xf32>
      %c0_12 = arith.constant 0 : index
      %c0_13 = arith.constant 0 : index
      %14 = vector.load %arg5[%c0_12, %c0_13] : memref<1x256xf32, #tpu.memory_space<vmem>>, vector<1x256xf32>
      %15 = vector.broadcast %14 : vector<1x256xf32> to vector<256x256xf32>
      %16 = arith.addf %13, %15 : vector<256x256xf32>
      %17 = arith.truncf %16 : vector<256x256xf32> to vector<256x256xbf16>
      %c0_14 = arith.constant 0 : index
      %c0_15 = arith.constant 0 : index
      %18 = vector.load %arg6[%c0_14, %c0_15] : memref<256x256xbf16, #tpu.memory_space<vmem>>, vector<256x256xbf16>
      tpu.vector_store %arg6[%c0_14, %c0_15], %17 {strides = array<i32>} : memref<256x256xbf16, #tpu.memory_space<vmem>>, vector<256x256xbf16>,
    } else {
    }
    return
  }
  func.func @transform_0(%arg0: i32, %arg1: i32, %arg2: i32) -> (i32, i32) {
    %c0_i32 = arith.constant 0 : i32
    return %arg0, %arg2 : i32, i32
  }
  func.func @transform_1(%arg0: i32, %arg1: i32, %arg2: i32) -> (i32, i32) {
    %c0_i32 = arith.constant 0 : i32
    return %arg2, %arg1 : i32, i32
  }
  func.func @transform_2(%arg0: i32, %arg1: i32, %arg2: i32) -> (i32, i32) {
    %c0_i32 = arith.constant 0 : i32
    %c0_i32_0 = arith.constant 0 : i32
    return %c0_i32, %arg1 : i32, i32
  }
  func.func @transform_3(%arg0: i32, %arg1: i32, %arg2: i32) -> (i32, i32) {
    %c0_i32 = arith.constant 0 : i32
    return %arg0, %arg1 : i32, i32
  }
}

module attributes {stable_mosaic.version = 11 : i64} {
  func.func @_attn_kernel(%arg0: i32, %arg1: i32, %arg2: memref<1x128x128xbf16, #tpu.memory_space<vmem>>, %arg3: memref<1x128x128xbf16, #tpu.memory_space<vmem>>, %arg4: memref<1x128x128xbf16, #tpu.memory_space<vmem>>, %arg5: memref<1x128x128xbf16, #tpu.memory_space<vmem>>) attributes {dimension_semantics = [#tpu.dimension_semantics<parallel>, #tpu.dimension_semantics<parallel>], iteration_bounds = array<i64: 2, 2>, scalar_prefetch = 0 : i64, scratch_operands = 0 : i64, tpu.core_type = #tpu.core_type<tc>, window_params = [{transform_indices = @transform_0, window_bounds = array<i64: 1, 128, 128>}, {transform_indices = @transform_1, window_bounds = array<i64: 1, 128, 128>}, {transform_indices = @transform_2, window_bounds = array<i64: 1, 128, 128>}, {transform_indices = @transform_3, window_bounds = array<i64: 1, 128, 128>}]} {
    %c0 = arith.constant 0 : index
    %c0_0 = arith.constant 0 : index
    %c0_1 = arith.constant 0 : index
    %0 = vector.load %arg2[%c0, %c0_0, %c0_1] : memref<1x128x128xbf16, #tpu.memory_space<vmem>>, vector<1x128x128xbf16>
    %1 = vector.shape_cast %0 : vector<1x128x128xbf16> to vector<128x128xbf16>
    %cst = arith.constant 8.837890e-02 : bf16
    %2 = vector.broadcast %cst : bf16 to vector<128x128xbf16>
    %3 = arith.mulf %1, %2 : vector<128x128xbf16>
    %c0_2 = arith.constant 0 : index
    %c0_3 = arith.constant 0 : index
    %c0_4 = arith.constant 0 : index
    %4 = vector.load %arg3[%c0_2, %c0_3, %c0_4] : memref<1x128x128xbf16, #tpu.memory_space<vmem>>, vector<1x128x128xbf16>
    %5 = vector.shape_cast %4 : vector<1x128x128xbf16> to vector<128x128xbf16>
    %c0_5 = arith.constant 0 : index
    %c0_6 = arith.constant 0 : index
    %c0_7 = arith.constant 0 : index
    %6 = vector.load %arg4[%c0_5, %c0_6, %c0_7] : memref<1x128x128xbf16, #tpu.memory_space<vmem>>, vector<1x128x128xbf16>
    %7 = vector.shape_cast %6 : vector<1x128x128xbf16> to vector<128x128xbf16>
    %cst_8 = arith.constant dense<0.000000e+00> : vector<128x128xf32>
    %8 = tpu.matmul %3, %5, %cst_8 {dimension_numbers = #tpu.dot_dimension_numbers<[1], [1], [0], [0], [0, 0, 1, 0], [], []>} : vector<128x128xbf16>, vector<128x128xbf16>, vector<128x128xf32> -> vector<128x128xf32>
    %cst_9 = arith.constant dense<0xFF800000> : vector<128xf32>
    %9 = vector.multi_reduction <maximumf>, %8, %cst_9 [1] : vector<128x128xf32> to vector<128xf32>
    %10 = vector.shape_cast %9 : vector<128xf32> to vector<128x1xf32>
    %11 = vector.broadcast %10 : vector<128x1xf32> to vector<128x128xf32>
    %12 = arith.subf %8, %11 : vector<128x128xf32>
    %13 = math.exp %12 : vector<128x128xf32>
    %cst_10 = arith.constant dense<0.000000e+00> : vector<128xf32>
    %14 = vector.multi_reduction <add>, %13, %cst_10 [1] : vector<128x128xf32> to vector<128xf32>
    %15 = vector.shape_cast %14 : vector<128xf32> to vector<128x1xf32>
    %16 = arith.truncf %13 : vector<128x128xf32> to vector<128x128xbf16>
    %cst_11 = arith.constant dense<0.000000e+00> : vector<128x128xf32>
    %17 = tpu.matmul %16, %7, %cst_11 {dimension_numbers = #tpu.dot_dimension_numbers<[1], [0], [0], [1], [0, 0, 1, 1], [], []>} : vector<128x128xbf16>, vector<128x128xbf16>, vector<128x128xf32> -> vector<128x128xf32>
    %18 = tpu.reciprocal %15 {approx = true} : vector<128x1xf32> -> vector<128x1xf32>
    %19 = vector.broadcast %18 : vector<128x1xf32> to vector<128x128xf32>
    %20 = arith.mulf %17, %19 : vector<128x128xf32>
    %21 = arith.truncf %20 : vector<128x128xf32> to vector<128x128xbf16>
    %c0_12 = arith.constant 0 : index
    %c0_13 = arith.constant 0 : index
    %c0_14 = arith.constant 0 : index
    %22 = vector.load %arg5[%c0_12, %c0_13, %c0_14] : memref<1x128x128xbf16, #tpu.memory_space<vmem>>, vector<1x128x128xbf16>
    %23 = vector.shape_cast %22 : vector<1x128x128xbf16> to vector<128x128xbf16>
    %24 = vector.shape_cast %21 : vector<128x128xbf16> to vector<1x128x128xbf16>
    tpu.vector_store %arg5[%c0_12, %c0_13, %c0_14], %24 {strides = array<i32>} : memref<1x128x128xbf16, #tpu.memory_space<vmem>>, vector<1x128x128xbf16>,
    return
  }
  func.func @transform_0(%arg0: i32, %arg1: i32) -> (i32, i32, i32) {
    %c0_i32 = arith.constant 0 : i32
    %c0_i32_0 = arith.constant 0 : i32
    return %arg0, %c0_i32, %arg1 : i32, i32, i32
  }
  func.func @transform_1(%arg0: i32, %arg1: i32) -> (i32, i32, i32) {
    %c0_i32 = arith.constant 0 : i32
    %0 = arith.addi %c0_i32, %arg1 : i32
    %c0_i32_0 = arith.constant 0 : i32
    %c0_i32_1 = arith.constant 0 : i32
    return %arg0, %c0_i32_0, %0 : i32, i32, i32
  }
  func.func @transform_2(%arg0: i32, %arg1: i32) -> (i32, i32, i32) {
    %c2_i32 = arith.constant 2 : i32
    %0 = arith.addi %c2_i32, %arg1 : i32
    %c0_i32 = arith.constant 0 : i32
    %c0_i32_0 = arith.constant 0 : i32
    return %arg0, %c0_i32, %0 : i32, i32, i32
  }
  func.func @transform_3(%arg0: i32, %arg1: i32) -> (i32, i32, i32) {
    %c0_i32 = arith.constant 0 : i32
    %c0_i32_0 = arith.constant 0 : i32
    return %arg0, %c0_i32, %arg1 : i32, i32, i32
  }
}

module attributes {stable_mosaic.version = 11 : i64} {
  func.func @_ffn_ln_kernel(%arg0: i32, %arg1: i32, %arg2: memref<256x256xf32, #tpu.memory_space<vmem>>, %arg3: memref<256x512xbf16, #tpu.memory_space<vmem>>, %arg4: memref<1x512xf32, #tpu.memory_space<vmem>>, %arg5: memref<512x256xbf16, #tpu.memory_space<vmem>>, %arg6: memref<1x256xf32, #tpu.memory_space<vmem>>, %arg7: memref<1x256xf32, #tpu.memory_space<vmem>>, %arg8: memref<1x256xf32, #tpu.memory_space<vmem>>, %arg9: memref<256x256xf32, #tpu.memory_space<vmem>>, %arg10: memref<256x256xf32, #tpu.memory_space<vmem>>) attributes {dimension_semantics = [#tpu.dimension_semantics<parallel>, #tpu.dimension_semantics<arbitrary>], iteration_bounds = array<i64: 1, 2>, scalar_prefetch = 0 : i64, scratch_operands = 1 : i64, tpu.core_type = #tpu.core_type<tc>, window_params = [{transform_indices = @transform_0, window_bounds = array<i64: 256, 256>}, {transform_indices = @transform_1, window_bounds = array<i64: 256, 512>}, {transform_indices = @transform_2, window_bounds = array<i64: 1, 512>}, {transform_indices = @transform_3, window_bounds = array<i64: 512, 256>}, {pipeline_mode = #tpu.pipeline_mode<synchronous>, transform_indices = @transform_4, window_bounds = array<i64: 1, 256>}, {pipeline_mode = #tpu.pipeline_mode<synchronous>, transform_indices = @transform_5, window_bounds = array<i64: 1, 256>}, {pipeline_mode = #tpu.pipeline_mode<synchronous>, transform_indices = @transform_6, window_bounds = array<i64: 1, 256>}, {transform_indices = @transform_7, window_bounds = array<i64: 256, 256>}]} {
    %c0_i32 = arith.constant 0 : i32
    %0 = arith.cmpi eq, %arg1, %c0_i32 : i32
    %1 = arith.extui %0 : i1 to i32
    %c0_i32_0 = arith.constant 0 : i32
    %2 = arith.cmpi ne, %1, %c0_i32_0 : i32
    scf.if %2 {
      %cst_15 = arith.constant 0.000000e+00 : f32
      %21 = vector.broadcast %cst_15 : f32 to vector<256x256xf32>
      %c0_16 = arith.constant 0 : index
      %c0_17 = arith.constant 0 : index
      %22 = vector.load %arg10[%c0_16, %c0_17] : memref<256x256xf32, #tpu.memory_space<vmem>>, vector<256x256xf32>
      tpu.vector_store %arg10[%c0_16, %c0_17], %21 {strides = array<i32>} : memref<256x256xf32, #tpu.memory_space<vmem>>, vector<256x256xf32>,
    } else {
    }
    %c0 = arith.constant 0 : index
    %c0_1 = arith.constant 0 : index
    %3 = vector.load %arg2[%c0, %c0_1] : memref<256x256xf32, #tpu.memory_space<vmem>>, vector<256x256xf32>
    %4 = arith.truncf %3 : vector<256x256xf32> to vector<256x256xbf16>
    %c0_2 = arith.constant 0 : index
    %c0_3 = arith.constant 0 : index
    %5 = vector.load %arg3[%c0_2, %c0_3] : memref<256x512xbf16, #tpu.memory_space<vmem>>, vector<256x512xbf16>
    %cst = arith.constant dense<0.000000e+00> : vector<256x512xf32>
    %6 = tpu.matmul %4, %5, %cst {dimension_numbers = #tpu.dot_dimension_numbers<[1], [0], [0], [1], [0, 0, 1, 1], [], []>} : vector<256x256xbf16>, vector<256x512xbf16>, vector<256x512xf32> -> vector<256x512xf32>
    %c0_4 = arith.constant 0 : index
    %c0_5 = arith.constant 0 : index
    %7 = vector.load %arg4[%c0_4, %c0_5] : memref<1x512xf32, #tpu.memory_space<vmem>>, vector<1x512xf32>
    %8 = vector.broadcast %7 : vector<1x512xf32> to vector<256x512xf32>
    %9 = arith.addf %6, %8 : vector<256x512xf32>
    %cst_6 = arith.constant 0.000000e+00 : f32
    %10 = vector.broadcast %cst_6 : f32 to vector<256x512xf32>
    %11 = arith.maximumf %9, %10 : vector<256x512xf32>
    %c0_7 = arith.constant 0 : index
    %c0_8 = arith.constant 0 : index
    %12 = vector.load %arg10[%c0_7, %c0_8] : memref<256x256xf32, #tpu.memory_space<vmem>>, vector<256x256xf32>
    %13 = arith.truncf %11 : vector<256x512xf32> to vector<256x512xbf16>
    %c0_9 = arith.constant 0 : index
    %c0_10 = arith.constant 0 : index
    %14 = vector.load %arg5[%c0_9, %c0_10] : memref<512x256xbf16, #tpu.memory_space<vmem>>, vector<512x256xbf16>
    %cst_11 = arith.constant dense<0.000000e+00> : vector<256x256xf32>
    %15 = tpu.matmul %13, %14, %cst_11 {dimension_numbers = #tpu.dot_dimension_numbers<[1], [0], [0], [1], [0, 0, 1, 1], [], []>} : vector<256x512xbf16>, vector<512x256xbf16>, vector<256x256xf32> -> vector<256x256xf32>
    %16 = arith.addf %12, %15 : vector<256x256xf32>
    %c0_12 = arith.constant 0 : index
    %c0_13 = arith.constant 0 : index
    %17 = vector.load %arg10[%c0_12, %c0_13] : memref<256x256xf32, #tpu.memory_space<vmem>>, vector<256x256xf32>
    tpu.vector_store %arg10[%c0_12, %c0_13], %16 {strides = array<i32>} : memref<256x256xf32, #tpu.memory_space<vmem>>, vector<256x256xf32>,
    %c1_i32 = arith.constant 1 : i32
    %18 = arith.cmpi eq, %arg1, %c1_i32 : i32
    %19 = arith.extui %18 : i1 to i32
    %c0_i32_14 = arith.constant 0 : i32
    %20 = arith.cmpi ne, %19, %c0_i32_14 : i32
    scf.if %20 {
      %c0_15 = arith.constant 0 : index
      %c0_16 = arith.constant 0 : index
      %21 = vector.load %arg10[%c0_15, %c0_16] : memref<256x256xf32, #tpu.memory_space<vmem>>, vector<256x256xf32>
      %c0_17 = arith.constant 0 : index
      %c0_18 = arith.constant 0 : index
      %22 = vector.load %arg6[%c0_17, %c0_18] : memref<1x256xf32, #tpu.memory_space<vmem>>, vector<1x256xf32>
      %23 = vector.broadcast %22 : vector<1x256xf32> to vector<256x256xf32>
      %24 = arith.addf %21, %23 : vector<256x256xf32>
      %c0_19 = arith.constant 0 : index
      %c0_20 = arith.constant 0 : index
      %25 = vector.load %arg2[%c0_19, %c0_20] : memref<256x256xf32, #tpu.memory_space<vmem>>, vector<256x256xf32>
      %26 = arith.addf %24, %25 : vector<256x256xf32>
      %cst_21 = arith.constant dense<0.000000e+00> : vector<256xf32>
      %27 = vector.multi_reduction <add>, %26, %cst_21 [1] : vector<256x256xf32> to vector<256xf32>
      %28 = vector.shape_cast %27 : vector<256xf32> to vector<256x1xf32>
      %cst_22 = arith.constant 2.560000e+02 : f32
      %29 = vector.broadcast %cst_22 : f32 to vector<256x1xf32>
      %30 = arith.divf %28, %29 : vector<256x1xf32>
      %31 = vector.broadcast %30 : vector<256x1xf32> to vector<256x256xf32>
      %32 = arith.subf %26, %31 : vector<256x256xf32>
      %33 = arith.mulf %32, %32 : vector<256x256xf32>
      %cst_23 = arith.constant dense<0.000000e+00> : vector<256xf32>
      %34 = vector.multi_reduction <add>, %33, %cst_23 [1] : vector<256x256xf32> to vector<256xf32>
      %35 = vector.shape_cast %34 : vector<256xf32> to vector<256x1xf32>
      %cst_24 = arith.constant 2.560000e+02 : f32
      %36 = vector.broadcast %cst_24 : f32 to vector<256x1xf32>
      %37 = arith.divf %35, %36 : vector<256x1xf32>
      %cst_25 = arith.constant 9.99999974E-6 : f32
      %38 = vector.broadcast %cst_25 : f32 to vector<256x1xf32>
      %39 = arith.addf %37, %38 : vector<256x1xf32>
      %40 = math.rsqrt %39 : vector<256x1xf32>
      %41 = vector.broadcast %40 : vector<256x1xf32> to vector<256x256xf32>
      %42 = arith.mulf %32, %41 : vector<256x256xf32>
      %c0_26 = arith.constant 0 : index
      %c0_27 = arith.constant 0 : index
      %43 = vector.load %arg7[%c0_26, %c0_27] : memref<1x256xf32, #tpu.memory_space<vmem>>, vector<1x256xf32>
      %44 = vector.broadcast %43 : vector<1x256xf32> to vector<256x256xf32>
      %45 = arith.mulf %42, %44 : vector<256x256xf32>
      %c0_28 = arith.constant 0 : index
      %c0_29 = arith.constant 0 : index
      %46 = vector.load %arg8[%c0_28, %c0_29] : memref<1x256xf32, #tpu.memory_space<vmem>>, vector<1x256xf32>
      %47 = vector.broadcast %46 : vector<1x256xf32> to vector<256x256xf32>
      %48 = arith.addf %45, %47 : vector<256x256xf32>
      %c0_30 = arith.constant 0 : index
      %c0_31 = arith.constant 0 : index
      %49 = vector.load %arg9[%c0_30, %c0_31] : memref<256x256xf32, #tpu.memory_space<vmem>>, vector<256x256xf32>
      tpu.vector_store %arg9[%c0_30, %c0_31], %48 {strides = array<i32>} : memref<256x256xf32, #tpu.memory_space<vmem>>, vector<256x256xf32>,
    } else {
    }
    return
  }
  func.func @transform_0(%arg0: i32, %arg1: i32) -> (i32, i32) {
    %c0_i32 = arith.constant 0 : i32
    %c0_i32_0 = arith.constant 0 : i32
    return %arg0, %c0_i32 : i32, i32
  }
  func.func @transform_1(%arg0: i32, %arg1: i32) -> (i32, i32) {
    %c0_i32 = arith.constant 0 : i32
    %c0_i32_0 = arith.constant 0 : i32
    return %c0_i32, %arg1 : i32, i32
  }
  func.func @transform_2(%arg0: i32, %arg1: i32) -> (i32, i32) {
    %c0_i32 = arith.constant 0 : i32
    %c0_i32_0 = arith.constant 0 : i32
    return %c0_i32, %arg1 : i32, i32
  }
  func.func @transform_3(%arg0: i32, %arg1: i32) -> (i32, i32) {
    %c0_i32 = arith.constant 0 : i32
    %c0_i32_0 = arith.constant 0 : i32
    return %arg1, %c0_i32 : i32, i32
  }
  func.func @transform_4(%arg0: i32, %arg1: i32) -> (i32, i32) {
    %c0_i32 = arith.constant 0 : i32
    %c0_i32_0 = arith.constant 0 : i32
    %c0_i32_1 = arith.constant 0 : i32
    return %c0_i32, %c0_i32_0 : i32, i32
  }
  func.func @transform_5(%arg0: i32, %arg1: i32) -> (i32, i32) {
    %c0_i32 = arith.constant 0 : i32
    %c0_i32_0 = arith.constant 0 : i32
    %c0_i32_1 = arith.constant 0 : i32
    return %c0_i32, %c0_i32_0 : i32, i32
  }
  func.func @transform_6(%arg0: i32, %arg1: i32) -> (i32, i32) {
    %c0_i32 = arith.constant 0 : i32
    %c0_i32_0 = arith.constant 0 : i32
    %c0_i32_1 = arith.constant 0 : i32
    return %c0_i32, %c0_i32_0 : i32, i32
  }
  func.func @transform_7(%arg0: i32, %arg1: i32) -> (i32, i32) {
    %c0_i32 = arith.constant 0 : i32
    %c0_i32_0 = arith.constant 0 : i32
    return %arg0, %c0_i32 : i32, i32
  }
}

</mosaic_0001>

<bundles_post_ra>
// kernel: decoder_layer.9
= control target key start
LH: loop header
LB: loop body
LE: loop exit
PB: predicated region body
PF: predicated region fallthrough
CT: control target
= control target key end

     0   :  { %s2272_s0 = inlined_call_operand.vmem [shape: bf16[2,128,768], index: 0, kind: input, shape index: {}, may-alias: {0,1,2}]   ;;  %s2273_s1 = inlined_call_operand.vmem [shape: bf16[2,128,768], index: 1, kind: input, shape index: {}, may-alias: {0,1,2}]   ;;  %s2274_s2 = inlined_call_operand.vmem [shape: bf16[2,128,768], index: 2, kind: input, shape index: {}, may-alias: {0,1,2}]   ;;  %s2275_s3 = inlined_call_operand.vmem [shape: bf16[2,128,256], index: 3, kind: output, shape index: {}]  }
   0x1   :  { %2277 = sst [smem:[#allocation7_spill]] %s2275_s3 }
   0x2   :  { %s1930_s12 = smov 0   ;;  %s1932_s13 = smov 0  }
   0x3   :  { %s1934_s14 = smov 0   ;;  %s1936_s15 = smov 0  }
   0x4   :  { %s1938_s16 = smov 0   ;;  %s1940_s17 = smov 0  }
   0x5   :  { %s1942_s18 = smov 0   ;;  %s1944_s19 = smov 0  }
   0x6   :  { %s1946_s20 = smov 0   ;;  %s1948_s21 = smov 0  }
   0x7   :  { %s1950_s22 = smov 0  }
   0x8 LB: > { %s22_s24 = sadd.s32 1, %s1900_s20  ;;  %s25_s25 = sadd.s32 1, %s1904_s21  ;;  %s1908_s22 = sphi %s1950_s22, %s13_s22   ;;  %s1904_s21 = sphi %s1948_s21, %s2295_s21   ;;  %s1900_s20 = sphi %s1946_s20, %s2294_s20   ;;  %s1896_s19 = sphi %s1944_s19, %s2293_s19   ;;  %s1892_s18 = sphi %s1942_s18, %s2292_s18   ;;  %s1888_s17 = sphi %s1940_s17, %s2291_s17   ;;  %s1884_s16 = sphi %s1938_s16, %s2290_s16   ;;  %s1880_s15 = sphi %s1936_s15, %s2289_s15   ;;  %s1876_s14 = sphi %s1934_s14, %s2288_s14   ;;  %s1872_s13 = sphi %s1932_s13, %s2287_s13   ;;  %s1868_s12 = sphi %s1930_s12, %s2286_s12  }
   0x9   : > { %p23_p0 = scmp.ge.s32.totalorder %s22_s24, 2  ;;  %s34_s26 = sadd.s32 1, %s1888_s17 }
   0xa   : > { %p41_p1 = scmp.ne.s32.totalorder %s1888_s17, %s1884_s16  ;;  %p42_p2 = scmp.eq.s32.totalorder %s1908_s22, 0 }
   0xb   : > { %s2297_s24 = smov (%p23_p0, %s22_s24), 0  ;;  %s2299_s25 = smov (!%p23_p0, %s25_s25), %s1904_s21 }
   0xc   : > { %s30_s27 = ssub.s32 %s1900_s20, %s2297_s24  ;;  %p27_p3 = scmp.ge.s32.totalorder %s2299_s25, 2 }
   0xd   : > { %s57_s28 = sadd.s32 2, %s1900_s20  ;;  %p2003_p4 = por %p42_p2, %p41_p1 }
   0xe   : > { %s58_s30 = sadd.s32 2, %s2297_s24  ;;  %s2301_s25 = smov (%p27_p3, %s2299_s25), 0 }
   0xf   : > { %2279 = sst [smem:[#allocation6_spill]] %s2301_s25  ;;  %s60_s4 = ssub.s32 %s57_s28, %s58_s30 }
  0x10   : > { %s64_s5 = sadd.s32 1, %s1880_s15  ;;  %s29_s6 = ssub.s32 %s1904_s21, %s2301_s25 }
  0x11   : > { %p71_p5 = scmp.ne.s32.totalorder %s1880_s15, %s1876_s14  ;;  %s31_s7 = sor.u32 %s30_s27, %s29_s6 }
  0x12   : > { %s61_s8 = sor.u32 %s60_s4, %s29_s6  ;;  %p32_p6 = scmp.eq.s32.totalorder %s31_s7, 0 }
  0x13   : > { %p62_p7 = scmp.eq.s32.totalorder %s61_s8, 0  ;;  %p2017_p8 = por %p71_p5, %p42_p2 }
  0x14   : > { %s87_s10 = sadd.s32 4, %s1900_s20  ;;  %s88_s30 = sadd.s32 4, %s2297_s24 }
  0x15   : > { %s2023_s11 = scalar_select %p32_p6, %s1888_s17, %s34_s26  }
  0x16   : > { %s2026_s28 = scalar_select %p62_p7, %s1880_s15, %s64_s5  }
  0x17   : > { %s94_s23 = sadd.s32 1, %s1872_s13  ;;  %s90_s25 = ssub.s32 %s87_s10, %s88_s30 }
  0x18   : > { %p101_p9 = scmp.ne.s32.totalorder %s1872_s13, %s1868_s12  ;;  %s91_s27 = sor.u32 %s90_s25, %s29_s6 }
  0x19   : > { %s2281_s3 = sadd.s32 4294967295, %s1908_s22   ;;  %p92_p11 = scmp.eq.s32.totalorder %s91_s27, 0 }
  0x1a   : > { %p133_p10 = scmp.eq.s32.totalorder %s2281_s3, 3  ;;  %p2036_p12 = por %p101_p9, %p42_p2 }
  0x1b   : > { %s2048_s26 = scalar_select %p92_p11, %s1872_s13, %s94_s23  }
  0x1c   : > { %p2043_p13 = por %p133_p10, %p41_p1  ;;  %p1405_p0 = scmp.ge.s32.totalorder %s1908_s22, 4 }
  0x1e   : > { %155 = sbr.rel (%p1405_p0) target bundleno = 88 (0x58), region = 16 }
  0x25   : > { %158 = sbr.rel (!%p2003_p4) target bundleno = 54 (0x36), region = 20  ;;  %s160_s3 = sand.u32 (%p2003_p4), 1, %s1888_s17  }
  0x26   : > { %s1653_s25 = smul.u32 (%p2003_p4), 96, %s1904_s21  ;;  %s1406_s5 = sshll.u32 (%p2003_p4), %s160_s3, 6 }
  0x27   : > { %s162_s23 = scalar_lea.vmem (%p2003_p4), [#allocation2], %s1406_s5 }
  0x28   : > { %s164_s6 = sadd.s32 (%p2003_p4), %s1900_s20, %s1653_s25 }
  0x29   : > { %s1407_s8 = sshll.u32 (%p2003_p4), %s164_s6, 2 }
  0x2a   : > { %s2059_s27 = scalar_lea.vmem (%p2003_p4), %s2272_s0, %s1407_s8 }
  0x2b   : > { %v182_v0 = vld [vmem:[%s2059_s27] sm:$0xf] (%p2003_p4)  ;;  %v184_v1 = vld [vmem:[%s2059_s27 + $0x18] sm:$0xf] (%p2003_p4)  ;;  %v186_v2 = vld [vmem:[%s2059_s27 + $0x30] sm:$0xf] (%p2003_p4) }
  0x2c   : > { %183 = vst [vmem:[%s162_s23] sm:$0xf] %v182_v0  ;;  %185 = vst [vmem:[%s162_s23 + $0x4] sm:$0xf] %v184_v1  ;;  %v188_v3 = vld [vmem:[%s2059_s27 + $0x48] sm:$0xf] }
  0x2d   : > { %187 = vst [vmem:[%s162_s23 + $0x8] sm:$0xf] %v186_v2  ;;  %v190_v4 = vld [vmem:[%s2059_s27 + $0x60] sm:$0xf]  ;;  %v192_v5 = vld [vmem:[%s2059_s27 + $0x78] sm:$0xf] }
  0x2e   : > { %189 = vst [vmem:[%s162_s23 + $0xc] sm:$0xf] %v188_v3  ;;  %191 = vst [vmem:[%s162_s23 + $0x10] sm:$0xf] %v190_v4  ;;  %v194_v6 = vld [vmem:[%s2059_s27 + $0x90] sm:$0xf] }
  0x2f   : > { %193 = vst [vmem:[%s162_s23 + $0x14] sm:$0xf] %v192_v5  ;;  %v196_v7 = vld [vmem:[%s2059_s27 + $0xa8] sm:$0xf]  ;;  %v198_v8 = vld [vmem:[%s2059_s27 + $0xc0] sm:$0xf] }
  0x30   : > { %195 = vst [vmem:[%s162_s23 + $0x18] sm:$0xf] %v194_v6  ;;  %197 = vst [vmem:[%s162_s23 + $0x1c] sm:$0xf] %v196_v7  ;;  %v200_v9 = vld [vmem:[%s2059_s27 + $0xd8] sm:$0xf] }
  0x31   : > { %199 = vst [vmem:[%s162_s23 + $0x20] sm:$0xf] %v198_v8  ;;  %v202_v10 = vld [vmem:[%s2059_s27 + $0xf0] sm:$0xf]  ;;  %v204_v11 = vld [vmem:[%s2059_s27 + $0x108] sm:$0xf] }
  0x32   : > { %201 = vst [vmem:[%s162_s23 + $0x24] sm:$0xf] %v200_v9  ;;  %203 = vst [vmem:[%s162_s23 + $0x28] sm:$0xf] %v202_v10  ;;  %v206_v12 = vld [vmem:[%s2059_s27 + $0x120] sm:$0xf] }
  0x33   : > { %205 = vst [vmem:[%s162_s23 + $0x2c] sm:$0xf] %v204_v11  ;;  %v208_v13 = vld [vmem:[%s2059_s27 + $0x138] sm:$0xf]  ;;  %v210_v14 = vld [vmem:[%s2059_s27 + $0x150] sm:$0xf] }
  0x34   : > { %207 = vst [vmem:[%s162_s23 + $0x30] sm:$0xf] %v206_v12  ;;  %209 = vst [vmem:[%s162_s23 + $0x34] sm:$0xf] %v208_v13  ;;  %v212_v15 = vld [vmem:[%s2059_s27 + $0x168] sm:$0xf] }
  0x35   : > { %211 = vst [vmem:[%s162_s23 + $0x38] sm:$0xf] %v210_v14  ;;  %213 = vst [vmem:[%s162_s23 + $0x3c] sm:$0xf] %v212_v15 }
  0x36 PF: > { %268 = sbr.rel (!%p2017_p8) target bundleno = 71 (0x47), region = 61  ;;  %s270_s29 = sand.u32 (%p2017_p8), 1, %s1880_s15  }
  0x37   : > { %s1308_s3 = smul.u32 (%p2017_p8), 96, %s1904_s21  ;;  %s1408_s25 = sshll.u32 (%p2017_p8), %s270_s29, 6 }
  0x38   : > { %s272_s9 = scalar_lea.vmem (%p2017_p8), [#allocation3], %s1408_s25 }
  0x39   : > { %s1309_s5 = sadd.s32 (%p2017_p8), %s1900_s20, %s1308_s3 }
  0x3a   : > { %s1409_s6 = sshll.u32 (%p2017_p8), %s1309_s5, 2 }
  0x3b   : > { %s2085_s30 = scalar_lea.vmem (%p2017_p8), %s2273_s1, %s1409_s6 }
  0x3c   : > { %v1410_v16 = vld [vmem:[%s2085_s30 + $0x8] sm:$0xf] (%p2017_p8)  ;;  %v1411_v17 = vld [vmem:[%s2085_s30 + $0x20] sm:$0xf] (%p2017_p8)  ;;  %v1412_v18 = vld [vmem:[%s2085_s30 + $0x38] sm:$0xf] (%p2017_p8) }
  0x3d   : > { %294 = vst [vmem:[%s272_s9] sm:$0xf] %v1410_v16  ;;  %296 = vst [vmem:[%s272_s9 + $0x4] sm:$0xf] %v1411_v17  ;;  %v1413_v19 = vld [vmem:[%s2085_s30 + $0x50] sm:$0xf] }
  0x3e   : > { %298 = vst [vmem:[%s272_s9 + $0x8] sm:$0xf] %v1412_v18  ;;  %v1414_v20 = vld [vmem:[%s2085_s30 + $0x68] sm:$0xf]  ;;  %v1415_v21 = vld [vmem:[%s2085_s30 + $0x80] sm:$0xf] }
  0x3f   : > { %300 = vst [vmem:[%s272_s9 + $0xc] sm:$0xf] %v1413_v19  ;;  %302 = vst [vmem:[%s272_s9 + $0x10] sm:$0xf] %v1414_v20  ;;  %v1416_v22 = vld [vmem:[%s2085_s30 + $0x98] sm:$0xf] }
  0x40   : > { %304 = vst [vmem:[%s272_s9 + $0x14] sm:$0xf] %v1415_v21  ;;  %v1417_v23 = vld [vmem:[%s2085_s30 + $0xb0] sm:$0xf]  ;;  %v1418_v24 = vld [vmem:[%s2085_s30 + $0xc8] sm:$0xf] }
  0x41   : > { %306 = vst [vmem:[%s272_s9 + $0x18] sm:$0xf] %v1416_v22  ;;  %308 = vst [vmem:[%s272_s9 + $0x1c] sm:$0xf] %v1417_v23  ;;  %v1419_v25 = vld [vmem:[%s2085_s30 + $0xe0] sm:$0xf] }
  0x42   : > { %310 = vst [vmem:[%s272_s9 + $0x20] sm:$0xf] %v1418_v24  ;;  %v1420_v26 = vld [vmem:[%s2085_s30 + $0xf8] sm:$0xf]  ;;  %v1421_v27 = vld [vmem:[%s2085_s30 + $0x110] sm:$0xf] }
  0x43   : > { %312 = vst [vmem:[%s272_s9 + $0x24] sm:$0xf] %v1419_v25  ;;  %314 = vst [vmem:[%s272_s9 + $0x28] sm:$0xf] %v1420_v26  ;;  %v1422_v28 = vld [vmem:[%s2085_s30 + $0x128] sm:$0xf] }
  0x44   : > { %316 = vst [vmem:[%s272_s9 + $0x2c] sm:$0xf] %v1421_v27  ;;  %v1423_v29 = vld [vmem:[%s2085_s30 + $0x140] sm:$0xf]  ;;  %v1424_v30 = vld [vmem:[%s2085_s30 + $0x158] sm:$0xf] }
  0x45   : > { %318 = vst [vmem:[%s272_s9 + $0x30] sm:$0xf] %v1422_v28  ;;  %320 = vst [vmem:[%s272_s9 + $0x34] sm:$0xf] %v1423_v29  ;;  %v1425_v31 = vld [vmem:[%s2085_s30 + $0x170] sm:$0xf] }
  0x46   : > { %322 = vst [vmem:[%s272_s9 + $0x38] sm:$0xf] %v1424_v30  ;;  %324 = vst [vmem:[%s272_s9 + $0x3c] sm:$0xf] %v1425_v31 }
  0x47 PF: > { %379 = sbr.rel (!%p2036_p12) target bundleno = 88 (0x58), region = 102  ;;  %s381_s27 = sand.u32 (%p2036_p12), 1, %s1872_s13  }
  0x48   : > { %s1315_s23 = smul.u32 (%p2036_p12), 96, %s1904_s21  ;;  %s1426_s29 = sshll.u32 (%p2036_p12), %s381_s27, 6 }
  0x49   : > { %s383_s4 = scalar_lea.vmem (%p2036_p12), [#allocation4], %s1426_s29 }
  0x4a   : > { %s1316_s3 = sadd.s32 (%p2036_p12), %s1900_s20, %s1315_s23 }
  0x4b   : > { %s1427_s25 = sshll.u32 (%p2036_p12), %s1316_s3, 2 }
  0x4c   : > { %s2111_s8 = scalar_lea.vmem (%p2036_p12), %s2274_s2, %s1427_s25 }
  0x4d   : > { %v1428_v32 = vld [vmem:[%s2111_s8 + $0x10] sm:$0xf] (%p2036_p12)  ;;  %v1429_v33 = vld [vmem:[%s2111_s8 + $0x28] sm:$0xf] (%p2036_p12)  ;;  %v1430_v34 = vld [vmem:[%s2111_s8 + $0x40] sm:$0xf] (%p2036_p12) }
  0x4e   : > { %405 = vst [vmem:[%s383_s4] sm:$0xf] %v1428_v32  ;;  %407 = vst [vmem:[%s383_s4 + $0x4] sm:$0xf] %v1429_v33  ;;  %v1431_v35 = vld [vmem:[%s2111_s8 + $0x58] sm:$0xf] }
  0x4f   : > { %409 = vst [vmem:[%s383_s4 + $0x8] sm:$0xf] %v1430_v34  ;;  %v1432_v36 = vld [vmem:[%s2111_s8 + $0x70] sm:$0xf]  ;;  %v1433_v37 = vld [vmem:[%s2111_s8 + $0x88] sm:$0xf] }
  0x50   : > { %411 = vst [vmem:[%s383_s4 + $0xc] sm:$0xf] %v1431_v35  ;;  %413 = vst [vmem:[%s383_s4 + $0x10] sm:$0xf] %v1432_v36  ;;  %v1434_v38 = vld [vmem:[%s2111_s8 + $0xa0] sm:$0xf] }
  0x51   : > { %415 = vst [vmem:[%s383_s4 + $0x14] sm:$0xf] %v1433_v37  ;;  %v1435_v39 = vld [vmem:[%s2111_s8 + $0xb8] sm:$0xf]  ;;  %v1436_v40 = vld [vmem:[%s2111_s8 + $0xd0] sm:$0xf] }
  0x52   : > { %417 = vst [vmem:[%s383_s4 + $0x18] sm:$0xf] %v1434_v38  ;;  %419 = vst [vmem:[%s383_s4 + $0x1c] sm:$0xf] %v1435_v39  ;;  %v1437_v41 = vld [vmem:[%s2111_s8 + $0xe8] sm:$0xf] }
  0x53   : > { %421 = vst [vmem:[%s383_s4 + $0x20] sm:$0xf] %v1436_v40  ;;  %v1438_v42 = vld [vmem:[%s2111_s8 + $0x100] sm:$0xf]  ;;  %v1439_v43 = vld [vmem:[%s2111_s8 + $0x118] sm:$0xf] }
  0x54   : > { %423 = vst [vmem:[%s383_s4 + $0x24] sm:$0xf] %v1437_v41  ;;  %425 = vst [vmem:[%s383_s4 + $0x28] sm:$0xf] %v1438_v42  ;;  %v1440_v44 = vld [vmem:[%s2111_s8 + $0x130] sm:$0xf] }
  0x55   : > { %427 = vst [vmem:[%s383_s4 + $0x2c] sm:$0xf] %v1439_v43  ;;  %v1441_v45 = vld [vmem:[%s2111_s8 + $0x148] sm:$0xf]  ;;  %v1442_v46 = vld [vmem:[%s2111_s8 + $0x160] sm:$0xf] }
  0x56   : > { %429 = vst [vmem:[%s383_s4 + $0x30] sm:$0xf] %v1440_v44  ;;  %431 = vst [vmem:[%s383_s4 + $0x34] sm:$0xf] %v1441_v45  ;;  %v1443_v47 = vld [vmem:[%s2111_s8 + $0x178] sm:$0xf] }
  0x57   : > { %433 = vst [vmem:[%s383_s4 + $0x38] sm:$0xf] %v1442_v46  ;;  %435 = vst [vmem:[%s383_s4 + $0x3c] sm:$0xf] %v1443_v47 }
  0x58 PF: > { %p1444_p1 = scmp.ge.s32.totalorder %s1908_s22, 1  ;;  %p489_p2 = scmp.lt.s32.totalorder %s1908_s22, 5 }
  0x5a   : > { %p490_p3 = pnand %p1444_p1, %p489_p2 }
  0x5b   : > { %s503_s10 = sand.u32 (!%p490_p3), 1, %s1876_s14   ;;  %s496_s9 = sand.u32 (!%p490_p3), 1, %s1884_s16  }
  0x5c   : > { %493 = sbr.rel (%p490_p3) target bundleno = 790 (0x316), region = 143  ;;  %s1446_s30 = sshll.u32 (!%p490_p3), %s503_s10, 6 }
  0x5d   : > { %s505_s27 = scalar_lea.vmem (!%p490_p3), [#allocation3], %s1446_s30  ;;  %s2133_s23 = sshll.u32 (!%p490_p3), %s496_s9, 6 }
  0x5e   : > { %v1742_v48 = vld [vmem:[%s505_s27] sm:$0xff] (!%p490_p3)   ;;  %v1743_v49 = vld [vmem:[%s505_s27 + $0x8] sm:$0xff] (!%p490_p3)   ;;  %v1744_v50 = vld [vmem:[%s505_s27 + $0x10] sm:$0xff] (!%p490_p3)   ;;  %s2136_s29 = scalar_lea.vmem (!%p490_p3), [#allocation2], %s2133_s23  ;;  %s510_s14 = sand.u32 (!%p490_p3), 1, %s1868_s12  }
  0x5f   : > { %1589 = vmatprep.subr.bf16.mxu0 (!%p490_p3), %v1742_v48  ;;  %v544_v51 = vld [vmem:[%s2136_s29] sm:$0xf] (!%p490_p3)  ;;  %v545_v52 = vld [vmem:[%s2136_s29 + $0x4] sm:$0xf] (!%p490_p3)  ;;  %v1745_v56 = vld [vmem:[%s505_s27 + $0x18] sm:$0xff] (!%p490_p3)   ;;  %s1447_s16 = sshll.u32 (!%p490_p3), %s510_s14, 6 }
  0x60   : > { %1590 = vmatpush3.bf16.xpose.msra.mxu0 (!%p490_p3), %v1742_v48  ;;  %v560_v53 = vmul.bf16 (!%p490_p3), 1035287989, %v544_v51  ;;  %v561_v54 = vmul.bf16 (!%p490_p3), 1035287989, %v545_v52  ;;  %v1746_v57 = vld [vmem:[%s505_s27 + $0x20] sm:$0xff] (!%p490_p3)   ;;  %v1747_v58 = vld [vmem:[%s505_s27 + $0x28] sm:$0xff] (!%p490_p3)  }
  0x61   : > { %1591 = vmatprep.subr.bf16.mxu0 (!%p490_p3), %v1743_v49  ;;  %v1748_v59 = vld [vmem:[%s505_s27 + $0x30] sm:$0xff] (!%p490_p3)   ;;  %v1749_v60 = vld [vmem:[%s505_s27 + $0x38] sm:$0xff] (!%p490_p3)   ;;  %v546_v61 = vld [vmem:[%s2136_s29 + $0x8] sm:$0xf] (!%p490_p3)  ;;  %s2155_s3 = scalar_lea.vmem (!%p490_p3), [#allocation4], %s1447_s16  ;;  %s2206_s12 = scalar_lea.vmem (!%p490_p3), [#allocation5], %s2133_s23 }
  0x62   : > { %v1449_v55 = vcombine.low (!%p490_p3), %v560_v53, %v561_v54  ;;  %v547_v62 = vld [vmem:[%s2136_s29 + $0xc] sm:$0xf] (!%p490_p3)  ;;  %v548_v63 = vld [vmem:[%s2136_s29 + $0x10] sm:$0xf] (!%p490_p3)  ;;  %v549_v0 = vld [vmem:[%s2136_s29 + $0x14] sm:$0xf] (!%p490_p3) }
  0x63   : > { %v562_v1 = vmul.bf16 1035287989, %v546_v61  ;;  %v563_v2 = vmul.bf16 1035287989, %v547_v62  ;;  %v564_v3 = vmul.bf16 1035287989, %v548_v63 }
  0x64   : > { %1605 = vmatprep.mubr.bf16.mxu0 %v1449_v55  ;;  %v565_v4 = vmul.bf16 1035287989, %v549_v0  ;;  %v550_v7 = vld [vmem:[%s2136_s29 + $0x18] sm:$0xf]  ;;  %v551_v8 = vld [vmem:[%s2136_s29 + $0x1c] sm:$0xf] }
  0x65   : > { %v1450_v5 = vcombine.low %v562_v1, %v563_v2  ;;  %v552_v9 = vld [vmem:[%s2136_s29 + $0x20] sm:$0xf]  ;;  %v553_v10 = vld [vmem:[%s2136_s29 + $0x24] sm:$0xf]  ;;  %v566_v11 = vmul.bf16 1035287989, %v550_v7 }
  0x66   : > { %v1451_v6 = vcombine.low %v564_v3, %v565_v4  ;;  %v567_v12 = vmul.bf16 1035287989, %v551_v8  ;;  %v568_v13 = vmul.bf16 1035287989, %v552_v9  ;;  %v569_v14 = vmul.bf16 1035287989, %v553_v10 }
  0x67   : > { %v554_v17 = vld [vmem:[%s2136_s29 + $0x28] sm:$0xf]  ;;  %v555_v18 = vld [vmem:[%s2136_s29 + $0x2c] sm:$0xf]  ;;  %v556_v19 = vld [vmem:[%s2136_s29 + $0x30] sm:$0xf] }
  0x68   : > { %1592 = vmatpush3.bf16.xpose.msra.mxu0 %v1743_v49  ;;  %v1452_v15 = vcombine.low %v566_v11, %v567_v12  ;;  %v1453_v16 = vcombine.low %v568_v13, %v569_v14  ;;  %v557_v20 = vld [vmem:[%s2136_s29 + $0x34] sm:$0xf]  ;;  %v570_v21 = vmul.bf16 1035287989, %v554_v17  ;;  %v571_v22 = vmul.bf16 1035287989, %v555_v18 }
  0x69   : > { %1593 = vmatprep.subr.bf16.mxu0 %v1744_v50  ;;  %v572_v23 = vmul.bf16 1035287989, %v556_v19  ;;  %v573_v24 = vmul.bf16 1035287989, %v557_v20  ;;  %v558_v27 = vld [vmem:[%s2136_s29 + $0x38] sm:$0xf] }
  0x6a   : > { %v1454_v25 = vcombine.low %v570_v21, %v571_v22  ;;  %v559_v28 = vld [vmem:[%s2136_s29 + $0x3c] sm:$0xf]  ;;  %v574_v29 = vmul.bf16 1035287989, %v558_v27  ;;  %v1750_v32 = vld [vmem:[%s2155_s3] sm:$0xff]   ;;  %v1751_v33 = vld [vmem:[%s2155_s3 + $0x8] sm:$0xff]  }
  0x6b   : > { %v1455_v26 = vcombine.low %v572_v23, %v573_v24  ;;  %v575_v30 = vmul.bf16 1035287989, %v559_v28  ;;  %1621 = vmatprep.subr.bf16.mxu1 %v1750_v32  ;;  %v1752_v34 = vld [vmem:[%s2155_s3 + $0x10] sm:$0xff]   ;;  %v1753_v44 = vld [vmem:[%s2155_s3 + $0x18] sm:$0xff]   ;;  %v1754_v48 = vld [vmem:[%s2155_s3 + $0x20] sm:$0xff]   ;;  %s1490_s25 = sshll.u32 (%p2043_p13), %s1896_s19, 5 }
  0x6c   : > { %1622 = vmatpush3.bf16.msra.mxu1 %v1750_v32  ;;  %v1756_v54 = vld [vmem:[%s2155_s3 + $0x30] sm:$0xff]   ;;  %v1757_v55 = vld [vmem:[%s2155_s3 + $0x38] sm:$0xff]   ;;  %s1186_s5 = sadd.s32 (%p2043_p13), %s1892_s18, %s1490_s25  ;;  %s2284_s4 = sld [smem:[#allocation7_spill]] (%p2043_p13) }
  0x6d   : > { %v1456_v31 = vcombine.low %v574_v29, %v575_v30  ;;  %1623 = vmatprep.subr.bf16.mxu1 %v1751_v33  ;;  %s1491_s7 = sshll.u32 (%p2043_p13), %s1186_s5, 2 }
  0x70   : > { %1594 = vmatpush3.bf16.xpose.msra.mxu0 %v1744_v50  ;;  %1624 = vmatpush3.bf16.msra.mxu1 %v1751_v33  ;;  %v1755_v50 = vld [vmem:[%s2155_s3 + $0x28] sm:$0xff]  }
  0x71   : > { %1595 = vmatprep.subr.bf16.mxu0 %v1745_v56  ;;  %1625 = vmatprep.subr.bf16.mxu1 %v1752_v34 }
  0x72   : > { %s1188_s10 = scalar_lea.vmem (%p2043_p13), %s2284_s4, %s1491_s7 }
  0x74   : > { %1626 = vmatpush3.bf16.msra.mxu1 %v1752_v34 }
  0x75   : > { %1627 = vmatprep.subr.bf16.mxu1 %v1753_v44 }
  0x78   : > { %1596 = vmatpush3.bf16.xpose.msra.mxu0 %v1745_v56  ;;  %1628 = vmatpush3.bf16.msra.mxu1 %v1753_v44 }
  0x79   : > { %1597 = vmatprep.subr.bf16.mxu0 %v1746_v57  ;;  %1629 = vmatprep.subr.bf16.mxu1 %v1754_v48 }
  0x7c   : > { %1630 = vmatpush3.bf16.msra.mxu1 %v1754_v48 }
  0x7d   : > { %1631 = vmatprep.subr.bf16.mxu1 %v1755_v50 }
  0x80   : > { %1598 = vmatpush3.bf16.xpose.msra.mxu0 %v1746_v57  ;;  %1632 = vmatpush3.bf16.msra.mxu1 %v1755_v50 }
  0x81   : > { %1599 = vmatprep.subr.bf16.mxu0 %v1747_v58  ;;  %1633 = vmatprep.subr.bf16.mxu1 %v1756_v54 }
  0x84   : > { %1634 = vmatpush3.bf16.msra.mxu1 %v1756_v54 }
  0x85   : > { %1635 = vmatprep.subr.bf16.mxu1 %v1757_v55 }
  0x88   : > { %1600 = vmatpush3.bf16.xpose.msra.mxu0 %v1747_v58  ;;  %1636 = vmatpush3.bf16.msra.mxu1 %v1757_v55 }
  0x89   : > { %1601 = vmatprep.subr.bf16.mxu0 %v1748_v59 }
  0x90   : > { %1602 = vmatpush3.bf16.xpose.msra.mxu0 %v1748_v59 }
  0x91   : > { %1603 = vmatprep.subr.bf16.mxu0 %v1749_v60 }
  0x98   : > { %1604 = vmatpush3.bf16.xpose.msra.mxu0 %v1749_v60 }
  0x9f   : > { %1606 = vmatmul.mubr.bf16.vlgmr.msra.gmra.mrb[0].mxu0 %v1450_v5 }
  0xa0   : > { %1609 = vmatprep.mubr.bf16.mxu0 %v1451_v6 }
  0xa7   : > { %1610 = vmatmul.mubr.bf16.gmra.mrb[4].mxu0 %v1452_v15 }
  0xa8   : > { %1613 = vmatprep.mubr.bf16.mxu0 %v1453_v16 }
  0xaf   : > { %1614 = vmatmul.mubr.bf16.gmra.mrb[8].mxu0 %v1454_v25 }
  0xb0   : > { %1617 = vmatprep.mubr.bf16.mxu0 %v1455_v26 }
  0xb7   : > { %1618 = vmatmul.mubr.bf16.gmra.mrb[12].mxu0 %v1456_v31 }
 0x172   : > { %v1607_v35 = vpop.f32.mrb[0].mxu0 }
 0x173   : > { %805 = vmax.xlane.f32.xlu1 %v1607_v35  ;;  %v738_v36 = vpop.f32.mrb[1].mxu0 }
 0x174   : > { %801 = vmax.xlane.f32.xlu0 %v738_v36  ;;  %v1608_v37 = vpop.f32.mrb[2].mxu0 }
 0x175   : > { %v741_v38 = vpop.f32.mrb[3].mxu0 }
 0x177   : > { %807 = vmax.xlane.f32.xlu1 %v1608_v37 }
 0x178   : > { %803 = vmax.xlane.f32.xlu0 %v741_v38 }
 0x17a   : > { %v2160_v39 = vpop.f32.mrb[4].mxu0 }
 0x17b   : > { %v754_v40 = vpop.f32.mrb[5].mxu0 }
 0x17c   : > { %809 = vmax.xlane.f32.xlu0 %v754_v40  ;;  %v2162_v41 = vpop.f32.mrb[6].mxu0 }
 0x17d   : > { %v757_v42 = vpop.f32.mrb[7].mxu0 }
 0x17e   : > { %811 = vmax.xlane.f32.xlu1 %v757_v42 }
 0x180   : > { %813 = vmax.xlane.f32.xlu0 %v2160_v39 }
 0x182   : > { %815 = vmax.xlane.f32.xlu1 %v2162_v41  ;;  %v2166_v43 = vpop.f32.mrb[8].mxu0 }
 0x183   : > { %v2169_v45 = vpop.f32.mrb[9].mxu0 }
 0x184   : > { %817 = vmax.xlane.f32.xlu0 %v2169_v45  ;;  %v2172_v46 = vpop.f32.mrb[10].mxu0 }
 0x185   : > { %v2174_v47 = vpop.f32.mrb[11].mxu0 }
 0x186   : > { %819 = vmax.xlane.f32.xlu1 %v2174_v47 }
 0x188   : > { %821 = vmax.xlane.f32.xlu0 %v2166_v43 }
 0x18a   : > { %823 = vmax.xlane.f32.xlu1 %v2172_v46  ;;  %v2180_v49 = vpop.f32.mrb[12].mxu0 }
 0x18b   : > { %v2183_v51 = vpop.f32.mrb[13].mxu0 }
 0x18c   : > { %825 = vmax.xlane.f32.xlu0 %v2183_v51  ;;  %v2186_v52 = vpop.f32.mrb[14].mxu0 }
 0x18d   : > { %v2188_v53 = vpop.f32.mrb[15].mxu0 }
 0x18e   : > { %827 = vmax.xlane.f32.xlu1 %v2188_v53 }
 0x190   : > { %829 = vmax.xlane.f32.xlu0 %v2180_v49 }
 0x192   : > { %831 = vmax.xlane.f32.xlu1 %v2186_v52 }
 0x200   : > { %v806_v56 = vpop.xlane.xlu1 %805 }
 0x201   : > { %v835_v57 = vsub.f32 %v1607_v35, %v806_v56  ;;  %v802_v58 = vpop.xlane.xlu0 %801 }
 0x202   : > { %v833_v59 = vsub.f32 %v738_v36, %v802_v58 }
 0x203   : > { %v853_v60 = vmul.f32 1.442695, %v835_v57 }
 0x204   : > { %v849_v61 = vmul.f32 1.442695, %v833_v59  ;;  %v808_v62 = vpop.xlane.xlu1 %807 }
 0x205   : > { %1758 = vpow2.f32 %v853_v60  ;;  %v836_v63 = vsub.f32 %v1608_v37, %v808_v62  ;;  %v804_v0 = vpop.xlane.xlu0 %803 }
 0x206   : > { %v834_v1 = vsub.f32 %v741_v38, %v804_v0  ;;  %1760 = vpow2.f32 %v849_v61 }
 0x207   : > { %v855_v2 = vmul.f32 1.442695, %v836_v63 }
 0x208   : > { %v851_v3 = vmul.f32 1.442695, %v834_v1 }
 0x209   : > { %1762 = vpow2.f32 %v855_v2  ;;  %v810_v4 = vpop.xlane.xlu0 %809 }
 0x20a   : > { %1764 = vpow2.f32 %v851_v3  ;;  %v837_v5 = vsub.f32 %v754_v40, %v810_v4 }
 0x20b   : > { %v812_v6 = vpop.xlane.xlu1 %811 }
 0x20c   : > { %v857_v7 = vmul.f32 1.442695, %v837_v5  ;;  %v838_v8 = vsub.f32 %v757_v42, %v812_v6 }
 0x20d   : > { %v814_v9 = vpop.xlane.xlu0 %813 }
 0x20e   : > { %v859_v10 = vmul.f32 1.442695, %v838_v8  ;;  %v839_v11 = vsub.f32 %v2160_v39, %v814_v9  ;;  %1766 = vpow2.f32 %v857_v7 }
 0x20f   : > { %v1759_v12 = vpop.eup %1758  ;;  %v816_v13 = vpop.xlane.xlu1 %815 }
 0x210   : > { %1768 = vpow2.f32 %v859_v10  ;;  %v861_v14 = vmul.f32 1.442695, %v839_v11  ;;  %v840_v15 = vsub.f32 %v2162_v41, %v816_v13  ;;  %885 = vadd.xlane.f32.xlu0 %v1759_v12  ;;  %v1761_v17 = vpop.eup %1760 }
 0x211   : > { %v818_v16 = vpop.xlane.xlu0 %817 }
 0x212   : > { %1770 = vpow2.f32 %v861_v14  ;;  %v863_v18 = vmul.f32 1.442695, %v840_v15  ;;  %v841_v19 = vsub.f32 %v2169_v45, %v818_v16 }
 0x213   : > { %v1763_v20 = vpop.eup %1762  ;;  %v820_v21 = vpop.xlane.xlu1 %819 }
 0x214   : > { %v1765_v22 = vpop.eup %1764  ;;  %1772 = vpow2.f32 %v863_v18  ;;  %v865_v23 = vmul.f32 1.442695, %v841_v19  ;;  %v842_v24 = vsub.f32 %v2174_v47, %v820_v21  ;;  %881 = vadd.xlane.f32.xlu0 %v1761_v17  ;;  %887 = vadd.xlane.f32.xlu1 %v1763_v20  ;;  %v914_v25 = vpack.c.bf16 %v1763_v20, %v1759_v12 }
 0x215   : > { %v822_v26 = vpop.xlane.xlu0 %821  ;;  %v913_v27 = vpack.c.bf16 %v1765_v22, %v1761_v17 }
 0x216   : > { %v867_v28 = vmul.f32 1.442695, %v842_v24  ;;  %v843_v29 = vsub.f32 %v2166_v43, %v822_v26  ;;  %1774 = vpow2.f32 %v865_v23 }
 0x217   : > { %1637 = vmatprep.mubr.bf16.mxu1 %v913_v27  ;;  %v824_v30 = vpop.xlane.xlu1 %823 }
 0x218   : > { %1776 = vpow2.f32 %v867_v28  ;;  %v869_v31 = vmul.f32 1.442695, %v843_v29  ;;  %v844_v32 = vsub.f32 %v2172_v46, %v824_v30  ;;  %1638 = vmatmul.mubr.bf16.vlgmr.msra.gmra.mrb[0].mxu1 %v914_v25  ;;  %883 = vadd.xlane.f32.xlu1 %v1765_v22  ;;  %v1767_v33 = vpop.eup %1766 }
 0x219   : > { %v826_v34 = vpop.xlane.xlu0 %825 }
 0x21a   : > { %v1769_v35 = vpop.eup %1768  ;;  %1778 = vpow2.f32 %v869_v31  ;;  %v871_v36 = vmul.f32 1.442695, %v844_v32  ;;  %v845_v37 = vsub.f32 %v2183_v51, %v826_v34 }
 0x21b   : > { %v828_v38 = vpop.xlane.xlu1 %827  ;;  %v915_v39 = vpack.c.bf16 %v1769_v35, %v1767_v33 }
 0x21c   : > { %v1771_v40 = vpop.eup %1770  ;;  %1780 = vpow2.f32 %v871_v36  ;;  %v873_v41 = vmul.f32 1.442695, %v845_v37  ;;  %v846_v42 = vsub.f32 %v2188_v53, %v828_v38 }
 0x21d   : > { %1641 = vmatprep.mubr.bf16.mxu1 %v915_v39  ;;  %893 = vadd.xlane.f32.xlu0 %v1771_v40  ;;  %v830_v43 = vpop.xlane.xlu0 %829 }
 0x21e   : > { %v1773_v44 = vpop.eup %1772  ;;  %v875_v45 = vmul.f32 1.442695, %v846_v42  ;;  %v847_v46 = vsub.f32 %v2180_v49, %v830_v43  ;;  %1782 = vpow2.f32 %v873_v41 }
 0x21f   : > { %895 = vadd.xlane.f32.xlu1 %v1773_v44  ;;  %v832_v47 = vpop.xlane.xlu1 %831  ;;  %v916_v48 = vpack.c.bf16 %v1773_v44, %v1771_v40 }
 0x220   : > { %1784 = vpow2.f32 %v875_v45  ;;  %v877_v50 = vmul.f32 1.442695, %v847_v46  ;;  %v848_v51 = vsub.f32 %v2186_v52, %v832_v47  ;;  %v1775_v54 = vpop.eup %1774 }
 0x221   : > { %1642 = vmatmul.mubr.bf16.gmra.mrb[4].mxu1 %v916_v48  ;;  %889 = vadd.xlane.f32.xlu0 %v1767_v33 }
 0x222   : > { %v1777_v55 = vpop.eup %1776  ;;  %v879_v53 = vmul.f32 1.442695, %v848_v51  ;;  %1786 = vpow2.f32 %v877_v50 }
 0x223   : > { %891 = vadd.xlane.f32.xlu1 %v1769_v35  ;;  %v917_v56 = vpack.c.bf16 %v1777_v55, %v1775_v54 }
 0x224   : > { %v1779_v57 = vpop.eup %1778  ;;  %1788 = vpow2.f32 %v879_v53 }
 0x225   : > { %1645 = vmatprep.mubr.bf16.mxu1 %v917_v56  ;;  %901 = vadd.xlane.f32.xlu0 %v1779_v57 }
 0x226   : > { %v1781_v49 = vpop.eup %1780 }
 0x227   : > { %903 = vadd.xlane.f32.xlu1 %v1781_v49  ;;  %v918_v58 = vpack.c.bf16 %v1781_v49, %v1779_v57 }
 0x228   : > { %v1783_v59 = vpop.eup %1782 }
 0x229   : > { %1646 = vmatmul.mubr.bf16.gmra.mrb[8].mxu1 %v918_v58  ;;  %897 = vadd.xlane.f32.xlu0 %v1775_v54 }
 0x22a   : > { %v1785_v60 = vpop.eup %1784 }
 0x22b   : > { %899 = vadd.xlane.f32.xlu1 %v1777_v55  ;;  %v919_v52 = vpack.c.bf16 %v1785_v60, %v1783_v59 }
 0x22c   : > { %v1787_v61 = vpop.eup %1786 }
 0x22d   : > { %905 = vadd.xlane.f32.xlu0 %v1783_v59  ;;  %1649 = vmatprep.mubr.bf16.mxu1 %v919_v52 }
 0x22e   : > { %v1789_v62 = vpop.eup %1788 }
 0x22f   : > { %907 = vadd.xlane.f32.xlu1 %v1785_v60  ;;  %v920_v63 = vpack.c.bf16 %v1789_v62, %v1787_v61 }
 0x231   : > { %909 = vadd.xlane.f32.xlu0 %v1787_v61  ;;  %1650 = vmatmul.mubr.bf16.gmra.mrb[12].mxu1 %v920_v63 }
 0x233   : > { %911 = vadd.xlane.f32.xlu1 %v1789_v62 }
 0x29d   : > { %v886_v0 = vpop.xlane.xlu0 %885 }
 0x29e   : > { %1790 = vrcp.f32 %v886_v0 }
 0x2a1   : > { %v888_v1 = vpop.xlane.xlu1 %887  ;;  %v882_v2 = vpop.xlane.xlu0 %881 }
 0x2a2   : > { %1792 = vrcp.f32 %v882_v2 }
 0x2a3   : > { %1794 = vrcp.f32 %v888_v1 }
 0x2a5   : > { %v884_v3 = vpop.xlane.xlu1 %883 }
 0x2a6   : > { %1796 = vrcp.f32 %v884_v3 }
 0x2a8   : > { %v1791_v10 = vpop.eup %1790 }
 0x2aa   : > { %v894_v4 = vpop.xlane.xlu0 %893 }
 0x2ab   : > { %1798 = vrcp.f32 %v894_v4 }
 0x2ac   : > { %v896_v5 = vpop.xlane.xlu1 %895  ;;  %v1793_v12 = vpop.eup %1792 }
 0x2ad   : > { %1800 = vrcp.f32 %v896_v5  ;;  %v1795_v15 = vpop.eup %1794 }
 0x2ae   : > { %v890_v6 = vpop.xlane.xlu0 %889 }
 0x2af   : > { %1802 = vrcp.f32 %v890_v6 }
 0x2b0   : > { %v892_v7 = vpop.xlane.xlu1 %891  ;;  %v1797_v18 = vpop.eup %1796 }
 0x2b1   : > { %1804 = vrcp.f32 %v892_v7 }
 0x2b2   : > { %v902_v8 = vpop.xlane.xlu0 %901 }
 0x2b3   : > { %1806 = vrcp.f32 %v902_v8 }
 0x2b4   : > { %v904_v9 = vpop.xlane.xlu1 %903 }
 0x2b5   : > { %1808 = vrcp.f32 %v904_v9  ;;  %v1799_v28 = vpop.eup %1798 }
 0x2b6   : > { %v898_v13 = vpop.xlane.xlu0 %897 }
 0x2b7   : > { %1810 = vrcp.f32 %v898_v13  ;;  %v1801_v30 = vpop.eup %1800 }
 0x2b8   : > { %v900_v16 = vpop.xlane.xlu1 %899 }
 0x2b9   : > { %1812 = vrcp.f32 %v900_v16  ;;  %v1803_v32 = vpop.eup %1802 }
 0x2ba   : > { %v906_v26 = vpop.xlane.xlu0 %905 }
 0x2bb   : > { %v1805_v34 = vpop.eup %1804  ;;  %1814 = vrcp.f32 %v906_v26 }
 0x2bc   : > { %v908_v27 = vpop.xlane.xlu1 %907 }
 0x2bd   : > { %v1807_v44 = vpop.eup %1806 }
 0x2be   : > { %v910_v38 = vpop.xlane.xlu0 %909 }
 0x2bf   : > { %1816 = vrcp.f32 %v910_v38  ;;  %v1809_v46 = vpop.eup %1808 }
 0x2c0   : > { %v912_v41 = vpop.xlane.xlu1 %911 }
 0x2c1   : > { %1818 = vrcp.f32 %v912_v41  ;;  %v1811_v48 = vpop.eup %1810 }
 0x2c2   : > { %1820 = vrcp.f32 %v908_v27 }
 0x2c3   : > { %v1813_v51 = vpop.eup %1812 }
 0x2c5   : > { %v1815_v59 = vpop.eup %1814 }
 0x2c9   : > { %v1817_v52 = vpop.eup %1816 }
 0x2cb   : > { %v1819_v62 = vpop.eup %1818 }
 0x2cc   : > { %v1821_v0 = vpop.eup %1820 }
 0x2eb   : > { %v1639_v11 = vpop.f32.mrb[0].mxu1 }
 0x2ec   : > { %v1003_v14 = vpop.f32.mrb[1].mxu1  ;;  %v1084_v19 = vmul.f32 %v1791_v10, %v1639_v11 }
 0x2ed   : > { %v1640_v17 = vpop.f32.mrb[2].mxu1  ;;  %v1082_v22 = vmul.f32 %v1793_v12, %v1003_v14 }
 0x2ee   : > { %v1085_v20 = vmul.f32 %v1795_v15, %v1640_v17  ;;  %v1006_v21 = vpop.f32.mrb[3].mxu1 }
 0x2ef   : > { %v1083_v23 = vmul.f32 %v1797_v18, %v1006_v21 }
 0x2f0   : > { %v1518_v24 = vpack.c.bf16 %v1085_v20, %v1084_v19 }
 0x2f1   : > { %v1513_v25 = vpack.c.bf16 %v1083_v23, %v1082_v22 }
 0x2f2   : > { %1550 = vst [vmem:[%s2206_s12 + $0x8] sm:$0xff] %v1518_v24  }
 0x2f3   : > { %1514 = vst [vmem:[%s2206_s12] sm:$0xff] %v1513_v25  }
 0x2f4   : > { %v1643_v29 = vpop.f32.mrb[4].mxu1 }
 0x2f5   : > { %v1019_v31 = vpop.f32.mrb[5].mxu1  ;;  %v1088_v35 = vmul.f32 %v1799_v28, %v1643_v29 }
 0x2f6   : > { %v1644_v33 = vpop.f32.mrb[6].mxu1  ;;  %v1086_v39 = vmul.f32 %v1803_v32, %v1019_v31 }
 0x2f7   : > { %v1089_v36 = vmul.f32 %v1801_v30, %v1644_v33  ;;  %v1022_v37 = vpop.f32.mrb[7].mxu1 }
 0x2f8   : > { %v1087_v40 = vmul.f32 %v1805_v34, %v1022_v37 }
 0x2f9   : > { %v1528_v42 = vpack.c.bf16 %v1089_v36, %v1088_v35  ;;  %v1208_v10 = vld [vmem:[%s2206_s12 + $0x8] sm:$0xf] (%p2043_p13)  ;;  %v1210_v11 = vld [vmem:[%s2206_s12 + $0xc] sm:$0xf] (%p2043_p13) }
 0x2fa   : > { %v1523_v43 = vpack.c.bf16 %v1087_v40, %v1086_v39  ;;  %v1204_v8 = vld [vmem:[%s2206_s12] sm:$0xf] (%p2043_p13)  ;;  %v1206_v9 = vld [vmem:[%s2206_s12 + $0x4] sm:$0xf] (%p2043_p13)  ;;  %1209 = vst [vmem:[%s1188_s10 + $0x10] sm:$0xf] (%p2043_p13), %v1208_v10 }
 0x2fb   : > { %1552 = vst [vmem:[%s2206_s12 + $0x18] sm:$0xff] %v1528_v42   ;;  %1205 = vst [vmem:[%s1188_s10] sm:$0xf] (%p2043_p13), %v1204_v8 }
 0x2fc   : > { %1551 = vst [vmem:[%s2206_s12 + $0x10] sm:$0xff] %v1523_v43   ;;  %v1647_v45 = vpop.f32.mrb[8].mxu1  ;;  %1207 = vst [vmem:[%s1188_s10 + $0x8] sm:$0xf] (%p2043_p13), %v1206_v9 }
 0x2fd   : > { %v1035_v47 = vpop.f32.mrb[9].mxu1  ;;  %v1092_v54 = vmul.f32 %v1807_v44, %v1647_v45  ;;  %1211 = vst [vmem:[%s1188_s10 + $0x18] sm:$0xf] (%p2043_p13), %v1210_v11 }
 0x2fe   : > { %v1648_v50 = vpop.f32.mrb[10].mxu1  ;;  %v1090_v56 = vmul.f32 %v1811_v48, %v1035_v47 }
 0x2ff   : > { %v1093_v55 = vmul.f32 %v1809_v46, %v1648_v50  ;;  %v1038_v53 = vpop.f32.mrb[11].mxu1 }
 0x300   : > { %v1091_v57 = vmul.f32 %v1813_v51, %v1038_v53 }
 0x301   : > { %v1538_v49 = vpack.c.bf16 %v1093_v55, %v1092_v54 }
 0x302   : > { %v1533_v58 = vpack.c.bf16 %v1091_v57, %v1090_v56  ;;  %v1216_v14 = vld [vmem:[%s2206_s12 + $0x18] sm:$0xf] (%p2043_p13)  ;;  %v1218_v15 = vld [vmem:[%s2206_s12 + $0x1c] sm:$0xf] (%p2043_p13) }
 0x303   : > { %1554 = vst [vmem:[%s2206_s12 + $0x28] sm:$0xff] %v1538_v49   ;;  %v1212_v12 = vld [vmem:[%s2206_s12 + $0x10] sm:$0xf] (%p2043_p13)  ;;  %v1214_v13 = vld [vmem:[%s2206_s12 + $0x14] sm:$0xf] (%p2043_p13) }
 0x304   : > { %1553 = vst [vmem:[%s2206_s12 + $0x20] sm:$0xff] %v1533_v58   ;;  %v1651_v60 = vpop.f32.mrb[12].mxu1  ;;  %1213 = vst [vmem:[%s1188_s10 + $0x20] sm:$0xf] (%p2043_p13), %v1212_v12 }
 0x305   : > { %v1051_v61 = vpop.f32.mrb[13].mxu1  ;;  %v1096_v1 = vmul.f32 %v1817_v52, %v1651_v60  ;;  %1215 = vst [vmem:[%s1188_s10 + $0x28] sm:$0xf] (%p2043_p13), %v1214_v13  ;;  %1217 = vst [vmem:[%s1188_s10 + $0x30] sm:$0xf] (%p2043_p13), %v1216_v14 }
 0x306   : > { %v1652_v63 = vpop.f32.mrb[14].mxu1  ;;  %v1094_v4 = vmul.f32 %v1815_v59, %v1051_v61  ;;  %1184 = sbr.rel (!%p2043_p13) target bundleno = 790 (0x316), region = 159  ;;  %1219 = vst [vmem:[%s1188_s10 + $0x38] sm:$0xf] (%p2043_p13), %v1218_v15 }
 0x307   : > { %v1097_v2 = vmul.f32 %v1819_v62, %v1652_v63  ;;  %v1054_v3 = vpop.f32.mrb[15].mxu1 }
 0x308   : > { %v1095_v5 = vmul.f32 %v1821_v0, %v1054_v3 }
 0x309   : > { %v1548_v6 = vpack.c.bf16 %v1097_v2, %v1096_v1 }
 0x30a   : > { %v1543_v7 = vpack.c.bf16 %v1095_v5, %v1094_v4  ;;  %v1224_v18 = vld [vmem:[%s2206_s12 + $0x28] sm:$0xf] (%p2043_p13)  ;;  %v1226_v19 = vld [vmem:[%s2206_s12 + $0x2c] sm:$0xf] (%p2043_p13) }
 0x30b   : > { %1556 = vst [vmem:[%s2206_s12 + $0x38] sm:$0xff] %v1548_v6   ;;  %v1220_v16 = vld [vmem:[%s2206_s12 + $0x20] sm:$0xf] (%p2043_p13)  ;;  %v1222_v17 = vld [vmem:[%s2206_s12 + $0x24] sm:$0xf] (%p2043_p13) }
 0x30c   : > { %1555 = vst [vmem:[%s2206_s12 + $0x30] sm:$0xff] %v1543_v7   ;;  %1221 = vst [vmem:[%s1188_s10 + $0x40] sm:$0xf] (%p2043_p13), %v1220_v16 }
 0x30d   : > { %1223 = vst [vmem:[%s1188_s10 + $0x48] sm:$0xf] %v1222_v17  ;;  %1225 = vst [vmem:[%s1188_s10 + $0x50] sm:$0xf] %v1224_v18 }
 0x30e   : > { %1227 = vst [vmem:[%s1188_s10 + $0x58] sm:$0xf] %v1226_v19 }
 0x312   : > { %v1232_v22 = vld [vmem:[%s2206_s12 + $0x38] sm:$0xf]  ;;  %v1234_v23 = vld [vmem:[%s2206_s12 + $0x3c] sm:$0xf] }
 0x313   : > { %v1228_v20 = vld [vmem:[%s2206_s12 + $0x30] sm:$0xf]  ;;  %v1230_v21 = vld [vmem:[%s2206_s12 + $0x34] sm:$0xf]  ;;  %1233 = vst [vmem:[%s1188_s10 + $0x70] sm:$0xf] %v1232_v22 }
 0x314   : > { %1229 = vst [vmem:[%s1188_s10 + $0x60] sm:$0xf] %v1228_v20  ;;  %1231 = vst [vmem:[%s1188_s10 + $0x68] sm:$0xf] %v1230_v21 }
 0x315   : > { %1235 = vst [vmem:[%s1188_s10 + $0x78] sm:$0xf] %v1234_v23 }
 0x316 PF: > { %s13_s22 = sadd.s32 1, %s1908_s22   ;;  %s2285_s30 = sld [smem:[#allocation6_spill]] }
 0x317   : > { %p10_p4 = scmp.ge.s32.totalorder %s13_s22, 6   ;;  %s2286_s12 = smov %s1872_s13 }
 0x318   : > { %s2287_s13 = smov %s2048_s26  ;;  %s2288_s14 = smov %s1880_s15 }
 0x319   : > { %s2289_s15 = smov %s2026_s28  ;;  %s2290_s16 = smov %s1888_s17 }
 0x31a   : > { %s2291_s17 = smov %s2023_s11  ;;  %s2292_s18 = smov %s1900_s20 }
 0x31b   : > { %s2293_s19 = smov %s1904_s21  ;;  %s2294_s20 = smov %s2297_s24 }
 0x31c   : > { %s2295_s21 = smov %s2285_s30  ;;  %12 = sbr.rel (!%p10_p4) target bundleno = 8 (0x8), region = 247 }

// kernel: decoder_layer.8
= control target key start
LH: loop header
LB: loop body
LE: loop exit
PB: predicated region body
PF: predicated region fallthrough
CT: control target
= control target key end

     0   :  { %s2090_s12 = smov 0   ;;  %s2092_s13 = smov 0   ;;  %s2632_s0 = inlined_call_operand.vmem [shape: f32[256,256], index: 0, kind: input, shape index: {}]   ;;  %s2633_s1 = inlined_call_operand.vmem [shape: bf16[256,768], index: 1, kind: input, shape index: {}]   ;;  %s2634_s2 = inlined_call_operand.vmem [shape: f32[1,768], index: 2, kind: input, shape index: {}]   ;;  %s2635_s3 = inlined_call_operand.vmem [shape: bf16[256,768], index: 3, kind: output, shape index: {}]  }
   0x1   :  { %s2094_s14 = smov 0   ;;  %s2096_s15 = smov 0  }
   0x2   :  { %s2098_s16 = smov 0  }
   0x3 LB: > { %s28_s17 = sadd.s32 1, %s2064_s15  ;;  %s1795_s18 = sadd.s32 4294967295, %s2068_s16   ;;  %s2068_s16 = sphi %s2098_s16, %s13_s16   ;;  %s2064_s15 = sphi %s2096_s15, %s2640_s15   ;;  %s2060_s14 = sphi %s2094_s14, %s2639_s14   ;;  %s2056_s13 = sphi %s2092_s13, %s2638_s13   ;;  %s2052_s12 = sphi %s2090_s12, %s2637_s12  }
   0x4   : > { %p30_p0 = scmp.ge.s32.totalorder %s28_s17, 3  ;;  %p76_p1 = scmp.ne.s32.totalorder %s2056_s13, %s2052_s12 }
   0x5   : > { %p77_p2 = scmp.eq.s32.totalorder %s2068_s16, 0  ;;  %p134_p4 = scmp.eq.s32.totalorder %s1795_s18, 2 }
   0x6   : > { %s2642_s17 = smov (%p30_p0, %s28_s17), 0  ;;  %s69_s20 = sadd.s32 1, %s2056_s13 }
   0x7   : > { %p78_p3 = por %p77_p2, %p76_p1  ;;  %s65_s19 = ssub.s32 %s2064_s15, %s2642_s17 }
   0x8   : > { %p67_p5 = scmp.eq.s32.totalorder %s65_s19, 0  ;;  %p2125_p6 = por %p134_p4, %p76_p1 }
   0x9   : > { %p1799_p7 = scmp.ge.s32.totalorder %s2068_s16, 3 }
   0xa   : > { %s2130_s22 = scalar_select %p67_p5, %s2056_s13, %s69_s20  }
   0xb   : > { %171 = sbr.rel (%p1799_p7) target bundleno = 38 (0x26), region = 20 }
  0x12   : > { %174 = sbr.rel (!%p78_p3) target bundleno = 38 (0x26), region = 24  ;;  %s176_s23 = sand.u32 (%p78_p3), 1, %s2056_s13  }
  0x13   : > { %s1876_s24 = sshll.u32 (%p78_p3), %s2064_s15, 3  ;;  %s1800_s25 = sshll.u32 (%p78_p3), %s176_s23, 8 }
  0x14   : > { %s2138_s28 = scalar_lea.vmem (%p78_p3), %s2633_s1, %s1876_s24  ;;  %s2143_s29 = scalar_lea.vmem (%p78_p3), [#allocation3], %s1800_s25 }
  0x15   : > { %v274_v0 = vld [vmem:[%s2138_s28] sm:$0xff] (%p78_p3)  ;;  %v276_v1 = vld [vmem:[%s2138_s28 + $0x18] sm:$0xff] (%p78_p3)  ;;  %v278_v2 = vld [vmem:[%s2138_s28 + $0x30] sm:$0xff] (%p78_p3) }
  0x16   : > { %275 = vst [vmem:[%s2143_s29] sm:$0xff] (%p78_p3), %v274_v0  ;;  %277 = vst [vmem:[%s2143_s29 + $0x8] sm:$0xff] (%p78_p3), %v276_v1  ;;  %v280_v3 = vld [vmem:[%s2138_s28 + $0x48] sm:$0xff] (%p78_p3)  ;;  %v282_v4 = vld [vmem:[%s2138_s28 + $0x60] sm:$0xff] (%p78_p3) }
  0x17   : > { %279 = vst [vmem:[%s2143_s29 + $0x10] sm:$0xff] (%p78_p3), %v278_v2  ;;  %v284_v5 = vld [vmem:[%s2138_s28 + $0x78] sm:$0xff] (%p78_p3)  ;;  %281 = vst [vmem:[%s2143_s29 + $0x18] sm:$0xff] (%p78_p3), %v280_v3  ;;  %v286_v6 = vld [vmem:[%s2138_s28 + $0x90] sm:$0xff] (%p78_p3) }
  0x18   : > { %283 = vst [vmem:[%s2143_s29 + $0x20] sm:$0xff] (%p78_p3), %v282_v4  ;;  %285 = vst [vmem:[%s2143_s29 + $0x28] sm:$0xff] (%p78_p3), %v284_v5  ;;  %v288_v7 = vld [vmem:[%s2138_s28 + $0xa8] sm:$0xff] (%p78_p3)  ;;  %v290_v8 = vld [vmem:[%s2138_s28 + $0xc0] sm:$0xff] (%p78_p3) }
  0x19   : > { %287 = vst [vmem:[%s2143_s29 + $0x30] sm:$0xff] %v286_v6  ;;  %289 = vst [vmem:[%s2143_s29 + $0x38] sm:$0xff] %v288_v7  ;;  %v292_v9 = vld [vmem:[%s2138_s28 + $0xd8] sm:$0xff]  ;;  %v294_v10 = vld [vmem:[%s2138_s28 + $0xf0] sm:$0xff] }
  0x1a   : > { %291 = vst [vmem:[%s2143_s29 + $0x40] sm:$0xff] %v290_v8  ;;  %v296_v11 = vld [vmem:[%s2138_s28 + $0x108] sm:$0xff]  ;;  %293 = vst [vmem:[%s2143_s29 + $0x48] sm:$0xff] %v292_v9  ;;  %v298_v12 = vld [vmem:[%s2138_s28 + $0x120] sm:$0xff] }
  0x1b   : > { %295 = vst [vmem:[%s2143_s29 + $0x50] sm:$0xff] %v294_v10  ;;  %297 = vst [vmem:[%s2143_s29 + $0x58] sm:$0xff] %v296_v11  ;;  %v300_v13 = vld [vmem:[%s2138_s28 + $0x138] sm:$0xff]  ;;  %v302_v14 = vld [vmem:[%s2138_s28 + $0x150] sm:$0xff] }
  0x1c   : > { %299 = vst [vmem:[%s2143_s29 + $0x60] sm:$0xff] %v298_v12  ;;  %301 = vst [vmem:[%s2143_s29 + $0x68] sm:$0xff] %v300_v13  ;;  %v304_v15 = vld [vmem:[%s2138_s28 + $0x168] sm:$0xff]  ;;  %v306_v16 = vld [vmem:[%s2138_s28 + $0x180] sm:$0xff] }
  0x1d   : > { %303 = vst [vmem:[%s2143_s29 + $0x70] sm:$0xff] %v302_v14  ;;  %v308_v17 = vld [vmem:[%s2138_s28 + $0x198] sm:$0xff]  ;;  %305 = vst [vmem:[%s2143_s29 + $0x78] sm:$0xff] %v304_v15  ;;  %v310_v18 = vld [vmem:[%s2138_s28 + $0x1b0] sm:$0xff] }
  0x1e   : > { %307 = vst [vmem:[%s2143_s29 + $0x80] sm:$0xff] %v306_v16  ;;  %309 = vst [vmem:[%s2143_s29 + $0x88] sm:$0xff] %v308_v17  ;;  %v312_v19 = vld [vmem:[%s2138_s28 + $0x1c8] sm:$0xff]  ;;  %v314_v20 = vld [vmem:[%s2138_s28 + $0x1e0] sm:$0xff] }
  0x1f   : > { %311 = vst [vmem:[%s2143_s29 + $0x90] sm:$0xff] %v310_v18  ;;  %313 = vst [vmem:[%s2143_s29 + $0x98] sm:$0xff] %v312_v19  ;;  %v316_v21 = vld [vmem:[%s2138_s28 + $0x1f8] sm:$0xff]  ;;  %v318_v22 = vld [vmem:[%s2138_s28 + $0x210] sm:$0xff] }
  0x20   : > { %315 = vst [vmem:[%s2143_s29 + $0xa0] sm:$0xff] %v314_v20  ;;  %v320_v23 = vld [vmem:[%s2138_s28 + $0x228] sm:$0xff]  ;;  %317 = vst [vmem:[%s2143_s29 + $0xa8] sm:$0xff] %v316_v21  ;;  %v322_v24 = vld [vmem:[%s2138_s28 + $0x240] sm:$0xff] }
  0x21   : > { %319 = vst [vmem:[%s2143_s29 + $0xb0] sm:$0xff] %v318_v22  ;;  %321 = vst [vmem:[%s2143_s29 + $0xb8] sm:$0xff] %v320_v23  ;;  %v324_v25 = vld [vmem:[%s2138_s28 + $0x258] sm:$0xff]  ;;  %v326_v26 = vld [vmem:[%s2138_s28 + $0x270] sm:$0xff] }
  0x22   : > { %323 = vst [vmem:[%s2143_s29 + $0xc0] sm:$0xff] %v322_v24  ;;  %325 = vst [vmem:[%s2143_s29 + $0xc8] sm:$0xff] %v324_v25  ;;  %v328_v27 = vld [vmem:[%s2138_s28 + $0x288] sm:$0xff]  ;;  %v330_v28 = vld [vmem:[%s2138_s28 + $0x2a0] sm:$0xff] }
  0x23   : > { %327 = vst [vmem:[%s2143_s29 + $0xd0] sm:$0xff] %v326_v26  ;;  %v332_v29 = vld [vmem:[%s2138_s28 + $0x2b8] sm:$0xff]  ;;  %329 = vst [vmem:[%s2143_s29 + $0xd8] sm:$0xff] %v328_v27  ;;  %v334_v30 = vld [vmem:[%s2138_s28 + $0x2d0] sm:$0xff] }
  0x24   : > { %331 = vst [vmem:[%s2143_s29 + $0xe0] sm:$0xff] %v330_v28  ;;  %333 = vst [vmem:[%s2143_s29 + $0xe8] sm:$0xff] %v332_v29  ;;  %v336_v31 = vld [vmem:[%s2138_s28 + $0x2e8] sm:$0xff] }
  0x25   : > { %335 = vst [vmem:[%s2143_s29 + $0xf0] sm:$0xff] %v334_v30  ;;  %337 = vst [vmem:[%s2143_s29 + $0xf8] sm:$0xff] %v336_v31 }
  0x26 PF: > { %p1803_p8 = scmp.ge.s32.totalorder %s2068_s16, 1  ;;  %p350_p9 = scmp.lt.s32.totalorder %s2068_s16, 4 }
  0x28   : > { %p351_p10 = pnand %p1803_p8, %p350_p9 }
  0x29   : > { %s357_s30 = sand.u32 (!%p351_p10), 1, %s2052_s12   ;;  %v547_v32 = vld [vmem:[%s2632_s0 + $0x8] sm:$0xff] (!%p351_p10)  ;;  %v549_v33 = vld [vmem:[%s2632_s0 + $0x18] sm:$0xff] (!%p351_p10)  ;;  %v546_v5 = vld [vmem:[%s2632_s0] sm:$0xff] (!%p351_p10)  ;;  %s1806_s27 = sshll.u32 (!%p351_p10), %s2060_s14, 1 }
  0x2a   : > { %354 = sbr.rel (%p351_p10) target bundleno = 394 (0x18a), region = 66  ;;  %v579_v34 = vld [vmem:[%s2632_s0 + $0x108] sm:$0xff] (!%p351_p10)  ;;  %s2218_s10 = sshll.u32 (!%p351_p10), %s357_s30, 8  ;;  %v611_v35 = vpack.c.bf16 (!%p351_p10), %v549_v33, %v547_v32  ;;  %v581_v36 = vld [vmem:[%s2632_s0 + $0x118] sm:$0xff] (!%p351_p10)  ;;  %v548_v6 = vld [vmem:[%s2632_s0 + $0x10] sm:$0xff] (!%p351_p10) }
  0x2b   : > { %v627_v37 = vpack.c.bf16 (!%p351_p10), %v581_v36, %v579_v34  ;;  %s2224_s12 = scalar_lea.vmem (!%p351_p10), [#allocation3], %s2218_s10  ;;  %v578_v7 = vld [vmem:[%s2632_s0 + $0x100] sm:$0xff] (!%p351_p10)  ;;  %v580_v9 = vld [vmem:[%s2632_s0 + $0x110] sm:$0xff] (!%p351_p10)  ;;  %v551_v10 = vld [vmem:[%s2632_s0 + $0x28] sm:$0xff] (!%p351_p10)  ;;  %v610_v14 = vpack.c.bf16 (!%p351_p10), %v548_v6, %v546_v5  ;;  %p408_p11 = scmp.lt.s32.totalorder (!%p351_p10), %s1806_s27, 5 }
  0x2c   : > { %v1982_v38 = vld [vmem:[%s2224_s12 + $0x4] ss:$8 sps:$4 sm:$0xff] (!%p351_p10)   ;;  %866 = vmatprep.mubr.bf16.mxu0 (!%p351_p10), %v611_v35  ;;  %v1984_v39 = vld [vmem:[%s2224_s12] ss:$8 sps:$4 sm:$0xff] (!%p351_p10)   ;;  %v1985_v40 = vld [vmem:[%s2224_s12 + $0x14] ss:$8 sps:$4 sm:$0xff] (!%p351_p10)   ;;  %v626_v15 = vpack.c.bf16 (!%p351_p10), %v580_v9, %v578_v7 }
  0x2d   : > { %946 = vmatprep.mubr.bf16.mxu1 (!%p351_p10), %v627_v37  ;;  %834 = vmatprep.subr.bf16.mxu0 (!%p351_p10), %v1982_v38  ;;  %v1987_v41 = vld [vmem:[%s2224_s12 + $0x10] ss:$8 sps:$4 sm:$0xff] (!%p351_p10)   ;;  %v1988_v42 = vld [vmem:[%s2224_s12 + $0x24] ss:$8 sps:$4 sm:$0xff] (!%p351_p10)   ;;  %v1990_v43 = vld [vmem:[%s2224_s12 + $0x20] ss:$8 sps:$4 sm:$0xff] (!%p351_p10)  }
  0x2e   : > { %1910 = vmatprep.subr.bf16.mxu1 (!%p351_p10), %v1982_v38  ;;  %835 = vmatpush1.bf16.msra.mxu0 (!%p351_p10), %v1984_v39  ;;  %v1991_v44 = vld [vmem:[%s2224_s12 + $0x34] ss:$8 sps:$4 sm:$0xff] (!%p351_p10)   ;;  %v1993_v45 = vld [vmem:[%s2224_s12 + $0x30] ss:$8 sps:$4 sm:$0xff] (!%p351_p10)   ;;  %v1994_v46 = vld [vmem:[%s2224_s12 + $0x44] ss:$8 sps:$4 sm:$0xff] (!%p351_p10)  }
  0x2f   : > { %1926 = vmatpush1.bf16.msra.mxu1 (!%p351_p10), %v1984_v39  ;;  %836 = vmatprep.subr.bf16.mxu0 (!%p351_p10), %v1985_v40  ;;  %v1996_v47 = vld [vmem:[%s2224_s12 + $0x40] ss:$8 sps:$4 sm:$0xff] (!%p351_p10)   ;;  %v1997_v48 = vld [vmem:[%s2224_s12 + $0x54] ss:$8 sps:$4 sm:$0xff] (!%p351_p10)   ;;  %v1999_v49 = vld [vmem:[%s2224_s12 + $0x50] ss:$8 sps:$4 sm:$0xff] (!%p351_p10)  }
  0x30   : > { %1911 = vmatprep.subr.bf16.mxu1 (!%p351_p10), %v1985_v40  ;;  %v2000_v50 = vld [vmem:[%s2224_s12 + $0x64] ss:$8 sps:$4 sm:$0xff] (!%p351_p10)   ;;  %v2002_v51 = vld [vmem:[%s2224_s12 + $0x60] ss:$8 sps:$4 sm:$0xff] (!%p351_p10)   ;;  %v2003_v52 = vld [vmem:[%s2224_s12 + $0x74] ss:$8 sps:$4 sm:$0xff] (!%p351_p10)  }
  0x31   : > { %v2005_v53 = vld [vmem:[%s2224_s12 + $0x70] ss:$8 sps:$4 sm:$0xff]   ;;  %v2006_v54 = vld [vmem:[%s2224_s12 + $0x84] ss:$8 sps:$4 sm:$0xff]   ;;  %v2008_v55 = vld [vmem:[%s2224_s12 + $0x80] ss:$8 sps:$4 sm:$0xff]  }
  0x32   : > { %837 = vmatpush1.bf16.msra.mxu0 %v1987_v41  ;;  %v2009_v56 = vld [vmem:[%s2224_s12 + $0x94] ss:$8 sps:$4 sm:$0xff]   ;;  %v2011_v57 = vld [vmem:[%s2224_s12 + $0x90] ss:$8 sps:$4 sm:$0xff]   ;;  %v2012_v58 = vld [vmem:[%s2224_s12 + $0xa4] ss:$8 sps:$4 sm:$0xff]  }
  0x33   : > { %1927 = vmatpush1.bf16.msra.mxu1 %v1987_v41  ;;  %838 = vmatprep.subr.bf16.mxu0 %v1988_v42  ;;  %v2014_v59 = vld [vmem:[%s2224_s12 + $0xa0] ss:$8 sps:$4 sm:$0xff]   ;;  %v2015_v60 = vld [vmem:[%s2224_s12 + $0xb4] ss:$8 sps:$4 sm:$0xff]   ;;  %v2017_v61 = vld [vmem:[%s2224_s12 + $0xb0] ss:$8 sps:$4 sm:$0xff]  }
  0x34   : > { %1912 = vmatprep.subr.bf16.mxu1 %v1988_v42  ;;  %v2018_v62 = vld [vmem:[%s2224_s12 + $0xc4] ss:$8 sps:$4 sm:$0xff]   ;;  %v2020_v63 = vld [vmem:[%s2224_s12 + $0xc0] ss:$8 sps:$4 sm:$0xff]   ;;  %v2021_v0 = vld [vmem:[%s2224_s12 + $0xd4] ss:$8 sps:$4 sm:$0xff]  }
  0x35   : > { %v2023_v1 = vld [vmem:[%s2224_s12 + $0xd0] ss:$8 sps:$4 sm:$0xff]   ;;  %v2024_v2 = vld [vmem:[%s2224_s12 + $0xe4] ss:$8 sps:$4 sm:$0xff]   ;;  %v2026_v3 = vld [vmem:[%s2224_s12 + $0xe0] ss:$8 sps:$4 sm:$0xff]  }
  0x36   : > { %839 = vmatpush1.bf16.msra.mxu0 %v1990_v43  ;;  %v2027_v4 = vld [vmem:[%s2224_s12 + $0xf4] ss:$8 sps:$4 sm:$0xff]   ;;  %v2029_v8 = vld [vmem:[%s2224_s12 + $0xf0] ss:$8 sps:$4 sm:$0xff]   ;;  %v583_v12 = vld [vmem:[%s2632_s0 + $0x128] sm:$0xff]  ;;  %s2644_s27 = smov (!%p408_p11, %s1806_s27), 5 }
  0x37   : > { %1928 = vmatpush1.bf16.msra.mxu1 %v1990_v43  ;;  %840 = vmatprep.subr.bf16.mxu0 %v1991_v44  ;;  %v553_v11 = vld [vmem:[%s2632_s0 + $0x38] sm:$0xff]  ;;  %v550_v18 = vld [vmem:[%s2632_s0 + $0x20] sm:$0xff]  ;;  %v552_v19 = vld [vmem:[%s2632_s0 + $0x30] sm:$0xff]  ;;  %s410_s30 = scalar_lea.vmem %s2634_s2, %s2644_s27  ;;  %s2455_s4 = scalar_lea.vmem [#allocation4], %s2218_s10 }
  0x38   : > { %1913 = vmatprep.subr.bf16.mxu1 %v1991_v44  ;;  %v585_v13 = vld [vmem:[%s2632_s0 + $0x138] sm:$0xff]  ;;  %v613_v16 = vpack.c.bf16 %v553_v11, %v551_v10  ;;  %v582_v20 = vld [vmem:[%s2632_s0 + $0x120] sm:$0xff]  ;;  %v584_v21 = vld [vmem:[%s2632_s0 + $0x130] sm:$0xff]  ;;  %v612_v26 = vpack.c.bf16 %v552_v19, %v550_v18  ;;  %s1909_s10 = sshll.u32 (%p2125_p6), %s2060_s14, 3 }
  0x39   : > { %v629_v17 = vpack.c.bf16 %v585_v13, %v583_v12  ;;  %v555_v22 = vld [vmem:[%s2632_s0 + $0x48] sm:$0xff]  ;;  %v557_v23 = vld [vmem:[%s2632_s0 + $0x58] sm:$0xff]  ;;  %v628_v27 = vpack.c.bf16 %v584_v21, %v582_v20  ;;  %v554_v30 = vld [vmem:[%s2632_s0 + $0x40] sm:$0xff]  ;;  %s2554_s7 = scalar_lea.vmem (%p2125_p6), %s2635_s3, %s1909_s10 }
  0x3a   : > { %841 = vmatpush1.bf16.msra.mxu0 %v1993_v45  ;;  %v587_v24 = vld [vmem:[%s2632_s0 + $0x148] sm:$0xff]  ;;  %v589_v25 = vld [vmem:[%s2632_s0 + $0x158] sm:$0xff]  ;;  %v615_v28 = vpack.c.bf16 %v557_v23, %v555_v22  ;;  %v556_v31 = vld [vmem:[%s2632_s0 + $0x50] sm:$0xff] }
  0x3b   : > { %1929 = vmatpush1.bf16.msra.mxu1 %v1993_v45  ;;  %842 = vmatprep.subr.bf16.mxu0 %v1994_v46  ;;  %v631_v29 = vpack.c.bf16 %v589_v25, %v587_v24  ;;  %v586_v32 = vld [vmem:[%s2632_s0 + $0x140] sm:$0xff]  ;;  %v588_v33 = vld [vmem:[%s2632_s0 + $0x150] sm:$0xff]  ;;  %v559_v34 = vld [vmem:[%s2632_s0 + $0x68] sm:$0xff]  ;;  %v614_v38 = vpack.c.bf16 %v556_v31, %v554_v30 }
  0x3c   : > { %1914 = vmatprep.subr.bf16.mxu1 %v1994_v46  ;;  %v561_v35 = vld [vmem:[%s2632_s0 + $0x78] sm:$0xff]  ;;  %v591_v36 = vld [vmem:[%s2632_s0 + $0x168] sm:$0xff]  ;;  %v630_v39 = vpack.c.bf16 %v588_v33, %v586_v32  ;;  %v558_v42 = vld [vmem:[%s2632_s0 + $0x60] sm:$0xff]  ;;  %v1224_v32 = vlaneseq }
  0x3d   : > { %v593_v37 = vld [vmem:[%s2632_s0 + $0x178] sm:$0xff]  ;;  %v617_v40 = vpack.c.bf16 %v561_v35, %v559_v34  ;;  %v560_v43 = vld [vmem:[%s2632_s0 + $0x70] sm:$0xff]  ;;  %v590_v44 = vld [vmem:[%s2632_s0 + $0x160] sm:$0xff] }
  0x3e   : > { %843 = vmatpush1.bf16.msra.mxu0 %v1996_v47  ;;  %v633_v41 = vpack.c.bf16 %v593_v37, %v591_v36  ;;  %v592_v45 = vld [vmem:[%s2632_s0 + $0x170] sm:$0xff]  ;;  %v563_v46 = vld [vmem:[%s2632_s0 + $0x88] sm:$0xff]  ;;  %v573_v7 = vld [vmem:[%s2632_s0 + $0xd8] sm:$0xff]  ;;  %v1225_v33 = vshrl.u32 %v1224_v32, 7 }
  0x3f   : > { %1930 = vmatpush1.bf16.msra.mxu1 %v1996_v47  ;;  %844 = vmatprep.subr.bf16.mxu0 %v1997_v48  ;;  %v565_v47 = vld [vmem:[%s2632_s0 + $0x98] sm:$0xff]  ;;  %v600_v5 = vld [vmem:[%s2632_s0 + $0x1b0] sm:$0xff]  ;;  %v571_v6 = vld [vmem:[%s2632_s0 + $0xc8] sm:$0xff] }
  0x40   : > { %1915 = vmatprep.subr.bf16.mxu1 %v1997_v48  ;;  %v595_v48 = vld [vmem:[%s2632_s0 + $0x188] sm:$0xff]  ;;  %v605_v9 = vld [vmem:[%s2632_s0 + $0x1d8] sm:$0xff]  ;;  %v623_v12 = vpack.c.bf16 %v573_v7, %v571_v6  ;;  %v1226_v34 = vsub.s32 0, %v1225_v33  ;;  %v1222_v35 = vld [vmem:[%s410_s30] sm:$0x3]  ;;  %v1230_v36 = vsub.s32 1, %v1225_v33 }
  0x41   : > { %v575_v18 = vld [vmem:[%s2632_s0 + $0xe8] sm:$0xff]  ;;  %v577_v19 = vld [vmem:[%s2632_s0 + $0xf8] sm:$0xff] }
  0x42   : > { %845 = vmatpush1.bf16.msra.mxu0 %v1999_v49  ;;  %v607_v20 = vld [vmem:[%s2632_s0 + $0x1e8] sm:$0xff]  ;;  %v609_v21 = vld [vmem:[%s2632_s0 + $0x1f8] sm:$0xff]  ;;  %v625_v24 = vpack.c.bf16 %v577_v19, %v575_v18  ;;  %v2442_v37 = vrot.slane %v1222_v35, %v1226_v34 }
  0x43   : > { %1931 = vmatpush1.bf16.msra.mxu1 %v1999_v49  ;;  %846 = vmatprep.subr.bf16.mxu0 %v2000_v50  ;;  %v597_v49 = vld [vmem:[%s2632_s0 + $0x198] sm:$0xff]  ;;  %v641_v25 = vpack.c.bf16 %v609_v21, %v607_v20 }
  0x44   : > { %1916 = vmatprep.subr.bf16.mxu1 %v2000_v50  ;;  %v616_v50 = vpack.c.bf16 %v560_v43, %v558_v42 }
  0x46   : > { %847 = vmatpush1.bf16.msra.mxu0 %v2002_v51 }
  0x47   : > { %1932 = vmatpush1.bf16.msra.mxu1 %v2002_v51  ;;  %848 = vmatprep.subr.bf16.mxu0 %v2003_v52  ;;  %v632_v51 = vpack.c.bf16 %v592_v45, %v590_v44 }
  0x48   : > { %1917 = vmatprep.subr.bf16.mxu1 %v2003_v52  ;;  %v619_v52 = vpack.c.bf16 %v565_v47, %v563_v46 }
  0x4a   : > { %849 = vmatpush1.bf16.msra.mxu0 %v2005_v53 }
  0x4b   : > { %1933 = vmatpush1.bf16.msra.mxu1 %v2005_v53  ;;  %850 = vmatprep.subr.bf16.mxu0 %v2006_v54  ;;  %v635_v53 = vpack.c.bf16 %v597_v49, %v595_v48 }
  0x4c   : > { %1918 = vmatprep.subr.bf16.mxu1 %v2006_v54  ;;  %v562_v54 = vld [vmem:[%s2632_s0 + $0x80] sm:$0xff] }
  0x4e   : > { %851 = vmatpush1.bf16.msra.mxu0 %v2008_v55 }
  0x4f   : > { %1934 = vmatpush1.bf16.msra.mxu1 %v2008_v55  ;;  %852 = vmatprep.subr.bf16.mxu0 %v2009_v56  ;;  %v564_v55 = vld [vmem:[%s2632_s0 + $0x90] sm:$0xff] }
  0x50   : > { %1919 = vmatprep.subr.bf16.mxu1 %v2009_v56  ;;  %v594_v56 = vld [vmem:[%s2632_s0 + $0x180] sm:$0xff] }
  0x52   : > { %853 = vmatpush1.bf16.msra.mxu0 %v2011_v57 }
  0x53   : > { %1935 = vmatpush1.bf16.msra.mxu1 %v2011_v57  ;;  %854 = vmatprep.subr.bf16.mxu0 %v2012_v58  ;;  %v596_v57 = vld [vmem:[%s2632_s0 + $0x190] sm:$0xff] }
  0x54   : > { %1920 = vmatprep.subr.bf16.mxu1 %v2012_v58  ;;  %v567_v58 = vld [vmem:[%s2632_s0 + $0xa8] sm:$0xff] }
  0x56   : > { %855 = vmatpush1.bf16.msra.mxu0 %v2014_v59 }
  0x57   : > { %1936 = vmatpush1.bf16.msra.mxu1 %v2014_v59  ;;  %856 = vmatprep.subr.bf16.mxu0 %v2015_v60  ;;  %v569_v59 = vld [vmem:[%s2632_s0 + $0xb8] sm:$0xff] }
  0x58   : > { %1921 = vmatprep.subr.bf16.mxu1 %v2015_v60  ;;  %v599_v60 = vld [vmem:[%s2632_s0 + $0x1a8] sm:$0xff] }
  0x5a   : > { %857 = vmatpush1.bf16.msra.mxu0 %v2017_v61 }
  0x5b   : > { %1937 = vmatpush1.bf16.msra.mxu1 %v2017_v61  ;;  %858 = vmatprep.subr.bf16.mxu0 %v2018_v62  ;;  %v601_v61 = vld [vmem:[%s2632_s0 + $0x1b8] sm:$0xff] }
  0x5c   : > { %1922 = vmatprep.subr.bf16.mxu1 %v2018_v62  ;;  %v618_v62 = vpack.c.bf16 %v564_v55, %v562_v54 }
  0x5e   : > { %859 = vmatpush1.bf16.msra.mxu0 %v2020_v63 }
  0x5f   : > { %1938 = vmatpush1.bf16.msra.mxu1 %v2020_v63  ;;  %860 = vmatprep.subr.bf16.mxu0 %v2021_v0  ;;  %v634_v63 = vpack.c.bf16 %v596_v57, %v594_v56 }
  0x60   : > { %1923 = vmatprep.subr.bf16.mxu1 %v2021_v0  ;;  %v621_v0 = vpack.c.bf16 %v569_v59, %v567_v58 }
  0x62   : > { %861 = vmatpush1.bf16.msra.mxu0 %v2023_v1 }
  0x63   : > { %1939 = vmatpush1.bf16.msra.mxu1 %v2023_v1  ;;  %862 = vmatprep.subr.bf16.mxu0 %v2024_v2  ;;  %v637_v1 = vpack.c.bf16 %v601_v61, %v599_v60 }
  0x64   : > { %1924 = vmatprep.subr.bf16.mxu1 %v2024_v2  ;;  %v566_v2 = vld [vmem:[%s2632_s0 + $0xa0] sm:$0xff] }
  0x66   : > { %863 = vmatpush1.bf16.msra.mxu0 %v2026_v3 }
  0x67   : > { %1940 = vmatpush1.bf16.msra.mxu1 %v2026_v3  ;;  %864 = vmatprep.subr.bf16.mxu0 %v2027_v4  ;;  %v568_v3 = vld [vmem:[%s2632_s0 + $0xb0] sm:$0xff] }
  0x68   : > { %1925 = vmatprep.subr.bf16.mxu1 %v2027_v4  ;;  %v598_v4 = vld [vmem:[%s2632_s0 + $0x1a0] sm:$0xff]  ;;  %v620_v10 = vpack.c.bf16 %v568_v3, %v566_v2 }
  0x69   : > { %v636_v11 = vpack.c.bf16 %v600_v5, %v598_v4 }
  0x6a   : > { %865 = vmatpush1.bf16.msra.mxu0 %v2029_v8 }
  0x6b   : > { %1941 = vmatpush1.bf16.msra.mxu1 %v2029_v8  ;;  %v603_v8 = vld [vmem:[%s2632_s0 + $0x1c8] sm:$0xff] }
  0x6c   : > { %v639_v13 = vpack.c.bf16 %v605_v9, %v603_v8 }
  0x6d   : > { %867 = vmatmul.mubr.bf16.vlgmr.msra.gmra.mrb[0].mxu0 %v610_v14  ;;  %v570_v14 = vld [vmem:[%s2632_s0 + $0xc0] sm:$0xff] }
  0x6e   : > { %947 = vmatmul.mubr.bf16.vlgmr.msra.gmra.mrb[0].mxu1 %v626_v15  ;;  %876 = vmatprep.mubr.bf16.mxu0 %v613_v16  ;;  %v572_v15 = vld [vmem:[%s2632_s0 + $0xd0] sm:$0xff]  ;;  %v602_v16 = vld [vmem:[%s2632_s0 + $0x1c0] sm:$0xff] }
  0x6f   : > { %956 = vmatprep.mubr.bf16.mxu1 %v629_v17  ;;  %v604_v17 = vld [vmem:[%s2632_s0 + $0x1d0] sm:$0xff]  ;;  %v622_v22 = vpack.c.bf16 %v572_v15, %v570_v14 }
  0x70   : > { %v638_v23 = vpack.c.bf16 %v604_v17, %v602_v16 }
  0x75   : > { %877 = vmatmul.mubr.bf16.gmra.mrb[4].mxu0 %v612_v26  ;;  %v574_v26 = vld [vmem:[%s2632_s0 + $0xe0] sm:$0xff] }
  0x76   : > { %957 = vmatmul.mubr.bf16.gmra.mrb[4].mxu1 %v628_v27  ;;  %886 = vmatprep.mubr.bf16.mxu0 %v615_v28  ;;  %v576_v27 = vld [vmem:[%s2632_s0 + $0xf0] sm:$0xff]  ;;  %v606_v28 = vld [vmem:[%s2632_s0 + $0x1e0] sm:$0xff] }
  0x77   : > { %966 = vmatprep.mubr.bf16.mxu1 %v631_v29  ;;  %v608_v29 = vld [vmem:[%s2632_s0 + $0x1f0] sm:$0xff]  ;;  %v624_v30 = vpack.c.bf16 %v576_v27, %v574_v26 }
  0x78   : > { %v640_v31 = vpack.c.bf16 %v608_v29, %v606_v28 }
  0x7d   : > { %887 = vmatmul.mubr.bf16.gmra.mrb[8].mxu0 %v614_v38  ;;  %v2444_v38 = vrot.slane %v1222_v35, %v1230_v36 }
  0x7e   : > { %967 = vmatmul.mubr.bf16.gmra.mrb[8].mxu1 %v630_v39  ;;  %896 = vmatprep.mubr.bf16.mxu0 %v617_v40 }
  0x7f   : > { %976 = vmatprep.mubr.bf16.mxu1 %v633_v41 }
  0x85   : > { %897 = vmatmul.mubr.bf16.gmra.mrb[12].mxu0 %v616_v50 }
  0x86   : > { %977 = vmatmul.mubr.bf16.gmra.mrb[12].mxu1 %v632_v51  ;;  %906 = vmatprep.mubr.bf16.mxu0 %v619_v52 }
  0x87   : > { %986 = vmatprep.mubr.bf16.mxu1 %v635_v53 }
  0x8d   : > { %907 = vmatmul.mubr.bf16.gmra.mrb[16].mxu0 %v618_v62 }
  0x8e   : > { %987 = vmatmul.mubr.bf16.gmra.mrb[16].mxu1 %v634_v63  ;;  %916 = vmatprep.mubr.bf16.mxu0 %v621_v0 }
  0x8f   : > { %996 = vmatprep.mubr.bf16.mxu1 %v637_v1 }
  0x95   : > { %917 = vmatmul.mubr.bf16.gmra.mrb[20].mxu0 %v620_v10 }
  0x96   : > { %997 = vmatmul.mubr.bf16.gmra.mrb[20].mxu1 %v636_v11  ;;  %926 = vmatprep.mubr.bf16.mxu0 %v623_v12 }
  0x97   : > { %1006 = vmatprep.mubr.bf16.mxu1 %v639_v13 }
  0x9d   : > { %927 = vmatmul.mubr.bf16.gmra.mrb[24].mxu0 %v622_v22 }
  0x9e   : > { %1007 = vmatmul.mubr.bf16.gmra.mrb[24].mxu1 %v638_v23  ;;  %936 = vmatprep.mubr.bf16.mxu0 %v625_v24 }
  0x9f   : > { %1016 = vmatprep.mubr.bf16.mxu1 %v641_v25 }
  0xa5   : > { %937 = vmatmul.mubr.bf16.gmra.mrb[28].mxu0 %v624_v30 }
  0xa6   : > { %1017 = vmatmul.mubr.bf16.gmra.mrb[28].mxu1 %v640_v31 }
 0x140   : > { %v868_v39 = vpop.f32.mrb[0].mxu0 }
 0x141   : > { %v948_v40 = vpop.f32.mrb[0].mxu1  ;;  %v1234_v41 = vadd.f32 %v2442_v37, %v868_v39  ;;  %v870_v43 = vpop.f32.mrb[1].mxu0 }
 0x142   : > { %v1266_v42 = vadd.f32 %v2442_v37, %v948_v40  ;;  %v950_v44 = vpop.f32.mrb[1].mxu1  ;;  %v1235_v45 = vadd.f32 %v2444_v38, %v870_v43  ;;  %v872_v47 = vpop.f32.mrb[2].mxu0 }
 0x143   : > { %v1267_v46 = vadd.f32 %v2444_v38, %v950_v44  ;;  %v952_v48 = vpop.f32.mrb[2].mxu1  ;;  %v1236_v49 = vadd.f32 %v2442_v37, %v872_v47  ;;  %v874_v51 = vpop.f32.mrb[3].mxu0 }
 0x144   : > { %v1268_v50 = vadd.f32 %v2442_v37, %v952_v48  ;;  %v954_v52 = vpop.f32.mrb[3].mxu1  ;;  %v1877_v53 = vpack.c.bf16 %v1235_v45, %v1234_v41  ;;  %v1237_v55 = vadd.f32 %v2444_v38, %v874_v51 }
 0x145   : > { %v1893_v54 = vpack.c.bf16 %v1267_v46, %v1266_v42  ;;  %v1269_v56 = vadd.f32 %v2444_v38, %v954_v52 }
 0x146   : > { %1490 = vst [vmem:[%s2455_s4] sm:$0xff] %v1877_v53  ;;  %v1878_v57 = vpack.c.bf16 %v1237_v55, %v1236_v49 }
 0x147   : > { %1506 = vst [vmem:[%s2455_s4 + $0x80] sm:$0xff] %v1893_v54  ;;  %v1894_v58 = vpack.c.bf16 %v1269_v56, %v1268_v50 }
 0x148   : > { %1491 = vst [vmem:[%s2455_s4 + $0x8] sm:$0xff] %v1878_v57  ;;  %v878_v59 = vpop.f32.mrb[4].mxu0 }
 0x149   : > { %1507 = vst [vmem:[%s2455_s4 + $0x88] sm:$0xff] %v1894_v58  ;;  %v958_v60 = vpop.f32.mrb[4].mxu1  ;;  %v1238_v61 = vadd.f32 %v2442_v37, %v878_v59  ;;  %v880_v63 = vpop.f32.mrb[5].mxu0 }
 0x14a   : > { %v1270_v62 = vadd.f32 %v2442_v37, %v958_v60  ;;  %v960_v0 = vpop.f32.mrb[5].mxu1  ;;  %v1239_v1 = vadd.f32 %v2444_v38, %v880_v63  ;;  %v882_v3 = vpop.f32.mrb[6].mxu0 }
 0x14b   : > { %v1271_v2 = vadd.f32 %v2444_v38, %v960_v0  ;;  %v962_v4 = vpop.f32.mrb[6].mxu1  ;;  %v1240_v5 = vadd.f32 %v2442_v37, %v882_v3  ;;  %v884_v7 = vpop.f32.mrb[7].mxu0 }
 0x14c   : > { %v1272_v6 = vadd.f32 %v2442_v37, %v962_v4  ;;  %v964_v8 = vpop.f32.mrb[7].mxu1  ;;  %v1879_v9 = vpack.c.bf16 %v1239_v1, %v1238_v61  ;;  %v1241_v11 = vadd.f32 %v2444_v38, %v884_v7 }
 0x14d   : > { %v1895_v10 = vpack.c.bf16 %v1271_v2, %v1270_v62  ;;  %v1273_v12 = vadd.f32 %v2444_v38, %v964_v8 }
 0x14e   : > { %1492 = vst [vmem:[%s2455_s4 + $0x10] sm:$0xff] %v1879_v9  ;;  %v1880_v13 = vpack.c.bf16 %v1241_v11, %v1240_v5 }
 0x14f   : > { %1508 = vst [vmem:[%s2455_s4 + $0x90] sm:$0xff] %v1895_v10  ;;  %v1896_v14 = vpack.c.bf16 %v1273_v12, %v1272_v6 }
 0x150   : > { %1493 = vst [vmem:[%s2455_s4 + $0x18] sm:$0xff] %v1880_v13  ;;  %v888_v15 = vpop.f32.mrb[8].mxu0 }
 0x151   : > { %1509 = vst [vmem:[%s2455_s4 + $0x98] sm:$0xff] %v1896_v14  ;;  %v968_v16 = vpop.f32.mrb[8].mxu1  ;;  %v1242_v17 = vadd.f32 %v2442_v37, %v888_v15  ;;  %v890_v19 = vpop.f32.mrb[9].mxu0 }
 0x152   : > { %v1274_v18 = vadd.f32 %v2442_v37, %v968_v16  ;;  %v970_v20 = vpop.f32.mrb[9].mxu1  ;;  %v1243_v21 = vadd.f32 %v2444_v38, %v890_v19  ;;  %v892_v23 = vpop.f32.mrb[10].mxu0 }
 0x153   : > { %v1275_v22 = vadd.f32 %v2444_v38, %v970_v20  ;;  %v972_v24 = vpop.f32.mrb[10].mxu1  ;;  %v1244_v25 = vadd.f32 %v2442_v37, %v892_v23  ;;  %v894_v27 = vpop.f32.mrb[11].mxu0 }
 0x154   : > { %v1276_v26 = vadd.f32 %v2442_v37, %v972_v24  ;;  %v974_v28 = vpop.f32.mrb[11].mxu1  ;;  %v1881_v29 = vpack.c.bf16 %v1243_v21, %v1242_v17  ;;  %v1245_v31 = vadd.f32 %v2444_v38, %v894_v27 }
 0x155   : > { %v1897_v30 = vpack.c.bf16 %v1275_v22, %v1274_v18  ;;  %v1277_v32 = vadd.f32 %v2444_v38, %v974_v28 }
 0x156   : > { %1494 = vst [vmem:[%s2455_s4 + $0x20] sm:$0xff] %v1881_v29  ;;  %v1882_v33 = vpack.c.bf16 %v1245_v31, %v1244_v25 }
 0x157   : > { %1510 = vst [vmem:[%s2455_s4 + $0xa0] sm:$0xff] %v1897_v30  ;;  %v1898_v34 = vpack.c.bf16 %v1277_v32, %v1276_v26 }
 0x158   : > { %1495 = vst [vmem:[%s2455_s4 + $0x28] sm:$0xff] %v1882_v33  ;;  %v898_v35 = vpop.f32.mrb[12].mxu0 }
 0x159   : > { %1511 = vst [vmem:[%s2455_s4 + $0xa8] sm:$0xff] %v1898_v34  ;;  %v978_v36 = vpop.f32.mrb[12].mxu1  ;;  %v1246_v39 = vadd.f32 %v2442_v37, %v898_v35  ;;  %v900_v41 = vpop.f32.mrb[13].mxu0 }
 0x15a   : > { %v1278_v40 = vadd.f32 %v2442_v37, %v978_v36  ;;  %v980_v42 = vpop.f32.mrb[13].mxu1  ;;  %v1247_v43 = vadd.f32 %v2444_v38, %v900_v41  ;;  %v902_v45 = vpop.f32.mrb[14].mxu0 }
 0x15b   : > { %v1279_v44 = vadd.f32 %v2444_v38, %v980_v42  ;;  %v982_v46 = vpop.f32.mrb[14].mxu1  ;;  %v1248_v47 = vadd.f32 %v2442_v37, %v902_v45  ;;  %v904_v49 = vpop.f32.mrb[15].mxu0 }
 0x15c   : > { %v1280_v48 = vadd.f32 %v2442_v37, %v982_v46  ;;  %v984_v50 = vpop.f32.mrb[15].mxu1  ;;  %v1883_v51 = vpack.c.bf16 %v1247_v43, %v1246_v39  ;;  %v1249_v53 = vadd.f32 %v2444_v38, %v904_v49 }
 0x15d   : > { %v1899_v52 = vpack.c.bf16 %v1279_v44, %v1278_v40  ;;  %v1281_v54 = vadd.f32 %v2444_v38, %v984_v50 }
 0x15e   : > { %1496 = vst [vmem:[%s2455_s4 + $0x30] sm:$0xff] %v1883_v51  ;;  %v1884_v55 = vpack.c.bf16 %v1249_v53, %v1248_v47 }
 0x15f   : > { %1512 = vst [vmem:[%s2455_s4 + $0xb0] sm:$0xff] %v1899_v52  ;;  %v1900_v56 = vpack.c.bf16 %v1281_v54, %v1280_v48 }
 0x160   : > { %1497 = vst [vmem:[%s2455_s4 + $0x38] sm:$0xff] %v1884_v55  ;;  %v908_v57 = vpop.f32.mrb[16].mxu0 }
 0x161   : > { %1513 = vst [vmem:[%s2455_s4 + $0xb8] sm:$0xff] %v1900_v56  ;;  %v988_v58 = vpop.f32.mrb[16].mxu1  ;;  %v1250_v59 = vadd.f32 %v2442_v37, %v908_v57  ;;  %v910_v61 = vpop.f32.mrb[17].mxu0 }
 0x162   : > { %v1282_v60 = vadd.f32 %v2442_v37, %v988_v58  ;;  %v990_v62 = vpop.f32.mrb[17].mxu1  ;;  %v1251_v63 = vadd.f32 %v2444_v38, %v910_v61  ;;  %v912_v1 = vpop.f32.mrb[18].mxu0 }
 0x163   : > { %v1283_v0 = vadd.f32 %v2444_v38, %v990_v62  ;;  %v992_v2 = vpop.f32.mrb[18].mxu1  ;;  %v1252_v3 = vadd.f32 %v2442_v37, %v912_v1  ;;  %v914_v5 = vpop.f32.mrb[19].mxu0 }
 0x164   : > { %v1284_v4 = vadd.f32 %v2442_v37, %v992_v2  ;;  %v994_v6 = vpop.f32.mrb[19].mxu1  ;;  %v1885_v7 = vpack.c.bf16 %v1251_v63, %v1250_v59  ;;  %v1253_v9 = vadd.f32 %v2444_v38, %v914_v5 }
 0x165   : > { %v1901_v8 = vpack.c.bf16 %v1283_v0, %v1282_v60  ;;  %v1285_v10 = vadd.f32 %v2444_v38, %v994_v6 }
 0x166   : > { %1498 = vst [vmem:[%s2455_s4 + $0x40] sm:$0xff] %v1885_v7  ;;  %v1886_v11 = vpack.c.bf16 %v1253_v9, %v1252_v3 }
 0x167   : > { %1514 = vst [vmem:[%s2455_s4 + $0xc0] sm:$0xff] %v1901_v8  ;;  %v1902_v12 = vpack.c.bf16 %v1285_v10, %v1284_v4 }
 0x168   : > { %1499 = vst [vmem:[%s2455_s4 + $0x48] sm:$0xff] %v1886_v11  ;;  %v918_v13 = vpop.f32.mrb[20].mxu0  ;;  %v1628_v11 = vld [vmem:[%s2455_s4 + $0x10] sm:$0xff] (%p2125_p6) }
 0x169   : > { %1515 = vst [vmem:[%s2455_s4 + $0xc8] sm:$0xff] %v1902_v12  ;;  %v998_v14 = vpop.f32.mrb[20].mxu1  ;;  %v1254_v15 = vadd.f32 %v2442_v37, %v918_v13  ;;  %v920_v17 = vpop.f32.mrb[21].mxu0  ;;  %v1630_v12 = vld [vmem:[%s2455_s4 + $0x18] sm:$0xff] (%p2125_p6)  ;;  %v1632_v13 = vld [vmem:[%s2455_s4 + $0x20] sm:$0xff] (%p2125_p6)  ;;  %1629 = vst [vmem:[%s2554_s7 + $0x30] sm:$0xff] (%p2125_p6), %v1628_v11 }
 0x16a   : > { %v1286_v16 = vadd.f32 %v2442_v37, %v998_v14  ;;  %v1000_v18 = vpop.f32.mrb[21].mxu1  ;;  %v1255_v19 = vadd.f32 %v2444_v38, %v920_v17  ;;  %v922_v21 = vpop.f32.mrb[22].mxu0  ;;  %v1634_v14 = vld [vmem:[%s2455_s4 + $0x28] sm:$0xff] (%p2125_p6)  ;;  %1631 = vst [vmem:[%s2554_s7 + $0x48] sm:$0xff] (%p2125_p6), %v1630_v12  ;;  %1633 = vst [vmem:[%s2554_s7 + $0x60] sm:$0xff] (%p2125_p6), %v1632_v13 }
 0x16b   : > { %v1287_v20 = vadd.f32 %v2444_v38, %v1000_v18  ;;  %v1002_v22 = vpop.f32.mrb[22].mxu1  ;;  %v1256_v23 = vadd.f32 %v2442_v37, %v922_v21  ;;  %v924_v25 = vpop.f32.mrb[23].mxu0  ;;  %1635 = vst [vmem:[%s2554_s7 + $0x78] sm:$0xff] (%p2125_p6), %v1634_v14 }
 0x16c   : > { %v1288_v24 = vadd.f32 %v2442_v37, %v1002_v22  ;;  %v1004_v26 = vpop.f32.mrb[23].mxu1  ;;  %v1887_v27 = vpack.c.bf16 %v1255_v19, %v1254_v15  ;;  %v1257_v29 = vadd.f32 %v2444_v38, %v924_v25  ;;  %v1636_v15 = vld [vmem:[%s2455_s4 + $0x30] sm:$0xff] (%p2125_p6)  ;;  %v1656_v25 = vld [vmem:[%s2455_s4 + $0x80] sm:$0xff] (%p2125_p6) }
 0x16d   : > { %v1903_v28 = vpack.c.bf16 %v1287_v20, %v1286_v16  ;;  %v1289_v30 = vadd.f32 %v2444_v38, %v1004_v26  ;;  %v1638_v16 = vld [vmem:[%s2455_s4 + $0x38] sm:$0xff] (%p2125_p6)  ;;  %v1640_v17 = vld [vmem:[%s2455_s4 + $0x40] sm:$0xff] (%p2125_p6)  ;;  %1637 = vst [vmem:[%s2554_s7 + $0x90] sm:$0xff] (%p2125_p6), %v1636_v15  ;;  %v1658_v26 = vld [vmem:[%s2455_s4 + $0x88] sm:$0xff] (%p2125_p6) }
 0x16e   : > { %1500 = vst [vmem:[%s2455_s4 + $0x50] sm:$0xff] %v1887_v27  ;;  %v1888_v31 = vpack.c.bf16 %v1257_v29, %v1256_v23  ;;  %1639 = vst [vmem:[%s2554_s7 + $0xa8] sm:$0xff] (%p2125_p6), %v1638_v16  ;;  %v1660_v27 = vld [vmem:[%s2455_s4 + $0x90] sm:$0xff] (%p2125_p6)  ;;  %v1664_v29 = vld [vmem:[%s2455_s4 + $0xa0] sm:$0xff] (%p2125_p6) }
 0x16f   : > { %1516 = vst [vmem:[%s2455_s4 + $0xd0] sm:$0xff] %v1903_v28  ;;  %v1904_v32 = vpack.c.bf16 %v1289_v30, %v1288_v24  ;;  %1641 = vst [vmem:[%s2554_s7 + $0xc0] sm:$0xff] (%p2125_p6), %v1640_v17  ;;  %v1642_v18 = vld [vmem:[%s2455_s4 + $0x48] sm:$0xff] (%p2125_p6)  ;;  %v1662_v28 = vld [vmem:[%s2455_s4 + $0x98] sm:$0xff] (%p2125_p6) }
 0x170   : > { %1501 = vst [vmem:[%s2455_s4 + $0x58] sm:$0xff] %v1888_v31  ;;  %v928_v33 = vpop.f32.mrb[24].mxu0  ;;  %1643 = vst [vmem:[%s2554_s7 + $0xd8] sm:$0xff] (%p2125_p6), %v1642_v18  ;;  %v1666_v30 = vld [vmem:[%s2455_s4 + $0xa8] sm:$0xff] (%p2125_p6)  ;;  %v1668_v31 = vld [vmem:[%s2455_s4 + $0xb0] sm:$0xff] (%p2125_p6) }
 0x171   : > { %1517 = vst [vmem:[%s2455_s4 + $0xd8] sm:$0xff] %v1904_v32  ;;  %v1008_v34 = vpop.f32.mrb[24].mxu1  ;;  %v1258_v35 = vadd.f32 %v2442_v37, %v928_v33  ;;  %v930_v39 = vpop.f32.mrb[25].mxu0  ;;  %1657 = vst [vmem:[%s2554_s7 + $0x180] sm:$0xff] (%p2125_p6), %v1656_v25  ;;  %v1670_v32 = vld [vmem:[%s2455_s4 + $0xb8] sm:$0xff] (%p2125_p6)  ;;  %v1672_v33 = vld [vmem:[%s2455_s4 + $0xc0] sm:$0xff] (%p2125_p6) }
 0x172   : > { %v1290_v36 = vadd.f32 %v2442_v37, %v1008_v34  ;;  %v1010_v40 = vpop.f32.mrb[25].mxu1  ;;  %v1259_v41 = vadd.f32 %v2444_v38, %v930_v39  ;;  %v932_v43 = vpop.f32.mrb[26].mxu0  ;;  %1659 = vst [vmem:[%s2554_s7 + $0x198] sm:$0xff] (%p2125_p6), %v1658_v26  ;;  %1661 = vst [vmem:[%s2554_s7 + $0x1b0] sm:$0xff] (%p2125_p6), %v1660_v27  ;;  %v1674_v34 = vld [vmem:[%s2455_s4 + $0xc8] sm:$0xff] (%p2125_p6) }
 0x173   : > { %v1291_v42 = vadd.f32 %v2444_v38, %v1010_v40  ;;  %v1012_v44 = vpop.f32.mrb[26].mxu1  ;;  %v1260_v45 = vadd.f32 %v2442_v37, %v932_v43  ;;  %v934_v47 = vpop.f32.mrb[27].mxu0  ;;  %1663 = vst [vmem:[%s2554_s7 + $0x1c8] sm:$0xff] (%p2125_p6), %v1662_v28  ;;  %1665 = vst [vmem:[%s2554_s7 + $0x1e0] sm:$0xff] (%p2125_p6), %v1664_v29 }
 0x174   : > { %v1292_v46 = vadd.f32 %v2442_v37, %v1012_v44  ;;  %v1014_v48 = vpop.f32.mrb[27].mxu1  ;;  %v1889_v49 = vpack.c.bf16 %v1259_v41, %v1258_v35  ;;  %v1261_v51 = vadd.f32 %v2444_v38, %v934_v47  ;;  %1667 = vst [vmem:[%s2554_s7 + $0x1f8] sm:$0xff] (%p2125_p6), %v1666_v30  ;;  %1669 = vst [vmem:[%s2554_s7 + $0x210] sm:$0xff] (%p2125_p6), %v1668_v31 }
 0x175   : > { %v1905_v50 = vpack.c.bf16 %v1291_v42, %v1290_v36  ;;  %v1293_v52 = vadd.f32 %v2444_v38, %v1014_v48  ;;  %v1644_v19 = vld [vmem:[%s2455_s4 + $0x50] sm:$0xff] (%p2125_p6)  ;;  %1671 = vst [vmem:[%s2554_s7 + $0x228] sm:$0xff] (%p2125_p6), %v1670_v32  ;;  %1673 = vst [vmem:[%s2554_s7 + $0x240] sm:$0xff] (%p2125_p6), %v1672_v33 }
 0x176   : > { %1502 = vst [vmem:[%s2455_s4 + $0x60] sm:$0xff] %v1889_v49  ;;  %v1890_v53 = vpack.c.bf16 %v1261_v51, %v1260_v45  ;;  %1645 = vst [vmem:[%s2554_s7 + $0xf0] sm:$0xff] (%p2125_p6), %v1644_v19  ;;  %v1676_v35 = vld [vmem:[%s2455_s4 + $0xd0] sm:$0xff] (%p2125_p6) }
 0x177   : > { %1518 = vst [vmem:[%s2455_s4 + $0xe0] sm:$0xff] %v1905_v50  ;;  %v1906_v54 = vpack.c.bf16 %v1293_v52, %v1292_v46  ;;  %v1646_v20 = vld [vmem:[%s2455_s4 + $0x58] sm:$0xff] (%p2125_p6)  ;;  %1675 = vst [vmem:[%s2554_s7 + $0x258] sm:$0xff] (%p2125_p6), %v1674_v34 }
 0x178   : > { %1503 = vst [vmem:[%s2455_s4 + $0x68] sm:$0xff] %v1890_v53  ;;  %v938_v55 = vpop.f32.mrb[28].mxu0  ;;  %1647 = vst [vmem:[%s2554_s7 + $0x108] sm:$0xff] (%p2125_p6), %v1646_v20  ;;  %v1678_v36 = vld [vmem:[%s2455_s4 + $0xd8] sm:$0xff] (%p2125_p6) }
 0x179   : > { %1519 = vst [vmem:[%s2455_s4 + $0xe8] sm:$0xff] %v1906_v54  ;;  %v1018_v56 = vpop.f32.mrb[28].mxu1  ;;  %v1262_v57 = vadd.f32 %v2442_v37, %v938_v55  ;;  %v940_v59 = vpop.f32.mrb[29].mxu0  ;;  %1677 = vst [vmem:[%s2554_s7 + $0x270] sm:$0xff] (%p2125_p6), %v1676_v35 }
 0x17a   : > { %v1294_v58 = vadd.f32 %v2442_v37, %v1018_v56  ;;  %v1020_v60 = vpop.f32.mrb[29].mxu1  ;;  %v1263_v61 = vadd.f32 %v2444_v38, %v940_v59  ;;  %v942_v63 = vpop.f32.mrb[30].mxu0  ;;  %1679 = vst [vmem:[%s2554_s7 + $0x288] sm:$0xff] (%p2125_p6), %v1678_v36 }
 0x17b   : > { %v1295_v62 = vadd.f32 %v2444_v38, %v1020_v60  ;;  %v1022_v0 = vpop.f32.mrb[30].mxu1  ;;  %v1264_v1 = vadd.f32 %v2442_v37, %v942_v63  ;;  %v944_v3 = vpop.f32.mrb[31].mxu0  ;;  %1528 = sbr.rel (!%p2125_p6) target bundleno = 394 (0x18a), region = 82 }
 0x17c   : > { %v1296_v2 = vadd.f32 %v2442_v37, %v1022_v0  ;;  %v1024_v4 = vpop.f32.mrb[31].mxu1  ;;  %v1891_v5 = vpack.c.bf16 %v1263_v61, %v1262_v57  ;;  %v1265_v7 = vadd.f32 %v2444_v38, %v944_v3  ;;  %v1624_v37 = vld [vmem:[%s2455_s4] sm:$0xff] (%p2125_p6) }
 0x17d   : > { %v1907_v6 = vpack.c.bf16 %v1295_v62, %v1294_v58  ;;  %v1297_v8 = vadd.f32 %v2444_v38, %v1024_v4  ;;  %v1626_v38 = vld [vmem:[%s2455_s4 + $0x8] sm:$0xff] (%p2125_p6)  ;;  %1625 = vst [vmem:[%s2554_s7] sm:$0xff] (%p2125_p6), %v1624_v37  ;;  %v1648_v21 = vld [vmem:[%s2455_s4 + $0x60] sm:$0xff] (%p2125_p6) }
 0x17e   : > { %1504 = vst [vmem:[%s2455_s4 + $0x70] sm:$0xff] %v1891_v5  ;;  %v1892_v9 = vpack.c.bf16 %v1265_v7, %v1264_v1  ;;  %1627 = vst [vmem:[%s2554_s7 + $0x18] sm:$0xff] (%p2125_p6), %v1626_v38  ;;  %v1680_v39 = vld [vmem:[%s2455_s4 + $0xe0] sm:$0xff] (%p2125_p6) }
 0x17f   : > { %1520 = vst [vmem:[%s2455_s4 + $0xf0] sm:$0xff] %v1907_v6  ;;  %v1908_v10 = vpack.c.bf16 %v1297_v8, %v1296_v2  ;;  %v1650_v22 = vld [vmem:[%s2455_s4 + $0x68] sm:$0xff] (%p2125_p6)  ;;  %1649 = vst [vmem:[%s2554_s7 + $0x120] sm:$0xff] (%p2125_p6), %v1648_v21 }
 0x180   : > { %1505 = vst [vmem:[%s2455_s4 + $0x78] sm:$0xff] %v1892_v9  ;;  %1651 = vst [vmem:[%s2554_s7 + $0x138] sm:$0xff] (%p2125_p6), %v1650_v22  ;;  %v1682_v40 = vld [vmem:[%s2455_s4 + $0xe8] sm:$0xff] (%p2125_p6) }
 0x181   : > { %1521 = vst [vmem:[%s2455_s4 + $0xf8] sm:$0xff] %v1908_v10  ;;  %1681 = vst [vmem:[%s2554_s7 + $0x2a0] sm:$0xff] (%p2125_p6), %v1680_v39 }
 0x182   : > { %1683 = vst [vmem:[%s2554_s7 + $0x2b8] sm:$0xff] %v1682_v40 }
 0x185   : > { %v1652_v23 = vld [vmem:[%s2455_s4 + $0x70] sm:$0xff] }
 0x186   : > { %1653 = vst [vmem:[%s2554_s7 + $0x150] sm:$0xff] %v1652_v23  ;;  %v1684_v41 = vld [vmem:[%s2455_s4 + $0xf0] sm:$0xff] }
 0x187   : > { %v1654_v24 = vld [vmem:[%s2455_s4 + $0x78] sm:$0xff]  ;;  %1685 = vst [vmem:[%s2554_s7 + $0x2d0] sm:$0xff] %v1684_v41 }
 0x188   : > { %1655 = vst [vmem:[%s2554_s7 + $0x168] sm:$0xff] %v1654_v24  ;;  %v1686_v42 = vld [vmem:[%s2455_s4 + $0xf8] sm:$0xff] }
 0x189   : > { %1687 = vst [vmem:[%s2554_s7 + $0x2e8] sm:$0xff] %v1686_v42 }
 0x18a PF: > { %s13_s16 = sadd.s32 1, %s2068_s16   ;;  %s2637_s12 = smov %s2056_s13 }
 0x18b   : > { %p10_p12 = scmp.ge.s32.totalorder %s13_s16, 5   ;;  %s2638_s13 = smov %s2130_s22 }
 0x18c   : > { %s2639_s14 = smov %s2064_s15  ;;  %s2640_s15 = smov %s2642_s17 }
 0x18d   :  { %12 = sbr.rel (!%p10_p12) target bundleno = 3 (0x3), region = 157 }

// kernel: decoder_layer.12
= control target key start
LH: loop header
LB: loop body
LE: loop exit
PB: predicated region body
PF: predicated region fallthrough
CT: control target
= control target key end

     0   :  { %s3152_s1 = inlined_call_operand.vmem [shape: bf16[256,512], index: 1, kind: input, shape index: {}]   ;;  %s3153_s0 = inlined_call_operand.vmem [shape: f32[256,256], index: 0, kind: input, shape index: {}]   ;;  %s3154_s2 = inlined_call_operand.vmem [shape: f32[1,512], index: 2, kind: input, shape index: {}]   ;;  %s3155_s3 = inlined_call_operand.vmem [shape: bf16[256,512], index: 3, kind: output, shape index: {}]  }
   0x1   :  { %v2321_v0 = vld [vmem:[%s3152_s1 + $0x4] ss:$16 sps:$4 sm:$0xff]   ;;  %v2323_v1 = vld [vmem:[%s3152_s1 + $0xc] ss:$16 sps:$4 sm:$0xff]   ;;  %v2325_v2 = vld [vmem:[%s3152_s1] ss:$16 sps:$4 sm:$0xff]  }
   0x2   :  { %754 = vmatprep.subr.bf16.mxu0 %v2321_v0  ;;  %v2326_v3 = vld [vmem:[%s3152_s1 + $0x8] ss:$16 sps:$4 sm:$0xff]   ;;  %947 = vmatprep.subr.bf16.mxu1 %v2323_v1  ;;  %v2327_v4 = vld [vmem:[%s3152_s1 + $0x24] ss:$16 sps:$4 sm:$0xff]   ;;  %v2329_v5 = vld [vmem:[%s3152_s1 + $0x2c] ss:$16 sps:$4 sm:$0xff]  }
   0x3   :  { %755 = vmatpush1.bf16.msra.mxu0 %v2325_v2  ;;  %948 = vmatpush1.bf16.msra.mxu1 %v2326_v3  ;;  %v2331_v6 = vld [vmem:[%s3152_s1 + $0x20] ss:$16 sps:$4 sm:$0xff]   ;;  %v2332_v7 = vld [vmem:[%s3152_s1 + $0x28] ss:$16 sps:$4 sm:$0xff]   ;;  %v2333_v8 = vld [vmem:[%s3152_s1 + $0x44] ss:$16 sps:$4 sm:$0xff]  }
   0x4   :  { %756 = vmatprep.subr.bf16.mxu0 %v2327_v4  ;;  %949 = vmatprep.subr.bf16.mxu1 %v2329_v5  ;;  %v2335_v9 = vld [vmem:[%s3152_s1 + $0x4c] ss:$16 sps:$4 sm:$0xff]   ;;  %v2337_v10 = vld [vmem:[%s3152_s1 + $0x40] ss:$16 sps:$4 sm:$0xff]   ;;  %v2338_v11 = vld [vmem:[%s3152_s1 + $0x48] ss:$16 sps:$4 sm:$0xff]  }
   0x5   :  { %v2339_v12 = vld [vmem:[%s3152_s1 + $0x64] ss:$16 sps:$4 sm:$0xff]   ;;  %v2341_v13 = vld [vmem:[%s3152_s1 + $0x6c] ss:$16 sps:$4 sm:$0xff]   ;;  %v2343_v14 = vld [vmem:[%s3152_s1 + $0x60] ss:$16 sps:$4 sm:$0xff]  }
   0x6   :  { %v2344_v15 = vld [vmem:[%s3152_s1 + $0x68] ss:$16 sps:$4 sm:$0xff]   ;;  %v2345_v16 = vld [vmem:[%s3152_s1 + $0x84] ss:$16 sps:$4 sm:$0xff]   ;;  %v2347_v17 = vld [vmem:[%s3152_s1 + $0x8c] ss:$16 sps:$4 sm:$0xff]  }
   0x7   :  { %757 = vmatpush1.bf16.msra.mxu0 %v2331_v6  ;;  %950 = vmatpush1.bf16.msra.mxu1 %v2332_v7  ;;  %v2349_v18 = vld [vmem:[%s3152_s1 + $0x80] ss:$16 sps:$4 sm:$0xff]   ;;  %v2350_v19 = vld [vmem:[%s3152_s1 + $0x88] ss:$16 sps:$4 sm:$0xff]   ;;  %v2351_v20 = vld [vmem:[%s3152_s1 + $0xa4] ss:$16 sps:$4 sm:$0xff]  }
   0x8   :  { %758 = vmatprep.subr.bf16.mxu0 %v2333_v8  ;;  %951 = vmatprep.subr.bf16.mxu1 %v2335_v9  ;;  %v2353_v21 = vld [vmem:[%s3152_s1 + $0xac] ss:$16 sps:$4 sm:$0xff]   ;;  %v2355_v22 = vld [vmem:[%s3152_s1 + $0xa0] ss:$16 sps:$4 sm:$0xff]   ;;  %v2356_v23 = vld [vmem:[%s3152_s1 + $0xa8] ss:$16 sps:$4 sm:$0xff]  }
   0x9   :  { %v2357_v24 = vld [vmem:[%s3152_s1 + $0xc4] ss:$16 sps:$4 sm:$0xff]   ;;  %v2359_v25 = vld [vmem:[%s3152_s1 + $0xcc] ss:$16 sps:$4 sm:$0xff]   ;;  %v2361_v26 = vld [vmem:[%s3152_s1 + $0xc0] ss:$16 sps:$4 sm:$0xff]  }
   0xa   :  { %v2362_v27 = vld [vmem:[%s3152_s1 + $0xc8] ss:$16 sps:$4 sm:$0xff]   ;;  %v2363_v28 = vld [vmem:[%s3152_s1 + $0xe4] ss:$16 sps:$4 sm:$0xff]   ;;  %v2365_v29 = vld [vmem:[%s3152_s1 + $0xec] ss:$16 sps:$4 sm:$0xff]  }
   0xb   :  { %759 = vmatpush1.bf16.msra.mxu0 %v2337_v10  ;;  %952 = vmatpush1.bf16.msra.mxu1 %v2338_v11  ;;  %v2367_v30 = vld [vmem:[%s3152_s1 + $0xe0] ss:$16 sps:$4 sm:$0xff]   ;;  %v2368_v31 = vld [vmem:[%s3152_s1 + $0xe8] ss:$16 sps:$4 sm:$0xff]   ;;  %v2369_v32 = vld [vmem:[%s3152_s1 + $0x104] ss:$16 sps:$4 sm:$0xff]  }
   0xc   :  { %760 = vmatprep.subr.bf16.mxu0 %v2339_v12  ;;  %953 = vmatprep.subr.bf16.mxu1 %v2341_v13  ;;  %v2371_v33 = vld [vmem:[%s3152_s1 + $0x10c] ss:$16 sps:$4 sm:$0xff]   ;;  %v2373_v34 = vld [vmem:[%s3152_s1 + $0x100] ss:$16 sps:$4 sm:$0xff]   ;;  %v2374_v35 = vld [vmem:[%s3152_s1 + $0x108] ss:$16 sps:$4 sm:$0xff]  }
   0xd   :  { %v2375_v36 = vld [vmem:[%s3152_s1 + $0x124] ss:$16 sps:$4 sm:$0xff]   ;;  %v2377_v37 = vld [vmem:[%s3152_s1 + $0x12c] ss:$16 sps:$4 sm:$0xff]   ;;  %v2379_v38 = vld [vmem:[%s3152_s1 + $0x120] ss:$16 sps:$4 sm:$0xff]  }
   0xe   :  { %v2380_v39 = vld [vmem:[%s3152_s1 + $0x128] ss:$16 sps:$4 sm:$0xff]   ;;  %v2381_v40 = vld [vmem:[%s3152_s1 + $0x144] ss:$16 sps:$4 sm:$0xff]   ;;  %v2383_v41 = vld [vmem:[%s3152_s1 + $0x14c] ss:$16 sps:$4 sm:$0xff]  }
   0xf   :  { %761 = vmatpush1.bf16.msra.mxu0 %v2343_v14  ;;  %954 = vmatpush1.bf16.msra.mxu1 %v2344_v15  ;;  %v2385_v42 = vld [vmem:[%s3152_s1 + $0x140] ss:$16 sps:$4 sm:$0xff]   ;;  %v2386_v43 = vld [vmem:[%s3152_s1 + $0x148] ss:$16 sps:$4 sm:$0xff]   ;;  %v2387_v44 = vld [vmem:[%s3152_s1 + $0x164] ss:$16 sps:$4 sm:$0xff]  }
  0x10   :  { %762 = vmatprep.subr.bf16.mxu0 %v2345_v16  ;;  %955 = vmatprep.subr.bf16.mxu1 %v2347_v17  ;;  %v2389_v45 = vld [vmem:[%s3152_s1 + $0x16c] ss:$16 sps:$4 sm:$0xff]   ;;  %v2391_v48 = vld [vmem:[%s3152_s1 + $0x160] ss:$16 sps:$4 sm:$0xff]   ;;  %v2392_v49 = vld [vmem:[%s3152_s1 + $0x168] ss:$16 sps:$4 sm:$0xff]  }
  0x11   :  { %v275_v46 = vld [vmem:[%s3153_s0 + $0x8] sm:$0xff]  ;;  %v277_v47 = vld [vmem:[%s3153_s0 + $0x18] sm:$0xff]  ;;  %v2393_v51 = vld [vmem:[%s3152_s1 + $0x184] ss:$16 sps:$4 sm:$0xff]  }
  0x12   :  { %v339_v50 = vpack.c.bf16 %v277_v47, %v275_v46  ;;  %v2395_v52 = vld [vmem:[%s3152_s1 + $0x18c] ss:$16 sps:$4 sm:$0xff]   ;;  %v2397_v53 = vld [vmem:[%s3152_s1 + $0x180] ss:$16 sps:$4 sm:$0xff]   ;;  %v2398_v54 = vld [vmem:[%s3152_s1 + $0x188] ss:$16 sps:$4 sm:$0xff]  }
  0x13   :  { %763 = vmatpush1.bf16.msra.mxu0 %v2349_v18  ;;  %956 = vmatpush1.bf16.msra.mxu1 %v2350_v19  ;;  %v2399_v55 = vld [vmem:[%s3152_s1 + $0x1a4] ss:$16 sps:$4 sm:$0xff]   ;;  %v2401_v56 = vld [vmem:[%s3152_s1 + $0x1ac] ss:$16 sps:$4 sm:$0xff]   ;;  %v2403_v57 = vld [vmem:[%s3152_s1 + $0x1a0] ss:$16 sps:$4 sm:$0xff]  }
  0x14   :  { %764 = vmatprep.subr.bf16.mxu0 %v2351_v20  ;;  %957 = vmatprep.subr.bf16.mxu1 %v2353_v21  ;;  %v2404_v58 = vld [vmem:[%s3152_s1 + $0x1a8] ss:$16 sps:$4 sm:$0xff]   ;;  %v2405_v59 = vld [vmem:[%s3152_s1 + $0x1c4] ss:$16 sps:$4 sm:$0xff]   ;;  %v2407_v60 = vld [vmem:[%s3152_s1 + $0x1cc] ss:$16 sps:$4 sm:$0xff]  }
  0x15   :  { %786 = vmatprep.mubr.bf16.mxu0 %v339_v50  ;;  %979 = vmatprep.mubr.bf16.mxu1 %v339_v50  ;;  %v2409_v61 = vld [vmem:[%s3152_s1 + $0x1c0] ss:$16 sps:$4 sm:$0xff]   ;;  %v2410_v62 = vld [vmem:[%s3152_s1 + $0x1c8] ss:$16 sps:$4 sm:$0xff]   ;;  %v2411_v63 = vld [vmem:[%s3152_s1 + $0x1e4] ss:$16 sps:$4 sm:$0xff]  }
  0x16   :  { %v2413_v0 = vld [vmem:[%s3152_s1 + $0x1ec] ss:$16 sps:$4 sm:$0xff]   ;;  %v2415_v1 = vld [vmem:[%s3152_s1 + $0x1e0] ss:$16 sps:$4 sm:$0xff]   ;;  %v2416_v2 = vld [vmem:[%s3152_s1 + $0x1e8] ss:$16 sps:$4 sm:$0xff]  }
  0x17   :  { %765 = vmatpush1.bf16.msra.mxu0 %v2355_v22  ;;  %958 = vmatpush1.bf16.msra.mxu1 %v2356_v23  ;;  %v274_v3 = vld [vmem:[%s3153_s0] sm:$0xff]  ;;  %v276_v4 = vld [vmem:[%s3153_s0 + $0x10] sm:$0xff]  ;;  %v279_v5 = vld [vmem:[%s3153_s0 + $0x28] sm:$0xff] }
  0x18   :  { %766 = vmatprep.subr.bf16.mxu0 %v2357_v24  ;;  %959 = vmatprep.subr.bf16.mxu1 %v2359_v25  ;;  %v281_v6 = vld [vmem:[%s3153_s0 + $0x38] sm:$0xff]  ;;  %v338_v7 = vpack.c.bf16 %v276_v4, %v274_v3  ;;  %v278_v9 = vld [vmem:[%s3153_s0 + $0x20] sm:$0xff]  ;;  %v280_v10 = vld [vmem:[%s3153_s0 + $0x30] sm:$0xff] }
  0x19   :  { %v341_v8 = vpack.c.bf16 %v281_v6, %v279_v5  ;;  %v283_v11 = vld [vmem:[%s3153_s0 + $0x48] sm:$0xff]  ;;  %v285_v12 = vld [vmem:[%s3153_s0 + $0x58] sm:$0xff]  ;;  %v340_v13 = vpack.c.bf16 %v280_v10, %v278_v9  ;;  %v282_v15 = vld [vmem:[%s3153_s0 + $0x40] sm:$0xff] }
  0x1a   :  { %v343_v14 = vpack.c.bf16 %v285_v12, %v283_v11  ;;  %v284_v16 = vld [vmem:[%s3153_s0 + $0x50] sm:$0xff]  ;;  %v287_v17 = vld [vmem:[%s3153_s0 + $0x68] sm:$0xff]  ;;  %v289_v18 = vld [vmem:[%s3153_s0 + $0x78] sm:$0xff] }
  0x1b   :  { %767 = vmatpush1.bf16.msra.mxu0 %v2361_v26  ;;  %960 = vmatpush1.bf16.msra.mxu1 %v2362_v27  ;;  %v342_v19 = vpack.c.bf16 %v284_v16, %v282_v15  ;;  %v345_v20 = vpack.c.bf16 %v289_v18, %v287_v17  ;;  %v286_v21 = vld [vmem:[%s3153_s0 + $0x60] sm:$0xff]  ;;  %v288_v22 = vld [vmem:[%s3153_s0 + $0x70] sm:$0xff]  ;;  %v291_v23 = vld [vmem:[%s3153_s0 + $0x88] sm:$0xff] }
  0x1c   :  { %768 = vmatprep.subr.bf16.mxu0 %v2363_v28  ;;  %961 = vmatprep.subr.bf16.mxu1 %v2365_v29  ;;  %v293_v24 = vld [vmem:[%s3153_s0 + $0x98] sm:$0xff]  ;;  %v344_v25 = vpack.c.bf16 %v288_v22, %v286_v21  ;;  %v290_v27 = vld [vmem:[%s3153_s0 + $0x80] sm:$0xff]  ;;  %v292_v28 = vld [vmem:[%s3153_s0 + $0x90] sm:$0xff] }
  0x1d   :  { %v347_v26 = vpack.c.bf16 %v293_v24, %v291_v23  ;;  %v295_v29 = vld [vmem:[%s3153_s0 + $0xa8] sm:$0xff]  ;;  %v304_v46 = vld [vmem:[%s3153_s0 + $0xf0] sm:$0xff]  ;;  %v318_v5 = vld [vmem:[%s3153_s0 + $0x160] sm:$0xff] }
  0x1e   :  { %v307_v47 = vld [vmem:[%s3153_s0 + $0x108] sm:$0xff]  ;;  %v320_v6 = vld [vmem:[%s3153_s0 + $0x170] sm:$0xff]  ;;  %v322_v11 = vld [vmem:[%s3153_s0 + $0x180] sm:$0xff] }
  0x1f   :  { %769 = vmatpush1.bf16.msra.mxu0 %v2367_v30  ;;  %962 = vmatpush1.bf16.msra.mxu1 %v2368_v31  ;;  %v297_v30 = vld [vmem:[%s3153_s0 + $0xb8] sm:$0xff]  ;;  %v346_v31 = vpack.c.bf16 %v292_v28, %v290_v27  ;;  %v360_v9 = vpack.c.bf16 %v320_v6, %v318_v5  ;;  %v324_v12 = vld [vmem:[%s3153_s0 + $0x190] sm:$0xff]  ;;  %v326_v17 = vld [vmem:[%s3153_s0 + $0x1a0] sm:$0xff] }
  0x20   :  { %770 = vmatprep.subr.bf16.mxu0 %v2369_v32  ;;  %963 = vmatprep.subr.bf16.mxu1 %v2371_v33  ;;  %v349_v32 = vpack.c.bf16 %v297_v30, %v295_v29  ;;  %v294_v33 = vld [vmem:[%s3153_s0 + $0xa0] sm:$0xff]  ;;  %v362_v15 = vpack.c.bf16 %v324_v12, %v322_v11  ;;  %v328_v18 = vld [vmem:[%s3153_s0 + $0x1b0] sm:$0xff] }
  0x21   :  { %v364_v21 = vpack.c.bf16 %v328_v18, %v326_v17  ;;  %v330_v23 = vld [vmem:[%s3153_s0 + $0x1c0] sm:$0xff]  ;;  %v332_v24 = vld [vmem:[%s3153_s0 + $0x1d0] sm:$0xff] }
  0x22   :  { %v366_v27 = vpack.c.bf16 %v332_v24, %v330_v23  ;;  %v334_v29 = vld [vmem:[%s3153_s0 + $0x1e0] sm:$0xff]  ;;  %v336_v30 = vld [vmem:[%s3153_s0 + $0x1f0] sm:$0xff] }
  0x23   :  { %771 = vmatpush1.bf16.msra.mxu0 %v2373_v34  ;;  %964 = vmatpush1.bf16.msra.mxu1 %v2374_v35  ;;  %v296_v34 = vld [vmem:[%s3153_s0 + $0xb0] sm:$0xff]  ;;  %v299_v35 = vld [vmem:[%s3153_s0 + $0xc8] sm:$0xff] }
  0x24   :  { %772 = vmatprep.subr.bf16.mxu0 %v2375_v36  ;;  %965 = vmatprep.subr.bf16.mxu1 %v2377_v37  ;;  %v301_v36 = vld [vmem:[%s3153_s0 + $0xd8] sm:$0xff]  ;;  %v348_v37 = vpack.c.bf16 %v296_v34, %v294_v33 }
  0x27   :  { %773 = vmatpush1.bf16.msra.mxu0 %v2379_v38  ;;  %966 = vmatpush1.bf16.msra.mxu1 %v2380_v39  ;;  %v351_v38 = vpack.c.bf16 %v301_v36, %v299_v35  ;;  %v298_v39 = vld [vmem:[%s3153_s0 + $0xc0] sm:$0xff] }
  0x28   :  { %774 = vmatprep.subr.bf16.mxu0 %v2381_v40  ;;  %967 = vmatprep.subr.bf16.mxu1 %v2383_v41  ;;  %v300_v40 = vld [vmem:[%s3153_s0 + $0xd0] sm:$0xff]  ;;  %v303_v41 = vld [vmem:[%s3153_s0 + $0xe8] sm:$0xff]  ;;  %v1527_v36 = vld [vmem:[%s3154_s2] sm:$0xf] }
  0x2b   :  { %775 = vmatpush1.bf16.msra.mxu0 %v2385_v42  ;;  %968 = vmatpush1.bf16.msra.mxu1 %v2386_v43  ;;  %v305_v42 = vld [vmem:[%s3153_s0 + $0xf8] sm:$0xff]  ;;  %v350_v43 = vpack.c.bf16 %v300_v40, %v298_v39 }
  0x2c   :  { %776 = vmatprep.subr.bf16.mxu0 %v2387_v44  ;;  %969 = vmatprep.subr.bf16.mxu1 %v2389_v45  ;;  %v353_v44 = vpack.c.bf16 %v305_v42, %v303_v41  ;;  %v302_v45 = vld [vmem:[%s3153_s0 + $0xe0] sm:$0xff] }
  0x2f   :  { %777 = vmatpush1.bf16.msra.mxu0 %v2391_v48  ;;  %970 = vmatpush1.bf16.msra.mxu1 %v2392_v49  ;;  %v309_v48 = vld [vmem:[%s3153_s0 + $0x118] sm:$0xff]  ;;  %v352_v49 = vpack.c.bf16 %v304_v46, %v302_v45 }
  0x30   :  { %778 = vmatprep.subr.bf16.mxu0 %v2393_v51  ;;  %971 = vmatprep.subr.bf16.mxu1 %v2395_v52  ;;  %v355_v50 = vpack.c.bf16 %v309_v48, %v307_v47  ;;  %v306_v51 = vld [vmem:[%s3153_s0 + $0x100] sm:$0xff]  ;;  %v308_v52 = vld [vmem:[%s3153_s0 + $0x110] sm:$0xff] }
  0x33   :  { %779 = vmatpush1.bf16.msra.mxu0 %v2397_v53  ;;  %972 = vmatpush1.bf16.msra.mxu1 %v2398_v54  ;;  %v311_v53 = vld [vmem:[%s3153_s0 + $0x128] sm:$0xff]  ;;  %v313_v54 = vld [vmem:[%s3153_s0 + $0x138] sm:$0xff] }
  0x34   :  { %780 = vmatprep.subr.bf16.mxu0 %v2399_v55  ;;  %973 = vmatprep.subr.bf16.mxu1 %v2401_v56  ;;  %v354_v55 = vpack.c.bf16 %v308_v52, %v306_v51  ;;  %v357_v56 = vpack.c.bf16 %v313_v54, %v311_v53 }
  0x37   :  { %781 = vmatpush1.bf16.msra.mxu0 %v2403_v57  ;;  %974 = vmatpush1.bf16.msra.mxu1 %v2404_v58  ;;  %v310_v57 = vld [vmem:[%s3153_s0 + $0x120] sm:$0xff]  ;;  %v312_v58 = vld [vmem:[%s3153_s0 + $0x130] sm:$0xff] }
  0x38   :  { %782 = vmatprep.subr.bf16.mxu0 %v2405_v59  ;;  %975 = vmatprep.subr.bf16.mxu1 %v2407_v60  ;;  %v315_v59 = vld [vmem:[%s3153_s0 + $0x148] sm:$0xff]  ;;  %v317_v60 = vld [vmem:[%s3153_s0 + $0x158] sm:$0xff] }
  0x3b   :  { %783 = vmatpush1.bf16.msra.mxu0 %v2409_v61  ;;  %976 = vmatpush1.bf16.msra.mxu1 %v2410_v62  ;;  %v356_v61 = vpack.c.bf16 %v312_v58, %v310_v57  ;;  %v359_v62 = vpack.c.bf16 %v317_v60, %v315_v59 }
  0x3c   :  { %784 = vmatprep.subr.bf16.mxu0 %v2411_v63  ;;  %977 = vmatprep.subr.bf16.mxu1 %v2413_v0  ;;  %v314_v63 = vld [vmem:[%s3153_s0 + $0x140] sm:$0xff]  ;;  %v316_v0 = vld [vmem:[%s3153_s0 + $0x150] sm:$0xff] }
  0x3d   :  { %v358_v3 = vpack.c.bf16 %v316_v0, %v314_v63 }
  0x3f   :  { %785 = vmatpush1.bf16.msra.mxu0 %v2415_v1  ;;  %978 = vmatpush1.bf16.msra.mxu1 %v2416_v2  ;;  %v319_v1 = vld [vmem:[%s3153_s0 + $0x168] sm:$0xff]  ;;  %v321_v2 = vld [vmem:[%s3153_s0 + $0x178] sm:$0xff] }
  0x40   :  { %v361_v4 = vpack.c.bf16 %v321_v2, %v319_v1 }
  0x42   :  { %787 = vmatmul.mubr.bf16.vlgmr.msra.gmra.mrb[0].mxu0 %v338_v7  ;;  %980 = vmatmul.mubr.bf16.vlgmr.msra.gmra.mrb[0].mxu1 %v338_v7  ;;  %v323_v7 = vld [vmem:[%s3153_s0 + $0x188] sm:$0xff] }
  0x43   :  { %796 = vmatprep.mubr.bf16.mxu0 %v341_v8  ;;  %989 = vmatprep.mubr.bf16.mxu1 %v341_v8  ;;  %v325_v8 = vld [vmem:[%s3153_s0 + $0x198] sm:$0xff] }
  0x44   :  { %v363_v10 = vpack.c.bf16 %v325_v8, %v323_v7 }
  0x4a   :  { %797 = vmatmul.mubr.bf16.gmra.mrb[4].mxu0 %v340_v13  ;;  %990 = vmatmul.mubr.bf16.gmra.mrb[4].mxu1 %v340_v13  ;;  %v327_v13 = vld [vmem:[%s3153_s0 + $0x1a8] sm:$0xff] }
  0x4b   :  { %806 = vmatprep.mubr.bf16.mxu0 %v343_v14  ;;  %999 = vmatprep.mubr.bf16.mxu1 %v343_v14  ;;  %v329_v14 = vld [vmem:[%s3153_s0 + $0x1b8] sm:$0xff] }
  0x4c   :  { %v365_v16 = vpack.c.bf16 %v329_v14, %v327_v13 }
  0x52   :  { %807 = vmatmul.mubr.bf16.gmra.mrb[8].mxu0 %v342_v19  ;;  %1000 = vmatmul.mubr.bf16.gmra.mrb[8].mxu1 %v342_v19  ;;  %v331_v19 = vld [vmem:[%s3153_s0 + $0x1c8] sm:$0xff] }
  0x53   :  { %816 = vmatprep.mubr.bf16.mxu0 %v345_v20  ;;  %1009 = vmatprep.mubr.bf16.mxu1 %v345_v20  ;;  %v333_v20 = vld [vmem:[%s3153_s0 + $0x1d8] sm:$0xff] }
  0x54   :  { %v367_v22 = vpack.c.bf16 %v333_v20, %v331_v19 }
  0x5a   :  { %817 = vmatmul.mubr.bf16.gmra.mrb[12].mxu0 %v344_v25  ;;  %1010 = vmatmul.mubr.bf16.gmra.mrb[12].mxu1 %v344_v25  ;;  %v335_v25 = vld [vmem:[%s3153_s0 + $0x1e8] sm:$0xff] }
  0x5b   :  { %826 = vmatprep.mubr.bf16.mxu0 %v347_v26  ;;  %1019 = vmatprep.mubr.bf16.mxu1 %v347_v26  ;;  %v337_v26 = vld [vmem:[%s3153_s0 + $0x1f8] sm:$0xff] }
  0x5c   :  { %v369_v28 = vpack.c.bf16 %v337_v26, %v335_v25 }
  0x62   :  { %827 = vmatmul.mubr.bf16.gmra.mrb[16].mxu0 %v346_v31  ;;  %1020 = vmatmul.mubr.bf16.gmra.mrb[16].mxu1 %v346_v31  ;;  %v368_v31 = vpack.c.bf16 %v336_v30, %v334_v29 }
  0x63   :  { %836 = vmatprep.mubr.bf16.mxu0 %v349_v32  ;;  %1029 = vmatprep.mubr.bf16.mxu1 %v349_v32  ;;  %v1529_v32 = vlaneseq }
  0x65   :  { %v1530_v33 = vshrl.u32 %v1529_v32, 7 }
  0x67   :  { %v1531_v34 = vsub.s32 0, %v1530_v33  ;;  %v1539_v35 = vsub.s32 2, %v1530_v33 }
  0x69   :  { %v2824_v39 = vrot.slane %v1527_v36, %v1531_v34  ;;  %v2826_v40 = vrot.slane %v1527_v36, %v1539_v35 }
  0x6a   :  { %837 = vmatmul.mubr.bf16.gmra.mrb[20].mxu0 %v348_v37  ;;  %1030 = vmatmul.mubr.bf16.gmra.mrb[20].mxu1 %v348_v37  ;;  %v1535_v37 = vsub.s32 1, %v1530_v33 }
  0x6b   :  { %846 = vmatprep.mubr.bf16.mxu0 %v351_v38  ;;  %1039 = vmatprep.mubr.bf16.mxu1 %v351_v38  ;;  %v1543_v38 = vsub.s32 3, %v1530_v33 }
  0x6c   :  { %v2828_v41 = vrot.slane %v1527_v36, %v1535_v37 }
  0x6d   :  { %v2830_v42 = vrot.slane %v1527_v36, %v1543_v38 }
  0x72   :  { %847 = vmatmul.mubr.bf16.gmra.mrb[24].mxu0 %v350_v43  ;;  %1040 = vmatmul.mubr.bf16.gmra.mrb[24].mxu1 %v350_v43 }
  0x73   :  { %856 = vmatprep.mubr.bf16.mxu0 %v353_v44  ;;  %1049 = vmatprep.mubr.bf16.mxu1 %v353_v44 }
  0x7a   :  { %857 = vmatmul.mubr.bf16.gmra.mrb[28].mxu0 %v352_v49  ;;  %1050 = vmatmul.mubr.bf16.gmra.mrb[28].mxu1 %v352_v49 }
  0x7b   :  { %866 = vmatprep.mubr.bf16.mxu0 %v355_v50  ;;  %1059 = vmatprep.mubr.bf16.mxu1 %v355_v50 }
  0x82   :  { %867 = vmatmul.mubr.bf16.gmra.mrb[32].mxu0 %v354_v55  ;;  %1060 = vmatmul.mubr.bf16.gmra.mrb[32].mxu1 %v354_v55 }
  0x83   :  { %876 = vmatprep.mubr.bf16.mxu0 %v357_v56  ;;  %1069 = vmatprep.mubr.bf16.mxu1 %v357_v56 }
  0x8a   :  { %877 = vmatmul.mubr.bf16.gmra.mrb[36].mxu0 %v356_v61  ;;  %1070 = vmatmul.mubr.bf16.gmra.mrb[36].mxu1 %v356_v61 }
  0x8b   :  { %886 = vmatprep.mubr.bf16.mxu0 %v359_v62  ;;  %1079 = vmatprep.mubr.bf16.mxu1 %v359_v62 }
  0x92   :  { %887 = vmatmul.mubr.bf16.gmra.mrb[40].mxu0 %v358_v3  ;;  %1080 = vmatmul.mubr.bf16.gmra.mrb[40].mxu1 %v358_v3 }
  0x93   :  { %896 = vmatprep.mubr.bf16.mxu0 %v361_v4  ;;  %1089 = vmatprep.mubr.bf16.mxu1 %v361_v4 }
  0x9a   :  { %897 = vmatmul.mubr.bf16.gmra.mrb[44].mxu0 %v360_v9  ;;  %1090 = vmatmul.mubr.bf16.gmra.mrb[44].mxu1 %v360_v9 }
  0x9b   :  { %906 = vmatprep.mubr.bf16.mxu0 %v363_v10  ;;  %1099 = vmatprep.mubr.bf16.mxu1 %v363_v10 }
  0xa2   :  { %907 = vmatmul.mubr.bf16.gmra.mrb[48].mxu0 %v362_v15  ;;  %1100 = vmatmul.mubr.bf16.gmra.mrb[48].mxu1 %v362_v15 }
  0xa3   :  { %916 = vmatprep.mubr.bf16.mxu0 %v365_v16  ;;  %1109 = vmatprep.mubr.bf16.mxu1 %v365_v16 }
  0xaa   :  { %917 = vmatmul.mubr.bf16.gmra.mrb[52].mxu0 %v364_v21  ;;  %1110 = vmatmul.mubr.bf16.gmra.mrb[52].mxu1 %v364_v21 }
  0xab   :  { %926 = vmatprep.mubr.bf16.mxu0 %v367_v22  ;;  %1119 = vmatprep.mubr.bf16.mxu1 %v367_v22 }
  0xb2   :  { %927 = vmatmul.mubr.bf16.gmra.mrb[56].mxu0 %v366_v27  ;;  %1120 = vmatmul.mubr.bf16.gmra.mrb[56].mxu1 %v366_v27 }
  0xb3   :  { %936 = vmatprep.mubr.bf16.mxu0 %v369_v28  ;;  %1129 = vmatprep.mubr.bf16.mxu1 %v369_v28 }
  0xba   :  { %937 = vmatmul.mubr.bf16.gmra.mrb[60].mxu0 %v368_v31  ;;  %1130 = vmatmul.mubr.bf16.gmra.mrb[60].mxu1 %v368_v31 }
 0x115   :  { %v788_v43 = vpop.f32.mrb[0].mxu0  ;;  %v981_v44 = vpop.f32.mrb[0].mxu1 }
 0x116   :  { %v1549_v45 = vadd.f32 %v2824_v39, %v788_v43  ;;  %v1551_v46 = vadd.f32 %v2826_v40, %v981_v44  ;;  %v790_v47 = vpop.f32.mrb[1].mxu0  ;;  %v983_v48 = vpop.f32.mrb[1].mxu1 }
 0x117   :  { %v1550_v49 = vadd.f32 %v2828_v41, %v790_v47  ;;  %v1552_v50 = vadd.f32 %v2830_v42, %v983_v48  ;;  %v792_v51 = vpop.f32.mrb[2].mxu0  ;;  %v985_v52 = vpop.f32.mrb[2].mxu1 }
 0x118   :  { %v1553_v53 = vadd.f32 %v2824_v39, %v792_v51  ;;  %v1555_v54 = vadd.f32 %v2826_v40, %v985_v52  ;;  %v794_v55 = vpop.f32.mrb[3].mxu0  ;;  %v987_v56 = vpop.f32.mrb[3].mxu1 }
 0x119   :  { %v2257_v57 = vpack.c.bf16 %v1550_v49, %v1549_v45  ;;  %v2258_v58 = vpack.c.bf16 %v1552_v50, %v1551_v46  ;;  %v1554_v59 = vadd.f32 %v2828_v41, %v794_v55  ;;  %v1556_v60 = vadd.f32 %v2830_v42, %v987_v56 }
 0x11b   :  { %2061 = vst [vmem:[%s3155_s3] sm:$0xff] %v2257_v57  ;;  %2062 = vst [vmem:[%s3155_s3 + $0x8] sm:$0xff] %v2258_v58  ;;  %v2259_v61 = vpack.c.bf16 %v1554_v59, %v1553_v53  ;;  %v2260_v62 = vpack.c.bf16 %v1556_v60, %v1555_v54 }
 0x11d   :  { %2063 = vst [vmem:[%s3155_s3 + $0x10] sm:$0xff] %v2259_v61  ;;  %2064 = vst [vmem:[%s3155_s3 + $0x18] sm:$0xff] %v2260_v62  ;;  %v798_v63 = vpop.f32.mrb[4].mxu0  ;;  %v991_v0 = vpop.f32.mrb[4].mxu1 }
 0x11e   :  { %v1557_v1 = vadd.f32 %v2824_v39, %v798_v63  ;;  %v1559_v2 = vadd.f32 %v2826_v40, %v991_v0  ;;  %v800_v3 = vpop.f32.mrb[5].mxu0  ;;  %v993_v4 = vpop.f32.mrb[5].mxu1 }
 0x11f   :  { %v1558_v5 = vadd.f32 %v2828_v41, %v800_v3  ;;  %v1560_v6 = vadd.f32 %v2830_v42, %v993_v4  ;;  %v802_v7 = vpop.f32.mrb[6].mxu0  ;;  %v995_v8 = vpop.f32.mrb[6].mxu1 }
 0x120   :  { %v1561_v9 = vadd.f32 %v2824_v39, %v802_v7  ;;  %v1563_v10 = vadd.f32 %v2826_v40, %v995_v8  ;;  %v804_v11 = vpop.f32.mrb[7].mxu0  ;;  %v997_v12 = vpop.f32.mrb[7].mxu1 }
 0x121   :  { %v2261_v13 = vpack.c.bf16 %v1558_v5, %v1557_v1  ;;  %v2262_v14 = vpack.c.bf16 %v1560_v6, %v1559_v2  ;;  %v1562_v15 = vadd.f32 %v2828_v41, %v804_v11  ;;  %v1564_v16 = vadd.f32 %v2830_v42, %v997_v12 }
 0x123   :  { %2065 = vst [vmem:[%s3155_s3 + $0x20] sm:$0xff] %v2261_v13  ;;  %2066 = vst [vmem:[%s3155_s3 + $0x28] sm:$0xff] %v2262_v14  ;;  %v2263_v17 = vpack.c.bf16 %v1562_v15, %v1561_v9  ;;  %v2264_v18 = vpack.c.bf16 %v1564_v16, %v1563_v10 }
 0x125   :  { %2067 = vst [vmem:[%s3155_s3 + $0x30] sm:$0xff] %v2263_v17  ;;  %2068 = vst [vmem:[%s3155_s3 + $0x38] sm:$0xff] %v2264_v18  ;;  %v808_v19 = vpop.f32.mrb[8].mxu0  ;;  %v1001_v20 = vpop.f32.mrb[8].mxu1 }
 0x126   :  { %v1565_v21 = vadd.f32 %v2824_v39, %v808_v19  ;;  %v1567_v22 = vadd.f32 %v2826_v40, %v1001_v20  ;;  %v810_v23 = vpop.f32.mrb[9].mxu0  ;;  %v1003_v24 = vpop.f32.mrb[9].mxu1 }
 0x127   :  { %v1566_v25 = vadd.f32 %v2828_v41, %v810_v23  ;;  %v1568_v26 = vadd.f32 %v2830_v42, %v1003_v24  ;;  %v812_v27 = vpop.f32.mrb[10].mxu0  ;;  %v1005_v28 = vpop.f32.mrb[10].mxu1 }
 0x128   :  { %v1569_v29 = vadd.f32 %v2824_v39, %v812_v27  ;;  %v1571_v30 = vadd.f32 %v2826_v40, %v1005_v28  ;;  %v814_v31 = vpop.f32.mrb[11].mxu0  ;;  %v1007_v32 = vpop.f32.mrb[11].mxu1 }
 0x129   :  { %v2265_v33 = vpack.c.bf16 %v1566_v25, %v1565_v21  ;;  %v2266_v34 = vpack.c.bf16 %v1568_v26, %v1567_v22  ;;  %v1570_v35 = vadd.f32 %v2828_v41, %v814_v31  ;;  %v1572_v36 = vadd.f32 %v2830_v42, %v1007_v32 }
 0x12b   :  { %2069 = vst [vmem:[%s3155_s3 + $0x40] sm:$0xff] %v2265_v33  ;;  %2070 = vst [vmem:[%s3155_s3 + $0x48] sm:$0xff] %v2266_v34  ;;  %v2267_v37 = vpack.c.bf16 %v1570_v35, %v1569_v29  ;;  %v2268_v38 = vpack.c.bf16 %v1572_v36, %v1571_v30 }
 0x12d   :  { %2071 = vst [vmem:[%s3155_s3 + $0x50] sm:$0xff] %v2267_v37  ;;  %2072 = vst [vmem:[%s3155_s3 + $0x58] sm:$0xff] %v2268_v38  ;;  %v818_v43 = vpop.f32.mrb[12].mxu0  ;;  %v1011_v44 = vpop.f32.mrb[12].mxu1 }
 0x12e   :  { %v1573_v45 = vadd.f32 %v2824_v39, %v818_v43  ;;  %v1575_v46 = vadd.f32 %v2826_v40, %v1011_v44  ;;  %v820_v47 = vpop.f32.mrb[13].mxu0  ;;  %v1013_v48 = vpop.f32.mrb[13].mxu1 }
 0x12f   :  { %v1574_v49 = vadd.f32 %v2828_v41, %v820_v47  ;;  %v1576_v50 = vadd.f32 %v2830_v42, %v1013_v48  ;;  %v822_v51 = vpop.f32.mrb[14].mxu0  ;;  %v1015_v52 = vpop.f32.mrb[14].mxu1 }
 0x130   :  { %v1577_v53 = vadd.f32 %v2824_v39, %v822_v51  ;;  %v1579_v54 = vadd.f32 %v2826_v40, %v1015_v52  ;;  %v824_v55 = vpop.f32.mrb[15].mxu0  ;;  %v1017_v56 = vpop.f32.mrb[15].mxu1 }
 0x131   :  { %v2269_v57 = vpack.c.bf16 %v1574_v49, %v1573_v45  ;;  %v2270_v58 = vpack.c.bf16 %v1576_v50, %v1575_v46  ;;  %v1578_v59 = vadd.f32 %v2828_v41, %v824_v55  ;;  %v1580_v60 = vadd.f32 %v2830_v42, %v1017_v56 }
 0x133   :  { %2073 = vst [vmem:[%s3155_s3 + $0x60] sm:$0xff] %v2269_v57  ;;  %2074 = vst [vmem:[%s3155_s3 + $0x68] sm:$0xff] %v2270_v58  ;;  %v2271_v61 = vpack.c.bf16 %v1578_v59, %v1577_v53  ;;  %v2272_v62 = vpack.c.bf16 %v1580_v60, %v1579_v54 }
 0x135   :  { %2075 = vst [vmem:[%s3155_s3 + $0x70] sm:$0xff] %v2271_v61  ;;  %2076 = vst [vmem:[%s3155_s3 + $0x78] sm:$0xff] %v2272_v62  ;;  %v828_v63 = vpop.f32.mrb[16].mxu0  ;;  %v1021_v0 = vpop.f32.mrb[16].mxu1 }
 0x136   :  { %v1581_v1 = vadd.f32 %v2824_v39, %v828_v63  ;;  %v1583_v2 = vadd.f32 %v2826_v40, %v1021_v0  ;;  %v830_v3 = vpop.f32.mrb[17].mxu0  ;;  %v1023_v4 = vpop.f32.mrb[17].mxu1 }
 0x137   :  { %v1582_v5 = vadd.f32 %v2828_v41, %v830_v3  ;;  %v1584_v6 = vadd.f32 %v2830_v42, %v1023_v4  ;;  %v832_v7 = vpop.f32.mrb[18].mxu0  ;;  %v1025_v8 = vpop.f32.mrb[18].mxu1 }
 0x138   :  { %v1585_v9 = vadd.f32 %v2824_v39, %v832_v7  ;;  %v1587_v10 = vadd.f32 %v2826_v40, %v1025_v8  ;;  %v834_v11 = vpop.f32.mrb[19].mxu0  ;;  %v1027_v12 = vpop.f32.mrb[19].mxu1 }
 0x139   :  { %v2273_v13 = vpack.c.bf16 %v1582_v5, %v1581_v1  ;;  %v2274_v14 = vpack.c.bf16 %v1584_v6, %v1583_v2  ;;  %v1586_v15 = vadd.f32 %v2828_v41, %v834_v11  ;;  %v1588_v16 = vadd.f32 %v2830_v42, %v1027_v12 }
 0x13b   :  { %2077 = vst [vmem:[%s3155_s3 + $0x80] sm:$0xff] %v2273_v13  ;;  %2078 = vst [vmem:[%s3155_s3 + $0x88] sm:$0xff] %v2274_v14  ;;  %v2275_v17 = vpack.c.bf16 %v1586_v15, %v1585_v9  ;;  %v2276_v18 = vpack.c.bf16 %v1588_v16, %v1587_v10 }
 0x13d   :  { %2079 = vst [vmem:[%s3155_s3 + $0x90] sm:$0xff] %v2275_v17  ;;  %2080 = vst [vmem:[%s3155_s3 + $0x98] sm:$0xff] %v2276_v18  ;;  %v838_v19 = vpop.f32.mrb[20].mxu0  ;;  %v1031_v20 = vpop.f32.mrb[20].mxu1 }
 0x13e   :  { %v1589_v21 = vadd.f32 %v2824_v39, %v838_v19  ;;  %v1591_v22 = vadd.f32 %v2826_v40, %v1031_v20  ;;  %v840_v23 = vpop.f32.mrb[21].mxu0  ;;  %v1033_v24 = vpop.f32.mrb[21].mxu1 }
 0x13f   :  { %v1590_v25 = vadd.f32 %v2828_v41, %v840_v23  ;;  %v1592_v26 = vadd.f32 %v2830_v42, %v1033_v24  ;;  %v842_v27 = vpop.f32.mrb[22].mxu0  ;;  %v1035_v28 = vpop.f32.mrb[22].mxu1 }
 0x140   :  { %v1593_v29 = vadd.f32 %v2824_v39, %v842_v27  ;;  %v1595_v30 = vadd.f32 %v2826_v40, %v1035_v28  ;;  %v844_v31 = vpop.f32.mrb[23].mxu0  ;;  %v1037_v32 = vpop.f32.mrb[23].mxu1 }
 0x141   :  { %v2277_v33 = vpack.c.bf16 %v1590_v25, %v1589_v21  ;;  %v2278_v34 = vpack.c.bf16 %v1592_v26, %v1591_v22  ;;  %v1594_v35 = vadd.f32 %v2828_v41, %v844_v31  ;;  %v1596_v36 = vadd.f32 %v2830_v42, %v1037_v32 }
 0x143   :  { %2081 = vst [vmem:[%s3155_s3 + $0xa0] sm:$0xff] %v2277_v33  ;;  %2082 = vst [vmem:[%s3155_s3 + $0xa8] sm:$0xff] %v2278_v34  ;;  %v2279_v37 = vpack.c.bf16 %v1594_v35, %v1593_v29  ;;  %v2280_v38 = vpack.c.bf16 %v1596_v36, %v1595_v30 }
 0x145   :  { %2083 = vst [vmem:[%s3155_s3 + $0xb0] sm:$0xff] %v2279_v37  ;;  %2084 = vst [vmem:[%s3155_s3 + $0xb8] sm:$0xff] %v2280_v38  ;;  %v848_v43 = vpop.f32.mrb[24].mxu0  ;;  %v1041_v44 = vpop.f32.mrb[24].mxu1 }
 0x146   :  { %v1597_v45 = vadd.f32 %v2824_v39, %v848_v43  ;;  %v1599_v46 = vadd.f32 %v2826_v40, %v1041_v44  ;;  %v850_v47 = vpop.f32.mrb[25].mxu0  ;;  %v1043_v48 = vpop.f32.mrb[25].mxu1 }
 0x147   :  { %v1598_v49 = vadd.f32 %v2828_v41, %v850_v47  ;;  %v1600_v50 = vadd.f32 %v2830_v42, %v1043_v48  ;;  %v852_v51 = vpop.f32.mrb[26].mxu0  ;;  %v1045_v52 = vpop.f32.mrb[26].mxu1 }
 0x148   :  { %v1601_v53 = vadd.f32 %v2824_v39, %v852_v51  ;;  %v1603_v54 = vadd.f32 %v2826_v40, %v1045_v52  ;;  %v854_v55 = vpop.f32.mrb[27].mxu0  ;;  %v1047_v56 = vpop.f32.mrb[27].mxu1 }
 0x149   :  { %v2281_v57 = vpack.c.bf16 %v1598_v49, %v1597_v45  ;;  %v2282_v58 = vpack.c.bf16 %v1600_v50, %v1599_v46  ;;  %v1602_v59 = vadd.f32 %v2828_v41, %v854_v55  ;;  %v1604_v60 = vadd.f32 %v2830_v42, %v1047_v56 }
 0x14b   :  { %2085 = vst [vmem:[%s3155_s3 + $0xc0] sm:$0xff] %v2281_v57  ;;  %2086 = vst [vmem:[%s3155_s3 + $0xc8] sm:$0xff] %v2282_v58  ;;  %v2283_v61 = vpack.c.bf16 %v1602_v59, %v1601_v53  ;;  %v2284_v62 = vpack.c.bf16 %v1604_v60, %v1603_v54 }
 0x14d   :  { %2087 = vst [vmem:[%s3155_s3 + $0xd0] sm:$0xff] %v2283_v61  ;;  %2088 = vst [vmem:[%s3155_s3 + $0xd8] sm:$0xff] %v2284_v62  ;;  %v858_v63 = vpop.f32.mrb[28].mxu0  ;;  %v1051_v0 = vpop.f32.mrb[28].mxu1 }
 0x14e   :  { %v1605_v1 = vadd.f32 %v2824_v39, %v858_v63  ;;  %v1607_v2 = vadd.f32 %v2826_v40, %v1051_v0  ;;  %v860_v3 = vpop.f32.mrb[29].mxu0  ;;  %v1053_v4 = vpop.f32.mrb[29].mxu1 }
 0x14f   :  { %v1606_v5 = vadd.f32 %v2828_v41, %v860_v3  ;;  %v1608_v6 = vadd.f32 %v2830_v42, %v1053_v4  ;;  %v862_v7 = vpop.f32.mrb[30].mxu0  ;;  %v1055_v8 = vpop.f32.mrb[30].mxu1 }
 0x150   :  { %v1609_v9 = vadd.f32 %v2824_v39, %v862_v7  ;;  %v1611_v10 = vadd.f32 %v2826_v40, %v1055_v8  ;;  %v864_v11 = vpop.f32.mrb[31].mxu0  ;;  %v1057_v12 = vpop.f32.mrb[31].mxu1 }
 0x151   :  { %v2285_v13 = vpack.c.bf16 %v1606_v5, %v1605_v1  ;;  %v2286_v14 = vpack.c.bf16 %v1608_v6, %v1607_v2  ;;  %v1610_v15 = vadd.f32 %v2828_v41, %v864_v11  ;;  %v1612_v16 = vadd.f32 %v2830_v42, %v1057_v12 }
 0x153   :  { %2089 = vst [vmem:[%s3155_s3 + $0xe0] sm:$0xff] %v2285_v13  ;;  %2090 = vst [vmem:[%s3155_s3 + $0xe8] sm:$0xff] %v2286_v14  ;;  %v2287_v17 = vpack.c.bf16 %v1610_v15, %v1609_v9  ;;  %v2288_v18 = vpack.c.bf16 %v1612_v16, %v1611_v10 }
 0x155   :  { %2091 = vst [vmem:[%s3155_s3 + $0xf0] sm:$0xff] %v2287_v17  ;;  %2092 = vst [vmem:[%s3155_s3 + $0xf8] sm:$0xff] %v2288_v18  ;;  %v868_v19 = vpop.f32.mrb[32].mxu0  ;;  %v1061_v20 = vpop.f32.mrb[32].mxu1 }
 0x156   :  { %v1613_v21 = vadd.f32 %v2824_v39, %v868_v19  ;;  %v1615_v22 = vadd.f32 %v2826_v40, %v1061_v20  ;;  %v870_v23 = vpop.f32.mrb[33].mxu0  ;;  %v1063_v24 = vpop.f32.mrb[33].mxu1 }
 0x157   :  { %v1614_v25 = vadd.f32 %v2828_v41, %v870_v23  ;;  %v1616_v26 = vadd.f32 %v2830_v42, %v1063_v24  ;;  %v872_v27 = vpop.f32.mrb[34].mxu0  ;;  %v1065_v28 = vpop.f32.mrb[34].mxu1 }
 0x158   :  { %v1617_v29 = vadd.f32 %v2824_v39, %v872_v27  ;;  %v1619_v30 = vadd.f32 %v2826_v40, %v1065_v28  ;;  %v874_v31 = vpop.f32.mrb[35].mxu0  ;;  %v1067_v32 = vpop.f32.mrb[35].mxu1 }
 0x159   :  { %v2289_v33 = vpack.c.bf16 %v1614_v25, %v1613_v21  ;;  %v2290_v34 = vpack.c.bf16 %v1616_v26, %v1615_v22  ;;  %v1618_v35 = vadd.f32 %v2828_v41, %v874_v31  ;;  %v1620_v36 = vadd.f32 %v2830_v42, %v1067_v32 }
 0x15b   :  { %2093 = vst [vmem:[%s3155_s3 + $0x100] sm:$0xff] %v2289_v33  ;;  %2094 = vst [vmem:[%s3155_s3 + $0x108] sm:$0xff] %v2290_v34  ;;  %v2291_v37 = vpack.c.bf16 %v1618_v35, %v1617_v29  ;;  %v2292_v38 = vpack.c.bf16 %v1620_v36, %v1619_v30 }
 0x15d   :  { %2095 = vst [vmem:[%s3155_s3 + $0x110] sm:$0xff] %v2291_v37  ;;  %2096 = vst [vmem:[%s3155_s3 + $0x118] sm:$0xff] %v2292_v38  ;;  %v878_v43 = vpop.f32.mrb[36].mxu0  ;;  %v1071_v44 = vpop.f32.mrb[36].mxu1 }
 0x15e   :  { %v1621_v45 = vadd.f32 %v2824_v39, %v878_v43  ;;  %v1623_v46 = vadd.f32 %v2826_v40, %v1071_v44  ;;  %v880_v47 = vpop.f32.mrb[37].mxu0  ;;  %v1073_v48 = vpop.f32.mrb[37].mxu1 }
 0x15f   :  { %v1622_v49 = vadd.f32 %v2828_v41, %v880_v47  ;;  %v1624_v50 = vadd.f32 %v2830_v42, %v1073_v48  ;;  %v882_v51 = vpop.f32.mrb[38].mxu0  ;;  %v1075_v52 = vpop.f32.mrb[38].mxu1 }
 0x160   :  { %v1625_v53 = vadd.f32 %v2824_v39, %v882_v51  ;;  %v1627_v54 = vadd.f32 %v2826_v40, %v1075_v52  ;;  %v884_v55 = vpop.f32.mrb[39].mxu0  ;;  %v1077_v56 = vpop.f32.mrb[39].mxu1 }
 0x161   :  { %v2293_v57 = vpack.c.bf16 %v1622_v49, %v1621_v45  ;;  %v2294_v58 = vpack.c.bf16 %v1624_v50, %v1623_v46  ;;  %v1626_v59 = vadd.f32 %v2828_v41, %v884_v55  ;;  %v1628_v60 = vadd.f32 %v2830_v42, %v1077_v56 }
 0x163   :  { %2097 = vst [vmem:[%s3155_s3 + $0x120] sm:$0xff] %v2293_v57  ;;  %2098 = vst [vmem:[%s3155_s3 + $0x128] sm:$0xff] %v2294_v58  ;;  %v2295_v61 = vpack.c.bf16 %v1626_v59, %v1625_v53  ;;  %v2296_v62 = vpack.c.bf16 %v1628_v60, %v1627_v54 }
 0x165   :  { %2099 = vst [vmem:[%s3155_s3 + $0x130] sm:$0xff] %v2295_v61  ;;  %2100 = vst [vmem:[%s3155_s3 + $0x138] sm:$0xff] %v2296_v62  ;;  %v888_v63 = vpop.f32.mrb[40].mxu0  ;;  %v1081_v0 = vpop.f32.mrb[40].mxu1 }
 0x166   :  { %v1629_v1 = vadd.f32 %v2824_v39, %v888_v63  ;;  %v1631_v2 = vadd.f32 %v2826_v40, %v1081_v0  ;;  %v890_v3 = vpop.f32.mrb[41].mxu0  ;;  %v1083_v4 = vpop.f32.mrb[41].mxu1 }
 0x167   :  { %v1630_v5 = vadd.f32 %v2828_v41, %v890_v3  ;;  %v1632_v6 = vadd.f32 %v2830_v42, %v1083_v4  ;;  %v892_v7 = vpop.f32.mrb[42].mxu0  ;;  %v1085_v8 = vpop.f32.mrb[42].mxu1 }
 0x168   :  { %v1633_v9 = vadd.f32 %v2824_v39, %v892_v7  ;;  %v1635_v10 = vadd.f32 %v2826_v40, %v1085_v8  ;;  %v894_v11 = vpop.f32.mrb[43].mxu0  ;;  %v1087_v12 = vpop.f32.mrb[43].mxu1 }
 0x169   :  { %v2297_v13 = vpack.c.bf16 %v1630_v5, %v1629_v1  ;;  %v2298_v14 = vpack.c.bf16 %v1632_v6, %v1631_v2  ;;  %v1634_v15 = vadd.f32 %v2828_v41, %v894_v11  ;;  %v1636_v16 = vadd.f32 %v2830_v42, %v1087_v12 }
 0x16b   :  { %2101 = vst [vmem:[%s3155_s3 + $0x140] sm:$0xff] %v2297_v13  ;;  %2102 = vst [vmem:[%s3155_s3 + $0x148] sm:$0xff] %v2298_v14  ;;  %v2299_v17 = vpack.c.bf16 %v1634_v15, %v1633_v9  ;;  %v2300_v18 = vpack.c.bf16 %v1636_v16, %v1635_v10 }
 0x16d   :  { %2103 = vst [vmem:[%s3155_s3 + $0x150] sm:$0xff] %v2299_v17  ;;  %2104 = vst [vmem:[%s3155_s3 + $0x158] sm:$0xff] %v2300_v18  ;;  %v898_v19 = vpop.f32.mrb[44].mxu0  ;;  %v1091_v20 = vpop.f32.mrb[44].mxu1 }
 0x16e   :  { %v1637_v21 = vadd.f32 %v2824_v39, %v898_v19  ;;  %v1639_v22 = vadd.f32 %v2826_v40, %v1091_v20  ;;  %v900_v23 = vpop.f32.mrb[45].mxu0  ;;  %v1093_v24 = vpop.f32.mrb[45].mxu1 }
 0x16f   :  { %v1638_v25 = vadd.f32 %v2828_v41, %v900_v23  ;;  %v1640_v26 = vadd.f32 %v2830_v42, %v1093_v24  ;;  %v902_v27 = vpop.f32.mrb[46].mxu0  ;;  %v1095_v28 = vpop.f32.mrb[46].mxu1 }
 0x170   :  { %v1641_v29 = vadd.f32 %v2824_v39, %v902_v27  ;;  %v1643_v30 = vadd.f32 %v2826_v40, %v1095_v28  ;;  %v904_v31 = vpop.f32.mrb[47].mxu0  ;;  %v1097_v32 = vpop.f32.mrb[47].mxu1 }
 0x171   :  { %v2301_v33 = vpack.c.bf16 %v1638_v25, %v1637_v21  ;;  %v2302_v34 = vpack.c.bf16 %v1640_v26, %v1639_v22  ;;  %v1642_v35 = vadd.f32 %v2828_v41, %v904_v31  ;;  %v1644_v36 = vadd.f32 %v2830_v42, %v1097_v32 }
 0x173   :  { %2105 = vst [vmem:[%s3155_s3 + $0x160] sm:$0xff] %v2301_v33  ;;  %2106 = vst [vmem:[%s3155_s3 + $0x168] sm:$0xff] %v2302_v34  ;;  %v2303_v37 = vpack.c.bf16 %v1642_v35, %v1641_v29  ;;  %v2304_v38 = vpack.c.bf16 %v1644_v36, %v1643_v30 }
 0x175   :  { %2107 = vst [vmem:[%s3155_s3 + $0x170] sm:$0xff] %v2303_v37  ;;  %2108 = vst [vmem:[%s3155_s3 + $0x178] sm:$0xff] %v2304_v38  ;;  %v908_v43 = vpop.f32.mrb[48].mxu0  ;;  %v1101_v44 = vpop.f32.mrb[48].mxu1 }
 0x176   :  { %v1645_v45 = vadd.f32 %v2824_v39, %v908_v43  ;;  %v1647_v46 = vadd.f32 %v2826_v40, %v1101_v44  ;;  %v910_v47 = vpop.f32.mrb[49].mxu0  ;;  %v1103_v48 = vpop.f32.mrb[49].mxu1 }
 0x177   :  { %v1646_v49 = vadd.f32 %v2828_v41, %v910_v47  ;;  %v1648_v50 = vadd.f32 %v2830_v42, %v1103_v48  ;;  %v912_v51 = vpop.f32.mrb[50].mxu0  ;;  %v1105_v52 = vpop.f32.mrb[50].mxu1 }
 0x178   :  { %v1649_v53 = vadd.f32 %v2824_v39, %v912_v51  ;;  %v1651_v54 = vadd.f32 %v2826_v40, %v1105_v52  ;;  %v914_v55 = vpop.f32.mrb[51].mxu0  ;;  %v1107_v56 = vpop.f32.mrb[51].mxu1 }
 0x179   :  { %v2305_v57 = vpack.c.bf16 %v1646_v49, %v1645_v45  ;;  %v2306_v58 = vpack.c.bf16 %v1648_v50, %v1647_v46  ;;  %v1650_v59 = vadd.f32 %v2828_v41, %v914_v55  ;;  %v1652_v60 = vadd.f32 %v2830_v42, %v1107_v56 }
 0x17b   :  { %2109 = vst [vmem:[%s3155_s3 + $0x180] sm:$0xff] %v2305_v57  ;;  %2110 = vst [vmem:[%s3155_s3 + $0x188] sm:$0xff] %v2306_v58  ;;  %v2307_v61 = vpack.c.bf16 %v1650_v59, %v1649_v53  ;;  %v2308_v62 = vpack.c.bf16 %v1652_v60, %v1651_v54 }
 0x17d   :  { %2111 = vst [vmem:[%s3155_s3 + $0x190] sm:$0xff] %v2307_v61  ;;  %2112 = vst [vmem:[%s3155_s3 + $0x198] sm:$0xff] %v2308_v62  ;;  %v918_v63 = vpop.f32.mrb[52].mxu0  ;;  %v1111_v0 = vpop.f32.mrb[52].mxu1 }
 0x17e   :  { %v1653_v1 = vadd.f32 %v2824_v39, %v918_v63  ;;  %v1655_v2 = vadd.f32 %v2826_v40, %v1111_v0  ;;  %v920_v3 = vpop.f32.mrb[53].mxu0  ;;  %v1113_v4 = vpop.f32.mrb[53].mxu1 }
 0x17f   :  { %v1654_v5 = vadd.f32 %v2828_v41, %v920_v3  ;;  %v1656_v6 = vadd.f32 %v2830_v42, %v1113_v4  ;;  %v922_v7 = vpop.f32.mrb[54].mxu0  ;;  %v1115_v8 = vpop.f32.mrb[54].mxu1 }
 0x180   :  { %v1657_v9 = vadd.f32 %v2824_v39, %v922_v7  ;;  %v1659_v10 = vadd.f32 %v2826_v40, %v1115_v8  ;;  %v924_v11 = vpop.f32.mrb[55].mxu0  ;;  %v1117_v12 = vpop.f32.mrb[55].mxu1 }
 0x181   :  { %v2309_v13 = vpack.c.bf16 %v1654_v5, %v1653_v1  ;;  %v2310_v14 = vpack.c.bf16 %v1656_v6, %v1655_v2  ;;  %v1658_v15 = vadd.f32 %v2828_v41, %v924_v11  ;;  %v1660_v16 = vadd.f32 %v2830_v42, %v1117_v12 }
 0x183   :  { %2113 = vst [vmem:[%s3155_s3 + $0x1a0] sm:$0xff] %v2309_v13  ;;  %2114 = vst [vmem:[%s3155_s3 + $0x1a8] sm:$0xff] %v2310_v14  ;;  %v2311_v17 = vpack.c.bf16 %v1658_v15, %v1657_v9  ;;  %v2312_v18 = vpack.c.bf16 %v1660_v16, %v1659_v10 }
 0x185   :  { %2115 = vst [vmem:[%s3155_s3 + $0x1b0] sm:$0xff] %v2311_v17  ;;  %2116 = vst [vmem:[%s3155_s3 + $0x1b8] sm:$0xff] %v2312_v18  ;;  %v928_v19 = vpop.f32.mrb[56].mxu0  ;;  %v1121_v20 = vpop.f32.mrb[56].mxu1 }
 0x186   :  { %v1661_v21 = vadd.f32 %v2824_v39, %v928_v19  ;;  %v1663_v22 = vadd.f32 %v2826_v40, %v1121_v20  ;;  %v930_v23 = vpop.f32.mrb[57].mxu0  ;;  %v1123_v24 = vpop.f32.mrb[57].mxu1 }
 0x187   :  { %v1662_v25 = vadd.f32 %v2828_v41, %v930_v23  ;;  %v1664_v26 = vadd.f32 %v2830_v42, %v1123_v24  ;;  %v932_v27 = vpop.f32.mrb[58].mxu0  ;;  %v1125_v28 = vpop.f32.mrb[58].mxu1 }
 0x188   :  { %v1665_v29 = vadd.f32 %v2824_v39, %v932_v27  ;;  %v1667_v30 = vadd.f32 %v2826_v40, %v1125_v28  ;;  %v934_v31 = vpop.f32.mrb[59].mxu0  ;;  %v1127_v32 = vpop.f32.mrb[59].mxu1 }
 0x189   :  { %v2313_v33 = vpack.c.bf16 %v1662_v25, %v1661_v21  ;;  %v2314_v34 = vpack.c.bf16 %v1664_v26, %v1663_v22  ;;  %v1666_v35 = vadd.f32 %v2828_v41, %v934_v31  ;;  %v1668_v36 = vadd.f32 %v2830_v42, %v1127_v32 }
 0x18b   :  { %2117 = vst [vmem:[%s3155_s3 + $0x1c0] sm:$0xff] %v2313_v33  ;;  %2118 = vst [vmem:[%s3155_s3 + $0x1c8] sm:$0xff] %v2314_v34  ;;  %v2315_v37 = vpack.c.bf16 %v1666_v35, %v1665_v29  ;;  %v2316_v38 = vpack.c.bf16 %v1668_v36, %v1667_v30 }
 0x18d   :  { %2119 = vst [vmem:[%s3155_s3 + $0x1d0] sm:$0xff] %v2315_v37  ;;  %2120 = vst [vmem:[%s3155_s3 + $0x1d8] sm:$0xff] %v2316_v38  ;;  %v938_v43 = vpop.f32.mrb[60].mxu0  ;;  %v1131_v44 = vpop.f32.mrb[60].mxu1 }
 0x18e   :  { %v1669_v45 = vadd.f32 %v2824_v39, %v938_v43  ;;  %v1671_v46 = vadd.f32 %v2826_v40, %v1131_v44  ;;  %v940_v47 = vpop.f32.mrb[61].mxu0  ;;  %v1133_v48 = vpop.f32.mrb[61].mxu1 }
 0x18f   :  { %v1670_v49 = vadd.f32 %v2828_v41, %v940_v47  ;;  %v1672_v50 = vadd.f32 %v2830_v42, %v1133_v48  ;;  %v942_v51 = vpop.f32.mrb[62].mxu0  ;;  %v1135_v52 = vpop.f32.mrb[62].mxu1 }
 0x190   :  { %v1673_v53 = vadd.f32 %v2824_v39, %v942_v51  ;;  %v1675_v54 = vadd.f32 %v2826_v40, %v1135_v52  ;;  %v944_v55 = vpop.f32.mrb[63].mxu0  ;;  %v1137_v56 = vpop.f32.mrb[63].mxu1 }
 0x191   :  { %v2317_v57 = vpack.c.bf16 %v1670_v49, %v1669_v45  ;;  %v2318_v58 = vpack.c.bf16 %v1672_v50, %v1671_v46  ;;  %v1674_v59 = vadd.f32 %v2828_v41, %v944_v55  ;;  %v1676_v60 = vadd.f32 %v2830_v42, %v1137_v56 }
 0x193   :  { %2121 = vst [vmem:[%s3155_s3 + $0x1e0] sm:$0xff] %v2317_v57  ;;  %2122 = vst [vmem:[%s3155_s3 + $0x1e8] sm:$0xff] %v2318_v58  ;;  %v2319_v61 = vpack.c.bf16 %v1674_v59, %v1673_v53  ;;  %v2320_v39 = vpack.c.bf16 %v1676_v60, %v1675_v54 }
 0x195   :  { %2123 = vst [vmem:[%s3155_s3 + $0x1f0] sm:$0xff] %v2319_v61  ;;  %2124 = vst [vmem:[%s3155_s3 + $0x1f8] sm:$0xff] %v2320_v39 }

// kernel: decoder_layer.10
= control target key start
LH: loop header
LB: loop body
LE: loop exit
PB: predicated region body
PF: predicated region fallthrough
CT: control target
= control target key end

     0   :  { %s3536_s1 = inlined_call_operand.vmem [shape: bf16[256,256], index: 1, kind: input, shape index: {}]   ;;  %s3537_s0 = inlined_call_operand.vmem [shape: bf16[256,256], index: 0, kind: input, shape index: {}]   ;;  %s3538_s2 = inlined_call_operand.vmem [shape: f32[1,256], index: 2, kind: input, shape index: {}]   ;;  %s3539_s3 = inlined_call_operand.vmem [shape: f32[256,256], index: 3, kind: input, shape index: {}]   ;;  %s3540_s4 = inlined_call_operand.vmem [shape: f32[1,256], index: 4, kind: input, shape index: {}]   ;;  %s3541_s5 = inlined_call_operand.vmem [shape: f32[1,256], index: 5, kind: input, shape index: {}]   ;;  %s3542_s6 = inlined_call_operand.vmem [shape: f32[256,256], index: 6, kind: output, shape index: {}]  }
   0x1   :  { %v1960_v0 = vld [vmem:[%s3536_s1 + $0x4] ss:$8 sps:$4 sm:$0xff]   ;;  %v1962_v1 = vld [vmem:[%s3536_s1] ss:$8 sps:$4 sm:$0xff]   ;;  %v1963_v2 = vld [vmem:[%s3536_s1 + $0x14] ss:$8 sps:$4 sm:$0xff]  }
   0x2   :  { %539 = vmatprep.subr.bf16.mxu0 %v1960_v0  ;;  %1928 = vmatprep.subr.bf16.mxu1 %v1960_v0  ;;  %v1965_v3 = vld [vmem:[%s3536_s1 + $0x10] ss:$8 sps:$4 sm:$0xff]   ;;  %v1966_v4 = vld [vmem:[%s3536_s1 + $0x24] ss:$8 sps:$4 sm:$0xff]   ;;  %v1968_v5 = vld [vmem:[%s3536_s1 + $0x20] ss:$8 sps:$4 sm:$0xff]   ;;  %v929_v0 = vlaneseq }
   0x3   :  { %540 = vmatpush1.bf16.msra.mxu0 %v1962_v1  ;;  %1944 = vmatpush1.bf16.msra.mxu1 %v1962_v1  ;;  %v1969_v6 = vld [vmem:[%s3536_s1 + $0x34] ss:$8 sps:$4 sm:$0xff]   ;;  %v1971_v7 = vld [vmem:[%s3536_s1 + $0x30] ss:$8 sps:$4 sm:$0xff]   ;;  %v1972_v8 = vld [vmem:[%s3536_s1 + $0x44] ss:$8 sps:$4 sm:$0xff]  }
   0x4   :  { %541 = vmatprep.subr.bf16.mxu0 %v1963_v2  ;;  %1929 = vmatprep.subr.bf16.mxu1 %v1963_v2  ;;  %v1974_v9 = vld [vmem:[%s3536_s1 + $0x40] ss:$8 sps:$4 sm:$0xff]   ;;  %v1975_v10 = vld [vmem:[%s3536_s1 + $0x54] ss:$8 sps:$4 sm:$0xff]   ;;  %v1977_v11 = vld [vmem:[%s3536_s1 + $0x50] ss:$8 sps:$4 sm:$0xff]  }
   0x5   :  { %v1978_v12 = vld [vmem:[%s3536_s1 + $0x64] ss:$8 sps:$4 sm:$0xff]   ;;  %v1980_v14 = vld [vmem:[%s3536_s1 + $0x60] ss:$8 sps:$4 sm:$0xff]   ;;  %v1981_v16 = vld [vmem:[%s3536_s1 + $0x74] ss:$8 sps:$4 sm:$0xff]  }
   0x6   :  { %v2010_v13 = vld [vmem:[%s3537_s0 + $0x4] ss:$8 sps:$4 sm:$0xff]   ;;  %v1983_v17 = vld [vmem:[%s3536_s1 + $0x70] ss:$8 sps:$4 sm:$0xff]   ;;  %v1986_v19 = vld [vmem:[%s3536_s1 + $0x80] ss:$8 sps:$4 sm:$0xff]  }
   0x7   :  { %542 = vmatpush1.bf16.msra.mxu0 %v1965_v3  ;;  %1945 = vmatpush1.bf16.msra.mxu1 %v1965_v3  ;;  %v2013_v15 = vld [vmem:[%s3537_s0 + $0x84] ss:$8 sps:$4 sm:$0xff]   ;;  %v1987_v20 = vld [vmem:[%s3536_s1 + $0x94] ss:$8 sps:$4 sm:$0xff]   ;;  %v1989_v21 = vld [vmem:[%s3536_s1 + $0x90] ss:$8 sps:$4 sm:$0xff]  }
   0x8   :  { %543 = vmatprep.subr.bf16.mxu0 %v1966_v4  ;;  %1930 = vmatprep.subr.bf16.mxu1 %v1966_v4  ;;  %v1984_v18 = vld [vmem:[%s3536_s1 + $0x84] ss:$8 sps:$4 sm:$0xff]   ;;  %v1992_v23 = vld [vmem:[%s3536_s1 + $0xa0] ss:$8 sps:$4 sm:$0xff]   ;;  %v1993_v24 = vld [vmem:[%s3536_s1 + $0xb4] ss:$8 sps:$4 sm:$0xff]  }
   0x9   :  { %571 = vmatprep.mubr.bf16.mxu0 %v2010_v13  ;;  %651 = vmatprep.mubr.bf16.mxu1 %v2013_v15  ;;  %v1990_v22 = vld [vmem:[%s3536_s1 + $0xa4] ss:$8 sps:$4 sm:$0xff]   ;;  %v1995_v25 = vld [vmem:[%s3536_s1 + $0xb0] ss:$8 sps:$4 sm:$0xff]   ;;  %v1998_v27 = vld [vmem:[%s3536_s1 + $0xc0] ss:$8 sps:$4 sm:$0xff]  }
   0xa   :  { %v1996_v26 = vld [vmem:[%s3536_s1 + $0xc4] ss:$8 sps:$4 sm:$0xff]   ;;  %v1999_v28 = vld [vmem:[%s3536_s1 + $0xd4] ss:$8 sps:$4 sm:$0xff]   ;;  %v2001_v29 = vld [vmem:[%s3536_s1 + $0xd0] ss:$8 sps:$4 sm:$0xff]  }
   0xb   :  { %544 = vmatpush1.bf16.msra.mxu0 %v1968_v5  ;;  %1946 = vmatpush1.bf16.msra.mxu1 %v1968_v5  ;;  %v2002_v30 = vld [vmem:[%s3536_s1 + $0xe4] ss:$8 sps:$4 sm:$0xff]   ;;  %v2004_v31 = vld [vmem:[%s3536_s1 + $0xe0] ss:$8 sps:$4 sm:$0xff]   ;;  %v2005_v32 = vld [vmem:[%s3536_s1 + $0xf4] ss:$8 sps:$4 sm:$0xff]  }
   0xc   :  { %545 = vmatprep.subr.bf16.mxu0 %v1969_v6  ;;  %1931 = vmatprep.subr.bf16.mxu1 %v1969_v6  ;;  %v2007_v33 = vld [vmem:[%s3536_s1 + $0xf0] ss:$8 sps:$4 sm:$0xff]   ;;  %v2008_v34 = vld [vmem:[%s3537_s0] ss:$8 sps:$4 sm:$0xff]   ;;  %v2014_v36 = vld [vmem:[%s3537_s0 + $0x14] ss:$8 sps:$4 sm:$0xff]  }
   0xd   :  { %v2011_v35 = vld [vmem:[%s3537_s0 + $0x80] ss:$8 sps:$4 sm:$0xff]   ;;  %v2017_v37 = vld [vmem:[%s3537_s0 + $0x94] ss:$8 sps:$4 sm:$0xff]   ;;  %v2016_v38 = vld [vmem:[%s3537_s0 + $0x10] ss:$8 sps:$4 sm:$0xff]  }
   0xe   :  { %v2019_v39 = vld [vmem:[%s3537_s0 + $0x90] ss:$8 sps:$4 sm:$0xff]   ;;  %v2020_v40 = vld [vmem:[%s3537_s0 + $0x24] ss:$8 sps:$4 sm:$0xff]   ;;  %v2022_v42 = vld [vmem:[%s3537_s0 + $0x20] ss:$8 sps:$4 sm:$0xff]  }
   0xf   :  { %546 = vmatpush1.bf16.msra.mxu0 %v1971_v7  ;;  %1947 = vmatpush1.bf16.msra.mxu1 %v1971_v7  ;;  %v2023_v41 = vld [vmem:[%s3537_s0 + $0xa4] ss:$8 sps:$4 sm:$0xff]   ;;  %v2025_v43 = vld [vmem:[%s3537_s0 + $0xa0] ss:$8 sps:$4 sm:$0xff]   ;;  %v2026_v44 = vld [vmem:[%s3537_s0 + $0x34] ss:$8 sps:$4 sm:$0xff]  }
  0x10   :  { %547 = vmatprep.subr.bf16.mxu0 %v1972_v8  ;;  %1932 = vmatprep.subr.bf16.mxu1 %v1972_v8  ;;  %v2029_v45 = vld [vmem:[%s3537_s0 + $0xb4] ss:$8 sps:$4 sm:$0xff]   ;;  %v2028_v46 = vld [vmem:[%s3537_s0 + $0x30] ss:$8 sps:$4 sm:$0xff]   ;;  %v2032_v48 = vld [vmem:[%s3537_s0 + $0x44] ss:$8 sps:$4 sm:$0xff]  }
  0x11   :  { %v2031_v47 = vld [vmem:[%s3537_s0 + $0xb0] ss:$8 sps:$4 sm:$0xff]   ;;  %v2035_v49 = vld [vmem:[%s3537_s0 + $0xc4] ss:$8 sps:$4 sm:$0xff]   ;;  %v2034_v50 = vld [vmem:[%s3537_s0 + $0x40] ss:$8 sps:$4 sm:$0xff]  }
  0x12   :  { %v2037_v51 = vld [vmem:[%s3537_s0 + $0xc0] ss:$8 sps:$4 sm:$0xff]   ;;  %v2038_v52 = vld [vmem:[%s3537_s0 + $0x54] ss:$8 sps:$4 sm:$0xff]   ;;  %v2040_v54 = vld [vmem:[%s3537_s0 + $0x50] ss:$8 sps:$4 sm:$0xff]  }
  0x13   :  { %548 = vmatpush1.bf16.msra.mxu0 %v1974_v9  ;;  %1948 = vmatpush1.bf16.msra.mxu1 %v1974_v9  ;;  %v2041_v53 = vld [vmem:[%s3537_s0 + $0xd4] ss:$8 sps:$4 sm:$0xff]   ;;  %v2043_v55 = vld [vmem:[%s3537_s0 + $0xd0] ss:$8 sps:$4 sm:$0xff]   ;;  %v2044_v56 = vld [vmem:[%s3537_s0 + $0x64] ss:$8 sps:$4 sm:$0xff]  }
  0x14   :  { %549 = vmatprep.subr.bf16.mxu0 %v1975_v10  ;;  %1933 = vmatprep.subr.bf16.mxu1 %v1975_v10  ;;  %v2047_v57 = vld [vmem:[%s3537_s0 + $0xe4] ss:$8 sps:$4 sm:$0xff]   ;;  %v2046_v58 = vld [vmem:[%s3537_s0 + $0x60] ss:$8 sps:$4 sm:$0xff]   ;;  %v2050_v60 = vld [vmem:[%s3537_s0 + $0x74] ss:$8 sps:$4 sm:$0xff]  }
  0x15   :  { %v2049_v59 = vld [vmem:[%s3537_s0 + $0xe0] ss:$8 sps:$4 sm:$0xff]   ;;  %v2053_v61 = vld [vmem:[%s3537_s0 + $0xf4] ss:$8 sps:$4 sm:$0xff]   ;;  %v2052_v62 = vld [vmem:[%s3537_s0 + $0x70] ss:$8 sps:$4 sm:$0xff]  }
  0x16   :  { %v2055_v63 = vld [vmem:[%s3537_s0 + $0xf0] ss:$8 sps:$4 sm:$0xff]   ;;  %v930_v1 = vshrl.u32 %v929_v0, 7  ;;  %v927_v3 = vld [vmem:[%s3538_s2] sm:$0x3]  ;;  %v1036_v15 = vld [vmem:[%s3539_s3 + $0x108] sm:$0xff] }
  0x17   :  { %550 = vmatpush1.bf16.msra.mxu0 %v1977_v11  ;;  %1949 = vmatpush1.bf16.msra.mxu1 %v1977_v11  ;;  %v1003_v9 = vld [vmem:[%s3539_s3] sm:$0xff] }
  0x18   :  { %551 = vmatprep.subr.bf16.mxu0 %v1978_v12  ;;  %1934 = vmatprep.subr.bf16.mxu1 %v1978_v12  ;;  %v2347_v2 = vsub.s32 0, %v930_v1  ;;  %v2352_v4 = vsub.s32 1, %v930_v1  ;;  %v1035_v12 = vld [vmem:[%s3539_s3 + $0x100] sm:$0xff]  ;;  %v1042_v1 = vld [vmem:[%s3539_s3 + $0x138] sm:$0xff] }
  0x1a   :  { %3585 = vst [vmem:[#allocation3_spill] sm:$0xff] %v2347_v2  ;;  %3586 = vst [vmem:[#allocation4_spill] sm:$0xff] %v2352_v4  ;;  %v2355_v5 = vrot.slane %v927_v3, %v2347_v2  ;;  %v2358_v6 = vrot.slane %v927_v3, %v2352_v4 }
  0x1b   :  { %552 = vmatpush1.bf16.msra.mxu0 %v1980_v14  ;;  %1950 = vmatpush1.bf16.msra.mxu1 %v1980_v14 }
  0x1c   :  { %553 = vmatprep.subr.bf16.mxu0 %v1981_v16  ;;  %1935 = vmatprep.subr.bf16.mxu1 %v1981_v16  ;;  %v1004_v16 = vld [vmem:[%s3539_s3 + $0x8] sm:$0xff] }
  0x1f   :  { %554 = vmatpush1.bf16.msra.mxu0 %v1983_v17  ;;  %1951 = vmatpush1.bf16.msra.mxu1 %v1983_v17 }
  0x20   :  { %555 = vmatprep.subr.bf16.mxu0 %v1984_v18  ;;  %1936 = vmatprep.subr.bf16.mxu1 %v1984_v18 }
  0x23   :  { %556 = vmatpush1.bf16.msra.mxu0 %v1986_v19  ;;  %1952 = vmatpush1.bf16.msra.mxu1 %v1986_v19 }
  0x24   :  { %557 = vmatprep.subr.bf16.mxu0 %v1987_v20  ;;  %1937 = vmatprep.subr.bf16.mxu1 %v1987_v20 }
  0x27   :  { %558 = vmatpush1.bf16.msra.mxu0 %v1989_v21  ;;  %1953 = vmatpush1.bf16.msra.mxu1 %v1989_v21  ;;  %v1037_v21 = vld [vmem:[%s3539_s3 + $0x110] sm:$0xff] }
  0x28   :  { %559 = vmatprep.subr.bf16.mxu0 %v1990_v22  ;;  %1938 = vmatprep.subr.bf16.mxu1 %v1990_v22 }
  0x2b   :  { %560 = vmatpush1.bf16.msra.mxu0 %v1992_v23  ;;  %1954 = vmatpush1.bf16.msra.mxu1 %v1992_v23 }
  0x2c   :  { %561 = vmatprep.subr.bf16.mxu0 %v1993_v24  ;;  %1939 = vmatprep.subr.bf16.mxu1 %v1993_v24 }
  0x2f   :  { %562 = vmatpush1.bf16.msra.mxu0 %v1995_v25  ;;  %1955 = vmatpush1.bf16.msra.mxu1 %v1995_v25 }
  0x30   :  { %563 = vmatprep.subr.bf16.mxu0 %v1996_v26  ;;  %1940 = vmatprep.subr.bf16.mxu1 %v1996_v26  ;;  %v1038_v26 = vld [vmem:[%s3539_s3 + $0x118] sm:$0xff] }
  0x33   :  { %564 = vmatpush1.bf16.msra.mxu0 %v1998_v27  ;;  %1956 = vmatpush1.bf16.msra.mxu1 %v1998_v27 }
  0x34   :  { %565 = vmatprep.subr.bf16.mxu0 %v1999_v28  ;;  %1941 = vmatprep.subr.bf16.mxu1 %v1999_v28 }
  0x37   :  { %566 = vmatpush1.bf16.msra.mxu0 %v2001_v29  ;;  %1957 = vmatpush1.bf16.msra.mxu1 %v2001_v29 }
  0x38   :  { %567 = vmatprep.subr.bf16.mxu0 %v2002_v30  ;;  %1942 = vmatprep.subr.bf16.mxu1 %v2002_v30 }
  0x3b   :  { %568 = vmatpush1.bf16.msra.mxu0 %v2004_v31  ;;  %1958 = vmatpush1.bf16.msra.mxu1 %v2004_v31 }
  0x3c   :  { %569 = vmatprep.subr.bf16.mxu0 %v2005_v32  ;;  %1943 = vmatprep.subr.bf16.mxu1 %v2005_v32 }
  0x3f   :  { %570 = vmatpush1.bf16.msra.mxu0 %v2007_v33  ;;  %1959 = vmatpush1.bf16.msra.mxu1 %v2007_v33 }
  0x42   :  { %572 = vmatmul.mubr.bf16.vlgmr.msra.gmra.mrb[0].mxu0 %v2008_v34  ;;  %652 = vmatmul.mubr.bf16.vlgmr.msra.gmra.mrb[0].mxu1 %v2011_v35  ;;  %v1005_v34 = vld [vmem:[%s3539_s3 + $0x10] sm:$0xff]  ;;  %v1006_v35 = vld [vmem:[%s3539_s3 + $0x18] sm:$0xff] }
  0x43   :  { %581 = vmatprep.mubr.bf16.mxu0 %v2014_v36  ;;  %661 = vmatprep.mubr.bf16.mxu1 %v2017_v37 }
  0x4a   :  { %582 = vmatmul.mubr.bf16.gmra.mrb[4].mxu0 %v2016_v38  ;;  %662 = vmatmul.mubr.bf16.gmra.mrb[4].mxu1 %v2019_v39  ;;  %v1007_v39 = vld [vmem:[%s3539_s3 + $0x20] sm:$0xff] }
  0x4b   :  { %591 = vmatprep.mubr.bf16.mxu0 %v2020_v40  ;;  %671 = vmatprep.mubr.bf16.mxu1 %v2023_v41 }
  0x52   :  { %592 = vmatmul.mubr.bf16.gmra.mrb[8].mxu0 %v2022_v42  ;;  %672 = vmatmul.mubr.bf16.gmra.mrb[8].mxu1 %v2025_v43  ;;  %v1039_v42 = vld [vmem:[%s3539_s3 + $0x120] sm:$0xff] }
  0x53   :  { %601 = vmatprep.mubr.bf16.mxu0 %v2026_v44  ;;  %681 = vmatprep.mubr.bf16.mxu1 %v2029_v45 }
  0x5a   :  { %602 = vmatmul.mubr.bf16.gmra.mrb[12].mxu0 %v2028_v46  ;;  %682 = vmatmul.mubr.bf16.gmra.mrb[12].mxu1 %v2031_v47 }
  0x5b   :  { %611 = vmatprep.mubr.bf16.mxu0 %v2032_v48  ;;  %691 = vmatprep.mubr.bf16.mxu1 %v2035_v49  ;;  %v1008_v48 = vld [vmem:[%s3539_s3 + $0x28] sm:$0xff] }
  0x62   :  { %612 = vmatmul.mubr.bf16.gmra.mrb[16].mxu0 %v2034_v50  ;;  %692 = vmatmul.mubr.bf16.gmra.mrb[16].mxu1 %v2037_v51  ;;  %v1040_v51 = vld [vmem:[%s3539_s3 + $0x128] sm:$0xff] }
  0x63   :  { %621 = vmatprep.mubr.bf16.mxu0 %v2038_v52  ;;  %701 = vmatprep.mubr.bf16.mxu1 %v2041_v53 }
  0x6a   :  { %622 = vmatmul.mubr.bf16.gmra.mrb[20].mxu0 %v2040_v54  ;;  %702 = vmatmul.mubr.bf16.gmra.mrb[20].mxu1 %v2043_v55  ;;  %v1009_v54 = vld [vmem:[%s3539_s3 + $0x30] sm:$0xff] }
  0x6b   :  { %631 = vmatprep.mubr.bf16.mxu0 %v2044_v56  ;;  %711 = vmatprep.mubr.bf16.mxu1 %v2047_v57 }
  0x72   :  { %632 = vmatmul.mubr.bf16.gmra.mrb[24].mxu0 %v2046_v58  ;;  %712 = vmatmul.mubr.bf16.gmra.mrb[24].mxu1 %v2049_v59 }
  0x73   :  { %641 = vmatprep.mubr.bf16.mxu0 %v2050_v60  ;;  %721 = vmatprep.mubr.bf16.mxu1 %v2053_v61  ;;  %v1010_v61 = vld [vmem:[%s3539_s3 + $0x38] sm:$0xff] }
  0x7a   :  { %642 = vmatmul.mubr.bf16.gmra.mrb[28].mxu0 %v2052_v62  ;;  %722 = vmatmul.mubr.bf16.gmra.mrb[28].mxu1 %v2055_v63  ;;  %v1041_v63 = vld [vmem:[%s3539_s3 + $0x130] sm:$0xff] }
 0x115   :  { %v573_v7 = vpop.f32.mrb[0].mxu0  ;;  %v653_v8 = vpop.f32.mrb[0].mxu1 }
 0x116   :  { %v939_v10 = vadd.f32 %v2355_v5, %v573_v7  ;;  %v971_v11 = vadd.f32 %v2355_v5, %v653_v8  ;;  %v575_v13 = vpop.f32.mrb[1].mxu0  ;;  %v655_v14 = vpop.f32.mrb[1].mxu1 }
 0x117   :  { %v940_v17 = vadd.f32 %v2358_v6, %v575_v13  ;;  %v972_v18 = vadd.f32 %v2358_v6, %v655_v14  ;;  %v577_v19 = vpop.f32.mrb[2].mxu0  ;;  %v657_v20 = vpop.f32.mrb[2].mxu1 }
 0x118   :  { %v973_v22 = vadd.f32 %v2355_v5, %v657_v20  ;;  %v579_v23 = vpop.f32.mrb[3].mxu0  ;;  %v659_v24 = vpop.f32.mrb[3].mxu1  ;;  %v2380_v25 = vadd.f32 %v1003_v9, %v939_v10  ;;  %v2385_v27 = vadd.f32 %v1035_v12, %v971_v11  ;;  %v941_v31 = vadd.f32 %v2355_v5, %v577_v19  ;;  %v1043_v19 = vld [vmem:[%s3539_s3 + $0x140] sm:$0xff] }
 0x119   :  { %v2387_v28 = vadd.f32 %v1036_v15, %v972_v18  ;;  %v974_v29 = vadd.f32 %v2358_v6, %v659_v24  ;;  %v2390_v30 = vadd.f32 %v1004_v16, %v940_v17  ;;  %v942_v32 = vadd.f32 %v2358_v6, %v579_v23  ;;  %v1011_v17 = vld [vmem:[%s3539_s3 + $0x40] sm:$0xff]  ;;  %v1012_v24 = vld [vmem:[%s3539_s3 + $0x48] sm:$0xff] }
 0x11a   :  { %v2394_v33 = vadd.f32 %v1037_v21, %v973_v22  ;;  %v2416_v44 = vadd.f32 %v1005_v34, %v941_v31  ;;  %v1044_v31 = vld [vmem:[%s3539_s3 + $0x148] sm:$0xff] }
 0x11b   :  { %v1131_v36 = vadd.f32 %v2390_v30, %v2380_v25  ;;  %v2404_v37 = vadd.f32 %v1038_v26, %v974_v29  ;;  %v1179_v43 = vadd.f32 %v2387_v28, %v2385_v27  ;;  %v2418_v45 = vadd.f32 %v1006_v35, %v942_v32  ;;  %v1013_v35 = vld [vmem:[%s3539_s3 + $0x50] sm:$0xff] }
 0x11d   :  { %1132 = vadd.xlane.f32.xlu0 %v1131_v36  ;;  %v583_v38 = vpop.f32.mrb[4].mxu0  ;;  %v1182_v40 = vadd.f32 %v2404_v37, %v2394_v33  ;;  %v663_v41 = vpop.f32.mrb[4].mxu1  ;;  %v1134_v11 = vadd.f32 %v2418_v45, %v2416_v44 }
 0x11e   :  { %v943_v46 = vadd.f32 %v2355_v5, %v583_v38  ;;  %v585_v47 = vpop.f32.mrb[5].mxu0  ;;  %v975_v49 = vadd.f32 %v2355_v5, %v663_v41  ;;  %v665_v50 = vpop.f32.mrb[5].mxu1 }
 0x11f   :  { %v944_v52 = vadd.f32 %v2358_v6, %v585_v47  ;;  %1183 = vadd.xlane.f32.xlu1 %v1182_v40  ;;  %v587_v53 = vpop.f32.mrb[6].mxu0  ;;  %v976_v55 = vadd.f32 %v2358_v6, %v665_v50  ;;  %v667_v56 = vpop.f32.mrb[6].mxu1 }
 0x120   :  { %v2433_v57 = vadd.f32 %v1007_v39, %v943_v46  ;;  %v945_v58 = vadd.f32 %v2355_v5, %v587_v53  ;;  %v2436_v59 = vadd.f32 %v1039_v42, %v975_v49  ;;  %v589_v60 = vpop.f32.mrb[7].mxu0  ;;  %v977_v62 = vadd.f32 %v2355_v5, %v667_v56  ;;  %v669_v0 = vpop.f32.mrb[7].mxu1  ;;  %v1014_v46 = vld [vmem:[%s3539_s3 + $0x58] sm:$0xff] }
 0x121   :  { %v2448_v3 = vadd.f32 %v1008_v48, %v944_v52  ;;  %1180 = vadd.xlane.f32.xlu0 %v1179_v43  ;;  %v946_v7 = vadd.f32 %v2358_v6, %v589_v60  ;;  %v2451_v8 = vadd.f32 %v1040_v51, %v976_v55  ;;  %v978_v9 = vadd.f32 %v2358_v6, %v669_v0  ;;  %v1045_v48 = vld [vmem:[%s3539_s3 + $0x150] sm:$0xff]  ;;  %v1046_v53 = vld [vmem:[%s3539_s3 + $0x158] sm:$0xff] }
 0x122   :  { %v2454_v10 = vadd.f32 %v1009_v54, %v945_v58  ;;  %v2460_v13 = vadd.f32 %v1041_v63, %v977_v62  ;;  %v1015_v63 = vld [vmem:[%s3539_s3 + $0x60] sm:$0xff] }
 0x123   :  { %v2458_v12 = vadd.f32 %v1010_v61, %v946_v7  ;;  %v1137_v14 = vadd.f32 %v2448_v3, %v2433_v57  ;;  %v2464_v15 = vadd.f32 %v1042_v1, %v978_v9  ;;  %v1185_v20 = vadd.f32 %v2451_v8, %v2436_v59  ;;  %v1047_v1 = vld [vmem:[%s3539_s3 + $0x160] sm:$0xff] }
 0x125   :  { %1135 = vadd.xlane.f32.xlu0 %v1134_v11  ;;  %1138 = vadd.xlane.f32.xlu1 %v1137_v14  ;;  %v593_v16 = vpop.f32.mrb[8].mxu0  ;;  %v673_v18 = vpop.f32.mrb[8].mxu1  ;;  %v1140_v21 = vadd.f32 %v2458_v12, %v2454_v10  ;;  %v1188_v39 = vadd.f32 %v2464_v15, %v2460_v13 }
 0x126   :  { %v947_v22 = vadd.f32 %v2355_v5, %v593_v16  ;;  %v595_v23 = vpop.f32.mrb[9].mxu0  ;;  %v979_v26 = vadd.f32 %v2355_v5, %v673_v18  ;;  %v675_v29 = vpop.f32.mrb[9].mxu1  ;;  %v1016_v16 = vld [vmem:[%s3539_s3 + $0x68] sm:$0xff] }
 0x127   :  { %v948_v32 = vadd.f32 %v2358_v6, %v595_v23  ;;  %v597_v34 = vpop.f32.mrb[10].mxu0  ;;  %v980_v36 = vadd.f32 %v2358_v6, %v675_v29  ;;  %v677_v38 = vpop.f32.mrb[10].mxu1 }
 0x128   :  { %v2491_v40 = vadd.f32 %v1011_v17, %v947_v22  ;;  %v2493_v41 = vadd.f32 %v1043_v19, %v979_v26  ;;  %v949_v42 = vadd.f32 %v2355_v5, %v597_v34  ;;  %v599_v43 = vpop.f32.mrb[11].mxu0  ;;  %v981_v47 = vadd.f32 %v2355_v5, %v677_v38  ;;  %v679_v49 = vpop.f32.mrb[11].mxu1  ;;  %v1048_v19 = vld [vmem:[%s3539_s3 + $0x168] sm:$0xff]  ;;  %v1017_v22 = vld [vmem:[%s3539_s3 + $0x70] sm:$0xff] }
 0x129   :  { %v2503_v50 = vadd.f32 %v1012_v24, %v948_v32  ;;  %1186 = vadd.xlane.f32.xlu0 %v1185_v20  ;;  %1141 = vadd.xlane.f32.xlu1 %v1140_v21  ;;  %v950_v51 = vadd.f32 %v2358_v6, %v599_v43  ;;  %v2506_v52 = vadd.f32 %v1044_v31, %v980_v36  ;;  %v1049_v38 = vld [vmem:[%s3539_s3 + $0x170] sm:$0xff] }
 0x12a   :  { %v2511_v54 = vadd.f32 %v1013_v35, %v949_v42  ;;  %v982_v55 = vadd.f32 %v2358_v6, %v679_v49  ;;  %v2516_v58 = vadd.f32 %v1045_v48, %v981_v47  ;;  %v1018_v35 = vld [vmem:[%s3539_s3 + $0x78] sm:$0xff] }
 0x12b   :  { %v2514_v56 = vadd.f32 %v1014_v46, %v950_v51  ;;  %v1143_v60 = vadd.f32 %v2503_v50, %v2491_v40  ;;  %v1191_v7 = vadd.f32 %v2506_v52, %v2493_v41  ;;  %v1050_v47 = vld [vmem:[%s3539_s3 + $0x178] sm:$0xff] }
 0x12c   :  { %v2520_v61 = vadd.f32 %v1046_v53, %v982_v55 }
 0x12d   :  { %1189 = vadd.xlane.f32.xlu1 %v1188_v39  ;;  %1144 = vadd.xlane.f32.xlu0 %v1143_v60  ;;  %v603_v62 = vpop.f32.mrb[12].mxu0  ;;  %v683_v0 = vpop.f32.mrb[12].mxu1  ;;  %v1146_v9 = vadd.f32 %v2514_v56, %v2511_v54 }
 0x12e   :  { %v951_v11 = vadd.f32 %v2355_v5, %v603_v62  ;;  %v605_v14 = vpop.f32.mrb[13].mxu0  ;;  %v983_v17 = vadd.f32 %v2355_v5, %v683_v0  ;;  %v685_v18 = vpop.f32.mrb[13].mxu1  ;;  %v1194_v26 = vadd.f32 %v2520_v61, %v2516_v58 }
 0x12f   :  { %v952_v20 = vadd.f32 %v2358_v6, %v605_v14  ;;  %v607_v21 = vpop.f32.mrb[14].mxu0  ;;  %v984_v23 = vadd.f32 %v2358_v6, %v685_v18  ;;  %v687_v24 = vpop.f32.mrb[14].mxu1 }
 0x130   :  { %v2547_v29 = vadd.f32 %v1015_v63, %v951_v11  ;;  %v2549_v31 = vadd.f32 %v1047_v1, %v983_v17  ;;  %v953_v32 = vadd.f32 %v2355_v5, %v607_v21  ;;  %v609_v34 = vpop.f32.mrb[15].mxu0  ;;  %v985_v36 = vadd.f32 %v2355_v5, %v687_v24  ;;  %v689_v39 = vpop.f32.mrb[15].mxu1  ;;  %v1019_v63 = vld [vmem:[%s3539_s3 + $0x80] sm:$0xff] }
 0x131   :  { %v2559_v42 = vadd.f32 %v1016_v16, %v952_v20  ;;  %1192 = vadd.xlane.f32.xlu0 %v1191_v7  ;;  %1147 = vadd.xlane.f32.xlu1 %v1146_v9  ;;  %v954_v43 = vadd.f32 %v2358_v6, %v609_v34  ;;  %v2562_v46 = vadd.f32 %v1048_v19, %v984_v23  ;;  %v1051_v1 = vld [vmem:[%s3539_s3 + $0x180] sm:$0xff]  ;;  %v1020_v16 = vld [vmem:[%s3539_s3 + $0x88] sm:$0xff] }
 0x132   :  { %v2567_v48 = vadd.f32 %v1017_v22, %v953_v32  ;;  %v986_v49 = vadd.f32 %v2358_v6, %v689_v39  ;;  %v2572_v53 = vadd.f32 %v1049_v38, %v985_v36  ;;  %v1052_v19 = vld [vmem:[%s3539_s3 + $0x188] sm:$0xff]  ;;  %v1021_v22 = vld [vmem:[%s3539_s3 + $0x90] sm:$0xff]  ;;  %v1022_v38 = vld [vmem:[%s3539_s3 + $0x98] sm:$0xff] }
 0x133   :  { %v2570_v51 = vadd.f32 %v1018_v35, %v954_v43  ;;  %v1149_v55 = vadd.f32 %v2559_v42, %v2547_v29  ;;  %v1197_v7 = vadd.f32 %v2562_v46, %v2549_v31  ;;  %v1053_v43 = vld [vmem:[%s3539_s3 + $0x190] sm:$0xff] }
 0x134   :  { %v2576_v60 = vadd.f32 %v1050_v47, %v986_v49 }
 0x135   :  { %1195 = vadd.xlane.f32.xlu1 %v1194_v26  ;;  %1150 = vadd.xlane.f32.xlu0 %v1149_v55  ;;  %v613_v62 = vpop.f32.mrb[16].mxu0  ;;  %v693_v0 = vpop.f32.mrb[16].mxu1  ;;  %v1152_v9 = vadd.f32 %v2570_v51, %v2567_v48 }
 0x136   :  { %v955_v11 = vadd.f32 %v2355_v5, %v613_v62  ;;  %v615_v14 = vpop.f32.mrb[17].mxu0  ;;  %v987_v17 = vadd.f32 %v2355_v5, %v693_v0  ;;  %v695_v18 = vpop.f32.mrb[17].mxu1  ;;  %v1200_v26 = vadd.f32 %v2576_v60, %v2572_v53 }
 0x137   :  { %v956_v20 = vadd.f32 %v2358_v6, %v615_v14  ;;  %v617_v21 = vpop.f32.mrb[18].mxu0  ;;  %v988_v23 = vadd.f32 %v2358_v6, %v695_v18  ;;  %v697_v24 = vpop.f32.mrb[18].mxu1 }
 0x138   :  { %v2603_v32 = vadd.f32 %v1019_v63, %v955_v11  ;;  %v2605_v34 = vadd.f32 %v1051_v1, %v987_v17  ;;  %v957_v35 = vadd.f32 %v2355_v5, %v617_v21  ;;  %v619_v36 = vpop.f32.mrb[19].mxu0  ;;  %v989_v39 = vadd.f32 %v2355_v5, %v697_v24  ;;  %v699_v47 = vpop.f32.mrb[19].mxu1  ;;  %v1054_v63 = vld [vmem:[%s3539_s3 + $0x198] sm:$0xff]  ;;  %v1023_v17 = vld [vmem:[%s3539_s3 + $0xa0] sm:$0xff]  ;;  %v1024_v24 = vld [vmem:[%s3539_s3 + $0xa8] sm:$0xff] }
 0x139   :  { %v2615_v49 = vadd.f32 %v1020_v16, %v956_v20  ;;  %1198 = vadd.xlane.f32.xlu0 %v1197_v7  ;;  %1153 = vadd.xlane.f32.xlu1 %v1152_v9  ;;  %v958_v55 = vadd.f32 %v2358_v6, %v619_v36  ;;  %v2618_v62 = vadd.f32 %v1052_v19, %v988_v23  ;;  %v1055_v19 = vld [vmem:[%s3539_s3 + $0x1a0] sm:$0xff]  ;;  %v1056_v36 = vld [vmem:[%s3539_s3 + $0x1a8] sm:$0xff] }
 0x13a   :  { %v2623_v0 = vadd.f32 %v1021_v22, %v957_v35  ;;  %v990_v1 = vadd.f32 %v2358_v6, %v699_v47  ;;  %v2628_v14 = vadd.f32 %v1053_v43, %v989_v39  ;;  %v1025_v43 = vld [vmem:[%s3539_s3 + $0xb0] sm:$0xff] }
 0x13b   :  { %v2626_v11 = vadd.f32 %v1022_v38, %v958_v55  ;;  %v1155_v7 = vadd.f32 %v2615_v49, %v2603_v32  ;;  %v1203_v20 = vadd.f32 %v2618_v62, %v2605_v34 }
 0x13c   :  { %3588 = vst [vmem:[#allocation6_spill] sm:$0xff] %v2628_v14  ;;  %v2632_v9 = vadd.f32 %v1054_v63, %v990_v1 }
 0x13d   :  { %3587 = vst [vmem:[#allocation5_spill] sm:$0xff] %v2626_v11  ;;  %1201 = vadd.xlane.f32.xlu1 %v1200_v26  ;;  %1156 = vadd.xlane.f32.xlu0 %v1155_v7  ;;  %v623_v16 = vpop.f32.mrb[20].mxu0  ;;  %v703_v18 = vpop.f32.mrb[20].mxu1  ;;  %v1158_v21 = vadd.f32 %v2626_v11, %v2623_v0 }
 0x13e   :  { %3589 = vst [vmem:[#allocation7_spill] sm:$0xff] %v2632_v9  ;;  %v959_v22 = vadd.f32 %v2355_v5, %v623_v16  ;;  %v625_v23 = vpop.f32.mrb[21].mxu0  ;;  %v991_v26 = vadd.f32 %v2355_v5, %v703_v18  ;;  %v705_v35 = vpop.f32.mrb[21].mxu1  ;;  %v1206_v63 = vadd.f32 %v2632_v9, %v2628_v14 }
 0x13f   :  { %v960_v38 = vadd.f32 %v2358_v6, %v625_v23  ;;  %v627_v39 = vpop.f32.mrb[22].mxu0  ;;  %v992_v47 = vadd.f32 %v2358_v6, %v705_v35  ;;  %v707_v55 = vpop.f32.mrb[22].mxu1  ;;  %v1026_v23 = vld [vmem:[%s3539_s3 + $0xb8] sm:$0xff]  ;;  %v1057_v35 = vld [vmem:[%s3539_s3 + $0x1b0] sm:$0xff] }
 0x140   :  { %v2659_v1 = vadd.f32 %v1023_v17, %v959_v22  ;;  %v2661_v7 = vadd.f32 %v1055_v19, %v991_v26  ;;  %v961_v16 = vadd.f32 %v2355_v5, %v627_v39  ;;  %v629_v18 = vpop.f32.mrb[23].mxu0  ;;  %v993_v4 = vadd.f32 %v2355_v5, %v707_v55  ;;  %v709_v2 = vpop.f32.mrb[23].mxu1  ;;  %v1058_v22 = vld [vmem:[%s3539_s3 + $0x1b8] sm:$0xff] }
 0x141   :  { %v2671_v11 = vadd.f32 %v1024_v24, %v960_v38  ;;  %1204 = vadd.xlane.f32.xlu0 %v1203_v20  ;;  %1159 = vadd.xlane.f32.xlu1 %v1158_v21  ;;  %v962_v17 = vadd.f32 %v2358_v6, %v629_v18  ;;  %v2674_v19 = vadd.f32 %v1056_v36, %v992_v47  ;;  %v1027_v36 = vld [vmem:[%s3539_s3 + $0xc0] sm:$0xff] }
 0x142   :  { %3590 = vst [vmem:[#allocation8_spill] sm:$0xff] %v2659_v1  ;;  %3591 = vst [vmem:[#allocation9_spill] sm:$0xff] %v2661_v7  ;;  %v2679_v26 = vadd.f32 %v1025_v43, %v961_v16  ;;  %v994_v39 = vadd.f32 %v2358_v6, %v709_v2  ;;  %v2684_v9 = vadd.f32 %v1057_v35, %v993_v4  ;;  %v1059_v2 = vld [vmem:[%s3539_s3 + $0x1c0] sm:$0xff]  ;;  %v1028_v16 = vld [vmem:[%s3539_s3 + $0xc8] sm:$0xff] }
 0x143   :  { %3592 = vst [vmem:[#allocation10_spill] sm:$0xff] %v2671_v11  ;;  %3593 = vst [vmem:[#allocation11_spill] sm:$0xff] %v2674_v19  ;;  %v2682_v55 = vadd.f32 %v1026_v23, %v962_v17  ;;  %v1161_v20 = vadd.f32 %v2671_v11, %v2659_v1  ;;  %v1209_v4 = vadd.f32 %v2674_v19, %v2661_v7  ;;  %v1060_v35 = vld [vmem:[%s3539_s3 + $0x1c8] sm:$0xff] }
 0x144   :  { %3594 = vst [vmem:[#allocation12_spill] sm:$0xff] %v2679_v26  ;;  %3596 = vst [vmem:[#allocation14_spill] sm:$0xff] %v2684_v9  ;;  %v2688_v21 = vadd.f32 %v1058_v22, %v994_v39  ;;  %v1029_v39 = vld [vmem:[%s3539_s3 + $0xd0] sm:$0xff] }
 0x145   :  { %3595 = vst [vmem:[#allocation13_spill] sm:$0xff] %v2682_v55  ;;  %1207 = vadd.xlane.f32.xlu1 %v1206_v63  ;;  %1162 = vadd.xlane.f32.xlu0 %v1161_v20  ;;  %v633_v24 = vpop.f32.mrb[24].mxu0  ;;  %v713_v38 = vpop.f32.mrb[24].mxu1  ;;  %v1164_v43 = vadd.f32 %v2682_v55, %v2679_v26 }
 0x146   :  { %3597 = vst [vmem:[#allocation15_spill] sm:$0xff] %v2688_v21  ;;  %v963_v47 = vadd.f32 %v2355_v5, %v633_v24  ;;  %v635_v63 = vpop.f32.mrb[25].mxu0  ;;  %v995_v18 = vadd.f32 %v2355_v5, %v713_v38  ;;  %v715_v23 = vpop.f32.mrb[25].mxu1  ;;  %v1212_v55 = vadd.f32 %v2688_v21, %v2684_v9 }
 0x147   :  { %v964_v17 = vadd.f32 %v2358_v6, %v635_v63  ;;  %v637_v22 = vpop.f32.mrb[26].mxu0  ;;  %v996_v20 = vadd.f32 %v2358_v6, %v715_v23  ;;  %v717_v24 = vpop.f32.mrb[26].mxu1  ;;  %v1030_v63 = vld [vmem:[%s3539_s3 + $0xd8] sm:$0xff]  ;;  %v1061_v23 = vld [vmem:[%s3539_s3 + $0x1d0] sm:$0xff] }
 0x148   :  { %v2715_v26 = vadd.f32 %v1027_v36, %v963_v47  ;;  %v2717_v38 = vadd.f32 %v1059_v2, %v995_v18  ;;  %v965_v19 = vadd.f32 %v2355_v5, %v637_v22  ;;  %v639_v7 = vpop.f32.mrb[27].mxu0  ;;  %v997_v14 = vadd.f32 %v2355_v5, %v717_v24  ;;  %v719_v11 = vpop.f32.mrb[27].mxu1  ;;  %v1062_v47 = vld [vmem:[%s3539_s3 + $0x1d8] sm:$0xff] }
 0x149   :  { %v2727_v1 = vadd.f32 %v1028_v16, %v964_v17  ;;  %1210 = vadd.xlane.f32.xlu0 %v1209_v4  ;;  %1165 = vadd.xlane.f32.xlu1 %v1164_v43  ;;  %v966_v36 = vadd.f32 %v2358_v6, %v639_v7  ;;  %v2730_v2 = vadd.f32 %v1060_v35, %v996_v20  ;;  %v1031_v16 = vld [vmem:[%s3539_s3 + $0xe0] sm:$0xff] }
 0x14a   :  { %3598 = vst [vmem:[#allocation16_spill] sm:$0xff] %v2715_v26  ;;  %3599 = vst [vmem:[#allocation17_spill] sm:$0xff] %v2717_v38  ;;  %v2735_v18 = vadd.f32 %v1029_v39, %v965_v19  ;;  %v998_v22 = vadd.f32 %v2358_v6, %v719_v11  ;;  %v2740_v21 = vadd.f32 %v1061_v23, %v997_v14  ;;  %v1063_v11 = vld [vmem:[%s3539_s3 + $0x1e0] sm:$0xff]  ;;  %v1032_v39 = vld [vmem:[%s3539_s3 + $0xe8] sm:$0xff] }
 0x14b   :  { %3600 = vst [vmem:[#allocation18_spill] sm:$0xff] %v2727_v1  ;;  %3601 = vst [vmem:[#allocation19_spill] sm:$0xff] %v2730_v2  ;;  %v2738_v24 = vadd.f32 %v1030_v63, %v966_v36  ;;  %v1167_v4 = vadd.f32 %v2727_v1, %v2715_v26  ;;  %v1215_v14 = vadd.f32 %v2730_v2, %v2717_v38  ;;  %v1064_v23 = vld [vmem:[%s3539_s3 + $0x1e8] sm:$0xff]  ;;  %v1034_v1 = vld [vmem:[%s3539_s3 + $0xf8] sm:$0xff] }
 0x14c   :  { %3602 = vst [vmem:[#allocation20_spill] sm:$0xff] %v2735_v18  ;;  %v2744_v43 = vadd.f32 %v1062_v47, %v998_v22  ;;  %v1033_v22 = vld [vmem:[%s3539_s3 + $0xf0] sm:$0xff] }
 0x14d   :  { %3603 = vst [vmem:[#allocation21_spill] sm:$0xff] %v2738_v24  ;;  %1213 = vadd.xlane.f32.xlu1 %v1212_v55  ;;  %1168 = vadd.xlane.f32.xlu0 %v1167_v4  ;;  %v643_v7 = vpop.f32.mrb[28].mxu0  ;;  %v723_v19 = vpop.f32.mrb[28].mxu1  ;;  %v1170_v35 = vadd.f32 %v2738_v24, %v2735_v18  ;;  %v1065_v24 = vld [vmem:[%s3539_s3 + $0x1f0] sm:$0xff] }
 0x14e   :  { %3604 = vst [vmem:[#allocation22_spill] sm:$0xff] %v2744_v43  ;;  %v967_v17 = vadd.f32 %v2355_v5, %v643_v7  ;;  %v645_v55 = vpop.f32.mrb[29].mxu0  ;;  %v999_v20 = vadd.f32 %v2355_v5, %v723_v19  ;;  %v725_v63 = vpop.f32.mrb[29].mxu1  ;;  %v1218_v19 = vadd.f32 %v2744_v43, %v2740_v21 }
 0x14f   :  { %v968_v36 = vadd.f32 %v2358_v6, %v645_v55  ;;  %v647_v47 = vpop.f32.mrb[30].mxu0  ;;  %v1000_v4 = vadd.f32 %v2358_v6, %v725_v63  ;;  %v727_v7 = vpop.f32.mrb[30].mxu1 }
 0x150   :  { %v2774_v18 = vadd.f32 %v1031_v16, %v967_v17  ;;  %v2776_v2 = vadd.f32 %v1063_v11, %v999_v20  ;;  %v969_v55 = vadd.f32 %v2355_v5, %v647_v47  ;;  %v649_v38 = vpop.f32.mrb[31].mxu0  ;;  %v1001_v63 = vadd.f32 %v2355_v5, %v727_v7  ;;  %v729_v26 = vpop.f32.mrb[31].mxu1  ;;  %v1066_v11 = vld [vmem:[%s3539_s3 + $0x1f8] sm:$0xff] }
 0x151   :  { %v2783_v9 = vadd.f32 %v1032_v39, %v968_v36  ;;  %1216 = vadd.xlane.f32.xlu0 %v1215_v14  ;;  %1171 = vadd.xlane.f32.xlu1 %v1170_v35  ;;  %v970_v43 = vadd.f32 %v2358_v6, %v649_v38  ;;  %v2786_v16 = vadd.f32 %v1064_v23, %v1000_v4 }
 0x152   :  { %v2791_v17 = vadd.f32 %v1033_v22, %v969_v55  ;;  %v2793_v20 = vadd.f32 %v1065_v24, %v1001_v63  ;;  %v1002_v47 = vadd.f32 %v2358_v6, %v729_v26 }
 0x153   :  { %v2796_v5 = vadd.f32 %v1034_v1, %v970_v43  ;;  %v1173_v14 = vadd.f32 %v2783_v9, %v2774_v18  ;;  %v1221_v38 = vadd.f32 %v2786_v16, %v2776_v2 }
 0x154   :  { %v2800_v35 = vadd.f32 %v1066_v11, %v1002_v47 }
 0x155   :  { %1219 = vadd.xlane.f32.xlu1 %v1218_v19  ;;  %1174 = vadd.xlane.f32.xlu0 %v1173_v14  ;;  %v1176_v39 = vadd.f32 %v2796_v5, %v2791_v17 }
 0x156   :  { %v1224_v6 = vadd.f32 %v2800_v35, %v2793_v20 }
 0x159   :  { %1222 = vadd.xlane.f32.xlu0 %v1221_v38  ;;  %1177 = vadd.xlane.f32.xlu1 %v1176_v39 }
 0x15d   :  { %1225 = vadd.xlane.f32.xlu1 %v1224_v6 }
 0x1aa   :  { %v1133_v1 = vpop.xlane.xlu0 %1132 }
 0x1ab   :  { %v1228_v26 = vmul.f32 0.00390625, %v1133_v1 }
 0x1ac   :  { %v1184_v23 = vpop.xlane.xlu1 %1183 }
 0x1ad   :  { %v2809_v24 = vsub.f32 %v2380_v25, %v1228_v26  ;;  %v2812_v43 = vsub.f32 %v2390_v30, %v1228_v26  ;;  %v1245_v7 = vmul.f32 0.00390625, %v1184_v23 }
 0x1ae   :  { %v1181_v36 = vpop.xlane.xlu0 %1180 }
 0x1af   :  { %v1244_v22 = vmul.f32 0.00390625, %v1181_v36  ;;  %v1324_v4 = vmul.f32 %v2809_v24, %v2809_v24  ;;  %v1325_v19 = vmul.f32 %v2812_v43, %v2812_v43  ;;  %v2829_v6 = vsub.f32 %v2394_v33, %v1245_v7 }
 0x1b1   :  { %v2819_v55 = vsub.f32 %v2385_v27, %v1244_v22  ;;  %v2822_v63 = vsub.f32 %v2387_v28, %v1244_v22  ;;  %v1388_v30 = vadd.f32 %v1325_v19, %v1324_v4  ;;  %v2832_v27 = vsub.f32 %v2404_v37, %v1245_v7 }
 0x1b2   :  { %v1136_v25 = vpop.xlane.xlu0 %1135  ;;  %v1139_v11 = vpop.xlane.xlu1 %1138 }
 0x1b3   :  { %v1229_v47 = vmul.f32 0.00390625, %v1136_v25  ;;  %v1230_v14 = vmul.f32 0.00390625, %v1139_v11  ;;  %v1356_v38 = vmul.f32 %v2819_v55, %v2819_v55  ;;  %v1357_v39 = vmul.f32 %v2822_v63, %v2822_v63  ;;  %1389 = vadd.xlane.f32.xlu0 %v1388_v30 }
 0x1b4   :  { %v1359_v30 = vmul.f32 %v2832_v27, %v2832_v27 }
 0x1b5   :  { %v2835_v28 = vsub.f32 %v2416_v44, %v1229_v47  ;;  %v2838_v1 = vsub.f32 %v2418_v45, %v1229_v47  ;;  %v2841_v26 = vsub.f32 %v2433_v57, %v1230_v14  ;;  %v2844_v23 = vsub.f32 %v2448_v3, %v1230_v14 }
 0x1b6   :  { %v1187_v36 = vpop.xlane.xlu0 %1186  ;;  %v1142_v22 = vpop.xlane.xlu1 %1141  ;;  %v1436_v33 = vadd.f32 %v1357_v39, %v1356_v38  ;;  %v1358_v3 = vmul.f32 %v2829_v6, %v2829_v6 }
 0x1b7   :  { %v1246_v4 = vmul.f32 0.00390625, %v1187_v36  ;;  %v1231_v19 = vmul.f32 0.00390625, %v1142_v22  ;;  %v1328_v37 = vmul.f32 %v2841_v26, %v2841_v26  ;;  %v1329_v44 = vmul.f32 %v2844_v23, %v2844_v23 }
 0x1b8   :  { %1437 = vadd.xlane.f32.xlu0 %v1436_v33  ;;  %v1326_v45 = vmul.f32 %v2835_v28, %v2835_v28  ;;  %v1327_v57 = vmul.f32 %v2838_v1, %v2838_v1 }
 0x1b9   :  { %v2857_v7 = vsub.f32 %v2436_v59, %v1246_v4  ;;  %v2860_v25 = vsub.f32 %v2451_v8, %v1246_v4  ;;  %v2863_v11 = vsub.f32 %v2454_v10, %v1231_v19  ;;  %v2868_v47 = vsub.f32 %v2458_v12, %v1231_v19 }
 0x1ba   :  { %v1190_v14 = vpop.xlane.xlu1 %1189  ;;  %v1145_v38 = vpop.xlane.xlu0 %1144  ;;  %v1394_v39 = vadd.f32 %v1329_v44, %v1328_v37  ;;  %v1391_v36 = vadd.f32 %v1327_v57, %v1326_v45  ;;  %v1439_v4 = vadd.f32 %v1359_v30, %v1358_v3 }
 0x1bb   :  { %v1247_v22 = vmul.f32 0.00390625, %v1190_v14  ;;  %v1232_v33 = vmul.f32 0.00390625, %v1145_v38  ;;  %v1360_v59 = vmul.f32 %v2857_v7, %v2857_v7  ;;  %v1361_v8 = vmul.f32 %v2860_v25, %v2860_v25 }
 0x1bc   :  { %1395 = vadd.xlane.f32.xlu0 %v1394_v39  ;;  %1392 = vadd.xlane.f32.xlu1 %v1391_v36  ;;  %v1330_v19 = vmul.f32 %v2863_v11, %v2863_v11 }
 0x1bd   :  { %v2875_v10 = vsub.f32 %v2491_v40, %v1232_v33  ;;  %v2878_v12 = vsub.f32 %v2503_v50, %v1232_v33  ;;  %v2883_v37 = vsub.f32 %v2460_v13, %v1247_v22  ;;  %v2886_v44 = vsub.f32 %v2464_v15, %v1247_v22 }
 0x1be   :  { %v1193_v45 = vpop.xlane.xlu0 %1192  ;;  %v1148_v57 = vpop.xlane.xlu1 %1147  ;;  %v1442_v14 = vadd.f32 %v1361_v8, %v1360_v59  ;;  %v1331_v40 = vmul.f32 %v2868_v47, %v2868_v47 }
 0x1bf   :  { %v1248_v38 = vmul.f32 0.00390625, %v1193_v45  ;;  %v1233_v39 = vmul.f32 0.00390625, %v1148_v57  ;;  %v1332_v50 = vmul.f32 %v2875_v10, %v2875_v10  ;;  %v1333_v3 = vmul.f32 %v2878_v12, %v2878_v12 }
 0x1c0   :  { %1443 = vadd.xlane.f32.xlu0 %v1442_v14  ;;  %1440 = vadd.xlane.f32.xlu1 %v1439_v4  ;;  %v1397_v8 = vadd.f32 %v1331_v40, %v1330_v19  ;;  %v1362_v45 = vmul.f32 %v2883_v37, %v2883_v37 }
 0x1c1   :  { %v2895_v13 = vsub.f32 %v2493_v41, %v1248_v38  ;;  %v2898_v15 = vsub.f32 %v2506_v52, %v1248_v38  ;;  %v2901_v30 = vsub.f32 %v2511_v54, %v1233_v39  ;;  %v2904_v36 = vsub.f32 %v2514_v56, %v1233_v39 }
 0x1c2   :  { %v1196_v22 = vpop.xlane.xlu1 %1195  ;;  %v1151_v33 = vpop.xlane.xlu0 %1150  ;;  %v1400_v59 = vadd.f32 %v1333_v3, %v1332_v50  ;;  %v1363_v41 = vmul.f32 %v2886_v44, %v2886_v44 }
 0x1c3   :  { %v1249_v4 = vmul.f32 0.00390625, %v1196_v22  ;;  %v1234_v57 = vmul.f32 0.00390625, %v1151_v33  ;;  %v1364_v52 = vmul.f32 %v2895_v13, %v2895_v13  ;;  %v1365_v54 = vmul.f32 %v2898_v15, %v2898_v15 }
 0x1c4   :  { %1401 = vadd.xlane.f32.xlu0 %v1400_v59  ;;  %1398 = vadd.xlane.f32.xlu1 %v1397_v8  ;;  %v1334_v56 = vmul.f32 %v2901_v30, %v2901_v30  ;;  %v1335_v38 = vmul.f32 %v2904_v36, %v2904_v36  ;;  %v1445_v33 = vadd.f32 %v1363_v41, %v1362_v45 }
 0x1c5   :  { %v2917_v19 = vsub.f32 %v2516_v58, %v1249_v4  ;;  %v2920_v14 = vsub.f32 %v2547_v29, %v1234_v57  ;;  %v2923_v40 = vsub.f32 %v2559_v42, %v1234_v57  ;;  %v2928_v39 = vsub.f32 %v2520_v61, %v1249_v4 }
 0x1c6   :  { %v1199_v50 = vpop.xlane.xlu0 %1198  ;;  %v1154_v3 = vpop.xlane.xlu1 %1153  ;;  %v1448_v22 = vadd.f32 %v1365_v54, %v1364_v52  ;;  %v1403_v4 = vadd.f32 %v1335_v38, %v1334_v56 }
 0x1c7   :  { %v1250_v59 = vmul.f32 0.00390625, %v1199_v50  ;;  %v1235_v8 = vmul.f32 0.00390625, %v1154_v3  ;;  %v1336_v58 = vmul.f32 %v2920_v14, %v2920_v14  ;;  %v1337_v29 = vmul.f32 %v2923_v40, %v2923_v40 }
 0x1c8   :  { %1449 = vadd.xlane.f32.xlu0 %v1448_v22  ;;  %1446 = vadd.xlane.f32.xlu1 %v1445_v33  ;;  %v1366_v45 = vmul.f32 %v2917_v19, %v2917_v19 }
 0x1c9   :  { %v2935_v42 = vsub.f32 %v2549_v31, %v1250_v59  ;;  %v2938_v61 = vsub.f32 %v2562_v46, %v1250_v59  ;;  %v2943_v41 = vsub.f32 %v2567_v48, %v1235_v8  ;;  %v2946_v57 = vsub.f32 %v2570_v51, %v1235_v8 }
 0x1ca   :  { %v1202_v52 = vpop.xlane.xlu1 %1201  ;;  %v1157_v54 = vpop.xlane.xlu0 %1156  ;;  %v1406_v50 = vadd.f32 %v1337_v29, %v1336_v58  ;;  %v1367_v31 = vmul.f32 %v2928_v39, %v2928_v39 }
 0x1cb   :  { %v1251_v3 = vmul.f32 0.00390625, %v1202_v52  ;;  %v1236_v22 = vmul.f32 0.00390625, %v1157_v54  ;;  %v1368_v46 = vmul.f32 %v2935_v42, %v2935_v42  ;;  %v1369_v56 = vmul.f32 %v2938_v61, %v2938_v61 }
 0x1cc   :  { %1407 = vadd.xlane.f32.xlu0 %v1406_v50  ;;  %1404 = vadd.xlane.f32.xlu1 %v1403_v4  ;;  %v1451_v29 = vadd.f32 %v1367_v31, %v1366_v45  ;;  %v1338_v52 = vmul.f32 %v2943_v41, %v2943_v41 }
 0x1cd   :  { %v2955_v48 = vsub.f32 %v2572_v53, %v1251_v3  ;;  %v2958_v51 = vsub.f32 %v2576_v60, %v1251_v3  ;;  %v2961_v38 = vsub.f32 %v2603_v32, %v1236_v22  ;;  %v2964_v33 = vsub.f32 %v2615_v49, %v1236_v22  ;;  %v3610_v22 = vld [vmem:[#allocation5_spill] sm:$0xff] }
 0x1ce   :  { %v1205_v59 = vpop.xlane.xlu0 %1204  ;;  %v1160_v8 = vpop.xlane.xlu1 %1159  ;;  %v1454_v58 = vadd.f32 %v1369_v56, %v1368_v46  ;;  %v1339_v53 = vmul.f32 %v2946_v57, %v2946_v57 }
 0x1cf   :  { %3605 = vst [vmem:[#allocation23_spill] sm:$0xff] %v2955_v48  ;;  %3606 = vst [vmem:[#allocation24_spill] sm:$0xff] %v2958_v51  ;;  %v1252_v4 = vmul.f32 0.00390625, %v1205_v59  ;;  %v1237_v54 = vmul.f32 0.00390625, %v1160_v8  ;;  %v1340_v60 = vmul.f32 %v2961_v38, %v2961_v38  ;;  %v1341_v32 = vmul.f32 %v2964_v33, %v2964_v33 }
 0x1d0   :  { %1455 = vadd.xlane.f32.xlu0 %v1454_v58  ;;  %1452 = vadd.xlane.f32.xlu1 %v1451_v29  ;;  %v1370_v49 = vmul.f32 %v2955_v48, %v2955_v48  ;;  %v1371_v3 = vmul.f32 %v2958_v51, %v2958_v51  ;;  %v1409_v58 = vadd.f32 %v1339_v53, %v1338_v52  ;;  %v3614_v51 = vld [vmem:[#allocation10_spill] sm:$0xff] }
 0x1d1   :  { %v2977_v45 = vsub.f32 %v2605_v34, %v1252_v4  ;;  %v2980_v50 = vsub.f32 %v2618_v62, %v1252_v4  ;;  %v2983_v31 = vsub.f32 %v2623_v0, %v1237_v54  ;;  %v2988_v46 = vsub.f32 %v3610_v22, %v1237_v54  ;;  %v3612_v0 = vld [vmem:[#allocation8_spill] sm:$0xff]  ;;  %v3616_v53 = vld [vmem:[#allocation6_spill] sm:$0xff] }
 0x1d2   :  { %v1208_v56 = vpop.xlane.xlu1 %1207  ;;  %v1163_v59 = vpop.xlane.xlu0 %1162  ;;  %v1412_v8 = vadd.f32 %v1341_v32, %v1340_v60  ;;  %v1457_v22 = vadd.f32 %v1371_v3, %v1370_v49  ;;  %v3618_v32 = vld [vmem:[#allocation7_spill] sm:$0xff]  ;;  %v3620_v49 = vld [vmem:[#allocation9_spill] sm:$0xff] }
 0x1d3   :  { %3607 = vst [vmem:[#allocation25_spill] sm:$0xff] %v2977_v45  ;;  %3608 = vst [vmem:[#allocation26_spill] sm:$0xff] %v2980_v50  ;;  %v1253_v29 = vmul.f32 0.00390625, %v1208_v56  ;;  %v1238_v48 = vmul.f32 0.00390625, %v1163_v59  ;;  %v1372_v34 = vmul.f32 %v2977_v45, %v2977_v45  ;;  %v1373_v62 = vmul.f32 %v2980_v50, %v2980_v50 }
 0x1d4   :  { %3609 = vst [vmem:[#allocation27_spill] sm:$0xff] %v2983_v31  ;;  %3611 = vst [vmem:[#allocation5_spill] sm:$0xff] %v2988_v46  ;;  %1413 = vadd.xlane.f32.xlu0 %v1412_v8  ;;  %1410 = vadd.xlane.f32.xlu1 %v1409_v58  ;;  %v1342_v52 = vmul.f32 %v2983_v31, %v2983_v31  ;;  %v1343_v58 = vmul.f32 %v2988_v46, %v2988_v46 }
 0x1d5   :  { %v2995_v4 = vsub.f32 %v3612_v0, %v1238_v48  ;;  %v2998_v54 = vsub.f32 %v3614_v51, %v1238_v48  ;;  %v3003_v60 = vsub.f32 %v3616_v53, %v1253_v29  ;;  %v3006_v56 = vsub.f32 %v3618_v32, %v1253_v29  ;;  %v3622_v29 = vld [vmem:[#allocation11_spill] sm:$0xff]  ;;  %v3626_v32 = vld [vmem:[#allocation13_spill] sm:$0xff] }
 0x1d6   :  { %v1211_v59 = vpop.xlane.xlu0 %1210  ;;  %v1166_v50 = vpop.xlane.xlu1 %1165  ;;  %v1460_v8 = vadd.f32 %v1373_v62, %v1372_v34  ;;  %v3624_v34 = vld [vmem:[#allocation12_spill] sm:$0xff] }
 0x1d7   :  { %3613 = vst [vmem:[#allocation8_spill] sm:$0xff] %v2995_v4  ;;  %3615 = vst [vmem:[#allocation10_spill] sm:$0xff] %v2998_v54  ;;  %v1254_v0 = vmul.f32 0.00390625, %v1211_v59  ;;  %v1239_v45 = vmul.f32 0.00390625, %v1166_v50  ;;  %v1344_v48 = vmul.f32 %v2995_v4, %v2995_v4  ;;  %v1345_v51 = vmul.f32 %v2998_v54, %v2998_v54 }
 0x1d8   :  { %3617 = vst [vmem:[#allocation6_spill] sm:$0xff] %v3003_v60  ;;  %3619 = vst [vmem:[#allocation7_spill] sm:$0xff] %v3006_v56  ;;  %1461 = vadd.xlane.f32.xlu0 %v1460_v8  ;;  %1458 = vadd.xlane.f32.xlu1 %v1457_v22  ;;  %v1415_v4 = vadd.f32 %v1343_v58, %v1342_v52  ;;  %v1374_v8 = vmul.f32 %v3003_v60, %v3003_v60  ;;  %v3628_v52 = vld [vmem:[#allocation14_spill] sm:$0xff] }
 0x1d9   :  { %v3015_v3 = vsub.f32 %v3620_v49, %v1254_v0  ;;  %v3018_v53 = vsub.f32 %v3622_v29, %v1254_v0  ;;  %v3021_v62 = vsub.f32 %v3624_v34, %v1239_v45  ;;  %v3024_v59 = vsub.f32 %v3626_v32, %v1239_v45  ;;  %v3631_v34 = vld [vmem:[#allocation18_spill] sm:$0xff] }
 0x1da   :  { %v1214_v50 = vpop.xlane.xlu1 %1213  ;;  %v1169_v46 = vpop.xlane.xlu0 %1168  ;;  %v1418_v31 = vadd.f32 %v1345_v51, %v1344_v48  ;;  %v1375_v22 = vmul.f32 %v3006_v56, %v3006_v56  ;;  %v3629_v48 = vld [vmem:[#allocation16_spill] sm:$0xff] }
 0x1db   :  { %3621 = vst [vmem:[#allocation9_spill] sm:$0xff] %v3015_v3  ;;  %3623 = vst [vmem:[#allocation11_spill] sm:$0xff] %v3018_v53  ;;  %v1255_v49 = vmul.f32 0.00390625, %v1214_v50  ;;  %v1240_v54 = vmul.f32 0.00390625, %v1169_v46  ;;  %v1376_v0 = vmul.f32 %v3015_v3, %v3015_v3  ;;  %v1377_v29 = vmul.f32 %v3018_v53, %v3018_v53  ;;  %v3633_v50 = vld [vmem:[#allocation15_spill] sm:$0xff] }
 0x1dc   :  { %3625 = vst [vmem:[#allocation12_spill] sm:$0xff] %v3021_v62  ;;  %3627 = vst [vmem:[#allocation13_spill] sm:$0xff] %v3024_v59  ;;  %1419 = vadd.xlane.f32.xlu0 %v1418_v31  ;;  %1416 = vadd.xlane.f32.xlu1 %v1415_v4  ;;  %v1346_v45 = vmul.f32 %v3021_v62, %v3021_v62  ;;  %v1347_v46 = vmul.f32 %v3024_v59, %v3024_v59  ;;  %v3636_v59 = vld [vmem:[#allocation19_spill] sm:$0xff] }
 0x1dd   :  { %v3037_v58 = vsub.f32 %v3628_v52, %v1255_v49  ;;  %v3040_v51 = vsub.f32 %v3629_v48, %v1240_v54  ;;  %v3043_v32 = vsub.f32 %v3631_v34, %v1240_v54  ;;  %v3048_v56 = vsub.f32 %v3633_v50, %v1255_v49  ;;  %v3635_v54 = vld [vmem:[#allocation17_spill] sm:$0xff] }
 0x1de   :  { %v1217_v31 = vpop.xlane.xlu0 %1216  ;;  %v1172_v4 = vpop.xlane.xlu1 %1171  ;;  %v1466_v60 = vadd.f32 %v1377_v29, %v1376_v0  ;;  %v1463_v53 = vadd.f32 %v1375_v22, %v1374_v8  ;;  %v1421_v50 = vadd.f32 %v1347_v46, %v1346_v45  ;;  %v3637_v22 = vld [vmem:[#allocation20_spill] sm:$0xff]  ;;  %v3638_v29 = vld [vmem:[#allocation21_spill] sm:$0xff] }
 0x1df   :  { %3630 = vst [vmem:[#allocation14_spill] sm:$0xff] %v3040_v51  ;;  %3632 = vst [vmem:[#allocation16_spill] sm:$0xff] %v3043_v32  ;;  %v1256_v62 = vmul.f32 0.00390625, %v1217_v31  ;;  %v1241_v3 = vmul.f32 0.00390625, %v1172_v4  ;;  %v1348_v52 = vmul.f32 %v3040_v51, %v3040_v51  ;;  %v1349_v48 = vmul.f32 %v3043_v32, %v3043_v32 }
 0x1e0   :  { %3634 = vst [vmem:[#allocation18_spill] sm:$0xff] %v3048_v56  ;;  %1467 = vadd.xlane.f32.xlu0 %v1466_v60  ;;  %1464 = vadd.xlane.f32.xlu1 %v1463_v53  ;;  %v1378_v8 = vmul.f32 %v3037_v58, %v3037_v58  ;;  %v1379_v53 = vmul.f32 %v3048_v56, %v3048_v56 }
 0x1e1   :  { %v3055_v34 = vsub.f32 %v3635_v54, %v1256_v62  ;;  %v3058_v49 = vsub.f32 %v3636_v59, %v1256_v62  ;;  %v3063_v0 = vsub.f32 %v3637_v22, %v1241_v3  ;;  %v3066_v31 = vsub.f32 %v3638_v29, %v1241_v3  ;;  %v3639_v3 = vld [vmem:[#allocation22_spill] sm:$0xff] }
 0x1e2   :  { %v1220_v4 = vpop.xlane.xlu1 %1219  ;;  %v1175_v32 = vpop.xlane.xlu0 %1174  ;;  %v1424_v60 = vadd.f32 %v1349_v48, %v1348_v52 }
 0x1e3   :  { %v1257_v54 = vmul.f32 0.00390625, %v1220_v4  ;;  %v1242_v51 = vmul.f32 0.00390625, %v1175_v32  ;;  %v1380_v62 = vmul.f32 %v3055_v34, %v3055_v34  ;;  %v1381_v59 = vmul.f32 %v3058_v49, %v3058_v49 }
 0x1e4   :  { %1425 = vadd.xlane.f32.xlu0 %v1424_v60  ;;  %1422 = vadd.xlane.f32.xlu1 %v1421_v50  ;;  %v1469_v4 = vadd.f32 %v1379_v53, %v1378_v8  ;;  %v1350_v60 = vmul.f32 %v3063_v0, %v3063_v0 }
 0x1e5   :  { %v3075_v45 = vsub.f32 %v2740_v21, %v1257_v54  ;;  %v3078_v46 = vsub.f32 %v3639_v3, %v1257_v54  ;;  %v3081_v52 = vsub.f32 %v2774_v18, %v1242_v51  ;;  %v3084_v48 = vsub.f32 %v2783_v9, %v1242_v51 }
 0x1e6   :  { %v1223_v32 = vpop.xlane.xlu0 %1222  ;;  %v1178_v22 = vpop.xlane.xlu1 %1177  ;;  %v1472_v29 = vadd.f32 %v1381_v59, %v1380_v62  ;;  %v1351_v21 = vmul.f32 %v3066_v31, %v3066_v31 }
 0x1e7   :  { %v1258_v50 = vmul.f32 0.00390625, %v1223_v32  ;;  %v1243_v56 = vmul.f32 0.00390625, %v1178_v22  ;;  %v1352_v54 = vmul.f32 %v3081_v52, %v3081_v52  ;;  %v1353_v18 = vmul.f32 %v3084_v48, %v3084_v48 }
 0x1e8   :  { %1473 = vadd.xlane.f32.xlu0 %v1472_v29  ;;  %1470 = vadd.xlane.f32.xlu1 %v1469_v4  ;;  %v1382_v8 = vmul.f32 %v3075_v45, %v3075_v45  ;;  %v1383_v53 = vmul.f32 %v3078_v46, %v3078_v46  ;;  %v1427_v22 = vadd.f32 %v1351_v21, %v1350_v60 }
 0x1e9   :  { %v3095_v9 = vsub.f32 %v2776_v2, %v1258_v50  ;;  %v3098_v51 = vsub.f32 %v2786_v16, %v1258_v50  ;;  %v3105_v62 = vsub.f32 %v2791_v17, %v1243_v56  ;;  %v3108_v59 = vsub.f32 %v2796_v5, %v1243_v56 }
 0x1ea   :  { %v1226_v3 = vpop.xlane.xlu1 %1225  ;;  %v1430_v32 = vadd.f32 %v1353_v18, %v1352_v54  ;;  %v1475_v50 = vadd.f32 %v1383_v53, %v1382_v8 }
 0x1eb   :  { %3640 = vst [vmem:[#allocation15_spill] sm:$0xff] %v3108_v59  ;;  %v1259_v2 = vmul.f32 0.00390625, %v1226_v3  ;;  %v1384_v16 = vmul.f32 %v3095_v9, %v3095_v9  ;;  %v1385_v29 = vmul.f32 %v3098_v51, %v3098_v51  ;;  %v1354_v56 = vmul.f32 %v3105_v62, %v3105_v62 }
 0x1ec   :  { %1431 = vadd.xlane.f32.xlu0 %v1430_v32  ;;  %1428 = vadd.xlane.f32.xlu1 %v1427_v22  ;;  %v1355_v60 = vmul.f32 %v3108_v59, %v3108_v59 }
 0x1ed   :  { %v1478_v4 = vadd.f32 %v1385_v29, %v1384_v16  ;;  %v3115_v17 = vsub.f32 %v2793_v20, %v1259_v2  ;;  %v3118_v5 = vsub.f32 %v2800_v35, %v1259_v2 }
 0x1ee   :  { %v1433_v21 = vadd.f32 %v1355_v60, %v1354_v56 }
 0x1ef   :  { %3641 = vst [vmem:[#allocation17_spill] sm:$0xff] %v3115_v17  ;;  %3642 = vst [vmem:[#allocation19_spill] sm:$0xff] %v3118_v5  ;;  %v1386_v54 = vmul.f32 %v3115_v17, %v3115_v17  ;;  %v1387_v18 = vmul.f32 %v3118_v5, %v3118_v5 }
 0x1f0   :  { %1479 = vadd.xlane.f32.xlu0 %v1478_v4  ;;  %1476 = vadd.xlane.f32.xlu1 %v1475_v50  ;;  %v1644_v50 = vld [vmem:[%s3540_s4] sm:$0x3] }
 0x1f1   :  { %v1481_v20 = vadd.f32 %v1387_v18, %v1386_v54  ;;  %v1720_v18 = vld [vmem:[%s3541_s5] sm:$0x3] }
 0x1f4   :  { %1434 = vadd.xlane.f32.xlu1 %v1433_v21 }
 0x1f8   :  { %1482 = vadd.xlane.f32.xlu1 %v1481_v20 }
 0x240   :  { %v1390_v35 = vpop.xlane.xlu0 %1389 }
 0x241   :  { %v1484_v8 = vmul.f32 0.00390625, %v1390_v35 }
 0x243   :  { %v1516_v53 = vadd.f32 1e-05, %v1484_v8  ;;  %v3643_v8 = vld [vmem:[#allocation3_spill] sm:$0xff] }
 0x245   :  { %v1438_v3 = vpop.xlane.xlu0 %1437  ;;  %2056 = vrsqrt.f32 %v1516_v53  ;;  %v3135_v53 = vrot.slane %v1644_v50, %v3643_v8 }
 0x246   :  { %v1500_v32 = vmul.f32 0.00390625, %v1438_v3  ;;  %v3644_v3 = vld [vmem:[#allocation4_spill] sm:$0xff] }
 0x248   :  { %v1532_v22 = vadd.f32 1e-05, %v1500_v32  ;;  %v3138_v32 = vrot.slane %v1644_v50, %v3644_v3 }
 0x249   :  { %v1396_v2 = vpop.xlane.xlu0 %1395  ;;  %v1393_v16 = vpop.xlane.xlu1 %1392 }
 0x24a   :  { %2058 = vrsqrt.f32 %v1532_v22  ;;  %v1486_v29 = vmul.f32 0.00390625, %v1396_v2  ;;  %v1485_v4 = vmul.f32 0.00390625, %v1393_v16 }
 0x24c   :  { %v1518_v56 = vadd.f32 1e-05, %v1486_v29  ;;  %v1517_v60 = vadd.f32 1e-05, %v1485_v4  ;;  %v3141_v29 = vrot.slane %v1720_v18, %v3643_v8  ;;  %v3144_v4 = vrot.slane %v1720_v18, %v3644_v3 }
 0x24d   :  { %v1444_v21 = vpop.xlane.xlu0 %1443  ;;  %v1441_v54 = vpop.xlane.xlu1 %1440 }
 0x24e   :  { %2060 = vrsqrt.f32 %v1518_v56  ;;  %v1502_v20 = vmul.f32 0.00390625, %v1444_v21  ;;  %v1501_v35 = vmul.f32 0.00390625, %v1441_v54 }
 0x24f   :  { %2062 = vrsqrt.f32 %v1517_v60  ;;  %v2057_v22 = vpop.eup %2056 }
 0x250   :  { %v1534_v2 = vadd.f32 1e-05, %v1502_v20  ;;  %v1533_v16 = vadd.f32 1e-05, %v1501_v35  ;;  %v1580_v56 = vmul.f32 %v2057_v22, %v2809_v24  ;;  %v1581_v21 = vmul.f32 %v2057_v22, %v2812_v43 }
 0x251   :  { %v1402_v54 = vpop.xlane.xlu0 %1401  ;;  %v1399_v5 = vpop.xlane.xlu1 %1398 }
 0x252   :  { %2064 = vrsqrt.f32 %v1534_v2  ;;  %v1488_v17 = vmul.f32 0.00390625, %v1402_v54  ;;  %v1487_v50 = vmul.f32 0.00390625, %v1399_v5  ;;  %v1656_v60 = vmul.f32 %v3135_v53, %v1580_v56 }
 0x253   :  { %v1657_v20 = vmul.f32 %v3138_v32, %v1581_v21  ;;  %2066 = vrsqrt.f32 %v1533_v16 }
 0x254   :  { %v2059_v35 = vpop.eup %2058  ;;  %v1520_v8 = vadd.f32 1e-05, %v1488_v17  ;;  %v1519_v59 = vadd.f32 1e-05, %v1487_v50  ;;  %v1732_v18 = vadd.f32 %v3141_v29, %v1656_v60 }
 0x255   :  { %v1733_v3 = vadd.f32 %v3144_v4, %v1657_v20  ;;  %v1612_v24 = vmul.f32 %v2059_v35, %v2819_v55  ;;  %v1613_v43 = vmul.f32 %v2059_v35, %v2822_v63  ;;  %v1450_v22 = vpop.xlane.xlu0 %1449  ;;  %v1447_v2 = vpop.xlane.xlu1 %1446 }
 0x256   :  { %2068 = vrsqrt.f32 %v1520_v8  ;;  %v1504_v5 = vmul.f32 0.00390625, %v1450_v22  ;;  %v1503_v54 = vmul.f32 0.00390625, %v1447_v2  ;;  %1796 = vst [vmem:[%s3542_s6] sm:$0xff] %v1732_v18 }
 0x257   :  { %1797 = vst [vmem:[%s3542_s6 + $0x8] sm:$0xff] %v1733_v3  ;;  %v1688_v17 = vmul.f32 %v3135_v53, %v1612_v24  ;;  %v1689_v16 = vmul.f32 %v3138_v32, %v1613_v43  ;;  %2070 = vrsqrt.f32 %v1519_v59 }
 0x258   :  { %v2061_v55 = vpop.eup %2060  ;;  %v1536_v63 = vadd.f32 1e-05, %v1504_v5  ;;  %v1535_v56 = vadd.f32 1e-05, %v1503_v54 }
 0x259   :  { %v2063_v21 = vpop.eup %2062  ;;  %v1764_v50 = vadd.f32 %v3141_v29, %v1688_v17  ;;  %v1765_v60 = vadd.f32 %v3144_v4, %v1689_v16  ;;  %v1584_v20 = vmul.f32 %v2061_v55, %v2841_v26  ;;  %v1585_v35 = vmul.f32 %v2061_v55, %v2844_v23  ;;  %v1408_v8 = vpop.xlane.xlu0 %1407 }
 0x25a   :  { %v1405_v18 = vpop.xlane.xlu1 %1404  ;;  %v1582_v3 = vmul.f32 %v2063_v21, %v2835_v28  ;;  %v1583_v24 = vmul.f32 %v2063_v21, %v2838_v1  ;;  %2072 = vrsqrt.f32 %v1536_v63  ;;  %v1490_v59 = vmul.f32 0.00390625, %v1408_v8 }
 0x25b   :  { %1828 = vst [vmem:[%s3542_s6 + $0x100] sm:$0xff] %v1764_v50  ;;  %1829 = vst [vmem:[%s3542_s6 + $0x108] sm:$0xff] %v1765_v60  ;;  %v1660_v26 = vmul.f32 %v3135_v53, %v1584_v20  ;;  %v1661_v23 = vmul.f32 %v3138_v32, %v1585_v35  ;;  %2074 = vrsqrt.f32 %v1535_v56  ;;  %v1489_v43 = vmul.f32 0.00390625, %v1405_v18 }
 0x25c   :  { %v2065_v22 = vpop.eup %2064  ;;  %v1658_v28 = vmul.f32 %v3135_v53, %v1582_v3  ;;  %v1659_v1 = vmul.f32 %v3138_v32, %v1583_v24  ;;  %v1522_v2 = vadd.f32 1e-05, %v1490_v59 }
 0x25d   :  { %v2067_v5 = vpop.eup %2066  ;;  %v1736_v54 = vadd.f32 %v3141_v29, %v1660_v26  ;;  %v1737_v17 = vadd.f32 %v3144_v4, %v1661_v23  ;;  %v1616_v16 = vmul.f32 %v2065_v22, %v2857_v7  ;;  %v1617_v55 = vmul.f32 %v2065_v22, %v2860_v25  ;;  %v1456_v63 = vpop.xlane.xlu0 %1455 }
 0x25e   :  { %v1453_v21 = vpop.xlane.xlu1 %1452  ;;  %v1734_v56 = vadd.f32 %v3141_v29, %v1658_v28  ;;  %v1735_v50 = vadd.f32 %v3144_v4, %v1659_v1  ;;  %v1614_v60 = vmul.f32 %v2067_v5, %v2829_v6  ;;  %v1615_v20 = vmul.f32 %v2067_v5, %v2832_v27 }
 0x25f   :  { %1800 = vst [vmem:[%s3542_s6 + $0x20] sm:$0xff] %v1736_v54  ;;  %1801 = vst [vmem:[%s3542_s6 + $0x28] sm:$0xff] %v1737_v17  ;;  %v1692_v7 = vmul.f32 %v3135_v53, %v1616_v16  ;;  %v1693_v25 = vmul.f32 %v3138_v32, %v1617_v55  ;;  %2076 = vrsqrt.f32 %v1522_v2  ;;  %v1521_v35 = vadd.f32 1e-05, %v1489_v43 }
 0x260   :  { %v2069_v8 = vpop.eup %2068  ;;  %1798 = vst [vmem:[%s3542_s6 + $0x10] sm:$0xff] %v1734_v56  ;;  %1799 = vst [vmem:[%s3542_s6 + $0x18] sm:$0xff] %v1735_v50  ;;  %v1690_v6 = vmul.f32 %v3135_v53, %v1614_v60  ;;  %v1691_v27 = vmul.f32 %v3138_v32, %v1615_v20  ;;  %v1506_v18 = vmul.f32 0.00390625, %v1456_v63  ;;  %v1505_v3 = vmul.f32 0.00390625, %v1453_v21 }
 0x261   :  { %v2071_v24 = vpop.eup %2070  ;;  %v1768_v59 = vadd.f32 %v3141_v29, %v1692_v7  ;;  %v1769_v26 = vadd.f32 %v3144_v4, %v1693_v25  ;;  %v1588_v23 = vmul.f32 %v2069_v8, %v2875_v10  ;;  %v1589_v43 = vmul.f32 %v2069_v8, %v2878_v12  ;;  %v1414_v22 = vpop.xlane.xlu0 %1413 }
 0x262   :  { %v1411_v28 = vpop.xlane.xlu1 %1410  ;;  %v1766_v1 = vadd.f32 %v3141_v29, %v1690_v6  ;;  %v1767_v2 = vadd.f32 %v3144_v4, %v1691_v27  ;;  %v1586_v5 = vmul.f32 %v2071_v24, %v2863_v11  ;;  %v1587_v54 = vmul.f32 %v2071_v24, %v2868_v47 }
 0x263   :  { %1832 = vst [vmem:[%s3542_s6 + $0x120] sm:$0xff] %v1768_v59  ;;  %1833 = vst [vmem:[%s3542_s6 + $0x128] sm:$0xff] %v1769_v26  ;;  %v1664_v10 = vmul.f32 %v3135_v53, %v1588_v23  ;;  %v1665_v12 = vmul.f32 %v3138_v32, %v1589_v43  ;;  %2078 = vrsqrt.f32 %v1521_v35  ;;  %v1538_v17 = vadd.f32 1e-05, %v1506_v18 }
 0x264   :  { %v2073_v16 = vpop.eup %2072  ;;  %1830 = vst [vmem:[%s3542_s6 + $0x110] sm:$0xff] %v1766_v1  ;;  %1831 = vst [vmem:[%s3542_s6 + $0x118] sm:$0xff] %v1767_v2  ;;  %v1662_v11 = vmul.f32 %v3135_v53, %v1586_v5  ;;  %v1663_v47 = vmul.f32 %v3138_v32, %v1587_v54  ;;  %v1537_v55 = vadd.f32 1e-05, %v1505_v3  ;;  %v1492_v63 = vmul.f32 0.00390625, %v1414_v22 }
 0x265   :  { %v2075_v21 = vpop.eup %2074  ;;  %v1740_v56 = vadd.f32 %v3141_v29, %v1664_v10  ;;  %v1741_v50 = vadd.f32 %v3144_v4, %v1665_v12  ;;  %v1620_v60 = vmul.f32 %v2073_v16, %v2895_v13  ;;  %v1621_v20 = vmul.f32 %v2073_v16, %v2898_v15  ;;  %v1462_v7 = vpop.xlane.xlu0 %1461 }
 0x266   :  { %v1459_v25 = vpop.xlane.xlu1 %1458  ;;  %v1738_v35 = vadd.f32 %v3141_v29, %v1662_v11  ;;  %v1739_v8 = vadd.f32 %v3144_v4, %v1663_v47  ;;  %v1618_v6 = vmul.f32 %v2075_v21, %v2883_v37  ;;  %v1619_v27 = vmul.f32 %v2075_v21, %v2886_v44 }
 0x267   :  { %1804 = vst [vmem:[%s3542_s6 + $0x40] sm:$0xff] %v1740_v56  ;;  %1805 = vst [vmem:[%s3542_s6 + $0x48] sm:$0xff] %v1741_v50  ;;  %v1696_v13 = vmul.f32 %v3135_v53, %v1620_v60  ;;  %v1697_v15 = vmul.f32 %v3138_v32, %v1621_v20  ;;  %2080 = vrsqrt.f32 %v1538_v17  ;;  %v1524_v18 = vadd.f32 1e-05, %v1492_v63 }
 0x268   :  { %1802 = vst [vmem:[%s3542_s6 + $0x30] sm:$0xff] %v1738_v35  ;;  %1803 = vst [vmem:[%s3542_s6 + $0x38] sm:$0xff] %v1739_v8  ;;  %v1694_v37 = vmul.f32 %v3135_v53, %v1618_v6  ;;  %v1695_v44 = vmul.f32 %v3138_v32, %v1619_v27  ;;  %2082 = vrsqrt.f32 %v1537_v55  ;;  %v1491_v3 = vmul.f32 0.00390625, %v1411_v28 }
 0x269   :  { %v2077_v24 = vpop.eup %2076  ;;  %v1772_v59 = vadd.f32 %v3141_v29, %v1696_v13  ;;  %v1773_v26 = vadd.f32 %v3144_v4, %v1697_v15  ;;  %2084 = vrsqrt.f32 %v1524_v18  ;;  %v1508_v23 = vmul.f32 0.00390625, %v1462_v7  ;;  %v1420_v43 = vpop.xlane.xlu0 %1419 }
 0x26a   :  { %v1417_v22 = vpop.xlane.xlu1 %1416  ;;  %v1770_v1 = vadd.f32 %v3141_v29, %v1694_v37  ;;  %v1771_v2 = vadd.f32 %v3144_v4, %v1695_v44  ;;  %v1592_v5 = vmul.f32 %v2077_v24, %v2920_v14  ;;  %v1593_v54 = vmul.f32 %v2077_v24, %v2923_v40 }
 0x26b   :  { %1836 = vst [vmem:[%s3542_s6 + $0x140] sm:$0xff] %v1772_v59  ;;  %1837 = vst [vmem:[%s3542_s6 + $0x148] sm:$0xff] %v1773_v26  ;;  %v1523_v28 = vadd.f32 1e-05, %v1491_v3  ;;  %v1540_v10 = vadd.f32 1e-05, %v1508_v23 }
 0x26c   :  { %v1507_v12 = vmul.f32 0.00390625, %v1459_v25  ;;  %v1494_v17 = vmul.f32 0.00390625, %v1420_v43  ;;  %1834 = vst [vmem:[%s3542_s6 + $0x130] sm:$0xff] %v1770_v1  ;;  %1835 = vst [vmem:[%s3542_s6 + $0x138] sm:$0xff] %v1771_v2  ;;  %v1668_v14 = vmul.f32 %v3135_v53, %v1592_v5  ;;  %v1669_v40 = vmul.f32 %v3138_v32, %v1593_v54 }
 0x26d   :  { %v1493_v16 = vmul.f32 0.00390625, %v1417_v22  ;;  %v2079_v11 = vpop.eup %2078  ;;  %2086 = vrsqrt.f32 %v1523_v28  ;;  %v1468_v63 = vpop.xlane.xlu0 %1467 }
 0x26e   :  { %v1539_v47 = vadd.f32 1e-05, %v1507_v12  ;;  %v1526_v55 = vadd.f32 1e-05, %v1494_v17  ;;  %v1465_v21 = vpop.xlane.xlu1 %1464  ;;  %v1744_v56 = vadd.f32 %v3141_v29, %v1668_v14  ;;  %v1745_v50 = vadd.f32 %v3144_v4, %v1669_v40 }
 0x26f   :  { %v1590_v60 = vmul.f32 %v2079_v11, %v2901_v30  ;;  %v1591_v20 = vmul.f32 %v2079_v11, %v2904_v36  ;;  %2088 = vrsqrt.f32 %v1540_v10  ;;  %v1525_v7 = vadd.f32 1e-05, %v1493_v16 }
 0x270   :  { %v1510_v25 = vmul.f32 0.00390625, %v1468_v63  ;;  %v1509_v35 = vmul.f32 0.00390625, %v1465_v21  ;;  %1808 = vst [vmem:[%s3542_s6 + $0x60] sm:$0xff] %v1744_v56  ;;  %1809 = vst [vmem:[%s3542_s6 + $0x68] sm:$0xff] %v1745_v50  ;;  %2090 = vrsqrt.f32 %v1539_v47 }
 0x271   :  { %v1666_v8 = vmul.f32 %v3135_v53, %v1590_v60  ;;  %v1667_v6 = vmul.f32 %v3138_v32, %v1591_v20  ;;  %v2081_v30 = vpop.eup %2080  ;;  %2092 = vrsqrt.f32 %v1526_v55  ;;  %v1426_v13 = vpop.xlane.xlu0 %1425 }
 0x272   :  { %v1542_v36 = vadd.f32 1e-05, %v1510_v25  ;;  %v1541_v27 = vadd.f32 1e-05, %v1509_v35  ;;  %v1423_v15 = vpop.xlane.xlu1 %1422  ;;  %v2083_v18 = vpop.eup %2082  ;;  %v1624_v3 = vmul.f32 %v2081_v30, %v2935_v42  ;;  %v1625_v24 = vmul.f32 %v2081_v30, %v2938_v61  ;;  %v3646_v35 = vld [vmem:[#allocation26_spill] sm:$0xff]  ;;  %v3647_v30 = vld [vmem:[#allocation23_spill] sm:$0xff] }
 0x273   :  { %v1742_v37 = vadd.f32 %v3141_v29, %v1666_v8  ;;  %v1743_v44 = vadd.f32 %v3144_v4, %v1667_v6  ;;  %v2085_v59 = vpop.eup %2084  ;;  %v1622_v26 = vmul.f32 %v2083_v18, %v2917_v19  ;;  %v1623_v23 = vmul.f32 %v2083_v18, %v2928_v39 }
 0x274   :  { %2094 = vrsqrt.f32 %v1525_v7  ;;  %v1496_v43 = vmul.f32 0.00390625, %v1426_v13  ;;  %v1700_v22 = vmul.f32 %v3135_v53, %v1624_v3  ;;  %v1701_v42 = vmul.f32 %v3138_v32, %v1625_v24  ;;  %v3645_v7 = vld [vmem:[#allocation25_spill] sm:$0xff] }
 0x275   :  { %1806 = vst [vmem:[%s3542_s6 + $0x50] sm:$0xff] %v1742_v37  ;;  %1807 = vst [vmem:[%s3542_s6 + $0x58] sm:$0xff] %v1743_v44  ;;  %v1596_v61 = vmul.f32 %v2085_v59, %v2961_v38  ;;  %v1597_v19 = vmul.f32 %v2085_v59, %v2964_v33  ;;  %v1698_v39 = vmul.f32 %v3135_v53, %v1622_v26  ;;  %2096 = vrsqrt.f32 %v1542_v36  ;;  %v1474_v17 = vpop.xlane.xlu0 %1473 }
 0x276   :  { %v1699_v1 = vmul.f32 %v3138_v32, %v1623_v23  ;;  %v1528_v2 = vadd.f32 1e-05, %v1496_v43  ;;  %v1471_v5 = vpop.xlane.xlu1 %1470  ;;  %v1776_v54 = vadd.f32 %v3141_v29, %v1700_v22  ;;  %v1777_v28 = vadd.f32 %v3144_v4, %v1701_v42  ;;  %v3649_v23 = vld [vmem:[#allocation8_spill] sm:$0xff]  ;;  %v3650_v22 = vld [vmem:[#allocation10_spill] sm:$0xff] }
 0x277   :  { %v1672_v10 = vmul.f32 %v3135_v53, %v1596_v61  ;;  %v1673_v12 = vmul.f32 %v3138_v32, %v1597_v19  ;;  %v2087_v14 = vpop.eup %2086  ;;  %v1774_v38 = vadd.f32 %v3141_v29, %v1698_v39  ;;  %2098 = vrsqrt.f32 %v1541_v27  ;;  %v3648_v27 = vld [vmem:[#allocation24_spill] sm:$0xff] }
 0x278   :  { %v1775_v33 = vadd.f32 %v3144_v4, %v1699_v1  ;;  %v1495_v40 = vmul.f32 0.00390625, %v1423_v15  ;;  %1840 = vst [vmem:[%s3542_s6 + $0x160] sm:$0xff] %v1776_v54  ;;  %1841 = vst [vmem:[%s3542_s6 + $0x168] sm:$0xff] %v1777_v28  ;;  %v1594_v47 = vmul.f32 %v2087_v14, %v2943_v41  ;;  %v1595_v55 = vmul.f32 %v2087_v14, %v2946_v57  ;;  %v3651_v1 = vld [vmem:[#allocation27_spill] sm:$0xff] }
 0x279   :  { %v1748_v16 = vadd.f32 %v3141_v29, %v1672_v10  ;;  %v1749_v11 = vadd.f32 %v3144_v4, %v1673_v12  ;;  %v2089_v63 = vpop.eup %2088  ;;  %1838 = vst [vmem:[%s3542_s6 + $0x150] sm:$0xff] %v1774_v38  ;;  %2100 = vrsqrt.f32 %v1528_v2  ;;  %v1512_v56 = vmul.f32 0.00390625, %v1474_v17 }
 0x27a   :  { %1839 = vst [vmem:[%s3542_s6 + $0x158] sm:$0xff] %v1775_v33  ;;  %v1527_v21 = vadd.f32 1e-05, %v1495_v40  ;;  %v1511_v50 = vmul.f32 0.00390625, %v1471_v5  ;;  %v3322_v60 = vpop.xlane.xlu1 %1428  ;;  %v2091_v20 = vpop.eup %2090  ;;  %v1670_v41 = vmul.f32 %v3135_v53, %v1594_v47  ;;  %v1671_v57 = vmul.f32 %v3138_v32, %v1595_v55  ;;  %v3652_v5 = vld [vmem:[#allocation5_spill] sm:$0xff] }
 0x27b   :  { %1812 = vst [vmem:[%s3542_s6 + $0x80] sm:$0xff] %v1748_v16  ;;  %1813 = vst [vmem:[%s3542_s6 + $0x88] sm:$0xff] %v1749_v11  ;;  %v1628_v25 = vmul.f32 %v2089_v63, %v3645_v7  ;;  %v1629_v8 = vmul.f32 %v2089_v63, %v3646_v35  ;;  %v2093_v6 = vpop.eup %2092  ;;  %v1626_v36 = vmul.f32 %v2091_v20, %v3647_v30  ;;  %v1544_v15 = vadd.f32 1e-05, %v1512_v56  ;;  %v3653_v40 = vld [vmem:[#allocation9_spill] sm:$0xff]  ;;  %v3654_v11 = vld [vmem:[#allocation11_spill] sm:$0xff]  ;;  %v1432_v55 = vpop.xlane.xlu0 %1431 }
 0x27c   :  { %v1627_v13 = vmul.f32 %v2091_v20, %v3648_v27  ;;  %2102 = vrsqrt.f32 %v1527_v21  ;;  %v1746_v18 = vadd.f32 %v3141_v29, %v1670_v41  ;;  %v1747_v37 = vadd.f32 %v3144_v4, %v1671_v57  ;;  %v3656_v30 = vld [vmem:[#allocation7_spill] sm:$0xff] }
 0x27d   :  { %v1704_v44 = vmul.f32 %v3135_v53, %v1628_v25  ;;  %v1705_v3 = vmul.f32 %v3138_v32, %v1629_v8  ;;  %v1702_v59 = vmul.f32 %v3135_v53, %v1626_v36  ;;  %v1600_v43 = vmul.f32 %v2093_v6, %v3649_v23 }
 0x27e   :  { %v2095_v24 = vpop.eup %2094  ;;  %v1703_v26 = vmul.f32 %v3138_v32, %v1627_v13  ;;  %v1601_v42 = vmul.f32 %v2093_v6, %v3650_v22  ;;  %v3344_v61 = vpop.xlane.xlu1 %1476  ;;  %1810 = vst [vmem:[%s3542_s6 + $0x70] sm:$0xff] %v1746_v18  ;;  %1811 = vst [vmem:[%s3542_s6 + $0x78] sm:$0xff] %v1747_v37  ;;  %2104 = vrsqrt.f32 %v1544_v15  ;;  %v1543_v20 = vadd.f32 1e-05, %v1511_v50  ;;  %v3655_v6 = vld [vmem:[#allocation6_spill] sm:$0xff] }
 0x27f   :  { %v1780_v19 = vadd.f32 %v3141_v29, %v1704_v44  ;;  %v1781_v39 = vadd.f32 %v3144_v4, %v1705_v3  ;;  %v1598_v2 = vmul.f32 %v2095_v24, %v3651_v1  ;;  %v1599_v54 = vmul.f32 %v2095_v24, %v3652_v5  ;;  %v2097_v28 = vpop.eup %2096  ;;  %v3657_v18 = vld [vmem:[#allocation14_spill] sm:$0xff]  ;;  %v3658_v44 = vld [vmem:[#allocation16_spill] sm:$0xff]  ;;  %v3660_v1 = vld [vmem:[#allocation13_spill] sm:$0xff]  ;;  %v1480_v5 = vpop.xlane.xlu0 %1479 }
 0x280   :  { %v1778_v10 = vadd.f32 %v3141_v29, %v1702_v59  ;;  %v1779_v12 = vadd.f32 %v3144_v4, %v1703_v26  ;;  %v1676_v17 = vmul.f32 %v3135_v53, %v1600_v43  ;;  %v1677_v14 = vmul.f32 %v3138_v32, %v1601_v42 }
 0x281   :  { %1844 = vst [vmem:[%s3542_s6 + $0x180] sm:$0xff] %v1780_v19  ;;  %1845 = vst [vmem:[%s3542_s6 + $0x188] sm:$0xff] %v1781_v39  ;;  %v1674_v38 = vmul.f32 %v3135_v53, %v1598_v2  ;;  %v1675_v33 = vmul.f32 %v3138_v32, %v1599_v54  ;;  %v1632_v16 = vmul.f32 %v2097_v28, %v3653_v40  ;;  %v2099_v63 = vpop.eup %2098  ;;  %2106 = vrsqrt.f32 %v1543_v20  ;;  %v3659_v19 = vld [vmem:[#allocation12_spill] sm:$0xff] }
 0x282   :  { %v1633_v47 = vmul.f32 %v2097_v28, %v3654_v11  ;;  %1842 = vst [vmem:[%s3542_s6 + $0x170] sm:$0xff] %v1778_v10  ;;  %1843 = vst [vmem:[%s3542_s6 + $0x178] sm:$0xff] %v1779_v12  ;;  %v1752_v21 = vadd.f32 %v3141_v29, %v1676_v17  ;;  %v1753_v56 = vadd.f32 %v3144_v4, %v1677_v14  ;;  %v1435_v35 = vpop.xlane.xlu1 %1434  ;;  %v1498_v27 = vmul.f32 0.00390625, %v1432_v55 }
 0x283   :  { %v1750_v41 = vadd.f32 %v3141_v29, %v1674_v38  ;;  %v1751_v57 = vadd.f32 %v3144_v4, %v1675_v33  ;;  %v1708_v7 = vmul.f32 %v3135_v53, %v1632_v16  ;;  %v2101_v8 = vpop.eup %2100  ;;  %v1630_v50 = vmul.f32 %v2099_v63, %v3655_v6 }
 0x284   :  { %v1709_v25 = vmul.f32 %v3138_v32, %v1633_v47  ;;  %1816 = vst [vmem:[%s3542_s6 + $0xa0] sm:$0xff] %v1752_v21  ;;  %1817 = vst [vmem:[%s3542_s6 + $0xa8] sm:$0xff] %v1753_v56  ;;  %v1631_v36 = vmul.f32 %v2099_v63, %v3656_v30  ;;  %v1604_v37 = vmul.f32 %v2101_v8, %v3657_v18  ;;  %v1530_v23 = vadd.f32 1e-05, %v1498_v27 }
 0x285   :  { %1814 = vst [vmem:[%s3542_s6 + $0x90] sm:$0xff] %v1750_v41  ;;  %1815 = vst [vmem:[%s3542_s6 + $0x98] sm:$0xff] %v1751_v57  ;;  %v1784_v13 = vadd.f32 %v3141_v29, %v1708_v7  ;;  %v1605_v3 = vmul.f32 %v2101_v8, %v3658_v44  ;;  %v1706_v59 = vmul.f32 %v3135_v53, %v1630_v50  ;;  %v1497_v43 = vmul.f32 0.00390625, %v3322_v60  ;;  %v3661_v8 = vld [vmem:[#allocation18_spill] sm:$0xff] }
 0x286   :  { %v1785_v15 = vadd.f32 %v3144_v4, %v1709_v25  ;;  %v2103_v24 = vpop.eup %2102  ;;  %v1707_v26 = vmul.f32 %v3138_v32, %v1631_v36  ;;  %v1680_v22 = vmul.f32 %v3135_v53, %v1604_v37  ;;  %2108 = vrsqrt.f32 %v1530_v23  ;;  %v1483_v38 = vpop.xlane.xlu1 %1482 }
 0x287   :  { %1848 = vst [vmem:[%s3542_s6 + $0x1a0] sm:$0xff] %v1784_v13  ;;  %v1681_v42 = vmul.f32 %v3138_v32, %v1605_v3  ;;  %v1602_v39 = vmul.f32 %v2103_v24, %v3659_v19  ;;  %v1603_v2 = vmul.f32 %v2103_v24, %v3660_v1  ;;  %v1782_v54 = vadd.f32 %v3141_v29, %v1706_v59 }
 0x288   :  { %1849 = vst [vmem:[%s3542_s6 + $0x1a8] sm:$0xff] %v1785_v15  ;;  %v1783_v60 = vadd.f32 %v3144_v4, %v1707_v26  ;;  %v1529_v28 = vadd.f32 1e-05, %v1497_v43  ;;  %v1756_v10 = vadd.f32 %v3141_v29, %v1680_v22  ;;  %v1514_v33 = vmul.f32 0.00390625, %v1480_v5  ;;  %v2105_v55 = vpop.eup %2104 }
 0x289   :  { %v1757_v12 = vadd.f32 %v3144_v4, %v1681_v42  ;;  %v1678_v17 = vmul.f32 %v3135_v53, %v1602_v39  ;;  %v1679_v14 = vmul.f32 %v3138_v32, %v1603_v2  ;;  %1846 = vst [vmem:[%s3542_s6 + $0x190] sm:$0xff] %v1782_v54  ;;  %v1513_v40 = vmul.f32 0.00390625, %v3344_v61 }
 0x28a   :  { %1847 = vst [vmem:[%s3542_s6 + $0x198] sm:$0xff] %v1783_v60  ;;  %2110 = vrsqrt.f32 %v1529_v28  ;;  %v1499_v16 = vmul.f32 0.00390625, %v1435_v35  ;;  %1820 = vst [vmem:[%s3542_s6 + $0xc0] sm:$0xff] %v1756_v10  ;;  %v1546_v63 = vadd.f32 1e-05, %v1514_v33  ;;  %v1515_v56 = vmul.f32 0.00390625, %v1483_v38 }
 0x28b   :  { %1821 = vst [vmem:[%s3542_s6 + $0xc8] sm:$0xff] %v1757_v12  ;;  %v1754_v11 = vadd.f32 %v3141_v29, %v1678_v17  ;;  %v1755_v47 = vadd.f32 %v3144_v4, %v1679_v14  ;;  %v1545_v21 = vadd.f32 1e-05, %v1513_v40  ;;  %v1636_v61 = vmul.f32 %v2105_v55, %v3055_v34  ;;  %v2107_v41 = vpop.eup %2106  ;;  %v3662_v17 = vld [vmem:[#allocation15_spill] sm:$0xff]  ;;  %v3663_v38 = vld [vmem:[#allocation17_spill] sm:$0xff] }
 0x28c   :  { %v1637_v20 = vmul.f32 %v2105_v55, %v3058_v49  ;;  %2112 = vrsqrt.f32 %v1546_v63  ;;  %v1531_v57 = vadd.f32 1e-05, %v1499_v16  ;;  %v1634_v35 = vmul.f32 %v2107_v41, %v3037_v58  ;;  %v3664_v40 = vld [vmem:[#allocation19_spill] sm:$0xff] }
 0x28d   :  { %1818 = vst [vmem:[%s3542_s6 + $0xb0] sm:$0xff] %v1754_v11  ;;  %1819 = vst [vmem:[%s3542_s6 + $0xb8] sm:$0xff] %v1755_v47  ;;  %v1712_v7 = vmul.f32 %v3135_v53, %v1636_v61  ;;  %v1635_v6 = vmul.f32 %v2107_v41, %v3661_v8  ;;  %2114 = vrsqrt.f32 %v1545_v21  ;;  %v1547_v50 = vadd.f32 1e-05, %v1515_v56 }
 0x28e   :  { %v1713_v25 = vmul.f32 %v3138_v32, %v1637_v20  ;;  %v1710_v34 = vmul.f32 %v3135_v53, %v1634_v35  ;;  %2116 = vrsqrt.f32 %v1531_v57 }
 0x28f   :  { %v1788_v30 = vadd.f32 %v3141_v29, %v1712_v7  ;;  %v1711_v49 = vmul.f32 %v3138_v32, %v1635_v6  ;;  %2118 = vrsqrt.f32 %v1547_v50 }
 0x290   :  { %v1789_v36 = vadd.f32 %v3144_v4, %v1713_v25  ;;  %v2109_v27 = vpop.eup %2108  ;;  %v1786_v58 = vadd.f32 %v3141_v29, %v1710_v34 }
 0x291   :  { %1852 = vst [vmem:[%s3542_s6 + $0x1c0] sm:$0xff] %v1788_v30  ;;  %v1787_v13 = vadd.f32 %v3144_v4, %v1711_v49  ;;  %v1608_v15 = vmul.f32 %v2109_v27, %v3081_v52  ;;  %v1609_v18 = vmul.f32 %v2109_v27, %v3084_v48 }
 0x292   :  { %1853 = vst [vmem:[%s3542_s6 + $0x1c8] sm:$0xff] %v1789_v36  ;;  %1850 = vst [vmem:[%s3542_s6 + $0x1b0] sm:$0xff] %v1786_v58 }
 0x293   :  { %1851 = vst [vmem:[%s3542_s6 + $0x1b8] sm:$0xff] %v1787_v13  ;;  %v1684_v44 = vmul.f32 %v3135_v53, %v1608_v15  ;;  %v1685_v3 = vmul.f32 %v3138_v32, %v1609_v18 }
 0x294   :  { %v2111_v37 = vpop.eup %2110 }
 0x295   :  { %v1606_v24 = vmul.f32 %v2111_v37, %v3063_v0  ;;  %v1607_v52 = vmul.f32 %v2111_v37, %v3066_v31  ;;  %v1760_v48 = vadd.f32 %v3141_v29, %v1684_v44  ;;  %v1761_v59 = vadd.f32 %v3144_v4, %v1685_v3 }
 0x296   :  { %v2113_v43 = vpop.eup %2112 }
 0x297   :  { %v1682_v26 = vmul.f32 %v3135_v53, %v1606_v24  ;;  %v1683_v23 = vmul.f32 %v3138_v32, %v1607_v52  ;;  %1824 = vst [vmem:[%s3542_s6 + $0xe0] sm:$0xff] %v1760_v48  ;;  %1825 = vst [vmem:[%s3542_s6 + $0xe8] sm:$0xff] %v1761_v59  ;;  %v1640_v22 = vmul.f32 %v2113_v43, %v3095_v9  ;;  %v2115_v19 = vpop.eup %2114 }
 0x298   :  { %v1641_v42 = vmul.f32 %v2113_v43, %v3098_v51  ;;  %v1638_v2 = vmul.f32 %v2115_v19, %v3075_v45  ;;  %v1639_v5 = vmul.f32 %v2115_v19, %v3078_v46  ;;  %v2117_v9 = vpop.eup %2116 }
 0x299   :  { %v1758_v0 = vadd.f32 %v3141_v29, %v1682_v26  ;;  %v1759_v31 = vadd.f32 %v3144_v4, %v1683_v23  ;;  %v1716_v39 = vmul.f32 %v3135_v53, %v1640_v22  ;;  %v2119_v10 = vpop.eup %2118  ;;  %v1610_v12 = vmul.f32 %v2117_v9, %v3105_v62 }
 0x29a   :  { %v1717_v1 = vmul.f32 %v3138_v32, %v1641_v42  ;;  %v1714_v60 = vmul.f32 %v3135_v53, %v1638_v2  ;;  %v1715_v28 = vmul.f32 %v3138_v32, %v1639_v5  ;;  %v1611_v14 = vmul.f32 %v2117_v9, %v3662_v17 }
 0x29b   :  { %1822 = vst [vmem:[%s3542_s6 + $0xd0] sm:$0xff] %v1758_v0  ;;  %1823 = vst [vmem:[%s3542_s6 + $0xd8] sm:$0xff] %v1759_v31  ;;  %v1792_v51 = vadd.f32 %v3141_v29, %v1716_v39  ;;  %v1642_v33 = vmul.f32 %v2119_v10, %v3663_v38  ;;  %v1643_v16 = vmul.f32 %v2119_v10, %v3664_v40 }
 0x29c   :  { %v1793_v54 = vadd.f32 %v3144_v4, %v1717_v1  ;;  %v1790_v45 = vadd.f32 %v3141_v29, %v1714_v60  ;;  %v1791_v46 = vadd.f32 %v3144_v4, %v1715_v28  ;;  %v1686_v62 = vmul.f32 %v3135_v53, %v1610_v12 }
 0x29d   :  { %1856 = vst [vmem:[%s3542_s6 + $0x1e0] sm:$0xff] %v1792_v51  ;;  %v1687_v11 = vmul.f32 %v3138_v32, %v1611_v14  ;;  %v1718_v47 = vmul.f32 %v3135_v53, %v1642_v33  ;;  %v1719_v55 = vmul.f32 %v3138_v32, %v1643_v16 }
 0x29e   :  { %1857 = vst [vmem:[%s3542_s6 + $0x1e8] sm:$0xff] %v1793_v54  ;;  %1854 = vst [vmem:[%s3542_s6 + $0x1d0] sm:$0xff] %v1790_v45  ;;  %v1762_v63 = vadd.f32 %v3141_v29, %v1686_v62 }
 0x29f   :  { %1855 = vst [vmem:[%s3542_s6 + $0x1d8] sm:$0xff] %v1791_v46  ;;  %v1763_v21 = vadd.f32 %v3144_v4, %v1687_v11  ;;  %v1794_v56 = vadd.f32 %v3141_v29, %v1718_v47  ;;  %v1795_v61 = vadd.f32 %v3144_v4, %v1719_v55 }
 0x2a0   :  { %1826 = vst [vmem:[%s3542_s6 + $0xf0] sm:$0xff] %v1762_v63 }
 0x2a1   :  { %1827 = vst [vmem:[%s3542_s6 + $0xf8] sm:$0xff] %v1763_v21  ;;  %1858 = vst [vmem:[%s3542_s6 + $0x1f0] sm:$0xff] %v1794_v56 }
 0x2a2   :  { %1859 = vst [vmem:[%s3542_s6 + $0x1f8] sm:$0xff] %v1795_v61 }

// kernel: decoder_layer.13
= control target key start
LH: loop header
LB: loop body
LE: loop exit
PB: predicated region body
PF: predicated region fallthrough
CT: control target
= control target key end

     0   :  { %s1879_s12 = smov 0   ;;  %s1881_s13 = smov 0   ;;  %s2189_s0 = inlined_call_operand.vmem [shape: bf16[2,128,256], index: 0, kind: input, shape index: {}]   ;;  %s2190_s1 = inlined_call_operand.vmem [shape: bf16[2,128,512], index: 1, kind: input, shape index: {}, may-alias: {1,2}]   ;;  %s2191_s2 = inlined_call_operand.vmem [shape: bf16[2,128,512], index: 2, kind: input, shape index: {}, may-alias: {1,2}]   ;;  %s2192_s3 = inlined_call_operand.vmem [shape: bf16[2,128,256], index: 3, kind: output, shape index: {}]  }
   0x1   :  { %s1883_s14 = smov 0   ;;  %s1885_s15 = smov 0  }
   0x2   :  { %s1887_s16 = smov 0   ;;  %s1889_s17 = smov 0  }
   0x3   :  { %s1891_s18 = smov 0   ;;  %s1893_s19 = smov 0  }
   0x4   :  { %s1895_s20 = smov 0  }
   0x5 LB: > { %s1397_s21 = sadd.s32 4294967295, %s1857_s20   ;;  %s22_s22 = sadd.s32 1, %s1849_s18  ;;  %s1857_s20 = sphi %s1895_s20, %s13_s20   ;;  %s1853_s19 = sphi %s1893_s19, %s2203_s19   ;;  %s1849_s18 = sphi %s1891_s18, %s2202_s18   ;;  %s1845_s17 = sphi %s1889_s17, %s2201_s17   ;;  %s1841_s16 = sphi %s1887_s16, %s2200_s16   ;;  %s1837_s15 = sphi %s1885_s15, %s2199_s15   ;;  %s1833_s14 = sphi %s1883_s14, %s2198_s14   ;;  %s1829_s13 = sphi %s1881_s13, %s2197_s13   ;;  %s1825_s12 = sphi %s1879_s12, %s2196_s12  }
   0x6   : > { %p23_p0 = scmp.ge.s32.totalorder %s22_s22, 2  ;;  %s25_s23 = sadd.s32 1, %s1853_s19 }
   0x7   : > { %s34_s24 = sadd.s32 1, %s1837_s15  ;;  %p41_p1 = scmp.ne.s32.totalorder %s1837_s15, %s1833_s14 }
   0x8   : > { %s2205_s22 = smov (%p23_p0, %s22_s22), 0  ;;  %s2207_s23 = smov (!%p23_p0, %s25_s23), %s1853_s19 }
   0x9   : > { %s30_s25 = ssub.s32 %s1849_s18, %s2205_s22  ;;  %p42_p2 = scmp.eq.s32.totalorder %s1857_s20, 0 }
   0xa   : > { %p27_p3 = scmp.ge.s32.totalorder %s2207_s23, 2  ;;  %s85_s26 = sadd.s32 2, %s1849_s18 }
   0xb   : > { %p1942_p4 = por %p42_p2, %p41_p1  ;;  %s86_s28 = sadd.s32 2, %s2205_s22 }
   0xc   : > { %s2209_s23 = smov (%p27_p3, %s2207_s23), 0  ;;  %s88_s29 = ssub.s32 %s85_s26, %s86_s28 }
   0xd   : > { %s92_s30 = sadd.s32 1, %s1829_s13  ;;  %s29_s4 = ssub.s32 %s1853_s19, %s2209_s23 }
   0xe   : > { %p99_p5 = scmp.ne.s32.totalorder %s1829_s13, %s1825_s12  ;;  %s31_s5 = sor.u32 %s30_s25, %s29_s4 }
   0xf   : > { %s89_s6 = sor.u32 %s88_s29, %s29_s4  ;;  %p32_p6 = scmp.eq.s32.totalorder %s31_s5, 0 }
  0x10   : > { %p90_p7 = scmp.eq.s32.totalorder %s89_s6, 0  ;;  %p1956_p8 = por %p99_p5, %p42_p2 }
  0x11   : > { %p131_p9 = scmp.eq.s32.totalorder %s1397_s21, 3  ;;  %p1400_p11 = scmp.ge.s32.totalorder %s1857_s20, 4 }
  0x12   : > { %s1961_s8 = scalar_select %p32_p6, %s1837_s15, %s34_s24  }
  0x13   : > { %s1964_s9 = scalar_select %p90_p7, %s1829_s13, %s92_s30  }
  0x14   : > { %p1969_p10 = por %p131_p9, %p41_p1  ;;  %153 = sbr.rel (%p1400_p11) target bundleno = 77 (0x4d), region = 16 }
  0x1b   : > { %156 = sbr.rel (!%p1942_p4) target bundleno = 43 (0x2b), region = 20  ;;  %s158_s11 = sand.u32 (%p1942_p4), 1, %s1837_s15  }
  0x1c   : > { %s1402_s21 = sshll.u32 (%p1942_p4), %s1853_s19, 5  ;;  %s1401_s24 = sshll.u32 (%p1942_p4), %s158_s11, 6 }
  0x1d   : > { %s162_s25 = sadd.s32 (%p1942_p4), %s1849_s18, %s1402_s21  ;;  %s160_s4 = scalar_lea.vmem (%p1942_p4), [#allocation2], %s1401_s24 }
  0x1e   : > { %s1403_s26 = sshll.u32 (%p1942_p4), %s162_s25, 2 }
  0x1f   : > { %s1982_s30 = scalar_lea.vmem (%p1942_p4), %s2189_s0, %s1403_s26 }
  0x20   : > { %v180_v0 = vld [vmem:[%s1982_s30] sm:$0xf] (%p1942_p4)  ;;  %v182_v1 = vld [vmem:[%s1982_s30 + $0x8] sm:$0xf] (%p1942_p4)  ;;  %v184_v2 = vld [vmem:[%s1982_s30 + $0x10] sm:$0xf] (%p1942_p4) }
  0x21   : > { %181 = vst [vmem:[%s160_s4] sm:$0xf] (%p1942_p4), %v180_v0  ;;  %183 = vst [vmem:[%s160_s4 + $0x4] sm:$0xf] (%p1942_p4), %v182_v1  ;;  %v186_v3 = vld [vmem:[%s1982_s30 + $0x18] sm:$0xf] (%p1942_p4) }
  0x22   : > { %185 = vst [vmem:[%s160_s4 + $0x8] sm:$0xf] %v184_v2  ;;  %v188_v4 = vld [vmem:[%s1982_s30 + $0x20] sm:$0xf]  ;;  %v190_v5 = vld [vmem:[%s1982_s30 + $0x28] sm:$0xf] }
  0x23   : > { %187 = vst [vmem:[%s160_s4 + $0xc] sm:$0xf] %v186_v3  ;;  %189 = vst [vmem:[%s160_s4 + $0x10] sm:$0xf] %v188_v4  ;;  %v192_v6 = vld [vmem:[%s1982_s30 + $0x30] sm:$0xf] }
  0x24   : > { %191 = vst [vmem:[%s160_s4 + $0x14] sm:$0xf] %v190_v5  ;;  %v194_v7 = vld [vmem:[%s1982_s30 + $0x38] sm:$0xf]  ;;  %v196_v8 = vld [vmem:[%s1982_s30 + $0x40] sm:$0xf] }
  0x25   : > { %193 = vst [vmem:[%s160_s4 + $0x18] sm:$0xf] %v192_v6  ;;  %195 = vst [vmem:[%s160_s4 + $0x1c] sm:$0xf] %v194_v7  ;;  %v198_v9 = vld [vmem:[%s1982_s30 + $0x48] sm:$0xf] }
  0x26   : > { %197 = vst [vmem:[%s160_s4 + $0x20] sm:$0xf] %v196_v8  ;;  %v200_v10 = vld [vmem:[%s1982_s30 + $0x50] sm:$0xf]  ;;  %v202_v11 = vld [vmem:[%s1982_s30 + $0x58] sm:$0xf] }
  0x27   : > { %199 = vst [vmem:[%s160_s4 + $0x24] sm:$0xf] %v198_v9  ;;  %201 = vst [vmem:[%s160_s4 + $0x28] sm:$0xf] %v200_v10  ;;  %v204_v12 = vld [vmem:[%s1982_s30 + $0x60] sm:$0xf] }
  0x28   : > { %203 = vst [vmem:[%s160_s4 + $0x2c] sm:$0xf] %v202_v11  ;;  %v206_v13 = vld [vmem:[%s1982_s30 + $0x68] sm:$0xf]  ;;  %v208_v14 = vld [vmem:[%s1982_s30 + $0x70] sm:$0xf] }
  0x29   : > { %205 = vst [vmem:[%s160_s4 + $0x30] sm:$0xf] %v204_v12  ;;  %207 = vst [vmem:[%s160_s4 + $0x34] sm:$0xf] %v206_v13  ;;  %v210_v15 = vld [vmem:[%s1982_s30 + $0x78] sm:$0xf] }
  0x2a   : > { %209 = vst [vmem:[%s160_s4 + $0x38] sm:$0xf] %v208_v14  ;;  %211 = vst [vmem:[%s160_s4 + $0x3c] sm:$0xf] %v210_v15 }
  0x2b PF: > { %266 = sbr.rel (!%p1942_p4) target bundleno = 60 (0x3c), region = 61  ;;  %s268_s5 = sand.u32 (%p1942_p4), 1, %s1837_s15  }
  0x2c   : > { %s1405_s6 = sshll.u32 (%p1942_p4), %s1853_s19, 6  ;;  %s1404_s11 = sshll.u32 (%p1942_p4), %s268_s5, 6 }
  0x2d   : > { %s272_s21 = sadd.s32 (%p1942_p4), %s1849_s18, %s1405_s6  ;;  %s270_s27 = scalar_lea.vmem (%p1942_p4), [#allocation3], %s1404_s11 }
  0x2e   : > { %s1406_s24 = sshll.u32 (%p1942_p4), %s272_s21, 2 }
  0x2f   : > { %s2008_s28 = scalar_lea.vmem (%p1942_p4), %s2190_s1, %s1406_s24 }
  0x30   : > { %v290_v16 = vld [vmem:[%s2008_s28] sm:$0xf] (%p1942_p4)  ;;  %v292_v17 = vld [vmem:[%s2008_s28 + $0x10] sm:$0xf] (%p1942_p4) }
  0x31   : > { %v294_v18 = vld [vmem:[%s2008_s28 + $0x20] sm:$0xf] (%p1942_p4)  ;;  %291 = vst [vmem:[%s270_s27] sm:$0xf] (%p1942_p4), %v290_v16  ;;  %293 = vst [vmem:[%s270_s27 + $0x4] sm:$0xf] (%p1942_p4), %v292_v17 }
  0x32   : > { %295 = vst [vmem:[%s270_s27 + $0x8] sm:$0xf] %v294_v18  ;;  %v296_v19 = vld [vmem:[%s2008_s28 + $0x30] sm:$0xf]  ;;  %v298_v20 = vld [vmem:[%s2008_s28 + $0x40] sm:$0xf] }
  0x33   : > { %v300_v21 = vld [vmem:[%s2008_s28 + $0x50] sm:$0xf]  ;;  %297 = vst [vmem:[%s270_s27 + $0xc] sm:$0xf] %v296_v19  ;;  %299 = vst [vmem:[%s270_s27 + $0x10] sm:$0xf] %v298_v20 }
  0x34   : > { %301 = vst [vmem:[%s270_s27 + $0x14] sm:$0xf] %v300_v21  ;;  %v302_v22 = vld [vmem:[%s2008_s28 + $0x60] sm:$0xf]  ;;  %v304_v23 = vld [vmem:[%s2008_s28 + $0x70] sm:$0xf] }
  0x35   : > { %v306_v24 = vld [vmem:[%s2008_s28 + $0x80] sm:$0xf]  ;;  %303 = vst [vmem:[%s270_s27 + $0x18] sm:$0xf] %v302_v22  ;;  %305 = vst [vmem:[%s270_s27 + $0x1c] sm:$0xf] %v304_v23 }
  0x36   : > { %307 = vst [vmem:[%s270_s27 + $0x20] sm:$0xf] %v306_v24  ;;  %v308_v25 = vld [vmem:[%s2008_s28 + $0x90] sm:$0xf]  ;;  %v310_v26 = vld [vmem:[%s2008_s28 + $0xa0] sm:$0xf] }
  0x37   : > { %v312_v27 = vld [vmem:[%s2008_s28 + $0xb0] sm:$0xf]  ;;  %309 = vst [vmem:[%s270_s27 + $0x24] sm:$0xf] %v308_v25  ;;  %311 = vst [vmem:[%s270_s27 + $0x28] sm:$0xf] %v310_v26 }
  0x38   : > { %313 = vst [vmem:[%s270_s27 + $0x2c] sm:$0xf] %v312_v27  ;;  %v314_v28 = vld [vmem:[%s2008_s28 + $0xc0] sm:$0xf]  ;;  %v316_v29 = vld [vmem:[%s2008_s28 + $0xd0] sm:$0xf] }
  0x39   : > { %v318_v30 = vld [vmem:[%s2008_s28 + $0xe0] sm:$0xf]  ;;  %315 = vst [vmem:[%s270_s27 + $0x30] sm:$0xf] %v314_v28  ;;  %317 = vst [vmem:[%s270_s27 + $0x34] sm:$0xf] %v316_v29 }
  0x3a   : > { %319 = vst [vmem:[%s270_s27 + $0x38] sm:$0xf] %v318_v30  ;;  %v320_v31 = vld [vmem:[%s2008_s28 + $0xf0] sm:$0xf] }
  0x3b   : > { %321 = vst [vmem:[%s270_s27 + $0x3c] sm:$0xf] %v320_v31 }
  0x3c PF: > { %376 = sbr.rel (!%p1956_p8) target bundleno = 77 (0x4d), region = 102  ;;  %s378_s29 = sand.u32 (%p1956_p8), 1, %s1829_s13  }
  0x3d   : > { %s1408_s30 = sshll.u32 (%p1956_p8), %s1853_s19, 6  ;;  %s1407_s4 = sshll.u32 (%p1956_p8), %s378_s29, 6 }
  0x3e   : > { %s1311_s5 = sadd.s32 (%p1956_p8), %s1849_s18, %s1408_s30  ;;  %s380_s7 = scalar_lea.vmem (%p1956_p8), [#allocation4], %s1407_s4 }
  0x3f   : > { %s1409_s6 = sshll.u32 (%p1956_p8), %s1311_s5, 2 }
  0x40   : > { %s2034_s24 = scalar_lea.vmem (%p1956_p8), %s2191_s2, %s1409_s6 }
  0x41   : > { %v1410_v32 = vld [vmem:[%s2034_s24 + $0x8] sm:$0xf] (%p1956_p8)  ;;  %v1411_v33 = vld [vmem:[%s2034_s24 + $0x18] sm:$0xf] (%p1956_p8) }
  0x42   : > { %v1412_v34 = vld [vmem:[%s2034_s24 + $0x28] sm:$0xf] (%p1956_p8)  ;;  %402 = vst [vmem:[%s380_s7] sm:$0xf] (%p1956_p8), %v1410_v32  ;;  %404 = vst [vmem:[%s380_s7 + $0x4] sm:$0xf] (%p1956_p8), %v1411_v33 }
  0x43   : > { %406 = vst [vmem:[%s380_s7 + $0x8] sm:$0xf] %v1412_v34  ;;  %v1413_v35 = vld [vmem:[%s2034_s24 + $0x38] sm:$0xf]  ;;  %v1414_v36 = vld [vmem:[%s2034_s24 + $0x48] sm:$0xf] }
  0x44   : > { %v1415_v37 = vld [vmem:[%s2034_s24 + $0x58] sm:$0xf]  ;;  %408 = vst [vmem:[%s380_s7 + $0xc] sm:$0xf] %v1413_v35  ;;  %410 = vst [vmem:[%s380_s7 + $0x10] sm:$0xf] %v1414_v36 }
  0x45   : > { %412 = vst [vmem:[%s380_s7 + $0x14] sm:$0xf] %v1415_v37  ;;  %v1416_v38 = vld [vmem:[%s2034_s24 + $0x68] sm:$0xf]  ;;  %v1417_v39 = vld [vmem:[%s2034_s24 + $0x78] sm:$0xf] }
  0x46   : > { %v1418_v40 = vld [vmem:[%s2034_s24 + $0x88] sm:$0xf]  ;;  %414 = vst [vmem:[%s380_s7 + $0x18] sm:$0xf] %v1416_v38  ;;  %416 = vst [vmem:[%s380_s7 + $0x1c] sm:$0xf] %v1417_v39 }
  0x47   : > { %418 = vst [vmem:[%s380_s7 + $0x20] sm:$0xf] %v1418_v40  ;;  %v1419_v41 = vld [vmem:[%s2034_s24 + $0x98] sm:$0xf]  ;;  %v1420_v42 = vld [vmem:[%s2034_s24 + $0xa8] sm:$0xf] }
  0x48   : > { %v1421_v43 = vld [vmem:[%s2034_s24 + $0xb8] sm:$0xf]  ;;  %420 = vst [vmem:[%s380_s7 + $0x24] sm:$0xf] %v1419_v41  ;;  %422 = vst [vmem:[%s380_s7 + $0x28] sm:$0xf] %v1420_v42 }
  0x49   : > { %424 = vst [vmem:[%s380_s7 + $0x2c] sm:$0xf] %v1421_v43  ;;  %v1422_v44 = vld [vmem:[%s2034_s24 + $0xc8] sm:$0xf]  ;;  %v1423_v45 = vld [vmem:[%s2034_s24 + $0xd8] sm:$0xf] }
  0x4a   : > { %v1424_v46 = vld [vmem:[%s2034_s24 + $0xe8] sm:$0xf]  ;;  %426 = vst [vmem:[%s380_s7 + $0x30] sm:$0xf] %v1422_v44  ;;  %428 = vst [vmem:[%s380_s7 + $0x34] sm:$0xf] %v1423_v45 }
  0x4b   : > { %430 = vst [vmem:[%s380_s7 + $0x38] sm:$0xf] %v1424_v46  ;;  %v1425_v47 = vld [vmem:[%s2034_s24 + $0xf8] sm:$0xf] }
  0x4c   : > { %432 = vst [vmem:[%s380_s7 + $0x3c] sm:$0xf] %v1425_v47 }
  0x4d PF: > { %p1426_p12 = scmp.ge.s32.totalorder %s1857_s20, 1  ;;  %p486_p13 = scmp.lt.s32.totalorder %s1857_s20, 5 }
  0x4f   : > { %p487_p0 = pnand %p1426_p12, %p486_p13 }
  0x50   : > { %s493_s25 = sand.u32 (!%p487_p0), 1, %s1833_s14   ;;  %s507_s14 = sand.u32 (!%p487_p0), 1, %s1825_s12  }
  0x51   : > { %490 = sbr.rel (%p487_p0) target bundleno = 779 (0x30b), region = 143  ;;  %s2055_s26 = sshll.u32 (!%p487_p0), %s493_s25, 6 }
  0x52   : > { %s502_s28 = scalar_lea.vmem (!%p487_p0), [#allocation3], %s2055_s26  ;;  %s2059_s27 = scalar_lea.vmem (!%p487_p0), [#allocation2], %s2055_s26 }
  0x53   : > { %v1707_v48 = vld [vmem:[%s502_s28] sm:$0xff] (!%p487_p0)   ;;  %v1708_v49 = vld [vmem:[%s502_s28 + $0x8] sm:$0xff] (!%p487_p0)   ;;  %v1709_v50 = vld [vmem:[%s502_s28 + $0x10] sm:$0xff] (!%p487_p0)   ;;  %s1429_s29 = sshll.u32 (!%p487_p0), %s507_s14, 6  ;;  %s2129_s12 = scalar_lea.vmem (!%p487_p0), [#allocation5], %s2055_s26 }
  0x54   : > { %1571 = vmatprep.subr.bf16.mxu0 (!%p487_p0), %v1707_v48  ;;  %v540_v51 = vld [vmem:[%s2059_s27] sm:$0xf] (!%p487_p0)  ;;  %v541_v52 = vld [vmem:[%s2059_s27 + $0x4] sm:$0xf] (!%p487_p0)  ;;  %v1710_v56 = vld [vmem:[%s502_s28 + $0x18] sm:$0xff] (!%p487_p0)   ;;  %s2078_s30 = scalar_lea.vmem (!%p487_p0), [#allocation4], %s1429_s29 }
  0x55   : > { %1572 = vmatpush3.bf16.xpose.msra.mxu0 (!%p487_p0), %v1707_v48  ;;  %v556_v53 = vmul.bf16 (!%p487_p0), 1035287989, %v540_v51  ;;  %v557_v54 = vmul.bf16 (!%p487_p0), 1035287989, %v541_v52  ;;  %v1711_v57 = vld [vmem:[%s502_s28 + $0x20] sm:$0xff] (!%p487_p0)   ;;  %v1712_v58 = vld [vmem:[%s502_s28 + $0x28] sm:$0xff] (!%p487_p0)  }
  0x56   : > { %1573 = vmatprep.subr.bf16.mxu0 (!%p487_p0), %v1708_v49  ;;  %v1713_v59 = vld [vmem:[%s502_s28 + $0x30] sm:$0xff] (!%p487_p0)   ;;  %v1714_v60 = vld [vmem:[%s502_s28 + $0x38] sm:$0xff] (!%p487_p0)   ;;  %v542_v61 = vld [vmem:[%s2059_s27 + $0x8] sm:$0xf] (!%p487_p0) }
  0x57   : > { %v1431_v55 = vcombine.low (!%p487_p0), %v556_v53, %v557_v54  ;;  %v543_v62 = vld [vmem:[%s2059_s27 + $0xc] sm:$0xf] (!%p487_p0)  ;;  %v544_v63 = vld [vmem:[%s2059_s27 + $0x10] sm:$0xf] (!%p487_p0)  ;;  %v545_v0 = vld [vmem:[%s2059_s27 + $0x14] sm:$0xf] (!%p487_p0) }
  0x58   : > { %v558_v1 = vmul.bf16 1035287989, %v542_v61  ;;  %v559_v2 = vmul.bf16 1035287989, %v543_v62  ;;  %v560_v3 = vmul.bf16 1035287989, %v544_v63 }
  0x59   : > { %1587 = vmatprep.mubr.bf16.mxu0 %v1431_v55  ;;  %v561_v4 = vmul.bf16 1035287989, %v545_v0  ;;  %v546_v7 = vld [vmem:[%s2059_s27 + $0x18] sm:$0xf]  ;;  %v547_v8 = vld [vmem:[%s2059_s27 + $0x1c] sm:$0xf] }
  0x5a   : > { %v1432_v5 = vcombine.low %v558_v1, %v559_v2  ;;  %v548_v9 = vld [vmem:[%s2059_s27 + $0x20] sm:$0xf]  ;;  %v549_v10 = vld [vmem:[%s2059_s27 + $0x24] sm:$0xf]  ;;  %v562_v11 = vmul.bf16 1035287989, %v546_v7 }
  0x5b   : > { %v1433_v6 = vcombine.low %v560_v3, %v561_v4  ;;  %v563_v12 = vmul.bf16 1035287989, %v547_v8  ;;  %v564_v13 = vmul.bf16 1035287989, %v548_v9  ;;  %v565_v14 = vmul.bf16 1035287989, %v549_v10 }
  0x5c   : > { %v550_v17 = vld [vmem:[%s2059_s27 + $0x28] sm:$0xf]  ;;  %v551_v18 = vld [vmem:[%s2059_s27 + $0x2c] sm:$0xf]  ;;  %v552_v19 = vld [vmem:[%s2059_s27 + $0x30] sm:$0xf] }
  0x5d   : > { %1574 = vmatpush3.bf16.xpose.msra.mxu0 %v1708_v49  ;;  %v1434_v15 = vcombine.low %v562_v11, %v563_v12  ;;  %v1435_v16 = vcombine.low %v564_v13, %v565_v14  ;;  %v553_v20 = vld [vmem:[%s2059_s27 + $0x34] sm:$0xf]  ;;  %v566_v21 = vmul.bf16 1035287989, %v550_v17  ;;  %v567_v22 = vmul.bf16 1035287989, %v551_v18 }
  0x5e   : > { %1575 = vmatprep.subr.bf16.mxu0 %v1709_v50  ;;  %v568_v23 = vmul.bf16 1035287989, %v552_v19  ;;  %v569_v24 = vmul.bf16 1035287989, %v553_v20  ;;  %v554_v27 = vld [vmem:[%s2059_s27 + $0x38] sm:$0xf] }
  0x5f   : > { %v1436_v25 = vcombine.low %v566_v21, %v567_v22  ;;  %v555_v28 = vld [vmem:[%s2059_s27 + $0x3c] sm:$0xf]  ;;  %v570_v29 = vmul.bf16 1035287989, %v554_v27  ;;  %v1715_v32 = vld [vmem:[%s2078_s30] sm:$0xff]   ;;  %v1716_v33 = vld [vmem:[%s2078_s30 + $0x8] sm:$0xff]  }
  0x60   : > { %v1437_v26 = vcombine.low %v568_v23, %v569_v24  ;;  %v571_v30 = vmul.bf16 1035287989, %v555_v28  ;;  %1603 = vmatprep.subr.bf16.mxu1 %v1715_v32  ;;  %v1717_v34 = vld [vmem:[%s2078_s30 + $0x10] sm:$0xff]   ;;  %v1718_v44 = vld [vmem:[%s2078_s30 + $0x18] sm:$0xff]   ;;  %v1719_v48 = vld [vmem:[%s2078_s30 + $0x20] sm:$0xff]   ;;  %s1472_s4 = sshll.u32 (%p1969_p10), %s1845_s17, 5 }
  0x61   : > { %1604 = vmatpush3.bf16.msra.mxu1 %v1715_v32  ;;  %v1721_v54 = vld [vmem:[%s2078_s30 + $0x30] sm:$0xff]   ;;  %v1722_v55 = vld [vmem:[%s2078_s30 + $0x38] sm:$0xff]   ;;  %s1182_s5 = sadd.s32 (%p1969_p10), %s1841_s16, %s1472_s4 }
  0x62   : > { %v1438_v31 = vcombine.low %v570_v29, %v571_v30  ;;  %1605 = vmatprep.subr.bf16.mxu1 %v1716_v33  ;;  %s1473_s10 = sshll.u32 (%p1969_p10), %s1182_s5, 2 }
  0x63   : > { %s1184_s21 = scalar_lea.vmem (%p1969_p10), %s2192_s3, %s1473_s10 }
  0x65   : > { %1576 = vmatpush3.bf16.xpose.msra.mxu0 %v1709_v50  ;;  %1606 = vmatpush3.bf16.msra.mxu1 %v1716_v33  ;;  %v1720_v50 = vld [vmem:[%s2078_s30 + $0x28] sm:$0xff]  }
  0x66   : > { %1577 = vmatprep.subr.bf16.mxu0 %v1710_v56  ;;  %1607 = vmatprep.subr.bf16.mxu1 %v1717_v34 }
  0x69   : > { %1608 = vmatpush3.bf16.msra.mxu1 %v1717_v34 }
  0x6a   : > { %1609 = vmatprep.subr.bf16.mxu1 %v1718_v44 }
  0x6d   : > { %1578 = vmatpush3.bf16.xpose.msra.mxu0 %v1710_v56  ;;  %1610 = vmatpush3.bf16.msra.mxu1 %v1718_v44 }
  0x6e   : > { %1579 = vmatprep.subr.bf16.mxu0 %v1711_v57  ;;  %1611 = vmatprep.subr.bf16.mxu1 %v1719_v48 }
  0x71   : > { %1612 = vmatpush3.bf16.msra.mxu1 %v1719_v48 }
  0x72   : > { %1613 = vmatprep.subr.bf16.mxu1 %v1720_v50 }
  0x75   : > { %1580 = vmatpush3.bf16.xpose.msra.mxu0 %v1711_v57  ;;  %1614 = vmatpush3.bf16.msra.mxu1 %v1720_v50 }
  0x76   : > { %1581 = vmatprep.subr.bf16.mxu0 %v1712_v58  ;;  %1615 = vmatprep.subr.bf16.mxu1 %v1721_v54 }
  0x79   : > { %1616 = vmatpush3.bf16.msra.mxu1 %v1721_v54 }
  0x7a   : > { %1617 = vmatprep.subr.bf16.mxu1 %v1722_v55 }
  0x7d   : > { %1582 = vmatpush3.bf16.xpose.msra.mxu0 %v1712_v58  ;;  %1618 = vmatpush3.bf16.msra.mxu1 %v1722_v55 }
  0x7e   : > { %1583 = vmatprep.subr.bf16.mxu0 %v1713_v59 }
  0x85   : > { %1584 = vmatpush3.bf16.xpose.msra.mxu0 %v1713_v59 }
  0x86   : > { %1585 = vmatprep.subr.bf16.mxu0 %v1714_v60 }
  0x8d   : > { %1586 = vmatpush3.bf16.xpose.msra.mxu0 %v1714_v60 }
  0x94   : > { %1588 = vmatmul.mubr.bf16.vlgmr.msra.gmra.mrb[0].mxu0 %v1432_v5 }
  0x95   : > { %1591 = vmatprep.mubr.bf16.mxu0 %v1433_v6 }
  0x9c   : > { %1592 = vmatmul.mubr.bf16.gmra.mrb[4].mxu0 %v1434_v15 }
  0x9d   : > { %1595 = vmatprep.mubr.bf16.mxu0 %v1435_v16 }
  0xa4   : > { %1596 = vmatmul.mubr.bf16.gmra.mrb[8].mxu0 %v1436_v25 }
  0xa5   : > { %1599 = vmatprep.mubr.bf16.mxu0 %v1437_v26 }
  0xac   : > { %1600 = vmatmul.mubr.bf16.gmra.mrb[12].mxu0 %v1438_v31 }
 0x167   : > { %v1589_v35 = vpop.f32.mrb[0].mxu0 }
 0x168   : > { %801 = vmax.xlane.f32.xlu1 %v1589_v35  ;;  %v734_v36 = vpop.f32.mrb[1].mxu0 }
 0x169   : > { %797 = vmax.xlane.f32.xlu0 %v734_v36  ;;  %v1590_v37 = vpop.f32.mrb[2].mxu0 }
 0x16a   : > { %v737_v38 = vpop.f32.mrb[3].mxu0 }
 0x16c   : > { %803 = vmax.xlane.f32.xlu1 %v1590_v37 }
 0x16d   : > { %799 = vmax.xlane.f32.xlu0 %v737_v38 }
 0x16f   : > { %v2083_v39 = vpop.f32.mrb[4].mxu0 }
 0x170   : > { %v750_v40 = vpop.f32.mrb[5].mxu0 }
 0x171   : > { %805 = vmax.xlane.f32.xlu0 %v750_v40  ;;  %v2085_v41 = vpop.f32.mrb[6].mxu0 }
 0x172   : > { %v753_v42 = vpop.f32.mrb[7].mxu0 }
 0x173   : > { %807 = vmax.xlane.f32.xlu1 %v753_v42 }
 0x175   : > { %809 = vmax.xlane.f32.xlu0 %v2083_v39 }
 0x177   : > { %811 = vmax.xlane.f32.xlu1 %v2085_v41  ;;  %v2089_v43 = vpop.f32.mrb[8].mxu0 }
 0x178   : > { %v2092_v45 = vpop.f32.mrb[9].mxu0 }
 0x179   : > { %813 = vmax.xlane.f32.xlu0 %v2092_v45  ;;  %v2095_v46 = vpop.f32.mrb[10].mxu0 }
 0x17a   : > { %v2097_v47 = vpop.f32.mrb[11].mxu0 }
 0x17b   : > { %815 = vmax.xlane.f32.xlu1 %v2097_v47 }
 0x17d   : > { %817 = vmax.xlane.f32.xlu0 %v2089_v43 }
 0x17f   : > { %819 = vmax.xlane.f32.xlu1 %v2095_v46  ;;  %v2103_v49 = vpop.f32.mrb[12].mxu0 }
 0x180   : > { %v2106_v51 = vpop.f32.mrb[13].mxu0 }
 0x181   : > { %821 = vmax.xlane.f32.xlu0 %v2106_v51  ;;  %v2109_v52 = vpop.f32.mrb[14].mxu0 }
 0x182   : > { %v2111_v53 = vpop.f32.mrb[15].mxu0 }
 0x183   : > { %823 = vmax.xlane.f32.xlu1 %v2111_v53 }
 0x185   : > { %825 = vmax.xlane.f32.xlu0 %v2103_v49 }
 0x187   : > { %827 = vmax.xlane.f32.xlu1 %v2109_v52 }
 0x1f5   : > { %v802_v56 = vpop.xlane.xlu1 %801 }
 0x1f6   : > { %v831_v57 = vsub.f32 %v1589_v35, %v802_v56  ;;  %v798_v58 = vpop.xlane.xlu0 %797 }
 0x1f7   : > { %v829_v59 = vsub.f32 %v734_v36, %v798_v58 }
 0x1f8   : > { %v849_v60 = vmul.f32 1.442695, %v831_v57 }
 0x1f9   : > { %v845_v61 = vmul.f32 1.442695, %v829_v59  ;;  %v804_v62 = vpop.xlane.xlu1 %803 }
 0x1fa   : > { %1723 = vpow2.f32 %v849_v60  ;;  %v832_v63 = vsub.f32 %v1590_v37, %v804_v62  ;;  %v800_v0 = vpop.xlane.xlu0 %799 }
 0x1fb   : > { %v830_v1 = vsub.f32 %v737_v38, %v800_v0  ;;  %1725 = vpow2.f32 %v845_v61 }
 0x1fc   : > { %v851_v2 = vmul.f32 1.442695, %v832_v63 }
 0x1fd   : > { %v847_v3 = vmul.f32 1.442695, %v830_v1 }
 0x1fe   : > { %1727 = vpow2.f32 %v851_v2  ;;  %v806_v4 = vpop.xlane.xlu0 %805 }
 0x1ff   : > { %1729 = vpow2.f32 %v847_v3  ;;  %v833_v5 = vsub.f32 %v750_v40, %v806_v4 }
 0x200   : > { %v808_v6 = vpop.xlane.xlu1 %807 }
 0x201   : > { %v853_v7 = vmul.f32 1.442695, %v833_v5  ;;  %v834_v8 = vsub.f32 %v753_v42, %v808_v6 }
 0x202   : > { %v810_v9 = vpop.xlane.xlu0 %809 }
 0x203   : > { %v855_v10 = vmul.f32 1.442695, %v834_v8  ;;  %v835_v11 = vsub.f32 %v2083_v39, %v810_v9  ;;  %1731 = vpow2.f32 %v853_v7 }
 0x204   : > { %v1724_v12 = vpop.eup %1723  ;;  %v812_v13 = vpop.xlane.xlu1 %811 }
 0x205   : > { %1733 = vpow2.f32 %v855_v10  ;;  %v857_v14 = vmul.f32 1.442695, %v835_v11  ;;  %v836_v15 = vsub.f32 %v2085_v41, %v812_v13  ;;  %881 = vadd.xlane.f32.xlu0 %v1724_v12  ;;  %v1726_v17 = vpop.eup %1725 }
 0x206   : > { %v814_v16 = vpop.xlane.xlu0 %813 }
 0x207   : > { %1735 = vpow2.f32 %v857_v14  ;;  %v859_v18 = vmul.f32 1.442695, %v836_v15  ;;  %v837_v19 = vsub.f32 %v2092_v45, %v814_v16 }
 0x208   : > { %v1728_v20 = vpop.eup %1727  ;;  %v816_v21 = vpop.xlane.xlu1 %815 }
 0x209   : > { %v1730_v22 = vpop.eup %1729  ;;  %1737 = vpow2.f32 %v859_v18  ;;  %v861_v23 = vmul.f32 1.442695, %v837_v19  ;;  %v838_v24 = vsub.f32 %v2097_v47, %v816_v21  ;;  %877 = vadd.xlane.f32.xlu0 %v1726_v17  ;;  %883 = vadd.xlane.f32.xlu1 %v1728_v20  ;;  %v910_v25 = vpack.c.bf16 %v1728_v20, %v1724_v12 }
 0x20a   : > { %v818_v26 = vpop.xlane.xlu0 %817  ;;  %v909_v27 = vpack.c.bf16 %v1730_v22, %v1726_v17 }
 0x20b   : > { %v863_v28 = vmul.f32 1.442695, %v838_v24  ;;  %v839_v29 = vsub.f32 %v2089_v43, %v818_v26  ;;  %1739 = vpow2.f32 %v861_v23 }
 0x20c   : > { %1619 = vmatprep.mubr.bf16.mxu1 %v909_v27  ;;  %v820_v30 = vpop.xlane.xlu1 %819 }
 0x20d   : > { %1741 = vpow2.f32 %v863_v28  ;;  %v865_v31 = vmul.f32 1.442695, %v839_v29  ;;  %v840_v32 = vsub.f32 %v2095_v46, %v820_v30  ;;  %1620 = vmatmul.mubr.bf16.vlgmr.msra.gmra.mrb[0].mxu1 %v910_v25  ;;  %879 = vadd.xlane.f32.xlu1 %v1730_v22  ;;  %v1732_v33 = vpop.eup %1731 }
 0x20e   : > { %v822_v34 = vpop.xlane.xlu0 %821 }
 0x20f   : > { %v1734_v35 = vpop.eup %1733  ;;  %1743 = vpow2.f32 %v865_v31  ;;  %v867_v36 = vmul.f32 1.442695, %v840_v32  ;;  %v841_v37 = vsub.f32 %v2106_v51, %v822_v34 }
 0x210   : > { %v824_v38 = vpop.xlane.xlu1 %823  ;;  %v911_v39 = vpack.c.bf16 %v1734_v35, %v1732_v33 }
 0x211   : > { %v1736_v40 = vpop.eup %1735  ;;  %1745 = vpow2.f32 %v867_v36  ;;  %v869_v41 = vmul.f32 1.442695, %v841_v37  ;;  %v842_v42 = vsub.f32 %v2111_v53, %v824_v38 }
 0x212   : > { %1623 = vmatprep.mubr.bf16.mxu1 %v911_v39  ;;  %889 = vadd.xlane.f32.xlu0 %v1736_v40  ;;  %v826_v43 = vpop.xlane.xlu0 %825 }
 0x213   : > { %v1738_v44 = vpop.eup %1737  ;;  %v871_v45 = vmul.f32 1.442695, %v842_v42  ;;  %v843_v46 = vsub.f32 %v2103_v49, %v826_v43  ;;  %1747 = vpow2.f32 %v869_v41 }
 0x214   : > { %891 = vadd.xlane.f32.xlu1 %v1738_v44  ;;  %v828_v47 = vpop.xlane.xlu1 %827  ;;  %v912_v48 = vpack.c.bf16 %v1738_v44, %v1736_v40 }
 0x215   : > { %1749 = vpow2.f32 %v871_v45  ;;  %v873_v50 = vmul.f32 1.442695, %v843_v46  ;;  %v844_v51 = vsub.f32 %v2109_v52, %v828_v47  ;;  %v1740_v54 = vpop.eup %1739 }
 0x216   : > { %1624 = vmatmul.mubr.bf16.gmra.mrb[4].mxu1 %v912_v48  ;;  %885 = vadd.xlane.f32.xlu0 %v1732_v33 }
 0x217   : > { %v1742_v55 = vpop.eup %1741  ;;  %v875_v53 = vmul.f32 1.442695, %v844_v51  ;;  %1751 = vpow2.f32 %v873_v50 }
 0x218   : > { %887 = vadd.xlane.f32.xlu1 %v1734_v35  ;;  %v913_v56 = vpack.c.bf16 %v1742_v55, %v1740_v54 }
 0x219   : > { %v1744_v57 = vpop.eup %1743  ;;  %1753 = vpow2.f32 %v875_v53 }
 0x21a   : > { %1627 = vmatprep.mubr.bf16.mxu1 %v913_v56  ;;  %897 = vadd.xlane.f32.xlu0 %v1744_v57 }
 0x21b   : > { %v1746_v49 = vpop.eup %1745 }
 0x21c   : > { %899 = vadd.xlane.f32.xlu1 %v1746_v49  ;;  %v914_v58 = vpack.c.bf16 %v1746_v49, %v1744_v57 }
 0x21d   : > { %v1748_v59 = vpop.eup %1747 }
 0x21e   : > { %1628 = vmatmul.mubr.bf16.gmra.mrb[8].mxu1 %v914_v58  ;;  %893 = vadd.xlane.f32.xlu0 %v1740_v54 }
 0x21f   : > { %v1750_v60 = vpop.eup %1749 }
 0x220   : > { %895 = vadd.xlane.f32.xlu1 %v1742_v55  ;;  %v915_v52 = vpack.c.bf16 %v1750_v60, %v1748_v59 }
 0x221   : > { %v1752_v61 = vpop.eup %1751 }
 0x222   : > { %901 = vadd.xlane.f32.xlu0 %v1748_v59  ;;  %1631 = vmatprep.mubr.bf16.mxu1 %v915_v52 }
 0x223   : > { %v1754_v62 = vpop.eup %1753 }
 0x224   : > { %903 = vadd.xlane.f32.xlu1 %v1750_v60  ;;  %v916_v63 = vpack.c.bf16 %v1754_v62, %v1752_v61 }
 0x226   : > { %905 = vadd.xlane.f32.xlu0 %v1752_v61  ;;  %1632 = vmatmul.mubr.bf16.gmra.mrb[12].mxu1 %v916_v63 }
 0x228   : > { %907 = vadd.xlane.f32.xlu1 %v1754_v62 }
 0x292   : > { %v882_v0 = vpop.xlane.xlu0 %881 }
 0x293   : > { %1755 = vrcp.f32 %v882_v0 }
 0x296   : > { %v884_v1 = vpop.xlane.xlu1 %883  ;;  %v878_v2 = vpop.xlane.xlu0 %877 }
 0x297   : > { %1757 = vrcp.f32 %v878_v2 }
 0x298   : > { %1759 = vrcp.f32 %v884_v1 }
 0x29a   : > { %v880_v3 = vpop.xlane.xlu1 %879 }
 0x29b   : > { %1761 = vrcp.f32 %v880_v3 }
 0x29d   : > { %v1756_v10 = vpop.eup %1755 }
 0x29f   : > { %v890_v4 = vpop.xlane.xlu0 %889 }
 0x2a0   : > { %1763 = vrcp.f32 %v890_v4 }
 0x2a1   : > { %v892_v5 = vpop.xlane.xlu1 %891  ;;  %v1758_v12 = vpop.eup %1757 }
 0x2a2   : > { %1765 = vrcp.f32 %v892_v5  ;;  %v1760_v15 = vpop.eup %1759 }
 0x2a3   : > { %v886_v6 = vpop.xlane.xlu0 %885 }
 0x2a4   : > { %1767 = vrcp.f32 %v886_v6 }
 0x2a5   : > { %v888_v7 = vpop.xlane.xlu1 %887  ;;  %v1762_v18 = vpop.eup %1761 }
 0x2a6   : > { %1769 = vrcp.f32 %v888_v7 }
 0x2a7   : > { %v898_v8 = vpop.xlane.xlu0 %897 }
 0x2a8   : > { %1771 = vrcp.f32 %v898_v8 }
 0x2a9   : > { %v900_v9 = vpop.xlane.xlu1 %899 }
 0x2aa   : > { %1773 = vrcp.f32 %v900_v9  ;;  %v1764_v28 = vpop.eup %1763 }
 0x2ab   : > { %v894_v13 = vpop.xlane.xlu0 %893 }
 0x2ac   : > { %1775 = vrcp.f32 %v894_v13  ;;  %v1766_v30 = vpop.eup %1765 }
 0x2ad   : > { %v896_v16 = vpop.xlane.xlu1 %895 }
 0x2ae   : > { %1777 = vrcp.f32 %v896_v16  ;;  %v1768_v32 = vpop.eup %1767 }
 0x2af   : > { %v902_v26 = vpop.xlane.xlu0 %901 }
 0x2b0   : > { %v1770_v34 = vpop.eup %1769  ;;  %1779 = vrcp.f32 %v902_v26 }
 0x2b1   : > { %v904_v27 = vpop.xlane.xlu1 %903 }
 0x2b2   : > { %v1772_v44 = vpop.eup %1771 }
 0x2b3   : > { %v906_v38 = vpop.xlane.xlu0 %905 }
 0x2b4   : > { %1781 = vrcp.f32 %v906_v38  ;;  %v1774_v46 = vpop.eup %1773 }
 0x2b5   : > { %v908_v41 = vpop.xlane.xlu1 %907 }
 0x2b6   : > { %1783 = vrcp.f32 %v908_v41  ;;  %v1776_v48 = vpop.eup %1775 }
 0x2b7   : > { %1785 = vrcp.f32 %v904_v27 }
 0x2b8   : > { %v1778_v51 = vpop.eup %1777 }
 0x2ba   : > { %v1780_v59 = vpop.eup %1779 }
 0x2be   : > { %v1782_v52 = vpop.eup %1781 }
 0x2c0   : > { %v1784_v62 = vpop.eup %1783 }
 0x2c1   : > { %v1786_v0 = vpop.eup %1785 }
 0x2e0   : > { %v1621_v11 = vpop.f32.mrb[0].mxu1 }
 0x2e1   : > { %v999_v14 = vpop.f32.mrb[1].mxu1  ;;  %v1080_v19 = vmul.f32 %v1756_v10, %v1621_v11 }
 0x2e2   : > { %v1622_v17 = vpop.f32.mrb[2].mxu1  ;;  %v1078_v22 = vmul.f32 %v1758_v12, %v999_v14 }
 0x2e3   : > { %v1081_v20 = vmul.f32 %v1760_v15, %v1622_v17  ;;  %v1002_v21 = vpop.f32.mrb[3].mxu1 }
 0x2e4   : > { %v1079_v23 = vmul.f32 %v1762_v18, %v1002_v21 }
 0x2e5   : > { %v1500_v24 = vpack.c.bf16 %v1081_v20, %v1080_v19 }
 0x2e6   : > { %v1495_v25 = vpack.c.bf16 %v1079_v23, %v1078_v22 }
 0x2e7   : > { %1532 = vst [vmem:[%s2129_s12 + $0x8] sm:$0xff] %v1500_v24  }
 0x2e8   : > { %1496 = vst [vmem:[%s2129_s12] sm:$0xff] %v1495_v25  }
 0x2e9   : > { %v1625_v29 = vpop.f32.mrb[4].mxu1 }
 0x2ea   : > { %v1015_v31 = vpop.f32.mrb[5].mxu1  ;;  %v1084_v35 = vmul.f32 %v1764_v28, %v1625_v29 }
 0x2eb   : > { %v1626_v33 = vpop.f32.mrb[6].mxu1  ;;  %v1082_v39 = vmul.f32 %v1768_v32, %v1015_v31 }
 0x2ec   : > { %v1085_v36 = vmul.f32 %v1766_v30, %v1626_v33  ;;  %v1018_v37 = vpop.f32.mrb[7].mxu1 }
 0x2ed   : > { %v1083_v40 = vmul.f32 %v1770_v34, %v1018_v37 }
 0x2ee   : > { %v1510_v42 = vpack.c.bf16 %v1085_v36, %v1084_v35  ;;  %v1204_v10 = vld [vmem:[%s2129_s12 + $0x8] sm:$0xf] (%p1969_p10)  ;;  %v1206_v11 = vld [vmem:[%s2129_s12 + $0xc] sm:$0xf] (%p1969_p10) }
 0x2ef   : > { %v1505_v43 = vpack.c.bf16 %v1083_v40, %v1082_v39  ;;  %v1200_v8 = vld [vmem:[%s2129_s12] sm:$0xf] (%p1969_p10)  ;;  %v1202_v9 = vld [vmem:[%s2129_s12 + $0x4] sm:$0xf] (%p1969_p10)  ;;  %1205 = vst [vmem:[%s1184_s21 + $0x10] sm:$0xf] (%p1969_p10), %v1204_v10 }
 0x2f0   : > { %1534 = vst [vmem:[%s2129_s12 + $0x18] sm:$0xff] %v1510_v42   ;;  %1201 = vst [vmem:[%s1184_s21] sm:$0xf] (%p1969_p10), %v1200_v8 }
 0x2f1   : > { %1533 = vst [vmem:[%s2129_s12 + $0x10] sm:$0xff] %v1505_v43   ;;  %v1629_v45 = vpop.f32.mrb[8].mxu1  ;;  %1203 = vst [vmem:[%s1184_s21 + $0x8] sm:$0xf] (%p1969_p10), %v1202_v9 }
 0x2f2   : > { %v1031_v47 = vpop.f32.mrb[9].mxu1  ;;  %v1088_v54 = vmul.f32 %v1772_v44, %v1629_v45  ;;  %1207 = vst [vmem:[%s1184_s21 + $0x18] sm:$0xf] (%p1969_p10), %v1206_v11 }
 0x2f3   : > { %v1630_v50 = vpop.f32.mrb[10].mxu1  ;;  %v1086_v56 = vmul.f32 %v1776_v48, %v1031_v47 }
 0x2f4   : > { %v1089_v55 = vmul.f32 %v1774_v46, %v1630_v50  ;;  %v1034_v53 = vpop.f32.mrb[11].mxu1 }
 0x2f5   : > { %v1087_v57 = vmul.f32 %v1778_v51, %v1034_v53 }
 0x2f6   : > { %v1520_v49 = vpack.c.bf16 %v1089_v55, %v1088_v54 }
 0x2f7   : > { %v1515_v58 = vpack.c.bf16 %v1087_v57, %v1086_v56  ;;  %v1212_v14 = vld [vmem:[%s2129_s12 + $0x18] sm:$0xf] (%p1969_p10)  ;;  %v1214_v15 = vld [vmem:[%s2129_s12 + $0x1c] sm:$0xf] (%p1969_p10) }
 0x2f8   : > { %1536 = vst [vmem:[%s2129_s12 + $0x28] sm:$0xff] %v1520_v49   ;;  %v1208_v12 = vld [vmem:[%s2129_s12 + $0x10] sm:$0xf] (%p1969_p10)  ;;  %v1210_v13 = vld [vmem:[%s2129_s12 + $0x14] sm:$0xf] (%p1969_p10) }
 0x2f9   : > { %1535 = vst [vmem:[%s2129_s12 + $0x20] sm:$0xff] %v1515_v58   ;;  %v1633_v60 = vpop.f32.mrb[12].mxu1  ;;  %1209 = vst [vmem:[%s1184_s21 + $0x20] sm:$0xf] (%p1969_p10), %v1208_v12 }
 0x2fa   : > { %v1047_v61 = vpop.f32.mrb[13].mxu1  ;;  %v1092_v1 = vmul.f32 %v1782_v52, %v1633_v60  ;;  %1211 = vst [vmem:[%s1184_s21 + $0x28] sm:$0xf] (%p1969_p10), %v1210_v13  ;;  %1213 = vst [vmem:[%s1184_s21 + $0x30] sm:$0xf] (%p1969_p10), %v1212_v14 }
 0x2fb   : > { %v1634_v63 = vpop.f32.mrb[14].mxu1  ;;  %v1090_v4 = vmul.f32 %v1780_v59, %v1047_v61  ;;  %1180 = sbr.rel (!%p1969_p10) target bundleno = 779 (0x30b), region = 159  ;;  %1215 = vst [vmem:[%s1184_s21 + $0x38] sm:$0xf] (%p1969_p10), %v1214_v15 }
 0x2fc   : > { %v1093_v2 = vmul.f32 %v1784_v62, %v1634_v63  ;;  %v1050_v3 = vpop.f32.mrb[15].mxu1 }
 0x2fd   : > { %v1091_v5 = vmul.f32 %v1786_v0, %v1050_v3 }
 0x2fe   : > { %v1530_v6 = vpack.c.bf16 %v1093_v2, %v1092_v1 }
 0x2ff   : > { %v1525_v7 = vpack.c.bf16 %v1091_v5, %v1090_v4  ;;  %v1220_v18 = vld [vmem:[%s2129_s12 + $0x28] sm:$0xf] (%p1969_p10)  ;;  %v1222_v19 = vld [vmem:[%s2129_s12 + $0x2c] sm:$0xf] (%p1969_p10) }
 0x300   : > { %1538 = vst [vmem:[%s2129_s12 + $0x38] sm:$0xff] %v1530_v6   ;;  %v1216_v16 = vld [vmem:[%s2129_s12 + $0x20] sm:$0xf] (%p1969_p10)  ;;  %v1218_v17 = vld [vmem:[%s2129_s12 + $0x24] sm:$0xf] (%p1969_p10) }
 0x301   : > { %1537 = vst [vmem:[%s2129_s12 + $0x30] sm:$0xff] %v1525_v7   ;;  %1217 = vst [vmem:[%s1184_s21 + $0x40] sm:$0xf] (%p1969_p10), %v1216_v16 }
 0x302   : > { %1219 = vst [vmem:[%s1184_s21 + $0x48] sm:$0xf] %v1218_v17  ;;  %1221 = vst [vmem:[%s1184_s21 + $0x50] sm:$0xf] %v1220_v18 }
 0x303   : > { %1223 = vst [vmem:[%s1184_s21 + $0x58] sm:$0xf] %v1222_v19 }
 0x307   : > { %v1228_v22 = vld [vmem:[%s2129_s12 + $0x38] sm:$0xf]  ;;  %v1230_v23 = vld [vmem:[%s2129_s12 + $0x3c] sm:$0xf] }
 0x308   : > { %v1224_v20 = vld [vmem:[%s2129_s12 + $0x30] sm:$0xf]  ;;  %v1226_v21 = vld [vmem:[%s2129_s12 + $0x34] sm:$0xf]  ;;  %1229 = vst [vmem:[%s1184_s21 + $0x70] sm:$0xf] %v1228_v22 }
 0x309   : > { %1225 = vst [vmem:[%s1184_s21 + $0x60] sm:$0xf] %v1224_v20  ;;  %1227 = vst [vmem:[%s1184_s21 + $0x68] sm:$0xf] %v1226_v21 }
 0x30a   : > { %1231 = vst [vmem:[%s1184_s21 + $0x78] sm:$0xf] %v1230_v23 }
 0x30b PF: > { %s13_s20 = sadd.s32 1, %s1857_s20   ;;  %s2196_s12 = smov %s1829_s13 }
 0x30c   : > { %p10_p1 = scmp.ge.s32.totalorder %s13_s20, 6   ;;  %s2197_s13 = smov %s1964_s9 }
 0x30d   : > { %s2198_s14 = smov %s1837_s15  ;;  %s2199_s15 = smov %s1961_s8 }
 0x30e   : > { %s2200_s16 = smov %s1849_s18  ;;  %s2201_s17 = smov %s1853_s19 }
 0x30f   : > { %s2202_s18 = smov %s2205_s22  ;;  %s2203_s19 = smov %s2209_s23 }
 0x310   :  { %12 = sbr.rel (!%p10_p1) target bundleno = 5 (0x5), region = 247 }

// kernel: decoder_layer.11
= control target key start
LH: loop header
LB: loop body
LE: loop exit
PB: predicated region body
PF: predicated region fallthrough
CT: control target
= control target key end

     0   :  { %s1777_s1 = inlined_call_operand.vmem [shape: bf16[256,256], index: 1, kind: input, shape index: {}]   ;;  %s1778_s0 = inlined_call_operand.vmem [shape: f32[256,256], index: 0, kind: input, shape index: {}]   ;;  %s1779_s2 = inlined_call_operand.vmem [shape: f32[1,256], index: 2, kind: input, shape index: {}]   ;;  %s1780_s3 = inlined_call_operand.vmem [shape: bf16[256,256], index: 3, kind: output, shape index: {}]  }
   0x1   :  { %v1254_v0 = vld [vmem:[%s1777_s1 + $0x4] ss:$8 sps:$4 sm:$0xff]   ;;  %v1256_v1 = vld [vmem:[%s1777_s1] ss:$8 sps:$4 sm:$0xff]   ;;  %v1257_v2 = vld [vmem:[%s1777_s1 + $0x14] ss:$8 sps:$4 sm:$0xff]  }
   0x2   :  { %434 = vmatprep.subr.bf16.mxu0 %v1254_v0  ;;  %1222 = vmatprep.subr.bf16.mxu1 %v1254_v0  ;;  %v1259_v3 = vld [vmem:[%s1777_s1 + $0x10] ss:$8 sps:$4 sm:$0xff]   ;;  %v1260_v4 = vld [vmem:[%s1777_s1 + $0x24] ss:$8 sps:$4 sm:$0xff]   ;;  %v1262_v5 = vld [vmem:[%s1777_s1 + $0x20] ss:$8 sps:$4 sm:$0xff]  }
   0x3   :  { %435 = vmatpush1.bf16.msra.mxu0 %v1256_v1  ;;  %1238 = vmatpush1.bf16.msra.mxu1 %v1256_v1  ;;  %v1263_v6 = vld [vmem:[%s1777_s1 + $0x34] ss:$8 sps:$4 sm:$0xff]   ;;  %v1265_v7 = vld [vmem:[%s1777_s1 + $0x30] ss:$8 sps:$4 sm:$0xff]   ;;  %v1266_v8 = vld [vmem:[%s1777_s1 + $0x44] ss:$8 sps:$4 sm:$0xff]  }
   0x4   :  { %436 = vmatprep.subr.bf16.mxu0 %v1257_v2  ;;  %1223 = vmatprep.subr.bf16.mxu1 %v1257_v2  ;;  %v1268_v9 = vld [vmem:[%s1777_s1 + $0x40] ss:$8 sps:$4 sm:$0xff]   ;;  %v1269_v10 = vld [vmem:[%s1777_s1 + $0x54] ss:$8 sps:$4 sm:$0xff]   ;;  %v1271_v11 = vld [vmem:[%s1777_s1 + $0x50] ss:$8 sps:$4 sm:$0xff]  }
   0x5   :  { %v1272_v12 = vld [vmem:[%s1777_s1 + $0x64] ss:$8 sps:$4 sm:$0xff]   ;;  %v149_v14 = vld [vmem:[%s1778_s0 + $0x18] sm:$0xff]  ;;  %v1274_v18 = vld [vmem:[%s1777_s1 + $0x60] ss:$8 sps:$4 sm:$0xff]  }
   0x6   :  { %v147_v13 = vld [vmem:[%s1778_s0 + $0x8] sm:$0xff]  ;;  %v181_v17 = vld [vmem:[%s1778_s0 + $0x118] sm:$0xff]  ;;  %v146_v38 = vld [vmem:[%s1778_s0] sm:$0xff] }
   0x7   :  { %437 = vmatpush1.bf16.msra.mxu0 %v1259_v3  ;;  %1239 = vmatpush1.bf16.msra.mxu1 %v1259_v3  ;;  %v211_v15 = vpack.c.bf16 %v149_v14, %v147_v13  ;;  %v179_v16 = vld [vmem:[%s1778_s0 + $0x108] sm:$0xff]  ;;  %v1275_v20 = vld [vmem:[%s1777_s1 + $0x74] ss:$8 sps:$4 sm:$0xff]   ;;  %v1277_v21 = vld [vmem:[%s1777_s1 + $0x70] ss:$8 sps:$4 sm:$0xff]  }
   0x8   :  { %438 = vmatprep.subr.bf16.mxu0 %v1260_v4  ;;  %1224 = vmatprep.subr.bf16.mxu1 %v1260_v4  ;;  %v227_v19 = vpack.c.bf16 %v181_v17, %v179_v16  ;;  %v1278_v22 = vld [vmem:[%s1777_s1 + $0x84] ss:$8 sps:$4 sm:$0xff]   ;;  %v1280_v23 = vld [vmem:[%s1777_s1 + $0x80] ss:$8 sps:$4 sm:$0xff]   ;;  %v1281_v24 = vld [vmem:[%s1777_s1 + $0x94] ss:$8 sps:$4 sm:$0xff]  }
   0x9   :  { %466 = vmatprep.mubr.bf16.mxu0 %v211_v15  ;;  %v1283_v25 = vld [vmem:[%s1777_s1 + $0x90] ss:$8 sps:$4 sm:$0xff]   ;;  %v1284_v26 = vld [vmem:[%s1777_s1 + $0xa4] ss:$8 sps:$4 sm:$0xff]   ;;  %v1286_v27 = vld [vmem:[%s1777_s1 + $0xa0] ss:$8 sps:$4 sm:$0xff]  }
   0xa   :  { %546 = vmatprep.mubr.bf16.mxu1 %v227_v19  ;;  %v1287_v28 = vld [vmem:[%s1777_s1 + $0xb4] ss:$8 sps:$4 sm:$0xff]   ;;  %v1289_v29 = vld [vmem:[%s1777_s1 + $0xb0] ss:$8 sps:$4 sm:$0xff]   ;;  %v1290_v30 = vld [vmem:[%s1777_s1 + $0xc4] ss:$8 sps:$4 sm:$0xff]  }
   0xb   :  { %439 = vmatpush1.bf16.msra.mxu0 %v1262_v5  ;;  %1240 = vmatpush1.bf16.msra.mxu1 %v1262_v5  ;;  %v1292_v31 = vld [vmem:[%s1777_s1 + $0xc0] ss:$8 sps:$4 sm:$0xff]   ;;  %v1293_v32 = vld [vmem:[%s1777_s1 + $0xd4] ss:$8 sps:$4 sm:$0xff]   ;;  %v1295_v33 = vld [vmem:[%s1777_s1 + $0xd0] ss:$8 sps:$4 sm:$0xff]  }
   0xc   :  { %440 = vmatprep.subr.bf16.mxu0 %v1263_v6  ;;  %1225 = vmatprep.subr.bf16.mxu1 %v1263_v6  ;;  %v1296_v34 = vld [vmem:[%s1777_s1 + $0xe4] ss:$8 sps:$4 sm:$0xff]   ;;  %v1298_v35 = vld [vmem:[%s1777_s1 + $0xe0] ss:$8 sps:$4 sm:$0xff]   ;;  %v1299_v36 = vld [vmem:[%s1777_s1 + $0xf4] ss:$8 sps:$4 sm:$0xff]  }
   0xd   :  { %v1301_v37 = vld [vmem:[%s1777_s1 + $0xf0] ss:$8 sps:$4 sm:$0xff]   ;;  %v178_v40 = vld [vmem:[%s1778_s0 + $0x100] sm:$0xff]  ;;  %v151_v42 = vld [vmem:[%s1778_s0 + $0x28] sm:$0xff] }
   0xe   :  { %v148_v39 = vld [vmem:[%s1778_s0 + $0x10] sm:$0xff]  ;;  %v153_v43 = vld [vmem:[%s1778_s0 + $0x38] sm:$0xff]  ;;  %v183_v44 = vld [vmem:[%s1778_s0 + $0x128] sm:$0xff] }
   0xf   :  { %441 = vmatpush1.bf16.msra.mxu0 %v1265_v7  ;;  %1241 = vmatpush1.bf16.msra.mxu1 %v1265_v7  ;;  %v180_v41 = vld [vmem:[%s1778_s0 + $0x110] sm:$0xff]  ;;  %v185_v45 = vld [vmem:[%s1778_s0 + $0x138] sm:$0xff]  ;;  %v210_v46 = vpack.c.bf16 %v148_v39, %v146_v38  ;;  %v213_v48 = vpack.c.bf16 %v153_v43, %v151_v42  ;;  %v150_v50 = vld [vmem:[%s1778_s0 + $0x20] sm:$0xff] }
  0x10   :  { %442 = vmatprep.subr.bf16.mxu0 %v1266_v8  ;;  %1226 = vmatprep.subr.bf16.mxu1 %v1266_v8  ;;  %v226_v47 = vpack.c.bf16 %v180_v41, %v178_v40  ;;  %v229_v49 = vpack.c.bf16 %v185_v45, %v183_v44  ;;  %v152_v51 = vld [vmem:[%s1778_s0 + $0x30] sm:$0xff]  ;;  %v182_v52 = vld [vmem:[%s1778_s0 + $0x120] sm:$0xff]  ;;  %v155_v54 = vld [vmem:[%s1778_s0 + $0x48] sm:$0xff] }
  0x11   :  { %v184_v53 = vld [vmem:[%s1778_s0 + $0x130] sm:$0xff]  ;;  %v157_v55 = vld [vmem:[%s1778_s0 + $0x58] sm:$0xff]  ;;  %v187_v56 = vld [vmem:[%s1778_s0 + $0x148] sm:$0xff]  ;;  %v212_v58 = vpack.c.bf16 %v152_v51, %v150_v50 }
  0x12   :  { %v189_v57 = vld [vmem:[%s1778_s0 + $0x158] sm:$0xff]  ;;  %v228_v59 = vpack.c.bf16 %v184_v53, %v182_v52  ;;  %v215_v60 = vpack.c.bf16 %v157_v55, %v155_v54  ;;  %v154_v62 = vld [vmem:[%s1778_s0 + $0x40] sm:$0xff]  ;;  %v156_v63 = vld [vmem:[%s1778_s0 + $0x50] sm:$0xff] }
  0x13   :  { %443 = vmatpush1.bf16.msra.mxu0 %v1268_v9  ;;  %1242 = vmatpush1.bf16.msra.mxu1 %v1268_v9  ;;  %v231_v61 = vpack.c.bf16 %v189_v57, %v187_v56  ;;  %v186_v0 = vld [vmem:[%s1778_s0 + $0x140] sm:$0xff]  ;;  %v188_v1 = vld [vmem:[%s1778_s0 + $0x150] sm:$0xff]  ;;  %v159_v2 = vld [vmem:[%s1778_s0 + $0x68] sm:$0xff]  ;;  %v214_v6 = vpack.c.bf16 %v156_v63, %v154_v62 }
  0x14   :  { %444 = vmatprep.subr.bf16.mxu0 %v1269_v10  ;;  %1227 = vmatprep.subr.bf16.mxu1 %v1269_v10  ;;  %v161_v3 = vld [vmem:[%s1778_s0 + $0x78] sm:$0xff]  ;;  %v191_v4 = vld [vmem:[%s1778_s0 + $0x168] sm:$0xff]  ;;  %v230_v7 = vpack.c.bf16 %v188_v1, %v186_v0  ;;  %v158_v10 = vld [vmem:[%s1778_s0 + $0x60] sm:$0xff]  ;;  %v824_v0 = vlaneseq }
  0x15   :  { %v193_v5 = vld [vmem:[%s1778_s0 + $0x178] sm:$0xff]  ;;  %v217_v8 = vpack.c.bf16 %v161_v3, %v159_v2  ;;  %v192_v13 = vld [vmem:[%s1778_s0 + $0x170] sm:$0xff]  ;;  %v163_v14 = vld [vmem:[%s1778_s0 + $0x88] sm:$0xff] }
  0x16   :  { %v233_v9 = vpack.c.bf16 %v193_v5, %v191_v4  ;;  %v165_v15 = vld [vmem:[%s1778_s0 + $0x98] sm:$0xff]  ;;  %v195_v16 = vld [vmem:[%s1778_s0 + $0x188] sm:$0xff]  ;;  %v825_v1 = vshrl.u32 %v824_v0, 7  ;;  %v822_v3 = vld [vmem:[%s1779_s2] sm:$0x3] }
  0x17   :  { %445 = vmatpush1.bf16.msra.mxu0 %v1271_v11  ;;  %1243 = vmatpush1.bf16.msra.mxu1 %v1271_v11  ;;  %v160_v11 = vld [vmem:[%s1778_s0 + $0x70] sm:$0xff]  ;;  %v197_v17 = vld [vmem:[%s1778_s0 + $0x198] sm:$0xff]  ;;  %v171_v38 = vld [vmem:[%s1778_s0 + $0xc8] sm:$0xff] }
  0x18   :  { %446 = vmatprep.subr.bf16.mxu0 %v1272_v12  ;;  %1228 = vmatprep.subr.bf16.mxu1 %v1272_v12  ;;  %v190_v12 = vld [vmem:[%s1778_s0 + $0x160] sm:$0xff]  ;;  %v173_v39 = vld [vmem:[%s1778_s0 + $0xd8] sm:$0xff]  ;;  %v203_v40 = vld [vmem:[%s1778_s0 + $0x1c8] sm:$0xff]  ;;  %v826_v2 = vsub.s32 0, %v825_v1  ;;  %v830_v4 = vsub.s32 1, %v825_v1 }
  0x19   :  { %v232_v19 = vpack.c.bf16 %v192_v13, %v190_v12  ;;  %v205_v41 = vld [vmem:[%s1778_s0 + $0x1d8] sm:$0xff]  ;;  %v223_v44 = vpack.c.bf16 %v173_v39, %v171_v38  ;;  %v175_v50 = vld [vmem:[%s1778_s0 + $0xe8] sm:$0xff] }
  0x1a   :  { %v239_v45 = vpack.c.bf16 %v205_v41, %v203_v40  ;;  %v177_v51 = vld [vmem:[%s1778_s0 + $0xf8] sm:$0xff]  ;;  %v207_v52 = vld [vmem:[%s1778_s0 + $0x1e8] sm:$0xff]  ;;  %v1613_v5 = vrot.slane %v822_v3, %v826_v2 }
  0x1b   :  { %447 = vmatpush1.bf16.msra.mxu0 %v1274_v18  ;;  %1244 = vmatpush1.bf16.msra.mxu1 %v1274_v18  ;;  %v216_v18 = vpack.c.bf16 %v160_v11, %v158_v10  ;;  %v209_v53 = vld [vmem:[%s1778_s0 + $0x1f8] sm:$0xff]  ;;  %v225_v56 = vpack.c.bf16 %v177_v51, %v175_v50 }
  0x1c   :  { %448 = vmatprep.subr.bf16.mxu0 %v1275_v20  ;;  %1229 = vmatprep.subr.bf16.mxu1 %v1275_v20  ;;  %v219_v20 = vpack.c.bf16 %v165_v15, %v163_v14  ;;  %v241_v57 = vpack.c.bf16 %v209_v53, %v207_v52 }
  0x1f   :  { %449 = vmatpush1.bf16.msra.mxu0 %v1277_v21  ;;  %1245 = vmatpush1.bf16.msra.mxu1 %v1277_v21  ;;  %v235_v21 = vpack.c.bf16 %v197_v17, %v195_v16 }
  0x20   :  { %450 = vmatprep.subr.bf16.mxu0 %v1278_v22  ;;  %1230 = vmatprep.subr.bf16.mxu1 %v1278_v22  ;;  %v162_v22 = vld [vmem:[%s1778_s0 + $0x80] sm:$0xff] }
  0x23   :  { %451 = vmatpush1.bf16.msra.mxu0 %v1280_v23  ;;  %1246 = vmatpush1.bf16.msra.mxu1 %v1280_v23  ;;  %v164_v23 = vld [vmem:[%s1778_s0 + $0x90] sm:$0xff] }
  0x24   :  { %452 = vmatprep.subr.bf16.mxu0 %v1281_v24  ;;  %1231 = vmatprep.subr.bf16.mxu1 %v1281_v24  ;;  %v194_v24 = vld [vmem:[%s1778_s0 + $0x180] sm:$0xff] }
  0x27   :  { %453 = vmatpush1.bf16.msra.mxu0 %v1283_v25  ;;  %1247 = vmatpush1.bf16.msra.mxu1 %v1283_v25  ;;  %v196_v25 = vld [vmem:[%s1778_s0 + $0x190] sm:$0xff] }
  0x28   :  { %454 = vmatprep.subr.bf16.mxu0 %v1284_v26  ;;  %1232 = vmatprep.subr.bf16.mxu1 %v1284_v26  ;;  %v167_v26 = vld [vmem:[%s1778_s0 + $0xa8] sm:$0xff] }
  0x2b   :  { %455 = vmatpush1.bf16.msra.mxu0 %v1286_v27  ;;  %1248 = vmatpush1.bf16.msra.mxu1 %v1286_v27  ;;  %v169_v27 = vld [vmem:[%s1778_s0 + $0xb8] sm:$0xff] }
  0x2c   :  { %456 = vmatprep.subr.bf16.mxu0 %v1287_v28  ;;  %1233 = vmatprep.subr.bf16.mxu1 %v1287_v28  ;;  %v199_v28 = vld [vmem:[%s1778_s0 + $0x1a8] sm:$0xff] }
  0x2f   :  { %457 = vmatpush1.bf16.msra.mxu0 %v1289_v29  ;;  %1249 = vmatpush1.bf16.msra.mxu1 %v1289_v29  ;;  %v201_v29 = vld [vmem:[%s1778_s0 + $0x1b8] sm:$0xff] }
  0x30   :  { %458 = vmatprep.subr.bf16.mxu0 %v1290_v30  ;;  %1234 = vmatprep.subr.bf16.mxu1 %v1290_v30  ;;  %v218_v30 = vpack.c.bf16 %v164_v23, %v162_v22 }
  0x33   :  { %459 = vmatpush1.bf16.msra.mxu0 %v1292_v31  ;;  %1250 = vmatpush1.bf16.msra.mxu1 %v1292_v31  ;;  %v234_v31 = vpack.c.bf16 %v196_v25, %v194_v24 }
  0x34   :  { %460 = vmatprep.subr.bf16.mxu0 %v1293_v32  ;;  %1235 = vmatprep.subr.bf16.mxu1 %v1293_v32  ;;  %v221_v32 = vpack.c.bf16 %v169_v27, %v167_v26 }
  0x37   :  { %461 = vmatpush1.bf16.msra.mxu0 %v1295_v33  ;;  %1251 = vmatpush1.bf16.msra.mxu1 %v1295_v33  ;;  %v237_v33 = vpack.c.bf16 %v201_v29, %v199_v28 }
  0x38   :  { %462 = vmatprep.subr.bf16.mxu0 %v1296_v34  ;;  %1236 = vmatprep.subr.bf16.mxu1 %v1296_v34  ;;  %v166_v34 = vld [vmem:[%s1778_s0 + $0xa0] sm:$0xff] }
  0x3b   :  { %463 = vmatpush1.bf16.msra.mxu0 %v1298_v35  ;;  %1252 = vmatpush1.bf16.msra.mxu1 %v1298_v35  ;;  %v168_v35 = vld [vmem:[%s1778_s0 + $0xb0] sm:$0xff] }
  0x3c   :  { %464 = vmatprep.subr.bf16.mxu0 %v1299_v36  ;;  %1237 = vmatprep.subr.bf16.mxu1 %v1299_v36  ;;  %v198_v36 = vld [vmem:[%s1778_s0 + $0x1a0] sm:$0xff]  ;;  %v220_v42 = vpack.c.bf16 %v168_v35, %v166_v34 }
  0x3f   :  { %465 = vmatpush1.bf16.msra.mxu0 %v1301_v37  ;;  %1253 = vmatpush1.bf16.msra.mxu1 %v1301_v37  ;;  %v200_v37 = vld [vmem:[%s1778_s0 + $0x1b0] sm:$0xff] }
  0x40   :  { %v236_v43 = vpack.c.bf16 %v200_v37, %v198_v36 }
  0x42   :  { %467 = vmatmul.mubr.bf16.vlgmr.msra.gmra.mrb[0].mxu0 %v210_v46  ;;  %547 = vmatmul.mubr.bf16.vlgmr.msra.gmra.mrb[0].mxu1 %v226_v47  ;;  %v170_v46 = vld [vmem:[%s1778_s0 + $0xc0] sm:$0xff]  ;;  %v172_v47 = vld [vmem:[%s1778_s0 + $0xd0] sm:$0xff] }
  0x43   :  { %476 = vmatprep.mubr.bf16.mxu0 %v213_v48  ;;  %556 = vmatprep.mubr.bf16.mxu1 %v229_v49  ;;  %v202_v48 = vld [vmem:[%s1778_s0 + $0x1c0] sm:$0xff]  ;;  %v204_v49 = vld [vmem:[%s1778_s0 + $0x1d0] sm:$0xff]  ;;  %v222_v54 = vpack.c.bf16 %v172_v47, %v170_v46 }
  0x44   :  { %v238_v55 = vpack.c.bf16 %v204_v49, %v202_v48 }
  0x4a   :  { %477 = vmatmul.mubr.bf16.gmra.mrb[4].mxu0 %v212_v58  ;;  %557 = vmatmul.mubr.bf16.gmra.mrb[4].mxu1 %v228_v59  ;;  %v174_v58 = vld [vmem:[%s1778_s0 + $0xe0] sm:$0xff]  ;;  %v176_v59 = vld [vmem:[%s1778_s0 + $0xf0] sm:$0xff] }
  0x4b   :  { %486 = vmatprep.mubr.bf16.mxu0 %v215_v60  ;;  %566 = vmatprep.mubr.bf16.mxu1 %v231_v61  ;;  %v206_v60 = vld [vmem:[%s1778_s0 + $0x1e0] sm:$0xff]  ;;  %v208_v61 = vld [vmem:[%s1778_s0 + $0x1f0] sm:$0xff]  ;;  %v224_v62 = vpack.c.bf16 %v176_v59, %v174_v58 }
  0x4c   :  { %v240_v63 = vpack.c.bf16 %v208_v61, %v206_v60 }
  0x52   :  { %487 = vmatmul.mubr.bf16.gmra.mrb[8].mxu0 %v214_v6  ;;  %567 = vmatmul.mubr.bf16.gmra.mrb[8].mxu1 %v230_v7  ;;  %v1615_v6 = vrot.slane %v822_v3, %v830_v4 }
  0x53   :  { %496 = vmatprep.mubr.bf16.mxu0 %v217_v8  ;;  %576 = vmatprep.mubr.bf16.mxu1 %v233_v9 }
  0x5a   :  { %497 = vmatmul.mubr.bf16.gmra.mrb[12].mxu0 %v216_v18  ;;  %577 = vmatmul.mubr.bf16.gmra.mrb[12].mxu1 %v232_v19 }
  0x5b   :  { %506 = vmatprep.mubr.bf16.mxu0 %v219_v20  ;;  %586 = vmatprep.mubr.bf16.mxu1 %v235_v21 }
  0x62   :  { %507 = vmatmul.mubr.bf16.gmra.mrb[16].mxu0 %v218_v30  ;;  %587 = vmatmul.mubr.bf16.gmra.mrb[16].mxu1 %v234_v31 }
  0x63   :  { %516 = vmatprep.mubr.bf16.mxu0 %v221_v32  ;;  %596 = vmatprep.mubr.bf16.mxu1 %v237_v33 }
  0x6a   :  { %517 = vmatmul.mubr.bf16.gmra.mrb[20].mxu0 %v220_v42  ;;  %597 = vmatmul.mubr.bf16.gmra.mrb[20].mxu1 %v236_v43 }
  0x6b   :  { %526 = vmatprep.mubr.bf16.mxu0 %v223_v44  ;;  %606 = vmatprep.mubr.bf16.mxu1 %v239_v45 }
  0x72   :  { %527 = vmatmul.mubr.bf16.gmra.mrb[24].mxu0 %v222_v54  ;;  %607 = vmatmul.mubr.bf16.gmra.mrb[24].mxu1 %v238_v55 }
  0x73   :  { %536 = vmatprep.mubr.bf16.mxu0 %v225_v56  ;;  %616 = vmatprep.mubr.bf16.mxu1 %v241_v57 }
  0x7a   :  { %537 = vmatmul.mubr.bf16.gmra.mrb[28].mxu0 %v224_v62  ;;  %617 = vmatmul.mubr.bf16.gmra.mrb[28].mxu1 %v240_v63 }
 0x115   :  { %v468_v7 = vpop.f32.mrb[0].mxu0  ;;  %v548_v8 = vpop.f32.mrb[0].mxu1 }
 0x116   :  { %v834_v9 = vadd.f32 %v1613_v5, %v468_v7  ;;  %v866_v10 = vadd.f32 %v1613_v5, %v548_v8  ;;  %v470_v11 = vpop.f32.mrb[1].mxu0  ;;  %v550_v12 = vpop.f32.mrb[1].mxu1 }
 0x117   :  { %v835_v13 = vadd.f32 %v1615_v6, %v470_v11  ;;  %v867_v14 = vadd.f32 %v1615_v6, %v550_v12  ;;  %v472_v15 = vpop.f32.mrb[2].mxu0  ;;  %v552_v16 = vpop.f32.mrb[2].mxu1 }
 0x118   :  { %v836_v17 = vadd.f32 %v1613_v5, %v472_v15  ;;  %v868_v18 = vadd.f32 %v1613_v5, %v552_v16  ;;  %v474_v19 = vpop.f32.mrb[3].mxu0  ;;  %v554_v20 = vpop.f32.mrb[3].mxu1 }
 0x119   :  { %v1190_v21 = vpack.c.bf16 %v835_v13, %v834_v9  ;;  %v1206_v22 = vpack.c.bf16 %v867_v14, %v866_v10  ;;  %v837_v23 = vadd.f32 %v1615_v6, %v474_v19  ;;  %v869_v24 = vadd.f32 %v1615_v6, %v554_v20 }
 0x11b   :  { %1090 = vst [vmem:[%s1780_s3] sm:$0xff] %v1190_v21  ;;  %1106 = vst [vmem:[%s1780_s3 + $0x80] sm:$0xff] %v1206_v22  ;;  %v1191_v25 = vpack.c.bf16 %v837_v23, %v836_v17  ;;  %v1207_v26 = vpack.c.bf16 %v869_v24, %v868_v18 }
 0x11d   :  { %1091 = vst [vmem:[%s1780_s3 + $0x8] sm:$0xff] %v1191_v25  ;;  %1107 = vst [vmem:[%s1780_s3 + $0x88] sm:$0xff] %v1207_v26  ;;  %v478_v27 = vpop.f32.mrb[4].mxu0  ;;  %v558_v28 = vpop.f32.mrb[4].mxu1 }
 0x11e   :  { %v838_v29 = vadd.f32 %v1613_v5, %v478_v27  ;;  %v870_v30 = vadd.f32 %v1613_v5, %v558_v28  ;;  %v480_v31 = vpop.f32.mrb[5].mxu0  ;;  %v560_v32 = vpop.f32.mrb[5].mxu1 }
 0x11f   :  { %v839_v33 = vadd.f32 %v1615_v6, %v480_v31  ;;  %v871_v34 = vadd.f32 %v1615_v6, %v560_v32  ;;  %v482_v35 = vpop.f32.mrb[6].mxu0  ;;  %v562_v36 = vpop.f32.mrb[6].mxu1 }
 0x120   :  { %v840_v37 = vadd.f32 %v1613_v5, %v482_v35  ;;  %v872_v38 = vadd.f32 %v1613_v5, %v562_v36  ;;  %v484_v39 = vpop.f32.mrb[7].mxu0  ;;  %v564_v40 = vpop.f32.mrb[7].mxu1 }
 0x121   :  { %v1192_v41 = vpack.c.bf16 %v839_v33, %v838_v29  ;;  %v1208_v42 = vpack.c.bf16 %v871_v34, %v870_v30  ;;  %v841_v43 = vadd.f32 %v1615_v6, %v484_v39  ;;  %v873_v44 = vadd.f32 %v1615_v6, %v564_v40 }
 0x123   :  { %1092 = vst [vmem:[%s1780_s3 + $0x10] sm:$0xff] %v1192_v41  ;;  %1108 = vst [vmem:[%s1780_s3 + $0x90] sm:$0xff] %v1208_v42  ;;  %v1193_v45 = vpack.c.bf16 %v841_v43, %v840_v37  ;;  %v1209_v46 = vpack.c.bf16 %v873_v44, %v872_v38 }
 0x125   :  { %1093 = vst [vmem:[%s1780_s3 + $0x18] sm:$0xff] %v1193_v45  ;;  %1109 = vst [vmem:[%s1780_s3 + $0x98] sm:$0xff] %v1209_v46  ;;  %v488_v47 = vpop.f32.mrb[8].mxu0  ;;  %v568_v48 = vpop.f32.mrb[8].mxu1 }
 0x126   :  { %v842_v49 = vadd.f32 %v1613_v5, %v488_v47  ;;  %v874_v50 = vadd.f32 %v1613_v5, %v568_v48  ;;  %v490_v51 = vpop.f32.mrb[9].mxu0  ;;  %v570_v52 = vpop.f32.mrb[9].mxu1 }
 0x127   :  { %v843_v53 = vadd.f32 %v1615_v6, %v490_v51  ;;  %v875_v54 = vadd.f32 %v1615_v6, %v570_v52  ;;  %v492_v55 = vpop.f32.mrb[10].mxu0  ;;  %v572_v56 = vpop.f32.mrb[10].mxu1 }
 0x128   :  { %v844_v57 = vadd.f32 %v1613_v5, %v492_v55  ;;  %v876_v58 = vadd.f32 %v1613_v5, %v572_v56  ;;  %v494_v59 = vpop.f32.mrb[11].mxu0  ;;  %v574_v60 = vpop.f32.mrb[11].mxu1 }
 0x129   :  { %v1194_v61 = vpack.c.bf16 %v843_v53, %v842_v49  ;;  %v1210_v62 = vpack.c.bf16 %v875_v54, %v874_v50  ;;  %v845_v63 = vadd.f32 %v1615_v6, %v494_v59  ;;  %v877_v0 = vadd.f32 %v1615_v6, %v574_v60 }
 0x12b   :  { %1094 = vst [vmem:[%s1780_s3 + $0x20] sm:$0xff] %v1194_v61  ;;  %1110 = vst [vmem:[%s1780_s3 + $0xa0] sm:$0xff] %v1210_v62  ;;  %v1195_v1 = vpack.c.bf16 %v845_v63, %v844_v57  ;;  %v1211_v2 = vpack.c.bf16 %v877_v0, %v876_v58 }
 0x12d   :  { %1095 = vst [vmem:[%s1780_s3 + $0x28] sm:$0xff] %v1195_v1  ;;  %1111 = vst [vmem:[%s1780_s3 + $0xa8] sm:$0xff] %v1211_v2  ;;  %v498_v3 = vpop.f32.mrb[12].mxu0  ;;  %v578_v4 = vpop.f32.mrb[12].mxu1 }
 0x12e   :  { %v846_v7 = vadd.f32 %v1613_v5, %v498_v3  ;;  %v878_v8 = vadd.f32 %v1613_v5, %v578_v4  ;;  %v500_v9 = vpop.f32.mrb[13].mxu0  ;;  %v580_v10 = vpop.f32.mrb[13].mxu1 }
 0x12f   :  { %v847_v11 = vadd.f32 %v1615_v6, %v500_v9  ;;  %v879_v12 = vadd.f32 %v1615_v6, %v580_v10  ;;  %v502_v13 = vpop.f32.mrb[14].mxu0  ;;  %v582_v14 = vpop.f32.mrb[14].mxu1 }
 0x130   :  { %v848_v15 = vadd.f32 %v1613_v5, %v502_v13  ;;  %v880_v16 = vadd.f32 %v1613_v5, %v582_v14  ;;  %v504_v17 = vpop.f32.mrb[15].mxu0  ;;  %v584_v18 = vpop.f32.mrb[15].mxu1 }
 0x131   :  { %v1196_v19 = vpack.c.bf16 %v847_v11, %v846_v7  ;;  %v1212_v20 = vpack.c.bf16 %v879_v12, %v878_v8  ;;  %v849_v21 = vadd.f32 %v1615_v6, %v504_v17  ;;  %v881_v22 = vadd.f32 %v1615_v6, %v584_v18 }
 0x133   :  { %1096 = vst [vmem:[%s1780_s3 + $0x30] sm:$0xff] %v1196_v19  ;;  %1112 = vst [vmem:[%s1780_s3 + $0xb0] sm:$0xff] %v1212_v20  ;;  %v1197_v23 = vpack.c.bf16 %v849_v21, %v848_v15  ;;  %v1213_v24 = vpack.c.bf16 %v881_v22, %v880_v16 }
 0x135   :  { %1097 = vst [vmem:[%s1780_s3 + $0x38] sm:$0xff] %v1197_v23  ;;  %1113 = vst [vmem:[%s1780_s3 + $0xb8] sm:$0xff] %v1213_v24  ;;  %v508_v25 = vpop.f32.mrb[16].mxu0  ;;  %v588_v26 = vpop.f32.mrb[16].mxu1 }
 0x136   :  { %v850_v27 = vadd.f32 %v1613_v5, %v508_v25  ;;  %v882_v28 = vadd.f32 %v1613_v5, %v588_v26  ;;  %v510_v29 = vpop.f32.mrb[17].mxu0  ;;  %v590_v30 = vpop.f32.mrb[17].mxu1 }
 0x137   :  { %v851_v31 = vadd.f32 %v1615_v6, %v510_v29  ;;  %v883_v32 = vadd.f32 %v1615_v6, %v590_v30  ;;  %v512_v33 = vpop.f32.mrb[18].mxu0  ;;  %v592_v34 = vpop.f32.mrb[18].mxu1 }
 0x138   :  { %v852_v35 = vadd.f32 %v1613_v5, %v512_v33  ;;  %v884_v36 = vadd.f32 %v1613_v5, %v592_v34  ;;  %v514_v37 = vpop.f32.mrb[19].mxu0  ;;  %v594_v38 = vpop.f32.mrb[19].mxu1 }
 0x139   :  { %v1198_v39 = vpack.c.bf16 %v851_v31, %v850_v27  ;;  %v1214_v40 = vpack.c.bf16 %v883_v32, %v882_v28  ;;  %v853_v41 = vadd.f32 %v1615_v6, %v514_v37  ;;  %v885_v42 = vadd.f32 %v1615_v6, %v594_v38 }
 0x13b   :  { %1098 = vst [vmem:[%s1780_s3 + $0x40] sm:$0xff] %v1198_v39  ;;  %1114 = vst [vmem:[%s1780_s3 + $0xc0] sm:$0xff] %v1214_v40  ;;  %v1199_v43 = vpack.c.bf16 %v853_v41, %v852_v35  ;;  %v1215_v44 = vpack.c.bf16 %v885_v42, %v884_v36 }
 0x13d   :  { %1099 = vst [vmem:[%s1780_s3 + $0x48] sm:$0xff] %v1199_v43  ;;  %1115 = vst [vmem:[%s1780_s3 + $0xc8] sm:$0xff] %v1215_v44  ;;  %v518_v45 = vpop.f32.mrb[20].mxu0  ;;  %v598_v46 = vpop.f32.mrb[20].mxu1 }
 0x13e   :  { %v854_v47 = vadd.f32 %v1613_v5, %v518_v45  ;;  %v886_v48 = vadd.f32 %v1613_v5, %v598_v46  ;;  %v520_v49 = vpop.f32.mrb[21].mxu0  ;;  %v600_v50 = vpop.f32.mrb[21].mxu1 }
 0x13f   :  { %v855_v51 = vadd.f32 %v1615_v6, %v520_v49  ;;  %v887_v52 = vadd.f32 %v1615_v6, %v600_v50  ;;  %v522_v53 = vpop.f32.mrb[22].mxu0  ;;  %v602_v54 = vpop.f32.mrb[22].mxu1 }
 0x140   :  { %v856_v55 = vadd.f32 %v1613_v5, %v522_v53  ;;  %v888_v56 = vadd.f32 %v1613_v5, %v602_v54  ;;  %v524_v57 = vpop.f32.mrb[23].mxu0  ;;  %v604_v58 = vpop.f32.mrb[23].mxu1 }
 0x141   :  { %v1200_v59 = vpack.c.bf16 %v855_v51, %v854_v47  ;;  %v1216_v60 = vpack.c.bf16 %v887_v52, %v886_v48  ;;  %v857_v61 = vadd.f32 %v1615_v6, %v524_v57  ;;  %v889_v62 = vadd.f32 %v1615_v6, %v604_v58 }
 0x143   :  { %1100 = vst [vmem:[%s1780_s3 + $0x50] sm:$0xff] %v1200_v59  ;;  %1116 = vst [vmem:[%s1780_s3 + $0xd0] sm:$0xff] %v1216_v60  ;;  %v1201_v63 = vpack.c.bf16 %v857_v61, %v856_v55  ;;  %v1217_v0 = vpack.c.bf16 %v889_v62, %v888_v56 }
 0x145   :  { %1101 = vst [vmem:[%s1780_s3 + $0x58] sm:$0xff] %v1201_v63  ;;  %1117 = vst [vmem:[%s1780_s3 + $0xd8] sm:$0xff] %v1217_v0  ;;  %v528_v1 = vpop.f32.mrb[24].mxu0  ;;  %v608_v2 = vpop.f32.mrb[24].mxu1 }
 0x146   :  { %v858_v3 = vadd.f32 %v1613_v5, %v528_v1  ;;  %v890_v4 = vadd.f32 %v1613_v5, %v608_v2  ;;  %v530_v7 = vpop.f32.mrb[25].mxu0  ;;  %v610_v8 = vpop.f32.mrb[25].mxu1 }
 0x147   :  { %v859_v9 = vadd.f32 %v1615_v6, %v530_v7  ;;  %v891_v10 = vadd.f32 %v1615_v6, %v610_v8  ;;  %v532_v11 = vpop.f32.mrb[26].mxu0  ;;  %v612_v12 = vpop.f32.mrb[26].mxu1 }
 0x148   :  { %v860_v13 = vadd.f32 %v1613_v5, %v532_v11  ;;  %v892_v14 = vadd.f32 %v1613_v5, %v612_v12  ;;  %v534_v15 = vpop.f32.mrb[27].mxu0  ;;  %v614_v16 = vpop.f32.mrb[27].mxu1 }
 0x149   :  { %v1202_v17 = vpack.c.bf16 %v859_v9, %v858_v3  ;;  %v1218_v18 = vpack.c.bf16 %v891_v10, %v890_v4  ;;  %v861_v19 = vadd.f32 %v1615_v6, %v534_v15  ;;  %v893_v20 = vadd.f32 %v1615_v6, %v614_v16 }
 0x14b   :  { %1102 = vst [vmem:[%s1780_s3 + $0x60] sm:$0xff] %v1202_v17  ;;  %1118 = vst [vmem:[%s1780_s3 + $0xe0] sm:$0xff] %v1218_v18  ;;  %v1203_v21 = vpack.c.bf16 %v861_v19, %v860_v13  ;;  %v1219_v22 = vpack.c.bf16 %v893_v20, %v892_v14 }
 0x14d   :  { %1103 = vst [vmem:[%s1780_s3 + $0x68] sm:$0xff] %v1203_v21  ;;  %1119 = vst [vmem:[%s1780_s3 + $0xe8] sm:$0xff] %v1219_v22  ;;  %v538_v23 = vpop.f32.mrb[28].mxu0  ;;  %v618_v24 = vpop.f32.mrb[28].mxu1 }
 0x14e   :  { %v862_v25 = vadd.f32 %v1613_v5, %v538_v23  ;;  %v894_v26 = vadd.f32 %v1613_v5, %v618_v24  ;;  %v540_v27 = vpop.f32.mrb[29].mxu0  ;;  %v620_v28 = vpop.f32.mrb[29].mxu1 }
 0x14f   :  { %v863_v29 = vadd.f32 %v1615_v6, %v540_v27  ;;  %v895_v30 = vadd.f32 %v1615_v6, %v620_v28  ;;  %v542_v31 = vpop.f32.mrb[30].mxu0  ;;  %v622_v32 = vpop.f32.mrb[30].mxu1 }
 0x150   :  { %v864_v33 = vadd.f32 %v1613_v5, %v542_v31  ;;  %v896_v34 = vadd.f32 %v1613_v5, %v622_v32  ;;  %v544_v35 = vpop.f32.mrb[31].mxu0  ;;  %v624_v36 = vpop.f32.mrb[31].mxu1 }
 0x151   :  { %v1204_v37 = vpack.c.bf16 %v863_v29, %v862_v25  ;;  %v1220_v38 = vpack.c.bf16 %v895_v30, %v894_v26  ;;  %v865_v39 = vadd.f32 %v1615_v6, %v544_v35  ;;  %v897_v40 = vadd.f32 %v1615_v6, %v624_v36 }
 0x153   :  { %1104 = vst [vmem:[%s1780_s3 + $0x70] sm:$0xff] %v1204_v37  ;;  %1120 = vst [vmem:[%s1780_s3 + $0xf0] sm:$0xff] %v1220_v38  ;;  %v1205_v41 = vpack.c.bf16 %v865_v39, %v864_v33  ;;  %v1221_v42 = vpack.c.bf16 %v897_v40, %v896_v34 }
 0x155   :  { %1105 = vst [vmem:[%s1780_s3 + $0x78] sm:$0xff] %v1205_v41  ;;  %1121 = vst [vmem:[%s1780_s3 + $0xf8] sm:$0xff] %v1221_v42 }

// kernel: decoder_layer.15
= control target key start
LH: loop header
LB: loop body
LE: loop exit
PB: predicated region body
PF: predicated region fallthrough
CT: control target
= control target key end

     0   :  { %12 = vsyncpa [#allocation5], 0  ;;  %s4348_s24 = smov 0   ;;  %s4350_s25 = smov 0   ;;  %s6245_s0 = inlined_call_operand.vmem [shape: f32[256,256], index: 0, kind: input, shape index: {}]   ;;  %s6246_s1 = inlined_call_operand.vmem [shape: bf16[256,1024], index: 1, kind: input, shape index: {}]   ;;  %s6247_s2 = inlined_call_operand.vmem [shape: f32[1,1024], index: 2, kind: input, shape index: {}]   ;;  %s6248_s3 = inlined_call_operand.vmem [shape: bf16[1024,256], index: 3, kind: input, shape index: {}]   ;;  %s6249_s4 = inlined_call_operand.vmem [shape: f32[1,256], index: 4, kind: input, shape index: {}]   ;;  %s6250_s5 = inlined_call_operand.vmem [shape: f32[1,256], index: 5, kind: input, shape index: {}]   ;;  %s6251_s6 = inlined_call_operand.vmem [shape: f32[1,256], index: 6, kind: input, shape index: {}]   ;;  %s6252_s7 = inlined_call_operand.hbm [shape: f32[256,256], index: 7, kind: output, shape index: {}]  }
   0x1   :  { %s4352_s26 = smov 0   ;;  %s4354_s27 = smov 0  }
   0x2   :  { %s4356_s28 = smov 0  }
   0x3 LB: > { %s3715_s29 = sadd.s32 4294967295, %s4302_s28   ;;  %s27_s30 = sadd.s32 1, %s4298_s27  ;;  %s4302_s28 = sphi %s4356_s28, %s18_s28   ;;  %s4298_s27 = sphi %s4354_s27, %s6376_s27   ;;  %s4294_s26 = sphi %s4352_s26, %s6375_s26   ;;  %s4290_s25 = sphi %s4350_s25, %s6374_s25   ;;  %s4286_s24 = sphi %s4348_s24, %s6373_s24  }
   0x4   : > { %p28_p0 = scmp.ge.s32.totalorder %s27_s30, 2  ;;  %p70_p1 = scmp.ne.s32.totalorder %s4290_s25, %s4286_s24 }
   0x5   : > { %p71_p2 = scmp.eq.s32.totalorder %s4302_s28, 0  ;;  %s63_s9 = sadd.s32 1, %s4290_s25 }
   0x6   : > { %s6378_s30 = smov (%p28_p0, %s27_s30), 0  ;;  %p3718_p5 = scmp.ge.s32.totalorder %s4302_s28, 2 }
   0x7   : > { %p72_p3 = por %p71_p2, %p70_p1  ;;  %s60_s8 = ssub.s32 %s4298_s27, %s6378_s30 }
   0x8   : > { %p61_p4 = scmp.eq.s32.totalorder %s60_s8, 0  ;;  %256 = sbr.rel (%p3718_p5) target bundleno = 51 (0x33), region = 32 }
   0xa   : > { %s4384_s10 = scalar_select %p61_p4, %s4290_s25, %s63_s9  }
   0xf   : > { %259 = sbr.rel (!%p72_p3) target bundleno = 51 (0x33), region = 36  ;;  %s261_s11 = sand.u32 (%p72_p3), 1, %s4290_s25  }
  0x10   : > { %s3862_s12 = sshll.u32 (%p72_p3), %s4298_s27, 4  ;;  %s3719_s13 = sshll.u32 (%p72_p3), %s261_s11, 9 }
  0x11   : > { %s4392_s16 = scalar_lea.vmem (%p72_p3), %s6246_s1, %s3862_s12  ;;  %s4397_s17 = scalar_lea.vmem (%p72_p3), [#allocation3], %s3719_s13 }
  0x12   : > { %v279_v0 = vld [vmem:[%s4392_s16] sm:$0xff] (%p72_p3)  ;;  %v281_v1 = vld [vmem:[%s4392_s16 + $0x8] sm:$0xff] (%p72_p3) }
  0x13   : > { %v283_v2 = vld [vmem:[%s4392_s16 + $0x20] sm:$0xff] (%p72_p3)  ;;  %280 = vst [vmem:[%s4397_s17] sm:$0xff] (%p72_p3), %v279_v0  ;;  %282 = vst [vmem:[%s4397_s17 + $0x8] sm:$0xff] (%p72_p3), %v281_v1  ;;  %v285_v3 = vld [vmem:[%s4392_s16 + $0x28] sm:$0xff] (%p72_p3) }
  0x14   : > { %284 = vst [vmem:[%s4397_s17 + $0x10] sm:$0xff] (%p72_p3), %v283_v2  ;;  %v287_v4 = vld [vmem:[%s4392_s16 + $0x40] sm:$0xff] (%p72_p3)  ;;  %v289_v5 = vld [vmem:[%s4392_s16 + $0x48] sm:$0xff] (%p72_p3)  ;;  %286 = vst [vmem:[%s4397_s17 + $0x18] sm:$0xff] (%p72_p3), %v285_v3 }
  0x15   : > { %288 = vst [vmem:[%s4397_s17 + $0x20] sm:$0xff] (%p72_p3), %v287_v4  ;;  %290 = vst [vmem:[%s4397_s17 + $0x28] sm:$0xff] (%p72_p3), %v289_v5  ;;  %v291_v6 = vld [vmem:[%s4392_s16 + $0x60] sm:$0xff] (%p72_p3)  ;;  %v293_v7 = vld [vmem:[%s4392_s16 + $0x68] sm:$0xff] (%p72_p3) }
  0x16   : > { %v295_v8 = vld [vmem:[%s4392_s16 + $0x80] sm:$0xff]  ;;  %292 = vst [vmem:[%s4397_s17 + $0x30] sm:$0xff] %v291_v6  ;;  %294 = vst [vmem:[%s4397_s17 + $0x38] sm:$0xff] %v293_v7  ;;  %v297_v9 = vld [vmem:[%s4392_s16 + $0x88] sm:$0xff] }
  0x17   : > { %296 = vst [vmem:[%s4397_s17 + $0x40] sm:$0xff] %v295_v8  ;;  %v299_v10 = vld [vmem:[%s4392_s16 + $0xa0] sm:$0xff]  ;;  %v301_v11 = vld [vmem:[%s4392_s16 + $0xa8] sm:$0xff]  ;;  %298 = vst [vmem:[%s4397_s17 + $0x48] sm:$0xff] %v297_v9 }
  0x18   : > { %300 = vst [vmem:[%s4397_s17 + $0x50] sm:$0xff] %v299_v10  ;;  %302 = vst [vmem:[%s4397_s17 + $0x58] sm:$0xff] %v301_v11  ;;  %v303_v12 = vld [vmem:[%s4392_s16 + $0xc0] sm:$0xff]  ;;  %v305_v13 = vld [vmem:[%s4392_s16 + $0xc8] sm:$0xff] }
  0x19   : > { %v307_v14 = vld [vmem:[%s4392_s16 + $0xe0] sm:$0xff]  ;;  %304 = vst [vmem:[%s4397_s17 + $0x60] sm:$0xff] %v303_v12  ;;  %306 = vst [vmem:[%s4397_s17 + $0x68] sm:$0xff] %v305_v13  ;;  %v309_v15 = vld [vmem:[%s4392_s16 + $0xe8] sm:$0xff] }
  0x1a   : > { %308 = vst [vmem:[%s4397_s17 + $0x70] sm:$0xff] %v307_v14  ;;  %v311_v16 = vld [vmem:[%s4392_s16 + $0x100] sm:$0xff]  ;;  %v313_v17 = vld [vmem:[%s4392_s16 + $0x108] sm:$0xff]  ;;  %310 = vst [vmem:[%s4397_s17 + $0x78] sm:$0xff] %v309_v15 }
  0x1b   : > { %312 = vst [vmem:[%s4397_s17 + $0x80] sm:$0xff] %v311_v16  ;;  %314 = vst [vmem:[%s4397_s17 + $0x88] sm:$0xff] %v313_v17  ;;  %v315_v18 = vld [vmem:[%s4392_s16 + $0x120] sm:$0xff]  ;;  %v317_v19 = vld [vmem:[%s4392_s16 + $0x128] sm:$0xff] }
  0x1c   : > { %v319_v20 = vld [vmem:[%s4392_s16 + $0x140] sm:$0xff]  ;;  %316 = vst [vmem:[%s4397_s17 + $0x90] sm:$0xff] %v315_v18  ;;  %318 = vst [vmem:[%s4397_s17 + $0x98] sm:$0xff] %v317_v19  ;;  %v321_v21 = vld [vmem:[%s4392_s16 + $0x148] sm:$0xff] }
  0x1d   : > { %320 = vst [vmem:[%s4397_s17 + $0xa0] sm:$0xff] %v319_v20  ;;  %v323_v22 = vld [vmem:[%s4392_s16 + $0x160] sm:$0xff]  ;;  %v325_v23 = vld [vmem:[%s4392_s16 + $0x168] sm:$0xff]  ;;  %322 = vst [vmem:[%s4397_s17 + $0xa8] sm:$0xff] %v321_v21 }
  0x1e   : > { %324 = vst [vmem:[%s4397_s17 + $0xb0] sm:$0xff] %v323_v22  ;;  %326 = vst [vmem:[%s4397_s17 + $0xb8] sm:$0xff] %v325_v23  ;;  %v327_v24 = vld [vmem:[%s4392_s16 + $0x180] sm:$0xff]  ;;  %v329_v25 = vld [vmem:[%s4392_s16 + $0x188] sm:$0xff] }
  0x1f   : > { %v331_v26 = vld [vmem:[%s4392_s16 + $0x1a0] sm:$0xff]  ;;  %328 = vst [vmem:[%s4397_s17 + $0xc0] sm:$0xff] %v327_v24  ;;  %330 = vst [vmem:[%s4397_s17 + $0xc8] sm:$0xff] %v329_v25  ;;  %v333_v27 = vld [vmem:[%s4392_s16 + $0x1a8] sm:$0xff] }
  0x20   : > { %332 = vst [vmem:[%s4397_s17 + $0xd0] sm:$0xff] %v331_v26  ;;  %v335_v28 = vld [vmem:[%s4392_s16 + $0x1c0] sm:$0xff]  ;;  %v337_v29 = vld [vmem:[%s4392_s16 + $0x1c8] sm:$0xff]  ;;  %334 = vst [vmem:[%s4397_s17 + $0xd8] sm:$0xff] %v333_v27 }
  0x21   : > { %336 = vst [vmem:[%s4397_s17 + $0xe0] sm:$0xff] %v335_v28  ;;  %338 = vst [vmem:[%s4397_s17 + $0xe8] sm:$0xff] %v337_v29  ;;  %v339_v30 = vld [vmem:[%s4392_s16 + $0x1e0] sm:$0xff]  ;;  %v341_v31 = vld [vmem:[%s4392_s16 + $0x1e8] sm:$0xff] }
  0x22   : > { %v343_v32 = vld [vmem:[%s4392_s16 + $0x200] sm:$0xff]  ;;  %340 = vst [vmem:[%s4397_s17 + $0xf0] sm:$0xff] %v339_v30  ;;  %342 = vst [vmem:[%s4397_s17 + $0xf8] sm:$0xff] %v341_v31  ;;  %v345_v33 = vld [vmem:[%s4392_s16 + $0x208] sm:$0xff] }
  0x23   : > { %344 = vst [vmem:[%s4397_s17 + $0x100] sm:$0xff] %v343_v32  ;;  %v347_v34 = vld [vmem:[%s4392_s16 + $0x220] sm:$0xff]  ;;  %v349_v35 = vld [vmem:[%s4392_s16 + $0x228] sm:$0xff]  ;;  %346 = vst [vmem:[%s4397_s17 + $0x108] sm:$0xff] %v345_v33 }
  0x24   : > { %348 = vst [vmem:[%s4397_s17 + $0x110] sm:$0xff] %v347_v34  ;;  %350 = vst [vmem:[%s4397_s17 + $0x118] sm:$0xff] %v349_v35  ;;  %v351_v36 = vld [vmem:[%s4392_s16 + $0x240] sm:$0xff]  ;;  %v353_v37 = vld [vmem:[%s4392_s16 + $0x248] sm:$0xff] }
  0x25   : > { %v355_v38 = vld [vmem:[%s4392_s16 + $0x260] sm:$0xff]  ;;  %352 = vst [vmem:[%s4397_s17 + $0x120] sm:$0xff] %v351_v36  ;;  %354 = vst [vmem:[%s4397_s17 + $0x128] sm:$0xff] %v353_v37  ;;  %v357_v39 = vld [vmem:[%s4392_s16 + $0x268] sm:$0xff] }
  0x26   : > { %356 = vst [vmem:[%s4397_s17 + $0x130] sm:$0xff] %v355_v38  ;;  %v359_v40 = vld [vmem:[%s4392_s16 + $0x280] sm:$0xff]  ;;  %v361_v41 = vld [vmem:[%s4392_s16 + $0x288] sm:$0xff]  ;;  %358 = vst [vmem:[%s4397_s17 + $0x138] sm:$0xff] %v357_v39 }
  0x27   : > { %360 = vst [vmem:[%s4397_s17 + $0x140] sm:$0xff] %v359_v40  ;;  %362 = vst [vmem:[%s4397_s17 + $0x148] sm:$0xff] %v361_v41  ;;  %v363_v42 = vld [vmem:[%s4392_s16 + $0x2a0] sm:$0xff]  ;;  %v365_v43 = vld [vmem:[%s4392_s16 + $0x2a8] sm:$0xff] }
  0x28   : > { %v367_v44 = vld [vmem:[%s4392_s16 + $0x2c0] sm:$0xff]  ;;  %364 = vst [vmem:[%s4397_s17 + $0x150] sm:$0xff] %v363_v42  ;;  %366 = vst [vmem:[%s4397_s17 + $0x158] sm:$0xff] %v365_v43  ;;  %v369_v45 = vld [vmem:[%s4392_s16 + $0x2c8] sm:$0xff] }
  0x29   : > { %368 = vst [vmem:[%s4397_s17 + $0x160] sm:$0xff] %v367_v44  ;;  %v371_v46 = vld [vmem:[%s4392_s16 + $0x2e0] sm:$0xff]  ;;  %v373_v47 = vld [vmem:[%s4392_s16 + $0x2e8] sm:$0xff]  ;;  %370 = vst [vmem:[%s4397_s17 + $0x168] sm:$0xff] %v369_v45 }
  0x2a   : > { %372 = vst [vmem:[%s4397_s17 + $0x170] sm:$0xff] %v371_v46  ;;  %374 = vst [vmem:[%s4397_s17 + $0x178] sm:$0xff] %v373_v47  ;;  %v375_v48 = vld [vmem:[%s4392_s16 + $0x300] sm:$0xff]  ;;  %v377_v49 = vld [vmem:[%s4392_s16 + $0x308] sm:$0xff] }
  0x2b   : > { %v379_v50 = vld [vmem:[%s4392_s16 + $0x320] sm:$0xff]  ;;  %376 = vst [vmem:[%s4397_s17 + $0x180] sm:$0xff] %v375_v48  ;;  %378 = vst [vmem:[%s4397_s17 + $0x188] sm:$0xff] %v377_v49  ;;  %v381_v51 = vld [vmem:[%s4392_s16 + $0x328] sm:$0xff] }
  0x2c   : > { %380 = vst [vmem:[%s4397_s17 + $0x190] sm:$0xff] %v379_v50  ;;  %v383_v52 = vld [vmem:[%s4392_s16 + $0x340] sm:$0xff]  ;;  %v385_v53 = vld [vmem:[%s4392_s16 + $0x348] sm:$0xff]  ;;  %382 = vst [vmem:[%s4397_s17 + $0x198] sm:$0xff] %v381_v51 }
  0x2d   : > { %384 = vst [vmem:[%s4397_s17 + $0x1a0] sm:$0xff] %v383_v52  ;;  %386 = vst [vmem:[%s4397_s17 + $0x1a8] sm:$0xff] %v385_v53  ;;  %v387_v54 = vld [vmem:[%s4392_s16 + $0x360] sm:$0xff]  ;;  %v389_v55 = vld [vmem:[%s4392_s16 + $0x368] sm:$0xff] }
  0x2e   : > { %v391_v56 = vld [vmem:[%s4392_s16 + $0x380] sm:$0xff]  ;;  %388 = vst [vmem:[%s4397_s17 + $0x1b0] sm:$0xff] %v387_v54  ;;  %390 = vst [vmem:[%s4397_s17 + $0x1b8] sm:$0xff] %v389_v55  ;;  %v393_v57 = vld [vmem:[%s4392_s16 + $0x388] sm:$0xff] }
  0x2f   : > { %392 = vst [vmem:[%s4397_s17 + $0x1c0] sm:$0xff] %v391_v56  ;;  %v395_v58 = vld [vmem:[%s4392_s16 + $0x3a0] sm:$0xff]  ;;  %v397_v59 = vld [vmem:[%s4392_s16 + $0x3a8] sm:$0xff]  ;;  %394 = vst [vmem:[%s4397_s17 + $0x1c8] sm:$0xff] %v393_v57 }
  0x30   : > { %396 = vst [vmem:[%s4397_s17 + $0x1d0] sm:$0xff] %v395_v58  ;;  %398 = vst [vmem:[%s4397_s17 + $0x1d8] sm:$0xff] %v397_v59  ;;  %v399_v60 = vld [vmem:[%s4392_s16 + $0x3c0] sm:$0xff]  ;;  %v401_v61 = vld [vmem:[%s4392_s16 + $0x3c8] sm:$0xff] }
  0x31   : > { %v403_v62 = vld [vmem:[%s4392_s16 + $0x3e0] sm:$0xff]  ;;  %400 = vst [vmem:[%s4397_s17 + $0x1e0] sm:$0xff] %v399_v60  ;;  %402 = vst [vmem:[%s4397_s17 + $0x1e8] sm:$0xff] %v401_v61  ;;  %v405_v63 = vld [vmem:[%s4392_s16 + $0x3e8] sm:$0xff] }
  0x32   : > { %404 = vst [vmem:[%s4397_s17 + $0x1f0] sm:$0xff] %v403_v62  ;;  %406 = vst [vmem:[%s4397_s17 + $0x1f8] sm:$0xff] %v405_v63 }
  0x33 PF: > { %p3722_p6 = scmp.ge.s32.totalorder %s4302_s28, 1  ;;  %p429_p7 = scmp.lt.s32.totalorder %s4302_s28, 3 }
  0x35   : > { %p430_p8 = pnand %p3722_p6, %p429_p7 }
  0x37   : > { %433 = sbr.rel (%p430_p8) target bundleno = 1277 (0x4fd), region = 67 }
  0x3e   : > { %s436_s18 = sand.u32 1, %s4286_s24   ;;  %s3724_s19 = sshll.u32 %s4294_s26, 2 }
  0x3f   : > { %s3723_s20 = sshll.u32 %s436_s18, 9  ;;  %p487_p9 = scmp.lt.s32.totalorder %s3724_s19, 7 }
  0x40   : > { %s3725_s21 = sshll.u32 %s4294_s26, 6  ;;  %s4540_s24 = scalar_lea.vmem [#allocation3], %s3723_s20 }
  0x41   : > { %s6380_s19 = smov (!%p487_p9, %s3724_s19), 7  ;;  %p492_p10 = scmp.lt.s32.totalorder %s3725_s21, 127 }
  0x42   : > { %s489_s8 = scalar_lea.vmem %s6247_s2, %s6380_s19  ;;  %p3728_p11 = scmp.ne.s32.totalorder %s4294_s26, 0 }
  0x43   : > { %s6382_s21 = smov (!%p492_p10, %s3725_s21), 127  ;;  %v4304_v0 = vmov (!%p3728_p11), 0.0  }
  0x44   : > { %s3863_s9 = sshll.u32 %s6382_s21, 3  ;;  %502 = sbr.rel (%p3728_p11) target bundleno = 100 (0x64), region = 75  ;;  %503 = vst [vmem:[#allocation2] sm:$0xff] (!%p3728_p11), %v4304_v0  ;;  %504 = vst [vmem:[#allocation2 + $0x8] sm:$0xff] (!%p3728_p11), %v4304_v0 }
  0x45   : > { %s4538_s13 = scalar_lea.vmem %s6248_s3, %s3863_s9  ;;  %505 = vst [vmem:[#allocation2 + $0x10] sm:$0xff] (!%p3728_p11), %v4304_v0  ;;  %506 = vst [vmem:[#allocation2 + $0x18] sm:$0xff] (!%p3728_p11), %v4304_v0 }
  0x46   : > { %507 = vst [vmem:[#allocation2 + $0x20] sm:$0xff] (!%p3728_p11), %v4304_v0  ;;  %508 = vst [vmem:[#allocation2 + $0x28] sm:$0xff] (!%p3728_p11), %v4304_v0 }
  0x47   : > { %509 = vst [vmem:[#allocation2 + $0x30] sm:$0xff] (!%p3728_p11), %v4304_v0  ;;  %510 = vst [vmem:[#allocation2 + $0x38] sm:$0xff] (!%p3728_p11), %v4304_v0 }
  0x48   : > { %511 = vst [vmem:[#allocation2 + $0x40] sm:$0xff] (!%p3728_p11), %v4304_v0  ;;  %512 = vst [vmem:[#allocation2 + $0x48] sm:$0xff] (!%p3728_p11), %v4304_v0 }
  0x49   : > { %513 = vst [vmem:[#allocation2 + $0x50] sm:$0xff] (!%p3728_p11), %v4304_v0  ;;  %514 = vst [vmem:[#allocation2 + $0x58] sm:$0xff] (!%p3728_p11), %v4304_v0 }
  0x4a   : > { %515 = vst [vmem:[#allocation2 + $0x60] sm:$0xff] (!%p3728_p11), %v4304_v0  ;;  %516 = vst [vmem:[#allocation2 + $0x68] sm:$0xff] (!%p3728_p11), %v4304_v0 }
  0x4b   : > { %517 = vst [vmem:[#allocation2 + $0x70] sm:$0xff] %v4304_v0  ;;  %518 = vst [vmem:[#allocation2 + $0x78] sm:$0xff] %v4304_v0 }
  0x4c   : > { %519 = vst [vmem:[#allocation2 + $0x80] sm:$0xff] %v4304_v0  ;;  %520 = vst [vmem:[#allocation2 + $0x88] sm:$0xff] %v4304_v0 }
  0x4d   : > { %521 = vst [vmem:[#allocation2 + $0x90] sm:$0xff] %v4304_v0  ;;  %522 = vst [vmem:[#allocation2 + $0x98] sm:$0xff] %v4304_v0 }
  0x4e   : > { %523 = vst [vmem:[#allocation2 + $0xa0] sm:$0xff] %v4304_v0  ;;  %524 = vst [vmem:[#allocation2 + $0xa8] sm:$0xff] %v4304_v0 }
  0x4f   : > { %525 = vst [vmem:[#allocation2 + $0xb0] sm:$0xff] %v4304_v0  ;;  %526 = vst [vmem:[#allocation2 + $0xb8] sm:$0xff] %v4304_v0 }
  0x50   : > { %527 = vst [vmem:[#allocation2 + $0xc0] sm:$0xff] %v4304_v0  ;;  %528 = vst [vmem:[#allocation2 + $0xc8] sm:$0xff] %v4304_v0 }
  0x51   : > { %529 = vst [vmem:[#allocation2 + $0xd0] sm:$0xff] %v4304_v0  ;;  %530 = vst [vmem:[#allocation2 + $0xd8] sm:$0xff] %v4304_v0 }
  0x52   : > { %531 = vst [vmem:[#allocation2 + $0xe0] sm:$0xff] %v4304_v0  ;;  %532 = vst [vmem:[#allocation2 + $0xe8] sm:$0xff] %v4304_v0 }
  0x53   : > { %533 = vst [vmem:[#allocation2 + $0xf0] sm:$0xff] %v4304_v0  ;;  %534 = vst [vmem:[#allocation2 + $0xf8] sm:$0xff] %v4304_v0 }
  0x54   : > { %535 = vst [vmem:[#allocation2 + $0x100] sm:$0xff] %v4304_v0  ;;  %536 = vst [vmem:[#allocation2 + $0x108] sm:$0xff] %v4304_v0 }
  0x55   : > { %537 = vst [vmem:[#allocation2 + $0x110] sm:$0xff] %v4304_v0  ;;  %538 = vst [vmem:[#allocation2 + $0x118] sm:$0xff] %v4304_v0 }
  0x56   : > { %539 = vst [vmem:[#allocation2 + $0x120] sm:$0xff] %v4304_v0  ;;  %540 = vst [vmem:[#allocation2 + $0x128] sm:$0xff] %v4304_v0 }
  0x57   : > { %541 = vst [vmem:[#allocation2 + $0x130] sm:$0xff] %v4304_v0  ;;  %542 = vst [vmem:[#allocation2 + $0x138] sm:$0xff] %v4304_v0 }
  0x58   : > { %543 = vst [vmem:[#allocation2 + $0x140] sm:$0xff] %v4304_v0  ;;  %544 = vst [vmem:[#allocation2 + $0x148] sm:$0xff] %v4304_v0 }
  0x59   : > { %545 = vst [vmem:[#allocation2 + $0x150] sm:$0xff] %v4304_v0  ;;  %546 = vst [vmem:[#allocation2 + $0x158] sm:$0xff] %v4304_v0 }
  0x5a   : > { %547 = vst [vmem:[#allocation2 + $0x160] sm:$0xff] %v4304_v0  ;;  %548 = vst [vmem:[#allocation2 + $0x168] sm:$0xff] %v4304_v0 }
  0x5b   : > { %549 = vst [vmem:[#allocation2 + $0x170] sm:$0xff] %v4304_v0  ;;  %550 = vst [vmem:[#allocation2 + $0x178] sm:$0xff] %v4304_v0 }
  0x5c   : > { %551 = vst [vmem:[#allocation2 + $0x180] sm:$0xff] %v4304_v0  ;;  %552 = vst [vmem:[#allocation2 + $0x188] sm:$0xff] %v4304_v0 }
  0x5d   : > { %553 = vst [vmem:[#allocation2 + $0x190] sm:$0xff] %v4304_v0  ;;  %554 = vst [vmem:[#allocation2 + $0x198] sm:$0xff] %v4304_v0 }
  0x5e   : > { %555 = vst [vmem:[#allocation2 + $0x1a0] sm:$0xff] %v4304_v0  ;;  %556 = vst [vmem:[#allocation2 + $0x1a8] sm:$0xff] %v4304_v0 }
  0x5f   : > { %557 = vst [vmem:[#allocation2 + $0x1b0] sm:$0xff] %v4304_v0  ;;  %558 = vst [vmem:[#allocation2 + $0x1b8] sm:$0xff] %v4304_v0 }
  0x60   : > { %559 = vst [vmem:[#allocation2 + $0x1c0] sm:$0xff] %v4304_v0  ;;  %560 = vst [vmem:[#allocation2 + $0x1c8] sm:$0xff] %v4304_v0 }
  0x61   : > { %561 = vst [vmem:[#allocation2 + $0x1d0] sm:$0xff] %v4304_v0  ;;  %562 = vst [vmem:[#allocation2 + $0x1d8] sm:$0xff] %v4304_v0 }
  0x62   : > { %563 = vst [vmem:[#allocation2 + $0x1e0] sm:$0xff] %v4304_v0  ;;  %564 = vst [vmem:[#allocation2 + $0x1e8] sm:$0xff] %v4304_v0 }
  0x63   : > { %565 = vst [vmem:[#allocation2 + $0x1f0] sm:$0xff] %v4304_v0  ;;  %566 = vst [vmem:[#allocation2 + $0x1f8] sm:$0xff] %v4304_v0 }
  0x64 PF: > { %v3978_v1 = vld [vmem:[%s4540_s24 + $0x4] ss:$16 sps:$4 sm:$0xff]   ;;  %v3980_v2 = vld [vmem:[%s4540_s24] ss:$16 sps:$4 sm:$0xff]   ;;  %v568_v14 = vld [vmem:[%s6245_s0 + $0x8] sm:$0xff]  ;;  %p3857_p12 = scmp.ne.s32.totalorder %s4294_s26, 1 }
  0x65   : > { %1069 = vmatprep.subr.bf16.mxu1 %v3978_v1  ;;  %v3981_v3 = vld [vmem:[%s4540_s24 + $0x24] ss:$16 sps:$4 sm:$0xff]   ;;  %v3983_v4 = vld [vmem:[%s4540_s24 + $0x20] ss:$16 sps:$4 sm:$0xff]   ;;  %v570_v15 = vld [vmem:[%s6245_s0 + $0x18] sm:$0xff] }
  0x66   : > { %1070 = vmatpush1.bf16.msra.mxu1 %v3980_v2  ;;  %v3984_v5 = vld [vmem:[%s4540_s24 + $0x44] ss:$16 sps:$4 sm:$0xff]   ;;  %v3986_v6 = vld [vmem:[%s4540_s24 + $0x40] ss:$16 sps:$4 sm:$0xff]   ;;  %v4626_v16 = vpack.c.bf16 %v570_v15, %v568_v14  ;;  %v4028_v38 = vld [vmem:[%s4540_s24 + $0xc] ss:$16 sps:$4 sm:$0xff]  }
  0x67   : > { %1071 = vmatprep.subr.bf16.mxu1 %v3981_v3  ;;  %v3987_v7 = vld [vmem:[%s4540_s24 + $0x64] ss:$16 sps:$4 sm:$0xff]   ;;  %v3989_v8 = vld [vmem:[%s4540_s24 + $0x60] ss:$16 sps:$4 sm:$0xff]   ;;  %v572_v39 = vld [vmem:[%s6245_s0 + $0x28] sm:$0xff] }
  0x68   : > { %v3990_v9 = vld [vmem:[%s4540_s24 + $0x84] ss:$16 sps:$4 sm:$0xff]   ;;  %v3992_v10 = vld [vmem:[%s4540_s24 + $0x80] ss:$16 sps:$4 sm:$0xff]   ;;  %1101 = vmatprep.mubr.bf16.mxu1 %v4626_v16  ;;  %v574_v40 = vld [vmem:[%s6245_s0 + $0x38] sm:$0xff] }
  0x69   : > { %v3993_v11 = vld [vmem:[%s4540_s24 + $0xa4] ss:$16 sps:$4 sm:$0xff]   ;;  %v3995_v12 = vld [vmem:[%s4540_s24 + $0xa0] ss:$16 sps:$4 sm:$0xff]   ;;  %v4026_v42 = vld [vmem:[%s4540_s24 + $0x8] ss:$16 sps:$4 sm:$0xff]   ;;  %v4664_v43 = vpack.c.bf16 %v574_v40, %v572_v39 }
  0x6a   : > { %1072 = vmatpush1.bf16.msra.mxu1 %v3983_v4  ;;  %v3996_v13 = vld [vmem:[%s4540_s24 + $0xc4] ss:$16 sps:$4 sm:$0xff]   ;;  %v3998_v17 = vld [vmem:[%s4540_s24 + $0xc0] ss:$16 sps:$4 sm:$0xff]   ;;  %v4031_v44 = vld [vmem:[%s4540_s24 + $0x2c] ss:$16 sps:$4 sm:$0xff]  }
  0x6b   : > { %1073 = vmatprep.subr.bf16.mxu1 %v3984_v5  ;;  %v3999_v18 = vld [vmem:[%s4540_s24 + $0xe4] ss:$16 sps:$4 sm:$0xff]   ;;  %v4001_v19 = vld [vmem:[%s4540_s24 + $0xe0] ss:$16 sps:$4 sm:$0xff]   ;;  %v4029_v47 = vld [vmem:[%s4540_s24 + $0x28] ss:$16 sps:$4 sm:$0xff]  }
  0x6c   : > { %v4002_v20 = vld [vmem:[%s4540_s24 + $0x104] ss:$16 sps:$4 sm:$0xff]   ;;  %v4004_v21 = vld [vmem:[%s4540_s24 + $0x100] ss:$16 sps:$4 sm:$0xff]   ;;  %v576_v48 = vld [vmem:[%s6245_s0 + $0x48] sm:$0xff] }
  0x6d   : > { %v4005_v22 = vld [vmem:[%s4540_s24 + $0x124] ss:$16 sps:$4 sm:$0xff]   ;;  %v4007_v23 = vld [vmem:[%s4540_s24 + $0x120] ss:$16 sps:$4 sm:$0xff]   ;;  %v578_v49 = vld [vmem:[%s6245_s0 + $0x58] sm:$0xff] }
  0x6e   : > { %1074 = vmatpush1.bf16.msra.mxu1 %v3986_v6  ;;  %v4008_v24 = vld [vmem:[%s4540_s24 + $0x144] ss:$16 sps:$4 sm:$0xff]   ;;  %v4010_v25 = vld [vmem:[%s4540_s24 + $0x140] ss:$16 sps:$4 sm:$0xff]   ;;  %v4034_v50 = vld [vmem:[%s4540_s24 + $0x4c] ss:$16 sps:$4 sm:$0xff]   ;;  %v4687_v54 = vpack.c.bf16 %v578_v49, %v576_v48 }
  0x6f   : > { %1075 = vmatprep.subr.bf16.mxu1 %v3987_v7  ;;  %v4011_v26 = vld [vmem:[%s4540_s24 + $0x164] ss:$16 sps:$4 sm:$0xff]   ;;  %v4013_v27 = vld [vmem:[%s4540_s24 + $0x160] ss:$16 sps:$4 sm:$0xff]   ;;  %v4032_v51 = vld [vmem:[%s4540_s24 + $0x48] ss:$16 sps:$4 sm:$0xff]  }
  0x70   : > { %v4014_v28 = vld [vmem:[%s4540_s24 + $0x184] ss:$16 sps:$4 sm:$0xff]   ;;  %v4016_v29 = vld [vmem:[%s4540_s24 + $0x180] ss:$16 sps:$4 sm:$0xff]   ;;  %v4037_v53 = vld [vmem:[%s4540_s24 + $0x6c] ss:$16 sps:$4 sm:$0xff]  }
  0x71   : > { %v4017_v30 = vld [vmem:[%s4540_s24 + $0x1a4] ss:$16 sps:$4 sm:$0xff]   ;;  %v4019_v31 = vld [vmem:[%s4540_s24 + $0x1a0] ss:$16 sps:$4 sm:$0xff]   ;;  %v4035_v57 = vld [vmem:[%s4540_s24 + $0x68] ss:$16 sps:$4 sm:$0xff]  }
  0x72   : > { %1076 = vmatpush1.bf16.msra.mxu1 %v3989_v8  ;;  %v4020_v32 = vld [vmem:[%s4540_s24 + $0x1c4] ss:$16 sps:$4 sm:$0xff]   ;;  %v4022_v33 = vld [vmem:[%s4540_s24 + $0x1c0] ss:$16 sps:$4 sm:$0xff]   ;;  %v580_v58 = vld [vmem:[%s6245_s0 + $0x68] sm:$0xff] }
  0x73   : > { %1077 = vmatprep.subr.bf16.mxu1 %v3990_v9  ;;  %v4023_v34 = vld [vmem:[%s4540_s24 + $0x1e4] ss:$16 sps:$4 sm:$0xff]   ;;  %v4025_v35 = vld [vmem:[%s4540_s24 + $0x1e0] ss:$16 sps:$4 sm:$0xff]   ;;  %v582_v59 = vld [vmem:[%s6245_s0 + $0x78] sm:$0xff] }
  0x74   : > { %v567_v36 = vld [vmem:[%s6245_s0] sm:$0xff]  ;;  %v569_v37 = vld [vmem:[%s6245_s0 + $0x10] sm:$0xff]  ;;  %v4040_v60 = vld [vmem:[%s4540_s24 + $0x8c] ss:$16 sps:$4 sm:$0xff]   ;;  %v4709_v0 = vpack.c.bf16 %v582_v59, %v580_v58 }
  0x75   : > { %v4661_v41 = vpack.c.bf16 %v569_v37, %v567_v36  ;;  %v571_v45 = vld [vmem:[%s6245_s0 + $0x20] sm:$0xff]  ;;  %v573_v46 = vld [vmem:[%s6245_s0 + $0x30] sm:$0xff]  ;;  %v4038_v61 = vld [vmem:[%s4540_s24 + $0x88] ss:$16 sps:$4 sm:$0xff]  }
  0x76   : > { %1078 = vmatpush1.bf16.msra.mxu1 %v3992_v10  ;;  %v4684_v52 = vpack.c.bf16 %v573_v46, %v571_v45  ;;  %v575_v55 = vld [vmem:[%s6245_s0 + $0x40] sm:$0xff]  ;;  %v577_v56 = vld [vmem:[%s6245_s0 + $0x50] sm:$0xff]  ;;  %v4043_v63 = vld [vmem:[%s4540_s24 + $0xac] ss:$16 sps:$4 sm:$0xff]  }
  0x77   : > { %1079 = vmatprep.subr.bf16.mxu1 %v3993_v11  ;;  %v4706_v62 = vpack.c.bf16 %v577_v56, %v575_v55  ;;  %v579_v1 = vld [vmem:[%s6245_s0 + $0x60] sm:$0xff]  ;;  %v581_v2 = vld [vmem:[%s6245_s0 + $0x70] sm:$0xff]  ;;  %v4041_v3 = vld [vmem:[%s4540_s24 + $0xa8] ss:$16 sps:$4 sm:$0xff]  }
  0x78   : > { %v584_v4 = vld [vmem:[%s6245_s0 + $0x88] sm:$0xff]  ;;  %v586_v5 = vld [vmem:[%s6245_s0 + $0x98] sm:$0xff]  ;;  %v4727_v7 = vpack.c.bf16 %v581_v2, %v579_v1  ;;  %v583_v11 = vld [vmem:[%s6245_s0 + $0x80] sm:$0xff] }
  0x79   : > { %v4046_v6 = vld [vmem:[%s4540_s24 + $0xcc] ss:$16 sps:$4 sm:$0xff]   ;;  %v4729_v8 = vpack.c.bf16 %v586_v5, %v584_v4  ;;  %v4044_v9 = vld [vmem:[%s4540_s24 + $0xc8] ss:$16 sps:$4 sm:$0xff]   ;;  %v595_v59 = vld [vmem:[%s6245_s0 + $0xe0] sm:$0xff] }
  0x7a   : > { %1080 = vmatpush1.bf16.msra.mxu1 %v3995_v12  ;;  %v4049_v10 = vld [vmem:[%s4540_s24 + $0xec] ss:$16 sps:$4 sm:$0xff]   ;;  %v4047_v14 = vld [vmem:[%s4540_s24 + $0xe8] ss:$16 sps:$4 sm:$0xff]  }
  0x7b   : > { %1081 = vmatprep.subr.bf16.mxu1 %v3996_v13  ;;  %v4074_v12 = vld [vmem:[%s4538_s13 + $0x4] ss:$8 sps:$4 sm:$0xff]   ;;  %v585_v13 = vld [vmem:[%s6245_s0 + $0x90] sm:$0xff]  ;;  %v4076_v15 = vld [vmem:[%s4538_s13] ss:$8 sps:$4 sm:$0xff]  }
  0x7c   : > { %2095 = vmatprep.subr.bf16.mxu0 %v4074_v12  ;;  %v4056_v36 = vld [vmem:[%s4540_s24 + $0x148] ss:$16 sps:$4 sm:$0xff]   ;;  %v4061_v37 = vld [vmem:[%s4540_s24 + $0x16c] ss:$16 sps:$4 sm:$0xff]  }
  0x7d   : > { %2096 = vmatpush1.bf16.msra.mxu0 %v4076_v15  ;;  %v4085_v39 = vld [vmem:[%s4538_s13 + $0x30] ss:$8 sps:$4 sm:$0xff]   ;;  %v4086_v40 = vld [vmem:[%s4538_s13 + $0x44] ss:$8 sps:$4 sm:$0xff]   ;;  %v4088_v49 = vld [vmem:[%s4538_s13 + $0x40] ss:$8 sps:$4 sm:$0xff]  }
  0x7e   : > { %1082 = vmatpush1.bf16.msra.mxu1 %v3998_v17  ;;  %v588_v17 = vld [vmem:[%s6245_s0 + $0xa8] sm:$0xff]  ;;  %v4089_v56 = vld [vmem:[%s4538_s13 + $0x54] ss:$8 sps:$4 sm:$0xff]  }
  0x7f   : > { %1083 = vmatprep.subr.bf16.mxu1 %v3999_v18  ;;  %v590_v18 = vld [vmem:[%s6245_s0 + $0xb8] sm:$0xff]  ;;  %v596_v46 = vld [vmem:[%s6245_s0 + $0xe8] sm:$0xff] }
  0x80   : > { %v4059_v45 = vld [vmem:[%s4540_s24 + $0x168] ss:$16 sps:$4 sm:$0xff]   ;;  %v4064_v48 = vld [vmem:[%s4540_s24 + $0x18c] ss:$16 sps:$4 sm:$0xff]  }
  0x81   : > { %v4067_v55 = vld [vmem:[%s4540_s24 + $0x1ac] ss:$16 sps:$4 sm:$0xff]   ;;  %v4071_v15 = vld [vmem:[%s4540_s24 + $0x1e8] ss:$16 sps:$4 sm:$0xff]  }
  0x82   : > { %1084 = vmatpush1.bf16.msra.mxu1 %v4001_v19  ;;  %v4052_v19 = vld [vmem:[%s4540_s24 + $0x10c] ss:$16 sps:$4 sm:$0xff]  }
  0x83   : > { %1085 = vmatprep.subr.bf16.mxu1 %v4002_v20  ;;  %v4751_v20 = vpack.c.bf16 %v585_v13, %v583_v11  ;;  %v4092_v58 = vld [vmem:[%s4538_s13 + $0x64] ss:$8 sps:$4 sm:$0xff]   ;;  %v602_v1 = vld [vmem:[%s6245_s0 + $0x118] sm:$0xff] }
  0x84   : > { %v4070_v2 = vld [vmem:[%s4540_s24 + $0x1cc] ss:$16 sps:$4 sm:$0xff]   ;;  %v4097_v11 = vld [vmem:[%s4538_s13 + $0x70] ss:$8 sps:$4 sm:$0xff]   ;;  %v599_v13 = vld [vmem:[%s6245_s0 + $0x100] sm:$0xff] }
  0x85   : > { %v4098_v12 = vld [vmem:[%s4538_s13 + $0x84] ss:$8 sps:$4 sm:$0xff]  }
  0x86   : > { %1086 = vmatpush1.bf16.msra.mxu1 %v4004_v21  ;;  %v4753_v21 = vpack.c.bf16 %v590_v18, %v588_v17  ;;  %v604_v17 = vld [vmem:[%s6245_s0 + $0x128] sm:$0xff]  ;;  %v606_v18 = vld [vmem:[%s6245_s0 + $0x138] sm:$0xff] }
  0x87   : > { %1087 = vmatprep.subr.bf16.mxu1 %v4005_v22  ;;  %v4050_v22 = vld [vmem:[%s4540_s24 + $0x108] ss:$16 sps:$4 sm:$0xff]  }
  0x8a   : > { %1088 = vmatpush1.bf16.msra.mxu1 %v4007_v23  ;;  %v4055_v23 = vld [vmem:[%s4540_s24 + $0x12c] ss:$16 sps:$4 sm:$0xff]  }
  0x8b   : > { %1089 = vmatprep.subr.bf16.mxu1 %v4008_v24  ;;  %v4077_v24 = vld [vmem:[%s4538_s13 + $0x14] ss:$8 sps:$4 sm:$0xff]  }
  0x8c   : > { %2097 = vmatprep.subr.bf16.mxu0 %v4077_v24  ;;  %v4101_v24 = vld [vmem:[%s4538_s13 + $0x94] ss:$8 sps:$4 sm:$0xff]  }
  0x8e   : > { %1090 = vmatpush1.bf16.msra.mxu1 %v4010_v25  ;;  %v4079_v25 = vld [vmem:[%s4538_s13 + $0x10] ss:$8 sps:$4 sm:$0xff]  }
  0x8f   : > { %1091 = vmatprep.subr.bf16.mxu1 %v4011_v26  ;;  %v4080_v26 = vld [vmem:[%s4538_s13 + $0x24] ss:$8 sps:$4 sm:$0xff]   ;;  %2098 = vmatpush1.bf16.msra.mxu0 %v4079_v25  ;;  %v4103_v25 = vld [vmem:[%s4538_s13 + $0x90] ss:$8 sps:$4 sm:$0xff]  }
  0x90   : > { %2099 = vmatprep.subr.bf16.mxu0 %v4080_v26  ;;  %v4104_v26 = vld [vmem:[%s4538_s13 + $0xa4] ss:$8 sps:$4 sm:$0xff]  }
  0x92   : > { %1092 = vmatpush1.bf16.msra.mxu1 %v4013_v27  ;;  %v587_v27 = vld [vmem:[%s6245_s0 + $0xa0] sm:$0xff] }
  0x93   : > { %1093 = vmatprep.subr.bf16.mxu1 %v4014_v28  ;;  %v589_v28 = vld [vmem:[%s6245_s0 + $0xb0] sm:$0xff] }
  0x96   : > { %1094 = vmatpush1.bf16.msra.mxu1 %v4016_v29  ;;  %v4053_v29 = vld [vmem:[%s4540_s24 + $0x128] ss:$16 sps:$4 sm:$0xff]  }
  0x97   : > { %1095 = vmatprep.subr.bf16.mxu1 %v4017_v30  ;;  %v592_v30 = vld [vmem:[%s6245_s0 + $0xc8] sm:$0xff] }
  0x9a   : > { %1096 = vmatpush1.bf16.msra.mxu1 %v4019_v31  ;;  %v594_v31 = vld [vmem:[%s6245_s0 + $0xd8] sm:$0xff] }
  0x9b   : > { %1097 = vmatprep.subr.bf16.mxu1 %v4020_v32  ;;  %v4058_v32 = vld [vmem:[%s4540_s24 + $0x14c] ss:$16 sps:$4 sm:$0xff]  }
  0x9e   : > { %1098 = vmatpush1.bf16.msra.mxu1 %v4022_v33  ;;  %v4082_v33 = vld [vmem:[%s4538_s13 + $0x20] ss:$8 sps:$4 sm:$0xff]  }
  0x9f   : > { %1099 = vmatprep.subr.bf16.mxu1 %v4023_v34  ;;  %v4777_v34 = vpack.c.bf16 %v589_v28, %v587_v27  ;;  %2100 = vmatpush1.bf16.msra.mxu0 %v4082_v33  ;;  %v603_v27 = vld [vmem:[%s6245_s0 + $0x120] sm:$0xff]  ;;  %v605_v28 = vld [vmem:[%s6245_s0 + $0x130] sm:$0xff] }
  0xa2   : > { %1100 = vmatpush1.bf16.msra.mxu1 %v4025_v35  ;;  %v4779_v35 = vpack.c.bf16 %v594_v31, %v592_v30  ;;  %v610_v30 = vld [vmem:[%s6245_s0 + $0x158] sm:$0xff]  ;;  %v4106_v31 = vld [vmem:[%s4538_s13 + $0xa0] ss:$8 sps:$4 sm:$0xff]  }
  0xa3   : > { %1262 = vmatprep.subr.bf16.mxu1 %v4028_v38  ;;  %v4083_v38 = vld [vmem:[%s4538_s13 + $0x34] ss:$8 sps:$4 sm:$0xff]  }
  0xa4   : > { %2101 = vmatprep.subr.bf16.mxu0 %v4083_v38  ;;  %v4110_v38 = vld [vmem:[%s4538_s13 + $0xc4] ss:$8 sps:$4 sm:$0xff]  }
  0xa5   : > { %1102 = vmatmul.mubr.bf16.vlgmr.msra.gmra.mrb[0].mxu1 %v4661_v41  ;;  %2102 = vmatpush1.bf16.msra.mxu0 %v4085_v39  ;;  %v607_v39 = vld [vmem:[%s6245_s0 + $0x140] sm:$0xff] }
  0xa6   : > { %1263 = vmatpush1.bf16.msra.mxu1 %v4026_v42  ;;  %1111 = vmatprep.mubr.bf16.mxu1 %v4664_v43  ;;  %v591_v42 = vld [vmem:[%s6245_s0 + $0xc0] sm:$0xff] }
  0xa7   : > { %1264 = vmatprep.subr.bf16.mxu1 %v4031_v44  ;;  %v593_v44 = vld [vmem:[%s6245_s0 + $0xd0] sm:$0xff]  ;;  %2103 = vmatprep.subr.bf16.mxu0 %v4086_v40 }
  0xa8   : > { %v609_v40 = vld [vmem:[%s6245_s0 + $0x150] sm:$0xff] }
  0xa9   : > { %2104 = vmatpush1.bf16.msra.mxu0 %v4088_v49  ;;  %v611_v49 = vld [vmem:[%s6245_s0 + $0x160] sm:$0xff] }
  0xaa   : > { %1265 = vmatpush1.bf16.msra.mxu1 %v4029_v47  ;;  %v598_v47 = vld [vmem:[%s6245_s0 + $0xf8] sm:$0xff]  ;;  %2105 = vmatprep.subr.bf16.mxu0 %v4089_v56  ;;  %v616_v56 = vld [vmem:[%s6245_s0 + $0x188] sm:$0xff] }
  0xab   : > { %1266 = vmatprep.subr.bf16.mxu1 %v4034_v50  ;;  %v4803_v50 = vpack.c.bf16 %v593_v44, %v591_v42  ;;  %v612_v42 = vld [vmem:[%s6245_s0 + $0x168] sm:$0xff]  ;;  %v614_v44 = vld [vmem:[%s6245_s0 + $0x178] sm:$0xff] }
  0xad   : > { %1112 = vmatmul.mubr.bf16.gmra.mrb[4].mxu1 %v4684_v52 }
  0xae   : > { %1121 = vmatprep.mubr.bf16.mxu1 %v4687_v54  ;;  %1267 = vmatpush1.bf16.msra.mxu1 %v4032_v51  ;;  %v4805_v51 = vpack.c.bf16 %v598_v47, %v596_v46  ;;  %v4898_v46 = vpack.c.bf16 %v609_v40, %v607_v39  ;;  %v4900_v47 = vpack.c.bf16 %v614_v44, %v612_v42  ;;  %v4127_v42 = vld [vmem:[%s4538_s13 + $0x114] ss:$8 sps:$4 sm:$0xff]  }
  0xaf   : > { %1268 = vmatprep.subr.bf16.mxu1 %v4037_v53  ;;  %v4062_v53 = vld [vmem:[%s4540_s24 + $0x188] ss:$16 sps:$4 sm:$0xff]  }
  0xb2   : > { %1269 = vmatpush1.bf16.msra.mxu1 %v4035_v57  ;;  %v4091_v57 = vld [vmem:[%s4538_s13 + $0x50] ss:$8 sps:$4 sm:$0xff]  }
  0xb3   : > { %1270 = vmatprep.subr.bf16.mxu1 %v4040_v60  ;;  %v597_v60 = vld [vmem:[%s6245_s0 + $0xf0] sm:$0xff]  ;;  %2106 = vmatpush1.bf16.msra.mxu0 %v4091_v57  ;;  %v618_v57 = vld [vmem:[%s6245_s0 + $0x198] sm:$0xff] }
  0xb4   : > { %v4829_v4 = vpack.c.bf16 %v597_v60, %v595_v59  ;;  %2107 = vmatprep.subr.bf16.mxu0 %v4092_v58  ;;  %v4116_v59 = vld [vmem:[%s4538_s13 + $0xe4] ss:$8 sps:$4 sm:$0xff]   ;;  %v4921_v60 = vpack.c.bf16 %v618_v57, %v616_v56 }
  0xb5   : > { %1122 = vmatmul.mubr.bf16.gmra.mrb[8].mxu1 %v4706_v62  ;;  %v4130_v56 = vld [vmem:[%s4538_s13 + $0x124] ss:$8 sps:$4 sm:$0xff]  }
  0xb6   : > { %1131 = vmatprep.mubr.bf16.mxu1 %v4709_v0  ;;  %1271 = vmatpush1.bf16.msra.mxu1 %v4038_v61  ;;  %v4065_v61 = vld [vmem:[%s4540_s24 + $0x1a8] ss:$16 sps:$4 sm:$0xff]  }
  0xb7   : > { %1272 = vmatprep.subr.bf16.mxu1 %v4043_v63  ;;  %v600_v63 = vld [vmem:[%s6245_s0 + $0x108] sm:$0xff] }
  0xb8   : > { %v4831_v5 = vpack.c.bf16 %v602_v1, %v600_v63  ;;  %v4119_v63 = vld [vmem:[%s4538_s13 + $0xf4] ss:$8 sps:$4 sm:$0xff]   ;;  %v615_v1 = vld [vmem:[%s6245_s0 + $0x180] sm:$0xff] }
  0xba   : > { %1273 = vmatpush1.bf16.msra.mxu1 %v4041_v3  ;;  %v4094_v3 = vld [vmem:[%s4538_s13 + $0x60] ss:$8 sps:$4 sm:$0xff]  }
  0xbb   : > { %1274 = vmatprep.subr.bf16.mxu1 %v4046_v6  ;;  %v4068_v6 = vld [vmem:[%s4540_s24 + $0x1c8] ss:$16 sps:$4 sm:$0xff]   ;;  %2108 = vmatpush1.bf16.msra.mxu0 %v4094_v3 }
  0xbc   : > { %v4121_v3 = vld [vmem:[%s4538_s13 + $0xf0] ss:$8 sps:$4 sm:$0xff]  }
  0xbd   : > { %1132 = vmatmul.mubr.bf16.gmra.mrb[12].mxu1 %v4727_v7 }
  0xbe   : > { %1141 = vmatprep.mubr.bf16.mxu1 %v4729_v8  ;;  %1275 = vmatpush1.bf16.msra.mxu1 %v4044_v9  ;;  %v4073_v9 = vld [vmem:[%s4540_s24 + $0x1ec] ss:$16 sps:$4 sm:$0xff]  }
  0xbf   : > { %1276 = vmatprep.subr.bf16.mxu1 %v4049_v10  ;;  %v4095_v10 = vld [vmem:[%s4538_s13 + $0x74] ss:$8 sps:$4 sm:$0xff]  }
  0xc0   : > { %2109 = vmatprep.subr.bf16.mxu0 %v4095_v10 }
  0xc1   : > { %2110 = vmatpush1.bf16.msra.mxu0 %v4097_v11 }
  0xc2   : > { %1277 = vmatpush1.bf16.msra.mxu1 %v4047_v14  ;;  %v601_v14 = vld [vmem:[%s6245_s0 + $0x110] sm:$0xff]  ;;  %2111 = vmatprep.subr.bf16.mxu0 %v4098_v12  ;;  %v619_v12 = vld [vmem:[%s6245_s0 + $0x1a0] sm:$0xff] }
  0xc3   : > { %1278 = vmatprep.subr.bf16.mxu1 %v4052_v19  ;;  %v4100_v19 = vld [vmem:[%s4538_s13 + $0x80] ss:$8 sps:$4 sm:$0xff]  }
  0xc5   : > { %1142 = vmatmul.mubr.bf16.gmra.mrb[16].mxu1 %v4751_v20  ;;  %2112 = vmatpush1.bf16.msra.mxu0 %v4100_v19 }
  0xc6   : > { %1151 = vmatprep.mubr.bf16.mxu1 %v4753_v21  ;;  %1279 = vmatpush1.bf16.msra.mxu1 %v4050_v22  ;;  %v4854_v22 = vpack.c.bf16 %v601_v14, %v599_v13  ;;  %v621_v13 = vld [vmem:[%s6245_s0 + $0x1b0] sm:$0xff]  ;;  %v624_v14 = vld [vmem:[%s6245_s0 + $0x1c8] sm:$0xff] }
  0xc7   : > { %1280 = vmatprep.subr.bf16.mxu1 %v4055_v23  ;;  %v4856_v23 = vpack.c.bf16 %v606_v18, %v604_v17  ;;  %2113 = vmatprep.subr.bf16.mxu0 %v4101_v24  ;;  %v4124_v17 = vld [vmem:[%s4538_s13 + $0x104] ss:$8 sps:$4 sm:$0xff]   ;;  %v4959_v18 = vpack.c.bf16 %v621_v13, %v619_v12  ;;  %v4131_v13 = vld [vmem:[%s4538_s13 + $0x130] ss:$8 sps:$4 sm:$0xff]  }
  0xc8   : > { %v623_v24 = vld [vmem:[%s6245_s0 + $0x1c0] sm:$0xff] }
  0xc9   : > { %2114 = vmatpush1.bf16.msra.mxu0 %v4103_v25  ;;  %v625_v25 = vld [vmem:[%s6245_s0 + $0x1d0] sm:$0xff] }
  0xca   : > { %1281 = vmatpush1.bf16.msra.mxu1 %v4053_v29  ;;  %v608_v29 = vld [vmem:[%s6245_s0 + $0x148] sm:$0xff]  ;;  %2115 = vmatprep.subr.bf16.mxu0 %v4104_v26 }
  0xcb   : > { %1282 = vmatprep.subr.bf16.mxu1 %v4058_v32  ;;  %v4876_v32 = vpack.c.bf16 %v605_v28, %v603_v27  ;;  %v4878_v33 = vpack.c.bf16 %v610_v30, %v608_v29  ;;  %v628_v26 = vld [vmem:[%s6245_s0 + $0x1e8] sm:$0xff]  ;;  %v630_v27 = vld [vmem:[%s6245_s0 + $0x1f8] sm:$0xff]  ;;  %v4977_v28 = vpack.c.bf16 %v625_v25, %v623_v24  ;;  %v627_v30 = vld [vmem:[%s6245_s0 + $0x1e0] sm:$0xff] }
  0xcc   : > { %v4979_v29 = vpack.c.bf16 %v630_v27, %v628_v26 }
  0xcd   : > { %1152 = vmatmul.mubr.bf16.gmra.mrb[20].mxu1 %v4777_v34  ;;  %2116 = vmatpush1.bf16.msra.mxu0 %v4106_v31  ;;  %v629_v31 = vld [vmem:[%s6245_s0 + $0x1f0] sm:$0xff] }
  0xce   : > { %1161 = vmatprep.mubr.bf16.mxu1 %v4779_v35  ;;  %1283 = vmatpush1.bf16.msra.mxu1 %v4056_v36  ;;  %v4107_v36 = vld [vmem:[%s4538_s13 + $0xb4] ss:$8 sps:$4 sm:$0xff]  }
  0xcf   : > { %1284 = vmatprep.subr.bf16.mxu1 %v4061_v37  ;;  %v4109_v37 = vld [vmem:[%s4538_s13 + $0xb0] ss:$8 sps:$4 sm:$0xff]   ;;  %2117 = vmatprep.subr.bf16.mxu0 %v4107_v36  ;;  %v4989_v36 = vpack.c.bf16 %v629_v31, %v627_v30  ;;  %v4134_v31 = vld [vmem:[%s4538_s13 + $0x140] ss:$8 sps:$4 sm:$0xff]  }
  0xd1   : > { %2118 = vmatpush1.bf16.msra.mxu0 %v4109_v37 }
  0xd2   : > { %1285 = vmatpush1.bf16.msra.mxu1 %v4059_v45  ;;  %v4112_v45 = vld [vmem:[%s4538_s13 + $0xc0] ss:$8 sps:$4 sm:$0xff]   ;;  %2119 = vmatprep.subr.bf16.mxu0 %v4110_v38 }
  0xd3   : > { %1286 = vmatprep.subr.bf16.mxu1 %v4064_v48  ;;  %v4113_v48 = vld [vmem:[%s4538_s13 + $0xd4] ss:$8 sps:$4 sm:$0xff]   ;;  %v4122_v38 = vld [vmem:[%s4538_s13 + $0x100] ss:$8 sps:$4 sm:$0xff]  }
  0xd5   : > { %1162 = vmatmul.mubr.bf16.gmra.mrb[24].mxu1 %v4803_v50  ;;  %2120 = vmatpush1.bf16.msra.mxu0 %v4112_v45 }
  0xd6   : > { %1171 = vmatprep.mubr.bf16.mxu1 %v4805_v51  ;;  %1287 = vmatpush1.bf16.msra.mxu1 %v4062_v53  ;;  %v613_v53 = vld [vmem:[%s6245_s0 + $0x170] sm:$0xff] }
  0xd7   : > { %1288 = vmatprep.subr.bf16.mxu1 %v4067_v55  ;;  %v4115_v55 = vld [vmem:[%s4538_s13 + $0xd0] ss:$8 sps:$4 sm:$0xff]   ;;  %2121 = vmatprep.subr.bf16.mxu0 %v4113_v48  ;;  %v4918_v58 = vpack.c.bf16 %v613_v53, %v611_v49 }
  0xd8   : > { %v4125_v49 = vld [vmem:[%s4538_s13 + $0x110] ss:$8 sps:$4 sm:$0xff]  }
  0xd9   : > { %2122 = vmatpush1.bf16.msra.mxu0 %v4115_v55 }
  0xda   : > { %1289 = vmatpush1.bf16.msra.mxu1 %v4065_v61  ;;  %v4118_v61 = vld [vmem:[%s4538_s13 + $0xe0] ss:$8 sps:$4 sm:$0xff]   ;;  %2123 = vmatprep.subr.bf16.mxu0 %v4116_v59 }
  0xdb   : > { %1290 = vmatprep.subr.bf16.mxu1 %v4070_v2  ;;  %v617_v2 = vld [vmem:[%s6245_s0 + $0x190] sm:$0xff] }
  0xdc   : > { %v4940_v10 = vpack.c.bf16 %v617_v2, %v615_v1 }
  0xdd   : > { %1172 = vmatmul.mubr.bf16.gmra.mrb[28].mxu1 %v4829_v4  ;;  %2124 = vmatpush1.bf16.msra.mxu0 %v4118_v61 }
  0xde   : > { %1181 = vmatprep.mubr.bf16.mxu1 %v4831_v5  ;;  %1291 = vmatpush1.bf16.msra.mxu1 %v4068_v6  ;;  %v620_v6 = vld [vmem:[%s6245_s0 + $0x1a8] sm:$0xff] }
  0xdf   : > { %1292 = vmatprep.subr.bf16.mxu1 %v4073_v9  ;;  %v622_v9 = vld [vmem:[%s6245_s0 + $0x1b8] sm:$0xff]  ;;  %2125 = vmatprep.subr.bf16.mxu0 %v4119_v63  ;;  %v4128_v63 = vld [vmem:[%s4538_s13 + $0x120] ss:$8 sps:$4 sm:$0xff]  }
  0xe0   : > { %v4942_v11 = vpack.c.bf16 %v622_v9, %v620_v6 }
  0xe1   : > { %2126 = vmatpush1.bf16.msra.mxu0 %v4121_v3  ;;  %v4133_v3 = vld [vmem:[%s4538_s13 + $0x134] ss:$8 sps:$4 sm:$0xff]  }
  0xe2   : > { %1293 = vmatpush1.bf16.msra.mxu1 %v4071_v15  ;;  %v626_v15 = vld [vmem:[%s6245_s0 + $0x1d8] sm:$0xff]  ;;  %2288 = vmatprep.subr.bf16.mxu0 %v4124_v17  ;;  %v4136_v17 = vld [vmem:[%s4538_s13 + $0x144] ss:$8 sps:$4 sm:$0xff]  }
  0xe3   : > { %v4961_v19 = vpack.c.bf16 %v626_v15, %v624_v14 }
  0xe5   : > { %1182 = vmatmul.mubr.bf16.gmra.mrb[32].mxu1 %v4854_v22 }
  0xe6   : > { %1191 = vmatprep.mubr.bf16.mxu1 %v4856_v23 }
  0xed   : > { %1192 = vmatmul.mubr.bf16.gmra.mrb[36].mxu1 %v4876_v32 }
  0xee   : > { %1201 = vmatprep.mubr.bf16.mxu1 %v4878_v33 }
  0xf5   : > { %1202 = vmatmul.mubr.bf16.gmra.mrb[40].mxu1 %v4898_v46 }
  0xf6   : > { %1211 = vmatprep.mubr.bf16.mxu1 %v4900_v47 }
  0xfd   : > { %1212 = vmatmul.mubr.bf16.gmra.mrb[44].mxu1 %v4918_v58 }
  0xfe   : > { %1221 = vmatprep.mubr.bf16.mxu1 %v4921_v60 }
 0x105   : > { %1222 = vmatmul.mubr.bf16.gmra.mrb[48].mxu1 %v4940_v10 }
 0x106   : > { %1231 = vmatprep.mubr.bf16.mxu1 %v4942_v11 }
 0x10d   : > { %1232 = vmatmul.mubr.bf16.gmra.mrb[52].mxu1 %v4959_v18 }
 0x10e   : > { %1241 = vmatprep.mubr.bf16.mxu1 %v4961_v19 }
 0x115   : > { %1242 = vmatmul.mubr.bf16.gmra.mrb[56].mxu1 %v4977_v28 }
 0x116   : > { %1251 = vmatprep.mubr.bf16.mxu1 %v4979_v29 }
 0x11d   : > { %1252 = vmatmul.mubr.bf16.gmra.mrb[60].mxu1 %v4989_v36 }
 0x11e   : > { %1294 = vmatprep.mubr.bf16.mxu1 %v4626_v16  ;;  %v729_v16 = vlaneseq }
 0x125   : > { %1295 = vmatmul.mubr.bf16.vlgmr.msra.gmra.mrb[64].mxu1 %v4661_v41  ;;  %v5012_v41 = vshrl.u32 %v729_v16, 7 }
 0x126   : > { %1304 = vmatprep.mubr.bf16.mxu1 %v4664_v43 }
 0x127   : > { %v5016_v43 = vsub.s32 0, %v5012_v41 }
 0x129   : > { %6294 = vst [vmem:[#allocation7_spill] sm:$0xff] %v5016_v43 }
 0x12d   : > { %1305 = vmatmul.mubr.bf16.gmra.mrb[68].mxu1 %v4684_v52  ;;  %v5023_v52 = vld [vmem:[%s489_s8] sm:$0xf] }
 0x12e   : > { %1314 = vmatprep.mubr.bf16.mxu1 %v4687_v54  ;;  %v5026_v54 = vsub.s32 1, %v5012_v41 }
 0x130   : > { %6295 = vst [vmem:[#allocation8_spill] sm:$0xff] %v5026_v54 }
 0x135   : > { %1315 = vmatmul.mubr.bf16.gmra.mrb[72].mxu1 %v4706_v62  ;;  %v5031_v62 = vrot.slane %v5023_v52, %v5016_v43 }
 0x136   : > { %1324 = vmatprep.mubr.bf16.mxu1 %v4709_v0  ;;  %v5035_v0 = vrot.slane %v5023_v52, %v5026_v54 }
 0x13d   : > { %1325 = vmatmul.mubr.bf16.gmra.mrb[76].mxu1 %v4727_v7 }
 0x13e   : > { %1334 = vmatprep.mubr.bf16.mxu1 %v4729_v8 }
 0x145   : > { %1335 = vmatmul.mubr.bf16.gmra.mrb[80].mxu1 %v4751_v20 }
 0x146   : > { %1344 = vmatprep.mubr.bf16.mxu1 %v4753_v21 }
 0x14d   : > { %1345 = vmatmul.mubr.bf16.gmra.mrb[84].mxu1 %v4777_v34 }
 0x14e   : > { %1354 = vmatprep.mubr.bf16.mxu1 %v4779_v35 }
 0x155   : > { %1355 = vmatmul.mubr.bf16.gmra.mrb[88].mxu1 %v4803_v50 }
 0x156   : > { %1364 = vmatprep.mubr.bf16.mxu1 %v4805_v51 }
 0x15d   : > { %1365 = vmatmul.mubr.bf16.gmra.mrb[92].mxu1 %v4829_v4 }
 0x15e   : > { %1374 = vmatprep.mubr.bf16.mxu1 %v4831_v5 }
 0x165   : > { %1375 = vmatmul.mubr.bf16.gmra.mrb[96].mxu1 %v4854_v22 }
 0x166   : > { %1384 = vmatprep.mubr.bf16.mxu1 %v4856_v23 }
 0x16d   : > { %1385 = vmatmul.mubr.bf16.gmra.mrb[100].mxu1 %v4876_v32 }
 0x16e   : > { %1394 = vmatprep.mubr.bf16.mxu1 %v4878_v33 }
 0x175   : > { %1395 = vmatmul.mubr.bf16.gmra.mrb[104].mxu1 %v4898_v46 }
 0x176   : > { %1404 = vmatprep.mubr.bf16.mxu1 %v4900_v47 }
 0x178   : > { %v1103_v7 = vpop.f32.mrb[0].mxu1 }
 0x179   : > { %v1104_v8 = vadd.f32 %v1103_v7, %v5031_v62  ;;  %v1105_v20 = vpop.f32.mrb[1].mxu1 }
 0x17a   : > { %v1106_v21 = vadd.f32 %v1105_v20, %v5035_v0  ;;  %v1107_v34 = vpop.f32.mrb[2].mxu1 }
 0x17b   : > { %v1108_v35 = vadd.f32 %v1107_v34, %v5031_v62  ;;  %v1109_v50 = vpop.f32.mrb[3].mxu1  ;;  %v1455_v4 = vmax.f32 %v1104_v8, 0.0  ;;  %v4139_v8 = vld [vmem:[%s4538_s13 + $0x154] ss:$8 sps:$4 sm:$0xff]  }
 0x17c   : > { %v1110_v51 = vadd.f32 %v1109_v50, %v5035_v0  ;;  %v1456_v22 = vmax.f32 %v1106_v21, 0.0 }
 0x17d   : > { %v1459_v5 = vmax.f32 %v1108_v35, 0.0  ;;  %1405 = vmatmul.mubr.bf16.gmra.mrb[108].mxu1 %v4918_v58  ;;  %v4137_v35 = vld [vmem:[%s4538_s13 + $0x150] ss:$8 sps:$4 sm:$0xff]  }
 0x17e   : > { %v1460_v23 = vmax.f32 %v1110_v51, 0.0  ;;  %1414 = vmatprep.mubr.bf16.mxu1 %v4921_v60 }
 0x17f   : > { %v1647_v32 = vpack.c.bf16 %v1459_v5, %v1455_v4  ;;  %v4142_v4 = vld [vmem:[%s4538_s13 + $0x164] ss:$8 sps:$4 sm:$0xff]  }
 0x180   : > { %v1113_v33 = vpop.f32.mrb[4].mxu1  ;;  %v1648_v37 = vpack.c.bf16 %v1460_v23, %v1456_v22 }
 0x181   : > { %v1114_v39 = vadd.f32 %v1113_v33, %v5031_v62  ;;  %v1115_v40 = vpop.f32.mrb[5].mxu1 }
 0x182   : > { %v1116_v44 = vadd.f32 %v1115_v40, %v5035_v0  ;;  %v1117_v45 = vpop.f32.mrb[6].mxu1  ;;  %2127 = vmatprep.mubr.bf16.mxu0 %v1648_v37  ;;  %v4140_v37 = vld [vmem:[%s4538_s13 + $0x160] ss:$8 sps:$4 sm:$0xff]   ;;  %v4145_v40 = vld [vmem:[%s4538_s13 + $0x174] ss:$8 sps:$4 sm:$0xff]  }
 0x183   : > { %v1118_v46 = vadd.f32 %v1117_v45, %v5031_v62  ;;  %v1119_v47 = vpop.f32.mrb[7].mxu1  ;;  %2128 = vmatmul.mubr.bf16.vlgmr.msra.gmra.mrb[0].mxu0 %v1647_v32  ;;  %v1463_v53 = vmax.f32 %v1114_v39, 0.0 }
 0x184   : > { %v1120_v48 = vadd.f32 %v1119_v47, %v5035_v0  ;;  %2289 = vmatpush1.bf16.msra.mxu0 %v4122_v38  ;;  %v1464_v57 = vmax.f32 %v1116_v44, 0.0 }
 0x185   : > { %v1467_v55 = vmax.f32 %v1118_v46, 0.0  ;;  %1415 = vmatmul.mubr.bf16.gmra.mrb[112].mxu1 %v4940_v10  ;;  %2290 = vmatprep.subr.bf16.mxu0 %v4127_v42  ;;  %v4143_v46 = vld [vmem:[%s4538_s13 + $0x170] ss:$8 sps:$4 sm:$0xff]  }
 0x186   : > { %v1468_v58 = vmax.f32 %v1120_v48, 0.0  ;;  %1424 = vmatprep.mubr.bf16.mxu1 %v4942_v11 }
 0x187   : > { %v1651_v59 = vpack.c.bf16 %v1467_v55, %v1463_v53 }
 0x188   : > { %v1652_v60 = vpack.c.bf16 %v1468_v58, %v1464_v57  ;;  %v1123_v61 = vpop.f32.mrb[8].mxu1  ;;  %2291 = vmatpush1.bf16.msra.mxu0 %v4125_v49  ;;  %v4148_v49 = vld [vmem:[%s4538_s13 + $0x184] ss:$8 sps:$4 sm:$0xff]  }
 0x189   : > { %v1124_v1 = vadd.f32 %v1123_v61, %v5031_v62  ;;  %v1125_v2 = vpop.f32.mrb[9].mxu1  ;;  %2292 = vmatprep.subr.bf16.mxu0 %v4130_v56 }
 0x18a   : > { %v1126_v6 = vadd.f32 %v1125_v2, %v5035_v0  ;;  %v1127_v9 = vpop.f32.mrb[10].mxu1  ;;  %2137 = vmatprep.mubr.bf16.mxu0 %v1652_v60 }
 0x18b   : > { %v1128_v10 = vadd.f32 %v1127_v9, %v5031_v62  ;;  %v1129_v12 = vpop.f32.mrb[11].mxu1  ;;  %2138 = vmatmul.mubr.bf16.gmra.mrb[4].mxu0 %v1651_v59  ;;  %v1471_v14 = vmax.f32 %v1124_v1, 0.0  ;;  %v4146_v59 = vld [vmem:[%s4538_s13 + $0x180] ss:$8 sps:$4 sm:$0xff]   ;;  %v4149_v9 = vld [vmem:[%s4538_s13 + $0x190] ss:$8 sps:$4 sm:$0xff]  }
 0x18c   : > { %v1130_v11 = vadd.f32 %v1129_v12, %v5035_v0  ;;  %2293 = vmatpush1.bf16.msra.mxu0 %v4128_v63  ;;  %v1472_v24 = vmax.f32 %v1126_v6, 0.0  ;;  %v4151_v63 = vld [vmem:[%s4538_s13 + $0x194] ss:$8 sps:$4 sm:$0xff]  }
 0x18d   : > { %v1475_v15 = vmax.f32 %v1128_v10, 0.0  ;;  %1425 = vmatmul.mubr.bf16.gmra.mrb[116].mxu1 %v4959_v18  ;;  %2294 = vmatprep.subr.bf16.mxu0 %v4133_v3 }
 0x18e   : > { %v1476_v25 = vmax.f32 %v1130_v11, 0.0  ;;  %1434 = vmatprep.mubr.bf16.mxu1 %v4961_v19  ;;  %v4154_v11 = vld [vmem:[%s4538_s13 + $0x1a4] ss:$8 sps:$4 sm:$0xff]  }
 0x18f   : > { %v1655_v26 = vpack.c.bf16 %v1475_v15, %v1471_v14 }
 0x190   : > { %v1656_v27 = vpack.c.bf16 %v1476_v25, %v1472_v24  ;;  %v1133_v30 = vpop.f32.mrb[12].mxu1  ;;  %2295 = vmatpush1.bf16.msra.mxu0 %v4131_v13  ;;  %v4152_v25 = vld [vmem:[%s4538_s13 + $0x1a0] ss:$8 sps:$4 sm:$0xff]  }
 0x191   : > { %v1134_v16 = vadd.f32 %v1133_v30, %v5031_v62  ;;  %v1135_v7 = vpop.f32.mrb[13].mxu1  ;;  %2296 = vmatprep.subr.bf16.mxu0 %v4136_v17  ;;  %v4157_v30 = vld [vmem:[%s4538_s13 + $0x1b4] ss:$8 sps:$4 sm:$0xff]  }
 0x192   : > { %v1136_v18 = vadd.f32 %v1135_v7, %v5035_v0  ;;  %v1137_v20 = vpop.f32.mrb[14].mxu1  ;;  %2147 = vmatprep.mubr.bf16.mxu0 %v1656_v27 }
 0x193   : > { %v1138_v21 = vadd.f32 %v1137_v20, %v5031_v62  ;;  %v1139_v34 = vpop.f32.mrb[15].mxu1  ;;  %2148 = vmatmul.mubr.bf16.gmra.mrb[8].mxu0 %v1655_v26  ;;  %v1479_v50 = vmax.f32 %v1134_v16, 0.0  ;;  %v4155_v20 = vld [vmem:[%s4538_s13 + $0x1b0] ss:$8 sps:$4 sm:$0xff]  }
 0x194   : > { %v1140_v19 = vadd.f32 %v1139_v34, %v5035_v0  ;;  %2297 = vmatpush1.bf16.msra.mxu0 %v4134_v31  ;;  %v1480_v5 = vmax.f32 %v1136_v18, 0.0 }
 0x195   : > { %v1483_v51 = vmax.f32 %v1138_v21, 0.0  ;;  %1435 = vmatmul.mubr.bf16.gmra.mrb[120].mxu1 %v4977_v28  ;;  %2298 = vmatprep.subr.bf16.mxu0 %v4139_v8 }
 0x196   : > { %v1484_v22 = vmax.f32 %v1140_v19, 0.0  ;;  %1444 = vmatprep.mubr.bf16.mxu1 %v4979_v29  ;;  %v4160_v19 = vld [vmem:[%s4538_s13 + $0x1c4] ss:$8 sps:$4 sm:$0xff]  }
 0x197   : > { %v1659_v23 = vpack.c.bf16 %v1483_v51, %v1479_v50 }
 0x198   : > { %v1660_v32 = vpack.c.bf16 %v1484_v22, %v1480_v5  ;;  %v1143_v33 = vpop.f32.mrb[16].mxu1  ;;  %2299 = vmatpush1.bf16.msra.mxu0 %v4137_v35  ;;  %v4158_v22 = vld [vmem:[%s4538_s13 + $0x1c0] ss:$8 sps:$4 sm:$0xff]  }
 0x199   : > { %v1144_v38 = vadd.f32 %v1143_v33, %v5031_v62  ;;  %v1145_v39 = vpop.f32.mrb[17].mxu1  ;;  %2300 = vmatprep.subr.bf16.mxu0 %v4142_v4  ;;  %v4163_v33 = vld [vmem:[%s4538_s13 + $0x1d4] ss:$8 sps:$4 sm:$0xff]  }
 0x19a   : > { %v1146_v28 = vadd.f32 %v1145_v39, %v5035_v0  ;;  %v1147_v42 = vpop.f32.mrb[18].mxu1  ;;  %2157 = vmatprep.mubr.bf16.mxu0 %v1660_v32 }
 0x19b   : > { %v1148_v44 = vadd.f32 %v1147_v42, %v5031_v62  ;;  %v1149_v45 = vpop.f32.mrb[19].mxu1  ;;  %2158 = vmatmul.mubr.bf16.gmra.mrb[12].mxu0 %v1659_v23  ;;  %v1487_v47 = vmax.f32 %v1144_v38, 0.0  ;;  %v4161_v42 = vld [vmem:[%s4538_s13 + $0x1d0] ss:$8 sps:$4 sm:$0xff]  }
 0x19c   : > { %v1150_v29 = vadd.f32 %v1149_v45, %v5035_v0  ;;  %2301 = vmatpush1.bf16.msra.mxu0 %v4140_v37  ;;  %v1488_v53 = vmax.f32 %v1146_v28, 0.0 }
 0x19d   : > { %v1491_v48 = vmax.f32 %v1148_v44, 0.0  ;;  %1445 = vmatmul.mubr.bf16.gmra.mrb[124].mxu1 %v4989_v36  ;;  %2302 = vmatprep.subr.bf16.mxu0 %v4145_v40 }
 0x19e   : > { %v1492_v55 = vmax.f32 %v1150_v29, 0.0  ;;  %v4166_v29 = vld [vmem:[%s4538_s13 + $0x1e4] ss:$8 sps:$4 sm:$0xff]  }
 0x19f   : > { %v1663_v56 = vpack.c.bf16 %v1491_v48, %v1487_v47 }
 0x1a0   : > { %v1664_v57 = vpack.c.bf16 %v1492_v55, %v1488_v53  ;;  %v1153_v58 = vpop.f32.mrb[20].mxu1  ;;  %2303 = vmatpush1.bf16.msra.mxu0 %v4143_v46  ;;  %v4164_v55 = vld [vmem:[%s4538_s13 + $0x1e0] ss:$8 sps:$4 sm:$0xff]  }
 0x1a1   : > { %v1154_v60 = vadd.f32 %v1153_v58, %v5031_v62  ;;  %v1155_v61 = vpop.f32.mrb[21].mxu1  ;;  %2304 = vmatprep.subr.bf16.mxu0 %v4148_v49  ;;  %v4169_v58 = vld [vmem:[%s4538_s13 + $0x1f4] ss:$8 sps:$4 sm:$0xff]  }
 0x1a2   : > { %v1156_v1 = vadd.f32 %v1155_v61, %v5035_v0  ;;  %v1157_v2 = vpop.f32.mrb[22].mxu1  ;;  %2167 = vmatprep.mubr.bf16.mxu0 %v1664_v57 }
 0x1a3   : > { %v1158_v36 = vadd.f32 %v1157_v2, %v5031_v62  ;;  %v1159_v3 = vpop.f32.mrb[23].mxu1  ;;  %2168 = vmatmul.mubr.bf16.gmra.mrb[16].mxu0 %v1663_v56  ;;  %v1495_v10 = vmax.f32 %v1154_v60, 0.0  ;;  %v4167_v2 = vld [vmem:[%s4538_s13 + $0x1f0] ss:$8 sps:$4 sm:$0xff]  }
 0x1a4   : > { %v1160_v6 = vadd.f32 %v1159_v3, %v5035_v0  ;;  %2305 = vmatpush1.bf16.msra.mxu0 %v4146_v59  ;;  %v1496_v13 = vmax.f32 %v1156_v1, 0.0 }
 0x1a5   : > { %v1499_v12 = vmax.f32 %v1158_v36, 0.0  ;;  %2306 = vmatprep.subr.bf16.mxu0 %v4151_v63 }
 0x1a6   : > { %v1500_v14 = vmax.f32 %v1160_v6, 0.0 }
 0x1a7   : > { %v1667_v15 = vpack.c.bf16 %v1499_v12, %v1495_v10 }
 0x1a8   : > { %v1668_v17 = vpack.c.bf16 %v1500_v14, %v1496_v13  ;;  %v1163_v24 = vpop.f32.mrb[24].mxu1  ;;  %2307 = vmatpush1.bf16.msra.mxu0 %v4149_v9 }
 0x1a9   : > { %v1164_v26 = vadd.f32 %v1163_v24, %v5031_v62  ;;  %v1165_v27 = vpop.f32.mrb[25].mxu1  ;;  %2308 = vmatprep.subr.bf16.mxu0 %v4154_v11 }
 0x1aa   : > { %v1166_v31 = vadd.f32 %v1165_v27, %v5035_v0  ;;  %v1167_v16 = vpop.f32.mrb[26].mxu1  ;;  %2177 = vmatprep.mubr.bf16.mxu0 %v1668_v17 }
 0x1ab   : > { %v1168_v7 = vadd.f32 %v1167_v16, %v5031_v62  ;;  %v1169_v8 = vpop.f32.mrb[27].mxu1  ;;  %2178 = vmatmul.mubr.bf16.gmra.mrb[20].mxu0 %v1667_v15  ;;  %v1503_v21 = vmax.f32 %v1164_v26, 0.0 }
 0x1ac   : > { %v1170_v18 = vadd.f32 %v1169_v8, %v5035_v0  ;;  %2309 = vmatpush1.bf16.msra.mxu0 %v4152_v25  ;;  %v1504_v35 = vmax.f32 %v1166_v31, 0.0 }
 0x1ad   : > { %v1507_v34 = vmax.f32 %v1168_v7, 0.0  ;;  %2310 = vmatprep.subr.bf16.mxu0 %v4157_v30 }
 0x1ae   : > { %v1508_v50 = vmax.f32 %v1170_v18, 0.0 }
 0x1af   : > { %v1671_v51 = vpack.c.bf16 %v1507_v34, %v1503_v21 }
 0x1b0   : > { %v1672_v4 = vpack.c.bf16 %v1508_v50, %v1504_v35  ;;  %v1173_v5 = vpop.f32.mrb[28].mxu1  ;;  %2311 = vmatpush1.bf16.msra.mxu0 %v4155_v20 }
 0x1b1   : > { %v1174_v23 = vadd.f32 %v1173_v5, %v5031_v62  ;;  %v1175_v32 = vpop.f32.mrb[29].mxu1  ;;  %2312 = vmatprep.subr.bf16.mxu0 %v4160_v19 }
 0x1b2   : > { %v1176_v37 = vadd.f32 %v1175_v32, %v5035_v0  ;;  %v1177_v38 = vpop.f32.mrb[30].mxu1  ;;  %2187 = vmatprep.mubr.bf16.mxu0 %v1672_v4 }
 0x1b3   : > { %v1178_v39 = vadd.f32 %v1177_v38, %v5031_v62  ;;  %v1179_v40 = vpop.f32.mrb[31].mxu1  ;;  %2188 = vmatmul.mubr.bf16.gmra.mrb[24].mxu0 %v1671_v51  ;;  %v1511_v44 = vmax.f32 %v1174_v23, 0.0 }
 0x1b4   : > { %v1180_v28 = vadd.f32 %v1179_v40, %v5035_v0  ;;  %2313 = vmatpush1.bf16.msra.mxu0 %v4158_v22  ;;  %v1512_v46 = vmax.f32 %v1176_v37, 0.0 }
 0x1b5   : > { %v1515_v45 = vmax.f32 %v1178_v39, 0.0  ;;  %2314 = vmatprep.subr.bf16.mxu0 %v4163_v33 }
 0x1b6   : > { %v1516_v47 = vmax.f32 %v1180_v28, 0.0 }
 0x1b7   : > { %v1675_v48 = vpack.c.bf16 %v1515_v45, %v1511_v44 }
 0x1b8   : > { %v1676_v49 = vpack.c.bf16 %v1516_v47, %v1512_v46  ;;  %v1183_v53 = vpop.f32.mrb[32].mxu1  ;;  %2315 = vmatpush1.bf16.msra.mxu0 %v4161_v42 }
 0x1b9   : > { %v1184_v56 = vadd.f32 %v1183_v53, %v5031_v62  ;;  %v1185_v57 = vpop.f32.mrb[33].mxu1  ;;  %2316 = vmatprep.subr.bf16.mxu0 %v4166_v29 }
 0x1ba   : > { %v1186_v59 = vadd.f32 %v1185_v57, %v5035_v0  ;;  %v1187_v60 = vpop.f32.mrb[34].mxu1  ;;  %2197 = vmatprep.mubr.bf16.mxu0 %v1676_v49 }
 0x1bb   : > { %v1188_v61 = vadd.f32 %v1187_v60, %v5031_v62  ;;  %v1189_v63 = vpop.f32.mrb[35].mxu1  ;;  %2198 = vmatmul.mubr.bf16.gmra.mrb[28].mxu0 %v1675_v48  ;;  %v1519_v36 = vmax.f32 %v1184_v56, 0.0 }
 0x1bc   : > { %v1190_v1 = vadd.f32 %v1189_v63, %v5035_v0  ;;  %2317 = vmatpush1.bf16.msra.mxu0 %v4164_v55  ;;  %v1520_v6 = vmax.f32 %v1186_v59, 0.0 }
 0x1bd   : > { %v1523_v3 = vmax.f32 %v1188_v61, 0.0  ;;  %2318 = vmatprep.subr.bf16.mxu0 %v4169_v58 }
 0x1be   : > { %v1524_v9 = vmax.f32 %v1190_v1, 0.0 }
 0x1bf   : > { %v1679_v10 = vpack.c.bf16 %v1523_v3, %v1519_v36 }
 0x1c0   : > { %v1680_v12 = vpack.c.bf16 %v1524_v9, %v1520_v6  ;;  %v1193_v11 = vpop.f32.mrb[36].mxu1  ;;  %2319 = vmatpush1.bf16.msra.mxu0 %v4167_v2 }
 0x1c1   : > { %v1194_v13 = vadd.f32 %v1193_v11, %v5031_v62  ;;  %v1195_v14 = vpop.f32.mrb[37].mxu1 }
 0x1c2   : > { %v1196_v15 = vadd.f32 %v1195_v14, %v5035_v0  ;;  %v1197_v17 = vpop.f32.mrb[38].mxu1  ;;  %2207 = vmatprep.mubr.bf16.mxu0 %v1680_v12 }
 0x1c3   : > { %v1198_v24 = vadd.f32 %v1197_v17, %v5031_v62  ;;  %v1199_v25 = vpop.f32.mrb[39].mxu1  ;;  %2208 = vmatmul.mubr.bf16.gmra.mrb[32].mxu0 %v1679_v10  ;;  %v1527_v27 = vmax.f32 %v1194_v13, 0.0 }
 0x1c4   : > { %v1200_v26 = vadd.f32 %v1199_v25, %v5035_v0  ;;  %v1528_v31 = vmax.f32 %v1196_v15, 0.0 }
 0x1c5   : > { %v1531_v30 = vmax.f32 %v1198_v24, 0.0 }
 0x1c6   : > { %v1532_v16 = vmax.f32 %v1200_v26, 0.0 }
 0x1c7   : > { %v1683_v7 = vpack.c.bf16 %v1531_v30, %v1527_v27 }
 0x1c8   : > { %v1684_v8 = vpack.c.bf16 %v1532_v16, %v1528_v31  ;;  %v1203_v18 = vpop.f32.mrb[40].mxu1 }
 0x1c9   : > { %v1204_v20 = vadd.f32 %v1203_v18, %v5031_v62  ;;  %v1205_v21 = vpop.f32.mrb[41].mxu1 }
 0x1ca   : > { %v1206_v34 = vadd.f32 %v1205_v21, %v5035_v0  ;;  %v1207_v19 = vpop.f32.mrb[42].mxu1  ;;  %2217 = vmatprep.mubr.bf16.mxu0 %v1684_v8 }
 0x1cb   : > { %v1208_v35 = vadd.f32 %v1207_v19, %v5031_v62  ;;  %v1209_v50 = vpop.f32.mrb[43].mxu1  ;;  %2218 = vmatmul.mubr.bf16.gmra.mrb[36].mxu0 %v1683_v7  ;;  %v1535_v4 = vmax.f32 %v1204_v20, 0.0 }
 0x1cc   : > { %v1210_v51 = vadd.f32 %v1209_v50, %v5035_v0  ;;  %v1536_v22 = vmax.f32 %v1206_v34, 0.0 }
 0x1cd   : > { %v1539_v5 = vmax.f32 %v1208_v35, 0.0 }
 0x1ce   : > { %v1540_v23 = vmax.f32 %v1210_v51, 0.0 }
 0x1cf   : > { %v1687_v32 = vpack.c.bf16 %v1539_v5, %v1535_v4 }
 0x1d0   : > { %v1688_v33 = vpack.c.bf16 %v1540_v23, %v1536_v22  ;;  %v1213_v37 = vpop.f32.mrb[44].mxu1 }
 0x1d1   : > { %v1214_v38 = vadd.f32 %v1213_v37, %v5031_v62  ;;  %v1215_v39 = vpop.f32.mrb[45].mxu1 }
 0x1d2   : > { %v1216_v40 = vadd.f32 %v1215_v39, %v5035_v0  ;;  %v1217_v28 = vpop.f32.mrb[46].mxu1  ;;  %2227 = vmatprep.mubr.bf16.mxu0 %v1688_v33 }
 0x1d3   : > { %v1218_v42 = vadd.f32 %v1217_v28, %v5031_v62  ;;  %v1219_v44 = vpop.f32.mrb[47].mxu1  ;;  %2228 = vmatmul.mubr.bf16.gmra.mrb[40].mxu0 %v1687_v32  ;;  %v1543_v29 = vmax.f32 %v1214_v38, 0.0  ;;  %v739_v38 = vsub.s32 2, %v5012_v41  ;;  %v743_v28 = vsub.s32 3, %v5012_v41 }
 0x1d4   : > { %v1220_v45 = vadd.f32 %v1219_v44, %v5035_v0  ;;  %v1544_v47 = vmax.f32 %v1216_v40, 0.0 }
 0x1d5   : > { %v1547_v46 = vmax.f32 %v1218_v42, 0.0 }
 0x1d6   : > { %v1548_v48 = vmax.f32 %v1220_v45, 0.0 }
 0x1d7   : > { %v1691_v49 = vpack.c.bf16 %v1547_v46, %v1543_v29 }
 0x1d8   : > { %v1692_v53 = vpack.c.bf16 %v1548_v48, %v1544_v47  ;;  %v1223_v55 = vpop.f32.mrb[48].mxu1  ;;  %v5145_v47 = vrot.slane %v5023_v52, %v739_v38 }
 0x1d9   : > { %v1224_v56 = vadd.f32 %v1223_v55, %v5031_v62  ;;  %v1225_v57 = vpop.f32.mrb[49].mxu1 }
 0x1da   : > { %v1226_v58 = vadd.f32 %v1225_v57, %v5035_v0  ;;  %v1227_v59 = vpop.f32.mrb[50].mxu1  ;;  %2237 = vmatprep.mubr.bf16.mxu0 %v1692_v53  ;;  %v5148_v53 = vrot.slane %v5023_v52, %v743_v28 }
 0x1db   : > { %v1228_v60 = vadd.f32 %v1227_v59, %v5031_v62  ;;  %v1229_v61 = vpop.f32.mrb[51].mxu1  ;;  %2238 = vmatmul.mubr.bf16.gmra.mrb[44].mxu0 %v1691_v49  ;;  %v1551_v1 = vmax.f32 %v1224_v56, 0.0 }
 0x1dc   : > { %v1230_v63 = vadd.f32 %v1229_v61, %v5035_v0  ;;  %v1552_v36 = vmax.f32 %v1226_v58, 0.0 }
 0x1dd   : > { %v1555_v2 = vmax.f32 %v1228_v60, 0.0 }
 0x1de   : > { %v1556_v3 = vmax.f32 %v1230_v63, 0.0 }
 0x1df   : > { %v1695_v6 = vpack.c.bf16 %v1555_v2, %v1551_v1 }
 0x1e0   : > { %v1696_v9 = vpack.c.bf16 %v1556_v3, %v1552_v36  ;;  %v1233_v10 = vpop.f32.mrb[52].mxu1 }
 0x1e1   : > { %v1234_v12 = vadd.f32 %v1233_v10, %v5031_v62  ;;  %v1235_v11 = vpop.f32.mrb[53].mxu1 }
 0x1e2   : > { %v1236_v13 = vadd.f32 %v1235_v11, %v5035_v0  ;;  %v1237_v14 = vpop.f32.mrb[54].mxu1  ;;  %2247 = vmatprep.mubr.bf16.mxu0 %v1696_v9 }
 0x1e3   : > { %v1238_v15 = vadd.f32 %v1237_v14, %v5031_v62  ;;  %v1239_v17 = vpop.f32.mrb[55].mxu1  ;;  %2248 = vmatmul.mubr.bf16.gmra.mrb[48].mxu0 %v1695_v6  ;;  %v1559_v25 = vmax.f32 %v1234_v12, 0.0 }
 0x1e4   : > { %v1240_v24 = vadd.f32 %v1239_v17, %v5035_v0  ;;  %v1560_v27 = vmax.f32 %v1236_v13, 0.0 }
 0x1e5   : > { %v1563_v26 = vmax.f32 %v1238_v15, 0.0 }
 0x1e6   : > { %v1564_v30 = vmax.f32 %v1240_v24, 0.0 }
 0x1e7   : > { %v1699_v31 = vpack.c.bf16 %v1563_v26, %v1559_v25 }
 0x1e8   : > { %v1700_v16 = vpack.c.bf16 %v1564_v30, %v1560_v27  ;;  %v1243_v7 = vpop.f32.mrb[56].mxu1 }
 0x1e9   : > { %v1244_v8 = vadd.f32 %v1243_v7, %v5031_v62  ;;  %v1245_v18 = vpop.f32.mrb[57].mxu1 }
 0x1ea   : > { %v1246_v20 = vadd.f32 %v1245_v18, %v5035_v0  ;;  %v1247_v21 = vpop.f32.mrb[58].mxu1  ;;  %2257 = vmatprep.mubr.bf16.mxu0 %v1700_v16 }
 0x1eb   : > { %v1248_v34 = vadd.f32 %v1247_v21, %v5031_v62  ;;  %v1249_v19 = vpop.f32.mrb[59].mxu1  ;;  %2258 = vmatmul.mubr.bf16.gmra.mrb[52].mxu0 %v1699_v31  ;;  %v1567_v50 = vmax.f32 %v1244_v8, 0.0 }
 0x1ec   : > { %v1250_v35 = vadd.f32 %v1249_v19, %v5035_v0  ;;  %v1568_v4 = vmax.f32 %v1246_v20, 0.0 }
 0x1ed   : > { %v1571_v51 = vmax.f32 %v1248_v34, 0.0 }
 0x1ee   : > { %v1572_v5 = vmax.f32 %v1250_v35, 0.0 }
 0x1ef   : > { %v1703_v22 = vpack.c.bf16 %v1571_v51, %v1567_v50 }
 0x1f0   : > { %v1704_v23 = vpack.c.bf16 %v1572_v5, %v1568_v4  ;;  %v1253_v32 = vpop.f32.mrb[60].mxu1 }
 0x1f1   : > { %v1254_v33 = vadd.f32 %v1253_v32, %v5031_v62  ;;  %v1255_v37 = vpop.f32.mrb[61].mxu1 }
 0x1f2   : > { %v1256_v39 = vadd.f32 %v1255_v37, %v5035_v0  ;;  %v1257_v40 = vpop.f32.mrb[62].mxu1  ;;  %2267 = vmatprep.mubr.bf16.mxu0 %v1704_v23 }
 0x1f3   : > { %v1258_v42 = vadd.f32 %v1257_v40, %v5031_v62  ;;  %v1259_v44 = vpop.f32.mrb[63].mxu1  ;;  %2268 = vmatmul.mubr.bf16.gmra.mrb[56].mxu0 %v1703_v22  ;;  %v1575_v29 = vmax.f32 %v1254_v33, 0.0 }
 0x1f4   : > { %v1260_v45 = vadd.f32 %v1259_v44, %v5035_v0  ;;  %v1576_v48 = vmax.f32 %v1256_v39, 0.0 }
 0x1f5   : > { %v1579_v46 = vmax.f32 %v1258_v42, 0.0 }
 0x1f6   : > { %v1580_v49 = vmax.f32 %v1260_v45, 0.0 }
 0x1f7   : > { %v1707_v55 = vpack.c.bf16 %v1579_v46, %v1575_v29 }
 0x1f8   : > { %v1708_v56 = vpack.c.bf16 %v1580_v49, %v1576_v48  ;;  %v1296_v57 = vpop.f32.mrb[64].mxu1 }
 0x1f9   : > { %v1297_v41 = vadd.f32 %v1296_v57, %v5145_v47  ;;  %v1298_v62 = vpop.f32.mrb[65].mxu1 }
 0x1fa   : > { %v1299_v58 = vadd.f32 %v1298_v62, %v5148_v53  ;;  %v1300_v59 = vpop.f32.mrb[66].mxu1  ;;  %2277 = vmatprep.mubr.bf16.mxu0 %v1708_v56 }
 0x1fb   : > { %v1301_v0 = vadd.f32 %v1300_v59, %v5145_v47  ;;  %v1302_v60 = vpop.f32.mrb[67].mxu1  ;;  %2278 = vmatmul.mubr.bf16.gmra.mrb[60].mxu0 %v1707_v55  ;;  %v1457_v63 = vmax.f32 %v1297_v41, 0.0 }
 0x1fc   : > { %v1303_v61 = vadd.f32 %v1302_v60, %v5148_v53  ;;  %v1458_v52 = vmax.f32 %v1299_v58, 0.0 }
 0x1fd   : > { %v1461_v1 = vmax.f32 %v1301_v0, 0.0 }
 0x1fe   : > { %v1462_v2 = vmax.f32 %v1303_v61, 0.0 }
 0x1ff   : > { %v1649_v36 = vpack.c.bf16 %v1461_v1, %v1457_v63 }
 0x200   : > { %v1650_v3 = vpack.c.bf16 %v1462_v2, %v1458_v52  ;;  %v1306_v6 = vpop.f32.mrb[68].mxu1 }
 0x201   : > { %v1307_v9 = vadd.f32 %v1306_v6, %v5145_v47  ;;  %v1308_v10 = vpop.f32.mrb[69].mxu1 }
 0x202   : > { %v1309_v12 = vadd.f32 %v1308_v10, %v5148_v53  ;;  %v1310_v11 = vpop.f32.mrb[70].mxu1  ;;  %2320 = vmatprep.mubr.bf16.mxu0 %v1650_v3 }
 0x203   : > { %v1311_v13 = vadd.f32 %v1310_v11, %v5145_v47  ;;  %v1312_v14 = vpop.f32.mrb[71].mxu1  ;;  %2321 = vmatmul.mubr.bf16.vlgmr.msra.gmra.mrb[0].mxu0 %v1649_v36  ;;  %v1465_v17 = vmax.f32 %v1307_v9, 0.0 }
 0x204   : > { %v1313_v15 = vadd.f32 %v1312_v14, %v5148_v53  ;;  %v1466_v25 = vmax.f32 %v1309_v12, 0.0 }
 0x205   : > { %v1469_v24 = vmax.f32 %v1311_v13, 0.0 }
 0x206   : > { %v1470_v26 = vmax.f32 %v1313_v15, 0.0 }
 0x207   : > { %v1653_v27 = vpack.c.bf16 %v1469_v24, %v1465_v17 }
 0x208   : > { %v1654_v30 = vpack.c.bf16 %v1470_v26, %v1466_v25  ;;  %v1316_v31 = vpop.f32.mrb[72].mxu1 }
 0x209   : > { %v1317_v16 = vadd.f32 %v1316_v31, %v5145_v47  ;;  %v1318_v7 = vpop.f32.mrb[73].mxu1 }
 0x20a   : > { %v1319_v8 = vadd.f32 %v1318_v7, %v5148_v53  ;;  %v1320_v18 = vpop.f32.mrb[74].mxu1  ;;  %2330 = vmatprep.mubr.bf16.mxu0 %v1654_v30 }
 0x20b   : > { %v1321_v20 = vadd.f32 %v1320_v18, %v5145_v47  ;;  %v1322_v21 = vpop.f32.mrb[75].mxu1  ;;  %2331 = vmatmul.mubr.bf16.gmra.mrb[4].mxu0 %v1653_v27  ;;  %v1473_v19 = vmax.f32 %v1317_v16, 0.0 }
 0x20c   : > { %v1323_v34 = vadd.f32 %v1322_v21, %v5148_v53  ;;  %v1474_v50 = vmax.f32 %v1319_v8, 0.0 }
 0x20d   : > { %v1477_v35 = vmax.f32 %v1321_v20, 0.0 }
 0x20e   : > { %v1478_v51 = vmax.f32 %v1323_v34, 0.0 }
 0x20f   : > { %v1657_v4 = vpack.c.bf16 %v1477_v35, %v1473_v19 }
 0x210   : > { %v1658_v5 = vpack.c.bf16 %v1478_v51, %v1474_v50  ;;  %v1326_v22 = vpop.f32.mrb[76].mxu1 }
 0x211   : > { %v1327_v23 = vadd.f32 %v1326_v22, %v5145_v47  ;;  %v1328_v32 = vpop.f32.mrb[77].mxu1 }
 0x212   : > { %v1329_v33 = vadd.f32 %v1328_v32, %v5148_v53  ;;  %v1330_v37 = vpop.f32.mrb[78].mxu1  ;;  %2340 = vmatprep.mubr.bf16.mxu0 %v1658_v5 }
 0x213   : > { %v1331_v38 = vadd.f32 %v1330_v37, %v5145_v47  ;;  %v1332_v39 = vpop.f32.mrb[79].mxu1  ;;  %2341 = vmatmul.mubr.bf16.gmra.mrb[8].mxu0 %v1657_v4  ;;  %v1481_v28 = vmax.f32 %v1327_v23, 0.0 }
 0x214   : > { %v1333_v40 = vadd.f32 %v1332_v39, %v5148_v53  ;;  %v1482_v44 = vmax.f32 %v1329_v33, 0.0 }
 0x215   : > { %v1485_v42 = vmax.f32 %v1331_v38, 0.0 }
 0x216   : > { %v1486_v45 = vmax.f32 %v1333_v40, 0.0 }
 0x217   : > { %v1661_v29 = vpack.c.bf16 %v1485_v42, %v1481_v28 }
 0x218   : > { %v1662_v46 = vpack.c.bf16 %v1486_v45, %v1482_v44  ;;  %v1336_v48 = vpop.f32.mrb[80].mxu1 }
 0x219   : > { %v1337_v49 = vadd.f32 %v1336_v48, %v5145_v47  ;;  %v1338_v55 = vpop.f32.mrb[81].mxu1 }
 0x21a   : > { %v1339_v56 = vadd.f32 %v1338_v55, %v5148_v53  ;;  %v1340_v57 = vpop.f32.mrb[82].mxu1  ;;  %2350 = vmatprep.mubr.bf16.mxu0 %v1662_v46 }
 0x21b   : > { %v1341_v41 = vadd.f32 %v1340_v57, %v5145_v47  ;;  %v1342_v62 = vpop.f32.mrb[83].mxu1  ;;  %2351 = vmatmul.mubr.bf16.gmra.mrb[12].mxu0 %v1661_v29  ;;  %v1489_v59 = vmax.f32 %v1337_v49, 0.0 }
 0x21c   : > { %v1343_v58 = vadd.f32 %v1342_v62, %v5148_v53  ;;  %v1490_v60 = vmax.f32 %v1339_v56, 0.0 }
 0x21d   : > { %v1493_v0 = vmax.f32 %v1341_v41, 0.0 }
 0x21e   : > { %v1494_v61 = vmax.f32 %v1343_v58, 0.0 }
 0x21f   : > { %v1665_v63 = vpack.c.bf16 %v1493_v0, %v1489_v59 }
 0x220   : > { %v1666_v1 = vpack.c.bf16 %v1494_v61, %v1490_v60  ;;  %v1346_v52 = vpop.f32.mrb[84].mxu1 }
 0x221   : > { %v1347_v2 = vadd.f32 %v1346_v52, %v5145_v47  ;;  %v1348_v36 = vpop.f32.mrb[85].mxu1 }
 0x222   : > { %v1349_v3 = vadd.f32 %v1348_v36, %v5148_v53  ;;  %v1350_v6 = vpop.f32.mrb[86].mxu1  ;;  %2360 = vmatprep.mubr.bf16.mxu0 %v1666_v1 }
 0x223   : > { %v1351_v9 = vadd.f32 %v1350_v6, %v5145_v47  ;;  %v1352_v10 = vpop.f32.mrb[87].mxu1  ;;  %2361 = vmatmul.mubr.bf16.gmra.mrb[16].mxu0 %v1665_v63  ;;  %v1497_v11 = vmax.f32 %v1347_v2, 0.0 }
 0x224   : > { %v1353_v12 = vadd.f32 %v1352_v10, %v5148_v53  ;;  %v1498_v14 = vmax.f32 %v1349_v3, 0.0 }
 0x225   : > { %v1501_v13 = vmax.f32 %v1351_v9, 0.0 }
 0x226   : > { %v1502_v15 = vmax.f32 %v1353_v12, 0.0 }
 0x227   : > { %v1669_v17 = vpack.c.bf16 %v1501_v13, %v1497_v11 }
 0x228   : > { %v1670_v24 = vpack.c.bf16 %v1502_v15, %v1498_v14  ;;  %v1356_v25 = vpop.f32.mrb[88].mxu1 }
 0x229   : > { %v1357_v26 = vadd.f32 %v1356_v25, %v5145_v47  ;;  %v1358_v27 = vpop.f32.mrb[89].mxu1 }
 0x22a   : > { %v1359_v30 = vadd.f32 %v1358_v27, %v5148_v53  ;;  %v1360_v31 = vpop.f32.mrb[90].mxu1  ;;  %2370 = vmatprep.mubr.bf16.mxu0 %v1670_v24 }
 0x22b   : > { %v1361_v16 = vadd.f32 %v1360_v31, %v5145_v47  ;;  %v1362_v7 = vpop.f32.mrb[91].mxu1  ;;  %2371 = vmatmul.mubr.bf16.gmra.mrb[20].mxu0 %v1669_v17  ;;  %v1505_v18 = vmax.f32 %v1357_v26, 0.0 }
 0x22c   : > { %v1363_v8 = vadd.f32 %v1362_v7, %v5148_v53  ;;  %v1506_v21 = vmax.f32 %v1359_v30, 0.0 }
 0x22d   : > { %v1509_v20 = vmax.f32 %v1361_v16, 0.0 }
 0x22e   : > { %v1510_v34 = vmax.f32 %v1363_v8, 0.0 }
 0x22f   : > { %v1673_v19 = vpack.c.bf16 %v1509_v20, %v1505_v18 }
 0x230   : > { %v1674_v35 = vpack.c.bf16 %v1510_v34, %v1506_v21  ;;  %v1366_v50 = vpop.f32.mrb[92].mxu1 }
 0x231   : > { %v1367_v51 = vadd.f32 %v1366_v50, %v5145_v47  ;;  %v1368_v4 = vpop.f32.mrb[93].mxu1 }
 0x232   : > { %v1369_v5 = vadd.f32 %v1368_v4, %v5148_v53  ;;  %v1370_v22 = vpop.f32.mrb[94].mxu1  ;;  %2380 = vmatprep.mubr.bf16.mxu0 %v1674_v35 }
 0x233   : > { %v1371_v23 = vadd.f32 %v1370_v22, %v5145_v47  ;;  %v1372_v32 = vpop.f32.mrb[95].mxu1  ;;  %2381 = vmatmul.mubr.bf16.gmra.mrb[24].mxu0 %v1673_v19  ;;  %v1513_v37 = vmax.f32 %v1367_v51, 0.0 }
 0x234   : > { %v1373_v33 = vadd.f32 %v1372_v32, %v5148_v53  ;;  %v1514_v39 = vmax.f32 %v1369_v5, 0.0 }
 0x235   : > { %v1517_v38 = vmax.f32 %v1371_v23, 0.0 }
 0x236   : > { %v1518_v40 = vmax.f32 %v1373_v33, 0.0 }
 0x237   : > { %v1677_v28 = vpack.c.bf16 %v1517_v38, %v1513_v37 }
 0x238   : > { %v1678_v42 = vpack.c.bf16 %v1518_v40, %v1514_v39  ;;  %v1376_v44 = vpop.f32.mrb[96].mxu1 }
 0x239   : > { %v1377_v45 = vadd.f32 %v1376_v44, %v5145_v47  ;;  %v1378_v29 = vpop.f32.mrb[97].mxu1 }
 0x23a   : > { %v1379_v46 = vadd.f32 %v1378_v29, %v5148_v53  ;;  %v1380_v48 = vpop.f32.mrb[98].mxu1  ;;  %2390 = vmatprep.mubr.bf16.mxu0 %v1678_v42 }
 0x23b   : > { %v1381_v49 = vadd.f32 %v1380_v48, %v5145_v47  ;;  %v1382_v55 = vpop.f32.mrb[99].mxu1  ;;  %2391 = vmatmul.mubr.bf16.gmra.mrb[28].mxu0 %v1677_v28  ;;  %v1521_v57 = vmax.f32 %v1377_v45, 0.0 }
 0x23c   : > { %v1383_v56 = vadd.f32 %v1382_v55, %v5148_v53  ;;  %v1522_v62 = vmax.f32 %v1379_v46, 0.0 }
 0x23d   : > { %v1525_v41 = vmax.f32 %v1381_v49, 0.0 }
 0x23e   : > { %v1526_v58 = vmax.f32 %v1383_v56, 0.0 }
 0x23f   : > { %v1681_v59 = vpack.c.bf16 %v1525_v41, %v1521_v57 }
 0x240   : > { %v1682_v0 = vpack.c.bf16 %v1526_v58, %v1522_v62  ;;  %v1386_v60 = vpop.f32.mrb[100].mxu1 }
 0x241   : > { %v1387_v61 = vadd.f32 %v1386_v60, %v5145_v47  ;;  %v1388_v63 = vpop.f32.mrb[101].mxu1 }
 0x242   : > { %v1389_v1 = vadd.f32 %v1388_v63, %v5148_v53  ;;  %v1390_v52 = vpop.f32.mrb[102].mxu1  ;;  %2400 = vmatprep.mubr.bf16.mxu0 %v1682_v0 }
 0x243   : > { %v1391_v2 = vadd.f32 %v1390_v52, %v5145_v47  ;;  %v1392_v36 = vpop.f32.mrb[103].mxu1  ;;  %2401 = vmatmul.mubr.bf16.gmra.mrb[32].mxu0 %v1681_v59  ;;  %v1529_v6 = vmax.f32 %v1387_v61, 0.0 }
 0x244   : > { %v1393_v3 = vadd.f32 %v1392_v36, %v5148_v53  ;;  %v1530_v10 = vmax.f32 %v1389_v1, 0.0 }
 0x245   : > { %v1533_v9 = vmax.f32 %v1391_v2, 0.0 }
 0x246   : > { %v1534_v12 = vmax.f32 %v1393_v3, 0.0 }
 0x247   : > { %v1685_v11 = vpack.c.bf16 %v1533_v9, %v1529_v6 }
 0x248   : > { %v1686_v13 = vpack.c.bf16 %v1534_v12, %v1530_v10  ;;  %v1396_v14 = vpop.f32.mrb[104].mxu1 }
 0x249   : > { %v1397_v15 = vadd.f32 %v1396_v14, %v5145_v47  ;;  %v1398_v17 = vpop.f32.mrb[105].mxu1 }
 0x24a   : > { %v1399_v24 = vadd.f32 %v1398_v17, %v5148_v53  ;;  %v1400_v25 = vpop.f32.mrb[106].mxu1  ;;  %2410 = vmatprep.mubr.bf16.mxu0 %v1686_v13 }
 0x24b   : > { %v1401_v26 = vadd.f32 %v1400_v25, %v5145_v47  ;;  %v1402_v27 = vpop.f32.mrb[107].mxu1  ;;  %2411 = vmatmul.mubr.bf16.gmra.mrb[36].mxu0 %v1685_v11  ;;  %v1537_v31 = vmax.f32 %v1397_v15, 0.0 }
 0x24c   : > { %v1403_v30 = vadd.f32 %v1402_v27, %v5148_v53  ;;  %v1538_v7 = vmax.f32 %v1399_v24, 0.0 }
 0x24d   : > { %v1541_v16 = vmax.f32 %v1401_v26, 0.0 }
 0x24e   : > { %v1542_v8 = vmax.f32 %v1403_v30, 0.0 }
 0x24f   : > { %v1689_v18 = vpack.c.bf16 %v1541_v16, %v1537_v31 }
 0x250   : > { %v1690_v20 = vpack.c.bf16 %v1542_v8, %v1538_v7  ;;  %v1406_v21 = vpop.f32.mrb[108].mxu1 }
 0x251   : > { %v1407_v34 = vadd.f32 %v1406_v21, %v5145_v47  ;;  %v1408_v19 = vpop.f32.mrb[109].mxu1 }
 0x252   : > { %v1409_v35 = vadd.f32 %v1408_v19, %v5148_v53  ;;  %v1410_v50 = vpop.f32.mrb[110].mxu1  ;;  %2420 = vmatprep.mubr.bf16.mxu0 %v1690_v20 }
 0x253   : > { %v1411_v51 = vadd.f32 %v1410_v50, %v5145_v47  ;;  %v1412_v4 = vpop.f32.mrb[111].mxu1  ;;  %2421 = vmatmul.mubr.bf16.gmra.mrb[40].mxu0 %v1689_v18  ;;  %v1545_v22 = vmax.f32 %v1407_v34, 0.0 }
 0x254   : > { %v1413_v5 = vadd.f32 %v1412_v4, %v5148_v53  ;;  %v1546_v32 = vmax.f32 %v1409_v35, 0.0 }
 0x255   : > { %v1549_v23 = vmax.f32 %v1411_v51, 0.0 }
 0x256   : > { %v1550_v33 = vmax.f32 %v1413_v5, 0.0 }
 0x257   : > { %v1693_v37 = vpack.c.bf16 %v1549_v23, %v1545_v22 }
 0x258   : > { %v1694_v38 = vpack.c.bf16 %v1550_v33, %v1546_v32  ;;  %v1416_v39 = vpop.f32.mrb[112].mxu1  ;;  %v1583_v32 = vld [vmem:[#allocation2] sm:$0xff]  ;;  %v1584_v33 = vld [vmem:[#allocation2 + $0x8] sm:$0xff] }
 0x259   : > { %v1417_v40 = vadd.f32 %v1416_v39, %v5145_v47  ;;  %v1418_v28 = vpop.f32.mrb[113].mxu1 }
 0x25a   : > { %v1419_v42 = vadd.f32 %v1418_v28, %v5148_v53  ;;  %v1420_v44 = vpop.f32.mrb[114].mxu1  ;;  %2430 = vmatprep.mubr.bf16.mxu0 %v1694_v38  ;;  %v1585_v38 = vld [vmem:[#allocation2 + $0x10] sm:$0xff]  ;;  %v1586_v28 = vld [vmem:[#allocation2 + $0x18] sm:$0xff] }
 0x25b   : > { %v1421_v45 = vadd.f32 %v1420_v44, %v5145_v47  ;;  %v1422_v29 = vpop.f32.mrb[115].mxu1  ;;  %2431 = vmatmul.mubr.bf16.gmra.mrb[44].mxu0 %v1693_v37  ;;  %v1553_v48 = vmax.f32 %v1417_v40, 0.0 }
 0x25c   : > { %v1423_v46 = vadd.f32 %v1422_v29, %v5148_v53  ;;  %v1554_v55 = vmax.f32 %v1419_v42, 0.0  ;;  %v1587_v29 = vld [vmem:[#allocation2 + $0x20] sm:$0xff] }
 0x25d   : > { %v1557_v49 = vmax.f32 %v1421_v45, 0.0 }
 0x25e   : > { %v1558_v56 = vmax.f32 %v1423_v46, 0.0  ;;  %v1588_v46 = vld [vmem:[#allocation2 + $0x28] sm:$0xff] }
 0x25f   : > { %v1697_v57 = vpack.c.bf16 %v1557_v49, %v1553_v48  ;;  %v1589_v49 = vld [vmem:[#allocation2 + $0x30] sm:$0xff] }
 0x260   : > { %v1698_v41 = vpack.c.bf16 %v1558_v56, %v1554_v55  ;;  %v1426_v62 = vpop.f32.mrb[116].mxu1 }
 0x261   : > { %v1427_v58 = vadd.f32 %v1426_v62, %v5145_v47  ;;  %v1428_v59 = vpop.f32.mrb[117].mxu1 }
 0x262   : > { %v1429_v0 = vadd.f32 %v1428_v59, %v5148_v53  ;;  %v1430_v60 = vpop.f32.mrb[118].mxu1  ;;  %2440 = vmatprep.mubr.bf16.mxu0 %v1698_v41 }
 0x263   : > { %v1431_v61 = vadd.f32 %v1430_v60, %v5145_v47  ;;  %v1432_v63 = vpop.f32.mrb[119].mxu1  ;;  %2441 = vmatmul.mubr.bf16.gmra.mrb[48].mxu0 %v1697_v57  ;;  %v1561_v52 = vmax.f32 %v1427_v58, 0.0  ;;  %v1590_v57 = vld [vmem:[#allocation2 + $0x38] sm:$0xff]  ;;  %v1591_v60 = vld [vmem:[#allocation2 + $0x40] sm:$0xff] }
 0x264   : > { %v1433_v1 = vadd.f32 %v1432_v63, %v5148_v53  ;;  %v1562_v36 = vmax.f32 %v1429_v0, 0.0 }
 0x265   : > { %v1565_v2 = vmax.f32 %v1431_v61, 0.0  ;;  %v1592_v61 = vld [vmem:[#allocation2 + $0x48] sm:$0xff] }
 0x266   : > { %v1566_v3 = vmax.f32 %v1433_v1, 0.0  ;;  %v1593_v1 = vld [vmem:[#allocation2 + $0x50] sm:$0xff] }
 0x267   : > { %v1701_v6 = vpack.c.bf16 %v1565_v2, %v1561_v52 }
 0x268   : > { %v1702_v9 = vpack.c.bf16 %v1566_v3, %v1562_v36  ;;  %v1436_v10 = vpop.f32.mrb[120].mxu1  ;;  %v1594_v36 = vld [vmem:[#allocation2 + $0x58] sm:$0xff] }
 0x269   : > { %v1437_v12 = vadd.f32 %v1436_v10, %v5145_v47  ;;  %v1438_v11 = vpop.f32.mrb[121].mxu1 }
 0x26a   : > { %v1439_v13 = vadd.f32 %v1438_v11, %v5148_v53  ;;  %v1440_v14 = vpop.f32.mrb[122].mxu1  ;;  %2450 = vmatprep.mubr.bf16.mxu0 %v1702_v9  ;;  %v1595_v11 = vld [vmem:[#allocation2 + $0x60] sm:$0xff] }
 0x26b   : > { %v1441_v15 = vadd.f32 %v1440_v14, %v5145_v47  ;;  %v1442_v17 = vpop.f32.mrb[123].mxu1  ;;  %2451 = vmatmul.mubr.bf16.gmra.mrb[52].mxu0 %v1701_v6  ;;  %v1569_v25 = vmax.f32 %v1437_v12, 0.0 }
 0x26c   : > { %v1443_v24 = vadd.f32 %v1442_v17, %v5148_v53  ;;  %v1570_v27 = vmax.f32 %v1439_v13, 0.0  ;;  %v1596_v13 = vld [vmem:[#allocation2 + $0x68] sm:$0xff] }
 0x26d   : > { %v1573_v26 = vmax.f32 %v1441_v15, 0.0  ;;  %v1597_v15 = vld [vmem:[#allocation2 + $0x70] sm:$0xff] }
 0x26e   : > { %v1574_v30 = vmax.f32 %v1443_v24, 0.0 }
 0x26f   : > { %v1705_v31 = vpack.c.bf16 %v1573_v26, %v1569_v25  ;;  %v1598_v25 = vld [vmem:[#allocation2 + $0x78] sm:$0xff] }
 0x270   : > { %v1706_v16 = vpack.c.bf16 %v1574_v30, %v1570_v27  ;;  %v1446_v7 = vpop.f32.mrb[124].mxu1 }
 0x271   : > { %v1447_v8 = vadd.f32 %v1446_v7, %v5145_v47  ;;  %v1448_v18 = vpop.f32.mrb[125].mxu1  ;;  %v1599_v7 = vld [vmem:[#allocation2 + $0x80] sm:$0xff] }
 0x272   : > { %v1449_v20 = vadd.f32 %v1448_v18, %v5148_v53  ;;  %v1450_v21 = vpop.f32.mrb[126].mxu1  ;;  %2460 = vmatprep.mubr.bf16.mxu0 %v1706_v16 }
 0x273   : > { %v1451_v34 = vadd.f32 %v1450_v21, %v5145_v47  ;;  %v1452_v19 = vpop.f32.mrb[127].mxu1  ;;  %2461 = vmatmul.mubr.bf16.gmra.mrb[56].mxu0 %v1705_v31  ;;  %v1577_v50 = vmax.f32 %v1447_v8, 0.0  ;;  %v1600_v8 = vld [vmem:[#allocation2 + $0x88] sm:$0xff] }
 0x274   : > { %v1453_v35 = vadd.f32 %v1452_v19, %v5148_v53  ;;  %v1578_v4 = vmax.f32 %v1449_v20, 0.0  ;;  %v1601_v20 = vld [vmem:[#allocation2 + $0x90] sm:$0xff]  ;;  %v1602_v19 = vld [vmem:[#allocation2 + $0x98] sm:$0xff] }
 0x275   : > { %v1581_v51 = vmax.f32 %v1451_v34, 0.0 }
 0x276   : > { %v1582_v5 = vmax.f32 %v1453_v35, 0.0 }
 0x277   : > { %v1709_v22 = vpack.c.bf16 %v1581_v51, %v1577_v50 }
 0x278   : > { %v1710_v23 = vpack.c.bf16 %v1582_v5, %v1578_v4 }
 0x27a   : > { %2470 = vmatprep.mubr.bf16.mxu0 %v1710_v23  ;;  %v1604_v23 = vld [vmem:[#allocation2 + $0xa8] sm:$0xff] }
 0x27b   : > { %2471 = vmatmul.mubr.bf16.gmra.mrb[60].mxu0 %v1709_v22  ;;  %v1603_v22 = vld [vmem:[#allocation2 + $0xa0] sm:$0xff] }
 0x2d6   : > { %v2322_v37 = vpop.f32.mrb[0].mxu0 }
 0x2d7   : > { %v2481_v39 = vadd.f32 %v2322_v37, %v1583_v32  ;;  %v2324_v40 = vpop.f32.mrb[1].mxu0 }
 0x2d8   : > { %v2482_v47 = vadd.f32 %v2324_v40, %v1584_v33  ;;  %v2326_v42 = vpop.f32.mrb[2].mxu0  ;;  %v1605_v33 = vld [vmem:[#allocation2 + $0xb0] sm:$0xff] }
 0x2d9   : > { %2545 = vst [vmem:[#allocation2] sm:$0xff] %v2481_v39  ;;  %v2483_v44 = vadd.f32 %v2326_v42, %v1585_v38  ;;  %v2328_v53 = vpop.f32.mrb[3].mxu0  ;;  %v1606_v39 = vld [vmem:[#allocation2 + $0xb8] sm:$0xff] }
 0x2da   : > { %2546 = vst [vmem:[#allocation2 + $0x8] sm:$0xff] %v2482_v47  ;;  %v2484_v45 = vadd.f32 %v2328_v53, %v1586_v28  ;;  %v1607_v53 = vld [vmem:[#allocation2 + $0xc0] sm:$0xff] }
 0x2db   : > { %2547 = vst [vmem:[#allocation2 + $0x10] sm:$0xff] %v2483_v44 }
 0x2dc   : > { %2548 = vst [vmem:[#allocation2 + $0x18] sm:$0xff] %v2484_v45  ;;  %v1608_v45 = vld [vmem:[#allocation2 + $0xc8] sm:$0xff] }
 0x2de   : > { %v2332_v48 = vpop.f32.mrb[4].mxu0 }
 0x2df   : > { %v2485_v55 = vadd.f32 %v2332_v48, %v1587_v29  ;;  %v2334_v56 = vpop.f32.mrb[5].mxu0 }
 0x2e0   : > { %v2486_v41 = vadd.f32 %v2334_v56, %v1588_v46  ;;  %v2336_v62 = vpop.f32.mrb[6].mxu0  ;;  %v1609_v46 = vld [vmem:[#allocation2 + $0xd0] sm:$0xff] }
 0x2e1   : > { %2549 = vst [vmem:[#allocation2 + $0x20] sm:$0xff] %v2485_v55  ;;  %v2487_v58 = vadd.f32 %v2336_v62, %v1589_v49  ;;  %v2338_v59 = vpop.f32.mrb[7].mxu0  ;;  %v1610_v55 = vld [vmem:[#allocation2 + $0xd8] sm:$0xff] }
 0x2e2   : > { %2550 = vst [vmem:[#allocation2 + $0x28] sm:$0xff] %v2486_v41  ;;  %v2488_v0 = vadd.f32 %v2338_v59, %v1590_v57  ;;  %v1611_v59 = vld [vmem:[#allocation2 + $0xe0] sm:$0xff] }
 0x2e3   : > { %2551 = vst [vmem:[#allocation2 + $0x30] sm:$0xff] %v2487_v58 }
 0x2e4   : > { %2552 = vst [vmem:[#allocation2 + $0x38] sm:$0xff] %v2488_v0  ;;  %v1612_v0 = vld [vmem:[#allocation2 + $0xe8] sm:$0xff] }
 0x2e6   : > { %v2342_v63 = vpop.f32.mrb[8].mxu0 }
 0x2e7   : > { %v2489_v52 = vadd.f32 %v2342_v63, %v1591_v60  ;;  %v2344_v2 = vpop.f32.mrb[9].mxu0 }
 0x2e8   : > { %v2490_v3 = vadd.f32 %v2344_v2, %v1592_v61  ;;  %v2346_v6 = vpop.f32.mrb[10].mxu0  ;;  %v1613_v61 = vld [vmem:[#allocation2 + $0xf0] sm:$0xff] }
 0x2e9   : > { %2553 = vst [vmem:[#allocation2 + $0x40] sm:$0xff] %v2489_v52  ;;  %v2491_v9 = vadd.f32 %v2346_v6, %v1593_v1  ;;  %v2348_v10 = vpop.f32.mrb[11].mxu0  ;;  %v1614_v52 = vld [vmem:[#allocation2 + $0xf8] sm:$0xff] }
 0x2ea   : > { %2554 = vst [vmem:[#allocation2 + $0x48] sm:$0xff] %v2490_v3  ;;  %v2492_v12 = vadd.f32 %v2348_v10, %v1594_v36  ;;  %v1615_v10 = vld [vmem:[#allocation2 + $0x100] sm:$0xff] }
 0x2eb   : > { %2555 = vst [vmem:[#allocation2 + $0x50] sm:$0xff] %v2491_v9 }
 0x2ec   : > { %2556 = vst [vmem:[#allocation2 + $0x58] sm:$0xff] %v2492_v12  ;;  %v1616_v12 = vld [vmem:[#allocation2 + $0x108] sm:$0xff] }
 0x2ee   : > { %v2352_v14 = vpop.f32.mrb[12].mxu0 }
 0x2ef   : > { %v2493_v17 = vadd.f32 %v2352_v14, %v1595_v11  ;;  %v2354_v24 = vpop.f32.mrb[13].mxu0 }
 0x2f0   : > { %v2494_v26 = vadd.f32 %v2354_v24, %v1596_v13  ;;  %v2356_v27 = vpop.f32.mrb[14].mxu0  ;;  %v1617_v13 = vld [vmem:[#allocation2 + $0x110] sm:$0xff] }
 0x2f1   : > { %2557 = vst [vmem:[#allocation2 + $0x60] sm:$0xff] %v2493_v17  ;;  %v2495_v30 = vadd.f32 %v2356_v27, %v1597_v15  ;;  %v2358_v31 = vpop.f32.mrb[15].mxu0  ;;  %v1618_v17 = vld [vmem:[#allocation2 + $0x118] sm:$0xff] }
 0x2f2   : > { %2558 = vst [vmem:[#allocation2 + $0x68] sm:$0xff] %v2494_v26  ;;  %v2496_v16 = vadd.f32 %v2358_v31, %v1598_v25  ;;  %v1619_v31 = vld [vmem:[#allocation2 + $0x120] sm:$0xff] }
 0x2f3   : > { %2559 = vst [vmem:[#allocation2 + $0x70] sm:$0xff] %v2495_v30 }
 0x2f4   : > { %2560 = vst [vmem:[#allocation2 + $0x78] sm:$0xff] %v2496_v16  ;;  %v1620_v16 = vld [vmem:[#allocation2 + $0x128] sm:$0xff] }
 0x2f6   : > { %v2362_v18 = vpop.f32.mrb[16].mxu0 }
 0x2f7   : > { %v2497_v21 = vadd.f32 %v2362_v18, %v1599_v7  ;;  %v2364_v34 = vpop.f32.mrb[17].mxu0 }
 0x2f8   : > { %v2498_v35 = vadd.f32 %v2364_v34, %v1600_v8  ;;  %v2366_v50 = vpop.f32.mrb[18].mxu0  ;;  %v1621_v8 = vld [vmem:[#allocation2 + $0x130] sm:$0xff] }
 0x2f9   : > { %2561 = vst [vmem:[#allocation2 + $0x80] sm:$0xff] %v2497_v21  ;;  %v2499_v51 = vadd.f32 %v2366_v50, %v1601_v20  ;;  %v2368_v4 = vpop.f32.mrb[19].mxu0  ;;  %v1622_v21 = vld [vmem:[#allocation2 + $0x138] sm:$0xff] }
 0x2fa   : > { %2562 = vst [vmem:[#allocation2 + $0x88] sm:$0xff] %v2498_v35  ;;  %v2500_v5 = vadd.f32 %v2368_v4, %v1602_v19  ;;  %v1623_v4 = vld [vmem:[#allocation2 + $0x140] sm:$0xff] }
 0x2fb   : > { %2563 = vst [vmem:[#allocation2 + $0x90] sm:$0xff] %v2499_v51 }
 0x2fc   : > { %2564 = vst [vmem:[#allocation2 + $0x98] sm:$0xff] %v2500_v5  ;;  %v1624_v5 = vld [vmem:[#allocation2 + $0x148] sm:$0xff] }
 0x2fe   : > { %v2372_v32 = vpop.f32.mrb[20].mxu0 }
 0x2ff   : > { %v2501_v37 = vadd.f32 %v2372_v32, %v1603_v22  ;;  %v2374_v38 = vpop.f32.mrb[21].mxu0 }
 0x300   : > { %v2502_v40 = vadd.f32 %v2374_v38, %v1604_v23  ;;  %v2376_v28 = vpop.f32.mrb[22].mxu0  ;;  %v1625_v23 = vld [vmem:[#allocation2 + $0x150] sm:$0xff] }
 0x301   : > { %2565 = vst [vmem:[#allocation2 + $0xa0] sm:$0xff] %v2501_v37  ;;  %v2503_v47 = vadd.f32 %v2376_v28, %v1605_v33  ;;  %v2378_v42 = vpop.f32.mrb[23].mxu0  ;;  %v1626_v37 = vld [vmem:[#allocation2 + $0x158] sm:$0xff] }
 0x302   : > { %2566 = vst [vmem:[#allocation2 + $0xa8] sm:$0xff] %v2502_v40  ;;  %v2504_v44 = vadd.f32 %v2378_v42, %v1606_v39  ;;  %v1627_v42 = vld [vmem:[#allocation2 + $0x160] sm:$0xff] }
 0x303   : > { %2567 = vst [vmem:[#allocation2 + $0xb0] sm:$0xff] %v2503_v47 }
 0x304   : > { %2568 = vst [vmem:[#allocation2 + $0xb8] sm:$0xff] %v2504_v44  ;;  %v1628_v44 = vld [vmem:[#allocation2 + $0x168] sm:$0xff] }
 0x306   : > { %v2382_v29 = vpop.f32.mrb[24].mxu0 }
 0x307   : > { %v2505_v48 = vadd.f32 %v2382_v29, %v1607_v53  ;;  %v2384_v49 = vpop.f32.mrb[25].mxu0 }
 0x308   : > { %v2506_v56 = vadd.f32 %v2384_v49, %v1608_v45  ;;  %v2386_v57 = vpop.f32.mrb[26].mxu0  ;;  %v1629_v45 = vld [vmem:[#allocation2 + $0x170] sm:$0xff] }
 0x309   : > { %2569 = vst [vmem:[#allocation2 + $0xc0] sm:$0xff] %v2505_v48  ;;  %v2507_v41 = vadd.f32 %v2386_v57, %v1609_v46  ;;  %v2388_v62 = vpop.f32.mrb[27].mxu0  ;;  %v1630_v48 = vld [vmem:[#allocation2 + $0x178] sm:$0xff] }
 0x30a   : > { %2570 = vst [vmem:[#allocation2 + $0xc8] sm:$0xff] %v2506_v56  ;;  %v2508_v58 = vadd.f32 %v2388_v62, %v1610_v55  ;;  %v1631_v62 = vld [vmem:[#allocation2 + $0x180] sm:$0xff] }
 0x30b   : > { %2571 = vst [vmem:[#allocation2 + $0xd0] sm:$0xff] %v2507_v41 }
 0x30c   : > { %2572 = vst [vmem:[#allocation2 + $0xd8] sm:$0xff] %v2508_v58  ;;  %v1632_v58 = vld [vmem:[#allocation2 + $0x188] sm:$0xff] }
 0x30e   : > { %v2392_v60 = vpop.f32.mrb[28].mxu0 }
 0x30f   : > { %v2509_v63 = vadd.f32 %v2392_v60, %v1611_v59  ;;  %v2394_v1 = vpop.f32.mrb[29].mxu0 }
 0x310   : > { %v2510_v2 = vadd.f32 %v2394_v1, %v1612_v0  ;;  %v2396_v36 = vpop.f32.mrb[30].mxu0  ;;  %v1633_v0 = vld [vmem:[#allocation2 + $0x190] sm:$0xff] }
 0x311   : > { %2573 = vst [vmem:[#allocation2 + $0xe0] sm:$0xff] %v2509_v63  ;;  %v2511_v3 = vadd.f32 %v2396_v36, %v1613_v61  ;;  %v2398_v6 = vpop.f32.mrb[31].mxu0  ;;  %v1634_v63 = vld [vmem:[#allocation2 + $0x198] sm:$0xff] }
 0x312   : > { %2574 = vst [vmem:[#allocation2 + $0xe8] sm:$0xff] %v2510_v2  ;;  %v2512_v9 = vadd.f32 %v2398_v6, %v1614_v52  ;;  %v1635_v6 = vld [vmem:[#allocation2 + $0x1a0] sm:$0xff] }
 0x313   : > { %2575 = vst [vmem:[#allocation2 + $0xf0] sm:$0xff] %v2511_v3 }
 0x314   : > { %2576 = vst [vmem:[#allocation2 + $0xf8] sm:$0xff] %v2512_v9  ;;  %v1636_v9 = vld [vmem:[#allocation2 + $0x1a8] sm:$0xff] }
 0x316   : > { %v2402_v11 = vpop.f32.mrb[32].mxu0 }
 0x317   : > { %v2513_v14 = vadd.f32 %v2402_v11, %v1615_v10  ;;  %v2404_v15 = vpop.f32.mrb[33].mxu0 }
 0x318   : > { %v2514_v24 = vadd.f32 %v2404_v15, %v1616_v12  ;;  %v2406_v25 = vpop.f32.mrb[34].mxu0  ;;  %v1637_v12 = vld [vmem:[#allocation2 + $0x1b0] sm:$0xff] }
 0x319   : > { %2577 = vst [vmem:[#allocation2 + $0x100] sm:$0xff] %v2513_v14  ;;  %v2515_v26 = vadd.f32 %v2406_v25, %v1617_v13  ;;  %v2408_v27 = vpop.f32.mrb[35].mxu0  ;;  %v1638_v14 = vld [vmem:[#allocation2 + $0x1b8] sm:$0xff] }
 0x31a   : > { %2578 = vst [vmem:[#allocation2 + $0x108] sm:$0xff] %v2514_v24  ;;  %v2516_v30 = vadd.f32 %v2408_v27, %v1618_v17  ;;  %v1639_v27 = vld [vmem:[#allocation2 + $0x1c0] sm:$0xff] }
 0x31b   : > { %2579 = vst [vmem:[#allocation2 + $0x110] sm:$0xff] %v2515_v26 }
 0x31c   : > { %2580 = vst [vmem:[#allocation2 + $0x118] sm:$0xff] %v2516_v30  ;;  %v1640_v30 = vld [vmem:[#allocation2 + $0x1c8] sm:$0xff] }
 0x31e   : > { %v2412_v7 = vpop.f32.mrb[36].mxu0 }
 0x31f   : > { %v2517_v18 = vadd.f32 %v2412_v7, %v1619_v31  ;;  %v2414_v20 = vpop.f32.mrb[37].mxu0 }
 0x320   : > { %v2518_v34 = vadd.f32 %v2414_v20, %v1620_v16  ;;  %v2416_v19 = vpop.f32.mrb[38].mxu0  ;;  %v1641_v16 = vld [vmem:[#allocation2 + $0x1d0] sm:$0xff] }
 0x321   : > { %2581 = vst [vmem:[#allocation2 + $0x120] sm:$0xff] %v2517_v18  ;;  %v2519_v35 = vadd.f32 %v2416_v19, %v1621_v8  ;;  %v2418_v50 = vpop.f32.mrb[39].mxu0  ;;  %v1642_v18 = vld [vmem:[#allocation2 + $0x1d8] sm:$0xff] }
 0x322   : > { %2582 = vst [vmem:[#allocation2 + $0x128] sm:$0xff] %v2518_v34  ;;  %v2520_v51 = vadd.f32 %v2418_v50, %v1622_v21  ;;  %v1643_v50 = vld [vmem:[#allocation2 + $0x1e0] sm:$0xff] }
 0x323   : > { %2583 = vst [vmem:[#allocation2 + $0x130] sm:$0xff] %v2519_v35 }
 0x324   : > { %2584 = vst [vmem:[#allocation2 + $0x138] sm:$0xff] %v2520_v51  ;;  %v1644_v51 = vld [vmem:[#allocation2 + $0x1e8] sm:$0xff] }
 0x326   : > { %v2422_v22 = vpop.f32.mrb[40].mxu0 }
 0x327   : > { %v2521_v32 = vadd.f32 %v2422_v22, %v1623_v4  ;;  %v2424_v33 = vpop.f32.mrb[41].mxu0 }
 0x328   : > { %v2522_v38 = vadd.f32 %v2424_v33, %v1624_v5  ;;  %v2426_v39 = vpop.f32.mrb[42].mxu0  ;;  %v1645_v5 = vld [vmem:[#allocation2 + $0x1f0] sm:$0xff] }
 0x329   : > { %2585 = vst [vmem:[#allocation2 + $0x140] sm:$0xff] %v2521_v32  ;;  %v2523_v40 = vadd.f32 %v2426_v39, %v1625_v23  ;;  %v2428_v28 = vpop.f32.mrb[43].mxu0  ;;  %v1646_v32 = vld [vmem:[#allocation2 + $0x1f8] sm:$0xff] }
 0x32a   : > { %2586 = vst [vmem:[#allocation2 + $0x148] sm:$0xff] %v2522_v38  ;;  %v2524_v47 = vadd.f32 %v2428_v28, %v1626_v37 }
 0x32b   : > { %2587 = vst [vmem:[#allocation2 + $0x150] sm:$0xff] %v2523_v40 }
 0x32c   : > { %2588 = vst [vmem:[#allocation2 + $0x158] sm:$0xff] %v2524_v47 }
 0x32e   : > { %v2432_v53 = vpop.f32.mrb[44].mxu0 }
 0x32f   : > { %v2525_v29 = vadd.f32 %v2432_v53, %v1627_v42  ;;  %v2434_v46 = vpop.f32.mrb[45].mxu0 }
 0x330   : > { %v2526_v49 = vadd.f32 %v2434_v46, %v1628_v44  ;;  %v2436_v55 = vpop.f32.mrb[46].mxu0 }
 0x331   : > { %2589 = vst [vmem:[#allocation2 + $0x160] sm:$0xff] %v2525_v29  ;;  %v2527_v56 = vadd.f32 %v2436_v55, %v1629_v45  ;;  %v2438_v57 = vpop.f32.mrb[47].mxu0 }
 0x332   : > { %2590 = vst [vmem:[#allocation2 + $0x168] sm:$0xff] %v2526_v49  ;;  %v2528_v41 = vadd.f32 %v2438_v57, %v1630_v48 }
 0x333   : > { %2591 = vst [vmem:[#allocation2 + $0x170] sm:$0xff] %v2527_v56 }
 0x334   : > { %2592 = vst [vmem:[#allocation2 + $0x178] sm:$0xff] %v2528_v41 }
 0x336   : > { %v2442_v59 = vpop.f32.mrb[48].mxu0 }
 0x337   : > { %v2529_v60 = vadd.f32 %v2442_v59, %v1631_v62  ;;  %v2444_v61 = vpop.f32.mrb[49].mxu0 }
 0x338   : > { %v2530_v1 = vadd.f32 %v2444_v61, %v1632_v58  ;;  %v2446_v52 = vpop.f32.mrb[50].mxu0 }
 0x339   : > { %2593 = vst [vmem:[#allocation2 + $0x180] sm:$0xff] %v2529_v60  ;;  %v2531_v2 = vadd.f32 %v2446_v52, %v1633_v0  ;;  %v2448_v36 = vpop.f32.mrb[51].mxu0 }
 0x33a   : > { %2594 = vst [vmem:[#allocation2 + $0x188] sm:$0xff] %v2530_v1  ;;  %v2532_v3 = vadd.f32 %v2448_v36, %v1634_v63 }
 0x33b   : > { %2595 = vst [vmem:[#allocation2 + $0x190] sm:$0xff] %v2531_v2 }
 0x33c   : > { %2596 = vst [vmem:[#allocation2 + $0x198] sm:$0xff] %v2532_v3 }
 0x33e   : > { %v2452_v10 = vpop.f32.mrb[52].mxu0 }
 0x33f   : > { %v2533_v11 = vadd.f32 %v2452_v10, %v1635_v6  ;;  %v2454_v13 = vpop.f32.mrb[53].mxu0 }
 0x340   : > { %v2534_v15 = vadd.f32 %v2454_v13, %v1636_v9  ;;  %v2456_v17 = vpop.f32.mrb[54].mxu0 }
 0x341   : > { %2597 = vst [vmem:[#allocation2 + $0x1a0] sm:$0xff] %v2533_v11  ;;  %v2535_v24 = vadd.f32 %v2456_v17, %v1637_v12  ;;  %v2458_v25 = vpop.f32.mrb[55].mxu0 }
 0x342   : > { %2598 = vst [vmem:[#allocation2 + $0x1a8] sm:$0xff] %v2534_v15  ;;  %v2536_v26 = vadd.f32 %v2458_v25, %v1638_v14 }
 0x343   : > { %2599 = vst [vmem:[#allocation2 + $0x1b0] sm:$0xff] %v2535_v24 }
 0x344   : > { %2600 = vst [vmem:[#allocation2 + $0x1b8] sm:$0xff] %v2536_v26 }
 0x346   : > { %v2462_v31 = vpop.f32.mrb[56].mxu0 }
 0x347   : > { %v2537_v7 = vadd.f32 %v2462_v31, %v1639_v27  ;;  %v2464_v8 = vpop.f32.mrb[57].mxu0 }
 0x348   : > { %v2538_v20 = vadd.f32 %v2464_v8, %v1640_v30  ;;  %v2466_v21 = vpop.f32.mrb[58].mxu0 }
 0x349   : > { %2601 = vst [vmem:[#allocation2 + $0x1c0] sm:$0xff] %v2537_v7  ;;  %v2539_v34 = vadd.f32 %v2466_v21, %v1641_v16  ;;  %v2468_v19 = vpop.f32.mrb[59].mxu0 }
 0x34a   : > { %2602 = vst [vmem:[#allocation2 + $0x1c8] sm:$0xff] %v2538_v20  ;;  %v2540_v35 = vadd.f32 %v2468_v19, %v1642_v18 }
 0x34b   : > { %2603 = vst [vmem:[#allocation2 + $0x1d0] sm:$0xff] %v2539_v34 }
 0x34c   : > { %2604 = vst [vmem:[#allocation2 + $0x1d8] sm:$0xff] %v2540_v35 }
 0x34e   : > { %v2472_v4 = vpop.f32.mrb[60].mxu0  ;;  %2612 = sbr.rel (%p3857_p12) target bundleno = 1251 (0x4e3), region = 79 }
 0x34f   : > { %v2541_v22 = vadd.f32 %v2472_v4, %v1643_v50  ;;  %v2474_v23 = vpop.f32.mrb[61].mxu0 }
 0x350   : > { %v2542_v33 = vadd.f32 %v2474_v23, %v1644_v51  ;;  %v2476_v37 = vpop.f32.mrb[62].mxu0 }
 0x351   : > { %2605 = vst [vmem:[#allocation2 + $0x1e0] sm:$0xff] %v2541_v22  ;;  %v2543_v38 = vadd.f32 %v2476_v37, %v1645_v5  ;;  %v2478_v39 = vpop.f32.mrb[63].mxu0 }
 0x352   : > { %2606 = vst [vmem:[#allocation2 + $0x1e8] sm:$0xff] %v2542_v33  ;;  %v2544_v40 = vadd.f32 %v2478_v39, %v1646_v32 }
 0x353   : > { %2607 = vst [vmem:[#allocation2 + $0x1f0] sm:$0xff] %v2543_v38 }
 0x354   : > { %2608 = vst [vmem:[#allocation2 + $0x1f8] sm:$0xff] %v2544_v40 }
 0x355   : > { %v2613_v28 = vld [vmem:[#allocation2] sm:$0xff]  ;;  %v2614_v47 = vld [vmem:[#allocation2 + $0x8] sm:$0xff]  ;;  %v2615_v58 = vld [vmem:[#allocation2 + $0x10] sm:$0xff] }
 0x356   : > { %v2677_v42 = vld [vmem:[%s6249_s4] sm:$0x3]  ;;  %v2754_v29 = vld [vmem:[%s6245_s0 + $0x8] sm:$0xff]  ;;  %v2616_v59 = vld [vmem:[#allocation2 + $0x18] sm:$0xff] }
 0x357   : > { %v5219_v44 = vrot.slane %v2677_v42, %v5016_v43  ;;  %v5222_v53 = vrot.slane %v2677_v42, %v5026_v54  ;;  %v2753_v45 = vld [vmem:[%s6245_s0] sm:$0xff]  ;;  %v2618_v48 = vld [vmem:[#allocation2 + $0x28] sm:$0xff]  ;;  %v2755_v0 = vld [vmem:[%s6245_s0 + $0x10] sm:$0xff] }
 0x358   : > { %v2617_v46 = vld [vmem:[#allocation2 + $0x20] sm:$0xff]  ;;  %v2758_v55 = vld [vmem:[%s6245_s0 + $0x28] sm:$0xff]  ;;  %v2756_v63 = vld [vmem:[%s6245_s0 + $0x18] sm:$0xff] }
 0x359   : > { %v2757_v49 = vld [vmem:[%s6245_s0 + $0x20] sm:$0xff]  ;;  %v2689_v56 = vadd.f32 %v5219_v44, %v2613_v28  ;;  %v2690_v57 = vadd.f32 %v5222_v53, %v2614_v47  ;;  %v2693_v41 = vadd.f32 %v5219_v44, %v2617_v46  ;;  %v2694_v62 = vadd.f32 %v5222_v53, %v2618_v48  ;;  %v2619_v1 = vld [vmem:[#allocation2 + $0x30] sm:$0xff]  ;;  %v2620_v52 = vld [vmem:[#allocation2 + $0x38] sm:$0xff] }
 0x35a   : > { %v2691_v60 = vadd.f32 %v5219_v44, %v2615_v58  ;;  %v2692_v61 = vadd.f32 %v5222_v53, %v2616_v59  ;;  %v2759_v9 = vld [vmem:[%s6245_s0 + $0x30] sm:$0xff]  ;;  %v2760_v10 = vld [vmem:[%s6245_s0 + $0x38] sm:$0xff]  ;;  %v2621_v12 = vld [vmem:[#allocation2 + $0x40] sm:$0xff]  ;;  %v2695_v14 = vadd.f32 %v5219_v44, %v2619_v1  ;;  %v2696_v15 = vadd.f32 %v5222_v53, %v2620_v52 }
 0x35b   : > { %v5248_v2 = vadd.f32 %v2753_v45, %v2689_v56  ;;  %v5250_v36 = vadd.f32 %v2754_v29, %v2690_v57  ;;  %v5252_v3 = vadd.f32 %v2757_v49, %v2693_v41  ;;  %v5254_v6 = vadd.f32 %v2758_v55, %v2694_v62  ;;  %v2622_v17 = vld [vmem:[#allocation2 + $0x48] sm:$0xff]  ;;  %v2761_v24 = vld [vmem:[%s6245_s0 + $0x40] sm:$0xff]  ;;  %v2623_v16 = vld [vmem:[#allocation2 + $0x50] sm:$0xff] }
 0x35c   : > { %v5262_v11 = vadd.f32 %v2755_v0, %v2691_v60  ;;  %v5264_v13 = vadd.f32 %v2756_v63, %v2692_v61  ;;  %v2762_v25 = vld [vmem:[%s6245_s0 + $0x48] sm:$0xff]  ;;  %v2697_v30 = vadd.f32 %v5219_v44, %v2621_v12  ;;  %v2698_v31 = vadd.f32 %v5222_v53, %v2622_v17  ;;  %v2624_v7 = vld [vmem:[#allocation2 + $0x58] sm:$0xff]  ;;  %v2763_v8 = vld [vmem:[%s6245_s0 + $0x50] sm:$0xff] }
 0x35d   : > { %v2881_v26 = vadd.f32 %v5250_v36, %v5248_v2  ;;  %v2887_v27 = vadd.f32 %v5254_v6, %v5252_v3  ;;  %v5285_v20 = vadd.f32 %v2759_v9, %v2695_v14  ;;  %v5287_v21 = vadd.f32 %v2760_v10, %v2696_v15  ;;  %v2764_v19 = vld [vmem:[%s6245_s0 + $0x58] sm:$0xff]  ;;  %v2625_v35 = vld [vmem:[#allocation2 + $0x60] sm:$0xff]  ;;  %v2626_v50 = vld [vmem:[#allocation2 + $0x68] sm:$0xff] }
 0x35e   : > { %v2884_v18 = vadd.f32 %v5264_v13, %v5262_v11  ;;  %v2699_v34 = vadd.f32 %v5219_v44, %v2623_v16  ;;  %v5293_v51 = vadd.f32 %v2761_v24, %v2697_v30  ;;  %v5295_v4 = vadd.f32 %v2762_v25, %v2698_v31  ;;  %v2765_v22 = vld [vmem:[%s6245_s0 + $0x60] sm:$0xff]  ;;  %v2766_v23 = vld [vmem:[%s6245_s0 + $0x68] sm:$0xff]  ;;  %v2627_v32 = vld [vmem:[#allocation2 + $0x70] sm:$0xff] }
 0x35f   : > { %2882 = vadd.xlane.f32.xlu0 %v2881_v26  ;;  %2888 = vadd.xlane.f32.xlu1 %v2887_v27  ;;  %v2700_v5 = vadd.f32 %v5222_v53, %v2624_v7  ;;  %v2890_v33 = vadd.f32 %v5287_v21, %v5285_v20  ;;  %v2701_v38 = vadd.f32 %v5219_v44, %v2625_v35  ;;  %v2628_v40 = vld [vmem:[#allocation2 + $0x78] sm:$0xff]  ;;  %v2767_v28 = vld [vmem:[%s6245_s0 + $0x70] sm:$0xff]  ;;  %v2629_v48 = vld [vmem:[#allocation2 + $0x80] sm:$0xff] }
 0x360   : > { %v5306_v37 = vadd.f32 %v2763_v8, %v2699_v34  ;;  %v2702_v39 = vadd.f32 %v5222_v53, %v2626_v50  ;;  %v2768_v47 = vld [vmem:[%s6245_s0 + $0x78] sm:$0xff]  ;;  %v2893_v42 = vadd.f32 %v5295_v4, %v5293_v51  ;;  %v2703_v29 = vadd.f32 %v5219_v44, %v2627_v32  ;;  %v2630_v49 = vld [vmem:[#allocation2 + $0x88] sm:$0xff]  ;;  %v2769_v62 = vld [vmem:[%s6245_s0 + $0x80] sm:$0xff] }
 0x361   : > { %v5318_v45 = vadd.f32 %v2764_v19, %v2700_v5  ;;  %v2704_v46 = vadd.f32 %v5222_v53, %v2628_v40  ;;  %v5322_v55 = vadd.f32 %v2765_v22, %v2701_v38  ;;  %v2705_v57 = vadd.f32 %v5219_v44, %v2629_v48  ;;  %v2631_v58 = vld [vmem:[#allocation2 + $0x90] sm:$0xff]  ;;  %v2632_v59 = vld [vmem:[#allocation2 + $0x98] sm:$0xff]  ;;  %v2770_v63 = vld [vmem:[%s6245_s0 + $0x88] sm:$0xff] }
 0x362   : > { %v5324_v56 = vadd.f32 %v2766_v23, %v2702_v39  ;;  %v2706_v41 = vadd.f32 %v5222_v53, %v2630_v49  ;;  %v5333_v60 = vadd.f32 %v2767_v28, %v2703_v29  ;;  %v2771_v1 = vld [vmem:[%s6245_s0 + $0x90] sm:$0xff]  ;;  %v2633_v52 = vld [vmem:[#allocation2 + $0xa0] sm:$0xff]  ;;  %v2707_v9 = vadd.f32 %v5219_v44, %v2631_v58  ;;  %v2772_v10 = vld [vmem:[%s6245_s0 + $0x98] sm:$0xff] }
 0x363   : > { %2885 = vadd.xlane.f32.xlu0 %v2884_v18  ;;  %2891 = vadd.xlane.f32.xlu1 %v2890_v33  ;;  %v2896_v0 = vadd.f32 %v5318_v45, %v5306_v37  ;;  %v5335_v61 = vadd.f32 %v2768_v47, %v2704_v46  ;;  %v2634_v12 = vld [vmem:[#allocation2 + $0xa8] sm:$0xff]  ;;  %v2773_v14 = vld [vmem:[%s6245_s0 + $0xa0] sm:$0xff]  ;;  %v2708_v17 = vadd.f32 %v5222_v53, %v2632_v59  ;;  %v2635_v27 = vld [vmem:[#allocation2 + $0xb0] sm:$0xff] }
 0x364   : > { %v2899_v15 = vadd.f32 %v5324_v56, %v5322_v55  ;;  %v2709_v24 = vadd.f32 %v5219_v44, %v2633_v52  ;;  %v2710_v25 = vadd.f32 %v5222_v53, %v2634_v12  ;;  %v2774_v26 = vld [vmem:[%s6245_s0 + $0xa8] sm:$0xff]  ;;  %v2636_v30 = vld [vmem:[#allocation2 + $0xb8] sm:$0xff]  ;;  %v5358_v31 = vadd.f32 %v2769_v62, %v2705_v57  ;;  %v2775_v18 = vld [vmem:[%s6245_s0 + $0xb0] sm:$0xff] }
 0x365   : > { %v5360_v16 = vadd.f32 %v2770_v63, %v2706_v41  ;;  %v2711_v7 = vadd.f32 %v5219_v44, %v2635_v27  ;;  %v2712_v8 = vadd.f32 %v5222_v53, %v2636_v30  ;;  %v2776_v34 = vld [vmem:[%s6245_s0 + $0xb8] sm:$0xff]  ;;  %v2637_v19 = vld [vmem:[#allocation2 + $0xc0] sm:$0xff]  ;;  %v2902_v35 = vadd.f32 %v5335_v61, %v5333_v60  ;;  %v2638_v22 = vld [vmem:[#allocation2 + $0xc8] sm:$0xff] }
 0x366   : > { %v5372_v50 = vadd.f32 %v2771_v1, %v2707_v9  ;;  %v5374_v5 = vadd.f32 %v2772_v10, %v2708_v17  ;;  %v2639_v23 = vld [vmem:[#allocation2 + $0xd0] sm:$0xff]  ;;  %v5376_v32 = vadd.f32 %v2773_v14, %v2709_v24  ;;  %v2640_v33 = vld [vmem:[#allocation2 + $0xd8] sm:$0xff]  ;;  %v5378_v38 = vadd.f32 %v2774_v26, %v2710_v25  ;;  %v2778_v29 = vld [vmem:[%s6245_s0 + $0xc8] sm:$0xff] }
 0x367   : > { %2894 = vadd.xlane.f32.xlu0 %v2893_v42  ;;  %2897 = vadd.xlane.f32.xlu1 %v2896_v0  ;;  %v5380_v39 = vadd.f32 %v2775_v18, %v2711_v7  ;;  %v5382_v40 = vadd.f32 %v2776_v34, %v2712_v8  ;;  %v2713_v28 = vadd.f32 %v5219_v44, %v2637_v19  ;;  %v2777_v42 = vld [vmem:[%s6245_s0 + $0xc0] sm:$0xff]  ;;  %v2779_v41 = vld [vmem:[%s6245_s0 + $0xd0] sm:$0xff]  ;;  %v2780_v62 = vld [vmem:[%s6245_s0 + $0xd8] sm:$0xff] }
 0x368   : > { %v2714_v47 = vadd.f32 %v5222_v53, %v2638_v22  ;;  %v2715_v46 = vadd.f32 %v5219_v44, %v2639_v23  ;;  %v2716_v48 = vadd.f32 %v5222_v53, %v2640_v33  ;;  %v2905_v49 = vadd.f32 %v5360_v16, %v5358_v31  ;;  %v2641_v58 = vld [vmem:[#allocation2 + $0xe0] sm:$0xff]  ;;  %v2642_v59 = vld [vmem:[#allocation2 + $0xe8] sm:$0xff]  ;;  %v2643_v0 = vld [vmem:[#allocation2 + $0xf0] sm:$0xff] }
 0x369   : > { %v2908_v57 = vadd.f32 %v5374_v5, %v5372_v50  ;;  %v2644_v63 = vld [vmem:[#allocation2 + $0xf8] sm:$0xff]  ;;  %v2911_v1 = vadd.f32 %v5378_v38, %v5376_v32  ;;  %v2914_v52 = vadd.f32 %v5382_v40, %v5380_v39  ;;  %v5408_v9 = vadd.f32 %v2777_v42, %v2713_v28  ;;  %v2645_v10 = vld [vmem:[#allocation2 + $0x100] sm:$0xff]  ;;  %v2646_v24 = vld [vmem:[#allocation2 + $0x108] sm:$0xff] }
 0x36a   : > { %v5410_v12 = vadd.f32 %v2778_v29, %v2714_v47  ;;  %v5412_v14 = vadd.f32 %v2779_v41, %v2715_v46  ;;  %v2717_v17 = vadd.f32 %v5219_v44, %v2641_v58  ;;  %v2647_v25 = vld [vmem:[#allocation2 + $0x110] sm:$0xff]  ;;  %v2648_v26 = vld [vmem:[#allocation2 + $0x118] sm:$0xff]  ;;  %v2718_v27 = vadd.f32 %v5222_v53, %v2642_v59  ;;  %v2781_v30 = vld [vmem:[%s6245_s0 + $0xe0] sm:$0xff] }
 0x36b   : > { %2900 = vadd.xlane.f32.xlu0 %v2899_v15  ;;  %2903 = vadd.xlane.f32.xlu1 %v2902_v35  ;;  %v5414_v15 = vadd.f32 %v2780_v62, %v2716_v48  ;;  %v2719_v7 = vadd.f32 %v5219_v44, %v2643_v0  ;;  %v2720_v8 = vadd.f32 %v5222_v53, %v2644_v63  ;;  %v2782_v18 = vld [vmem:[%s6245_s0 + $0xe8] sm:$0xff]  ;;  %v2783_v34 = vld [vmem:[%s6245_s0 + $0xf0] sm:$0xff]  ;;  %v2784_v19 = vld [vmem:[%s6245_s0 + $0xf8] sm:$0xff] }
 0x36c   : > { %v2721_v35 = vadd.f32 %v5219_v44, %v2645_v10  ;;  %v2722_v22 = vadd.f32 %v5222_v53, %v2646_v24  ;;  %v2785_v23 = vld [vmem:[%s6245_s0 + $0x100] sm:$0xff]  ;;  %v2786_v33 = vld [vmem:[%s6245_s0 + $0x108] sm:$0xff]  ;;  %v2723_v28 = vadd.f32 %v5219_v44, %v2647_v25  ;;  %v2724_v47 = vadd.f32 %v5222_v53, %v2648_v26  ;;  %v2787_v48 = vld [vmem:[%s6245_s0 + $0x110] sm:$0xff] }
 0x36d   : > { %v2917_v42 = vadd.f32 %v5410_v12, %v5408_v9  ;;  %v2920_v29 = vadd.f32 %v5414_v15, %v5412_v14  ;;  %v5446_v46 = vadd.f32 %v2781_v30, %v2717_v17  ;;  %v5454_v41 = vadd.f32 %v2782_v18, %v2718_v27  ;;  %v2650_v59 = vld [vmem:[#allocation2 + $0x128] sm:$0xff]  ;;  %v2651_v0 = vld [vmem:[#allocation2 + $0x130] sm:$0xff]  ;;  %v2652_v10 = vld [vmem:[#allocation2 + $0x138] sm:$0xff] }
 0x36e   : > { %v5456_v62 = vadd.f32 %v2783_v34, %v2719_v7  ;;  %v5458_v58 = vadd.f32 %v2784_v19, %v2720_v8  ;;  %v5460_v63 = vadd.f32 %v2785_v23, %v2721_v35  ;;  %v5462_v17 = vadd.f32 %v2786_v33, %v2722_v22  ;;  %v2789_v26 = vld [vmem:[%s6245_s0 + $0x120] sm:$0xff]  ;;  %v2790_v27 = vld [vmem:[%s6245_s0 + $0x128] sm:$0xff]  ;;  %v2791_v34 = vld [vmem:[%s6245_s0 + $0x130] sm:$0xff] }
 0x36f   : > { %2906 = vadd.xlane.f32.xlu0 %v2905_v49  ;;  %2909 = vadd.xlane.f32.xlu1 %v2908_v57  ;;  %v2788_v49 = vld [vmem:[%s6245_s0 + $0x118] sm:$0xff]  ;;  %v2649_v57 = vld [vmem:[#allocation2 + $0x120] sm:$0xff]  ;;  %v5464_v24 = vadd.f32 %v2787_v48, %v2723_v28  ;;  %v2727_v30 = vadd.f32 %v5219_v44, %v2651_v0  ;;  %v2923_v7 = vadd.f32 %v5454_v41, %v5446_v46  ;;  %v2654_v35 = vld [vmem:[#allocation2 + $0x148] sm:$0xff] }
 0x370   : > { %6296 = vst [vmem:[#allocation9_spill] sm:$0xff] %v5460_v63  ;;  %6297 = vst [vmem:[#allocation10_spill] sm:$0xff] %v5462_v17  ;;  %v5466_v25 = vadd.f32 %v2788_v49, %v2724_v47  ;;  %v2926_v8 = vadd.f32 %v5458_v58, %v5456_v62  ;;  %v2728_v18 = vadd.f32 %v5222_v53, %v2652_v10  ;;  %v2653_v19 = vld [vmem:[#allocation2 + $0x140] sm:$0xff]  ;;  %v2792_v22 = vld [vmem:[%s6245_s0 + $0x138] sm:$0xff] }
 0x371   : > { %6298 = vst [vmem:[#allocation11_spill] sm:$0xff] %v5464_v24  ;;  %v2655_v23 = vld [vmem:[#allocation2 + $0x150] sm:$0xff]  ;;  %v2656_v33 = vld [vmem:[#allocation2 + $0x158] sm:$0xff]  ;;  %v2929_v28 = vadd.f32 %v5462_v17, %v5460_v63  ;;  %v5496_v48 = vadd.f32 %v2791_v34, %v2727_v30  ;;  %v2729_v49 = vadd.f32 %v5219_v44, %v2653_v19  ;;  %v2658_v0 = vld [vmem:[#allocation2 + $0x168] sm:$0xff] }
 0x372   : > { %6299 = vst [vmem:[#allocation12_spill] sm:$0xff] %v5466_v25  ;;  %v2932_v47 = vadd.f32 %v5466_v25, %v5464_v24  ;;  %v2659_v10 = vld [vmem:[#allocation2 + $0x170] sm:$0xff]  ;;  %v5500_v54 = vadd.f32 %v2792_v22, %v2728_v18  ;;  %v2660_v30 = vld [vmem:[#allocation2 + $0x178] sm:$0xff]  ;;  %v2734_v34 = vadd.f32 %v5222_v53, %v2658_v0  ;;  %v2797_v19 = vld [vmem:[%s6245_s0 + $0x160] sm:$0xff] }
 0x373   : > { %2912 = vadd.xlane.f32.xlu0 %v2911_v1  ;;  %2915 = vadd.xlane.f32.xlu1 %v2914_v52  ;;  %v2725_v1 = vadd.f32 %v5219_v44, %v2649_v57  ;;  %v2726_v52 = vadd.f32 %v5222_v53, %v2650_v59  ;;  %v2730_v57 = vadd.f32 %v5222_v53, %v2654_v35  ;;  %v2657_v59 = vld [vmem:[#allocation2 + $0x160] sm:$0xff]  ;;  %v2798_v43 = vld [vmem:[%s6245_s0 + $0x168] sm:$0xff]  ;;  %v2799_v0 = vld [vmem:[%s6245_s0 + $0x170] sm:$0xff] }
 0x374   : > { %v2733_v18 = vadd.f32 %v5219_v44, %v2657_v59  ;;  %v2735_v35 = vadd.f32 %v5219_v44, %v2659_v10  ;;  %v2736_v59 = vadd.f32 %v5222_v53, %v2660_v30  ;;  %v2800_v10 = vld [vmem:[%s6245_s0 + $0x178] sm:$0xff]  ;;  %v2663_v30 = vld [vmem:[#allocation2 + $0x190] sm:$0xff]  ;;  %v5546_v24 = vadd.f32 %v2798_v43, %v2734_v34 }
 0x376   : > { %v5544_v25 = vadd.f32 %v2797_v19, %v2733_v18  ;;  %6306 = vst [vmem:[#allocation19_spill] sm:$0xff] %v5546_v24  ;;  %v5548_v17 = vadd.f32 %v2799_v0, %v2735_v35  ;;  %v5550_v63 = vadd.f32 %v2800_v10, %v2736_v59  ;;  %v2801_v18 = vld [vmem:[%s6245_s0 + $0x180] sm:$0xff]  ;;  %v2803_v19 = vld [vmem:[%s6245_s0 + $0x190] sm:$0xff]  ;;  %v2804_v35 = vld [vmem:[%s6245_s0 + $0x198] sm:$0xff] }
 0x377   : > { %2918 = vadd.xlane.f32.xlu0 %v2917_v42  ;;  %2921 = vadd.xlane.f32.xlu1 %v2920_v29  ;;  %v5492_v42 = vadd.f32 %v2789_v26, %v2725_v1  ;;  %v5494_v29 = vadd.f32 %v2790_v27, %v2726_v52  ;;  %v2793_v1 = vld [vmem:[%s6245_s0 + $0x140] sm:$0xff]  ;;  %v2794_v52 = vld [vmem:[%s6245_s0 + $0x148] sm:$0xff]  ;;  %v2731_v26 = vadd.f32 %v5219_v44, %v2655_v23  ;;  %v2668_v59 = vld [vmem:[#allocation2 + $0x1b8] sm:$0xff] }
 0x378   : > { %v2732_v27 = vadd.f32 %v5222_v53, %v2656_v33  ;;  %v5524_v23 = vadd.f32 %v2793_v1, %v2729_v49  ;;  %v5526_v33 = vadd.f32 %v2794_v52, %v2730_v57  ;;  %v2938_v49 = vadd.f32 %v5500_v54, %v5496_v48  ;;  %v2661_v52 = vld [vmem:[#allocation2 + $0x180] sm:$0xff]  ;;  %6305 = vst [vmem:[#allocation18_spill] sm:$0xff] %v5544_v25 }
 0x379   : > { %6300 = vst [vmem:[#allocation13_spill] sm:$0xff] %v5492_v42  ;;  %6301 = vst [vmem:[#allocation14_spill] sm:$0xff] %v5494_v29  ;;  %v2935_v22 = vadd.f32 %v5494_v29, %v5492_v42  ;;  %v2662_v29 = vld [vmem:[#allocation2 + $0x188] sm:$0xff]  ;;  %v2664_v42 = vld [vmem:[#allocation2 + $0x198] sm:$0xff]  ;;  %v2947_v0 = vadd.f32 %v5546_v24, %v5544_v25 }
 0x37a   : > { %6302 = vst [vmem:[#allocation15_spill] sm:$0xff] %v5526_v33  ;;  %6307 = vst [vmem:[#allocation20_spill] sm:$0xff] %v5548_v17  ;;  %v2740_v34 = vadd.f32 %v5222_v53, %v2664_v42  ;;  %v2805_v42 = vld [vmem:[%s6245_s0 + $0x1a0] sm:$0xff]  ;;  %v2806_v24 = vld [vmem:[%s6245_s0 + $0x1a8] sm:$0xff] }
 0x37b   : > { %2924 = vadd.xlane.f32.xlu0 %v2923_v7  ;;  %2927 = vadd.xlane.f32.xlu1 %v2926_v8  ;;  %v2795_v7 = vld [vmem:[%s6245_s0 + $0x150] sm:$0xff]  ;;  %v2796_v8 = vld [vmem:[%s6245_s0 + $0x158] sm:$0xff]  ;;  %6308 = vst [vmem:[#allocation21_spill] sm:$0xff] %v5550_v63  ;;  %v2670_v25 = vld [vmem:[#allocation2 + $0x1c8] sm:$0xff] }
 0x37c   : > { %v5540_v57 = vadd.f32 %v2795_v7, %v2731_v26  ;;  %v5542_v1 = vadd.f32 %v2796_v8, %v2732_v27  ;;  %v2739_v26 = vadd.f32 %v5219_v44, %v2663_v30  ;;  %v2665_v27 = vld [vmem:[#allocation2 + $0x1a0] sm:$0xff]  ;;  %v2666_v7 = vld [vmem:[#allocation2 + $0x1a8] sm:$0xff]  ;;  %v2941_v8 = vadd.f32 %v5526_v33, %v5524_v23 }
 0x37d   : > { %v2741_v10 = vadd.f32 %v5219_v44, %v2665_v27  ;;  %v2669_v27 = vld [vmem:[#allocation2 + $0x1c0] sm:$0xff] }
 0x37e   : > { %6303 = vst [vmem:[#allocation16_spill] sm:$0xff] %v5540_v57  ;;  %6304 = vst [vmem:[#allocation17_spill] sm:$0xff] %v5542_v1  ;;  %v2944_v43 = vadd.f32 %v5542_v1, %v5540_v57  ;;  %v5585_v57 = vadd.f32 %v2803_v19, %v2739_v26  ;;  %v2808_v26 = vld [vmem:[%s6245_s0 + $0x1b8] sm:$0xff] }
 0x37f   : > { %2930 = vadd.xlane.f32.xlu0 %v2929_v28  ;;  %2933 = vadd.xlane.f32.xlu1 %v2932_v47  ;;  %v2737_v28 = vadd.f32 %v5219_v44, %v2661_v52  ;;  %v2738_v47 = vadd.f32 %v5222_v53, %v2662_v29  ;;  %v2802_v29 = vld [vmem:[%s6245_s0 + $0x188] sm:$0xff]  ;;  %v2950_v52 = vadd.f32 %v5550_v63, %v5548_v17 }
 0x380   : > { %v2744_v63 = vadd.f32 %v5222_v53, %v2668_v59 }
 0x381   : > { %v5581_v30 = vadd.f32 %v2801_v18, %v2737_v28  ;;  %v5583_v1 = vadd.f32 %v2802_v29, %v2738_v47  ;;  %v2671_v28 = vld [vmem:[#allocation2 + $0x1d0] sm:$0xff]  ;;  %v2672_v18 = vld [vmem:[#allocation2 + $0x1d8] sm:$0xff]  ;;  %v5600_v29 = vadd.f32 %v2805_v42, %v2741_v10 }
 0x382   : > { %v2807_v47 = vld [vmem:[%s6245_s0 + $0x1b0] sm:$0xff]  ;;  %v2747_v59 = vadd.f32 %v5219_v44, %v2671_v28  ;;  %v5623_v42 = vadd.f32 %v2808_v26, %v2744_v63  ;;  %v2673_v28 = vld [vmem:[#allocation2 + $0x1e0] sm:$0xff] }
 0x383   : > { %2936 = vadd.xlane.f32.xlu0 %v2935_v22  ;;  %2939 = vadd.xlane.f32.xlu1 %v2938_v49  ;;  %v2667_v22 = vld [vmem:[#allocation2 + $0x1b0] sm:$0xff]  ;;  %v2742_v49 = vadd.f32 %v5222_v53, %v2666_v7  ;;  %6309 = vst [vmem:[#allocation22_spill] sm:$0xff] %v5581_v30  ;;  %6310 = vst [vmem:[#allocation23_spill] sm:$0xff] %v5583_v1  ;;  %v5590_v7 = vadd.f32 %v2804_v35, %v2740_v34  ;;  %v2809_v35 = vld [vmem:[%s6245_s0 + $0x1c0] sm:$0xff] }
 0x384   : > { %v2743_v33 = vadd.f32 %v5219_v44, %v2667_v22  ;;  %v2746_v34 = vadd.f32 %v5222_v53, %v2670_v25  ;;  %v2953_v19 = vadd.f32 %v5583_v1, %v5581_v30  ;;  %v2810_v22 = vld [vmem:[%s6245_s0 + $0x1c8] sm:$0xff]  ;;  %v2811_v10 = vld [vmem:[%s6245_s0 + $0x1d0] sm:$0xff]  ;;  %v2676_v30 = vld [vmem:[#allocation2 + $0x1f8] sm:$0xff]  ;;  %v2749_v63 = vadd.f32 %v5219_v44, %v2673_v28 }
 0x385   : > { %6311 = vst [vmem:[#allocation24_spill] sm:$0xff] %v5590_v7  ;;  %v2956_v25 = vadd.f32 %v5590_v7, %v5585_v57  ;;  %v2674_v1 = vld [vmem:[#allocation2 + $0x1e8] sm:$0xff]  ;;  %v5634_v7 = vadd.f32 %v2811_v10, %v2747_v59 }
 0x387   : > { %2942 = vadd.xlane.f32.xlu0 %v2941_v8  ;;  %2945 = vadd.xlane.f32.xlu1 %v2944_v43  ;;  %v5602_v8 = vadd.f32 %v2806_v24, %v2742_v49  ;;  %v2745_v43 = vadd.f32 %v5219_v44, %v2669_v27  ;;  %v2748_v24 = vadd.f32 %v5222_v53, %v2672_v18  ;;  %v2812_v27 = vld [vmem:[%s6245_s0 + $0x1d8] sm:$0xff]  ;;  %v2675_v18 = vld [vmem:[#allocation2 + $0x1f0] sm:$0xff] }
 0x388   : > { %v5621_v49 = vadd.f32 %v2807_v47, %v2743_v33  ;;  %v2750_v47 = vadd.f32 %v5222_v53, %v2674_v1  ;;  %v2815_v1 = vld [vmem:[%s6245_s0 + $0x1f0] sm:$0xff] }
 0x389   : > { %v2959_v17 = vadd.f32 %v5602_v8, %v5600_v29  ;;  %v5636_v33 = vadd.f32 %v2812_v27, %v2748_v24 }
 0x38a   : > { %v2962_v26 = vadd.f32 %v5623_v42, %v5621_v49 }
 0x38b   : > { %2948 = vadd.xlane.f32.xlu0 %v2947_v0  ;;  %2951 = vadd.xlane.f32.xlu1 %v2950_v52  ;;  %v5630_v0 = vadd.f32 %v2809_v35, %v2745_v43  ;;  %v5632_v52 = vadd.f32 %v2810_v22, %v2746_v34  ;;  %v2813_v43 = vld [vmem:[%s6245_s0 + $0x1e0] sm:$0xff]  ;;  %v2751_v34 = vadd.f32 %v5219_v44, %v2675_v18  ;;  %v2814_v22 = vld [vmem:[%s6245_s0 + $0x1e8] sm:$0xff] }
 0x38c   : > { %v2752_v35 = vadd.f32 %v5222_v53, %v2676_v30  ;;  %v2968_v44 = vadd.f32 %v5636_v33, %v5634_v7  ;;  %v5660_v24 = vadd.f32 %v2813_v43, %v2749_v63  ;;  %v5662_v53 = vadd.f32 %v2814_v22, %v2750_v47 }
 0x38d   : > { %v2965_v59 = vadd.f32 %v5632_v52, %v5630_v0  ;;  %v5664_v30 = vadd.f32 %v2815_v1, %v2751_v34 }
 0x38f   : > { %2954 = vadd.xlane.f32.xlu0 %v2953_v19  ;;  %2957 = vadd.xlane.f32.xlu1 %v2956_v25  ;;  %v2816_v19 = vld [vmem:[%s6245_s0 + $0x1f8] sm:$0xff]  ;;  %v2971_v25 = vadd.f32 %v5662_v53, %v5660_v24 }
 0x390   : > { %v5666_v10 = vadd.f32 %v2816_v19, %v2752_v35 }
 0x392   : > { %v2974_v27 = vadd.f32 %v5666_v10, %v5664_v30 }
 0x393   : > { %2960 = vadd.xlane.f32.xlu0 %v2959_v17  ;;  %2963 = vadd.xlane.f32.xlu1 %v2962_v26 }
 0x397   : > { %2966 = vadd.xlane.f32.xlu0 %v2965_v59  ;;  %2969 = vadd.xlane.f32.xlu1 %v2968_v44 }
 0x39b   : > { %2972 = vadd.xlane.f32.xlu0 %v2971_v25  ;;  %2975 = vadd.xlane.f32.xlu1 %v2974_v27 }
 0x3ec   : > { %v2883_v28 = vpop.xlane.xlu0 %2882  ;;  %v2889_v18 = vpop.xlane.xlu1 %2888 }
 0x3ed   : > { %v2978_v17 = vmul.f32 0.00390625, %v2883_v28  ;;  %v2980_v63 = vmul.f32 0.00390625, %v2889_v18 }
 0x3ef   : > { %v5673_v47 = vsub.f32 %v5248_v2, %v2978_v17  ;;  %v5676_v26 = vsub.f32 %v5250_v36, %v2978_v17  ;;  %v5679_v43 = vsub.f32 %v5252_v3, %v2980_v63  ;;  %v5682_v34 = vsub.f32 %v5254_v6, %v2980_v63 }
 0x3f0   : > { %v2886_v35 = vpop.xlane.xlu0 %2885  ;;  %v2892_v22 = vpop.xlane.xlu1 %2891 }
 0x3f1   : > { %v2979_v1 = vmul.f32 0.00390625, %v2886_v35  ;;  %v2981_v19 = vmul.f32 0.00390625, %v2892_v22  ;;  %v3074_v59 = vmul.f32 %v5673_v47, %v5673_v47  ;;  %v3075_v2 = vmul.f32 %v5676_v26, %v5676_v26 }
 0x3f2   : > { %v3078_v36 = vmul.f32 %v5679_v43, %v5679_v43  ;;  %v3079_v3 = vmul.f32 %v5682_v34, %v5682_v34 }
 0x3f3   : > { %v5693_v44 = vsub.f32 %v5262_v11, %v2979_v1  ;;  %v5696_v6 = vsub.f32 %v5264_v13, %v2979_v1  ;;  %v5699_v25 = vsub.f32 %v5285_v20, %v2981_v19  ;;  %v5702_v27 = vsub.f32 %v5287_v21, %v2981_v19 }
 0x3f4   : > { %v2895_v28 = vpop.xlane.xlu0 %2894  ;;  %v3138_v18 = vadd.f32 %v3075_v2, %v3074_v59  ;;  %v2898_v17 = vpop.xlane.xlu1 %2897  ;;  %v3144_v13 = vadd.f32 %v3079_v3, %v3078_v36 }
 0x3f5   : > { %6312 = vst [vmem:[#allocation25_spill] sm:$0xff] %v5702_v27  ;;  %v2982_v63 = vmul.f32 0.00390625, %v2895_v28  ;;  %v2983_v35 = vmul.f32 0.00390625, %v2898_v17  ;;  %v3076_v22 = vmul.f32 %v5693_v44, %v5693_v44  ;;  %v3077_v11 = vmul.f32 %v5696_v6, %v5696_v6 }
 0x3f6   : > { %3139 = vadd.xlane.f32.xlu0 %v3138_v18  ;;  %v3080_v20 = vmul.f32 %v5699_v25, %v5699_v25  ;;  %v3081_v21 = vmul.f32 %v5702_v27, %v5702_v27 }
 0x3f7   : > { %v5713_v1 = vsub.f32 %v5293_v51, %v2982_v63  ;;  %v5716_v19 = vsub.f32 %v5295_v4, %v2982_v63  ;;  %v5719_v59 = vsub.f32 %v5306_v37, %v2983_v35  ;;  %v5722_v2 = vsub.f32 %v5318_v45, %v2983_v35 }
 0x3f8   : > { %v2901_v28 = vpop.xlane.xlu0 %2900  ;;  %v3141_v36 = vadd.f32 %v3077_v11, %v3076_v22  ;;  %v2904_v3 = vpop.xlane.xlu1 %2903  ;;  %v3147_v4 = vadd.f32 %v3081_v21, %v3080_v20 }
 0x3f9   : > { %v2984_v18 = vmul.f32 0.00390625, %v2901_v28  ;;  %v2985_v17 = vmul.f32 0.00390625, %v2904_v3  ;;  %v3082_v27 = vmul.f32 %v5713_v1, %v5713_v1  ;;  %v3083_v51 = vmul.f32 %v5716_v19, %v5716_v19 }
 0x3fa   : > { %3145 = vadd.xlane.f32.xlu0 %v3144_v13  ;;  %3142 = vadd.xlane.f32.xlu1 %v3141_v36  ;;  %v3084_v37 = vmul.f32 %v5719_v59, %v5719_v59  ;;  %v3085_v45 = vmul.f32 %v5722_v2, %v5722_v2 }
 0x3fb   : > { %v5733_v63 = vsub.f32 %v5322_v55, %v2984_v18  ;;  %v5736_v35 = vsub.f32 %v5324_v56, %v2984_v18  ;;  %v5739_v22 = vsub.f32 %v5333_v60, %v2985_v17  ;;  %v5742_v11 = vsub.f32 %v5335_v61, %v2985_v17 }
 0x3fc   : > { %v2907_v13 = vpop.xlane.xlu0 %2906  ;;  %v3150_v20 = vadd.f32 %v3083_v51, %v3082_v27  ;;  %v2910_v21 = vpop.xlane.xlu1 %2909  ;;  %v3153_v56 = vadd.f32 %v3085_v45, %v3084_v37 }
 0x3fd   : > { %v2986_v28 = vmul.f32 0.00390625, %v2907_v13  ;;  %v2987_v36 = vmul.f32 0.00390625, %v2910_v21  ;;  %v3086_v3 = vmul.f32 %v5733_v63, %v5733_v63  ;;  %v3087_v55 = vmul.f32 %v5736_v35, %v5736_v35 }
 0x3fe   : > { %3148 = vadd.xlane.f32.xlu1 %v3147_v4  ;;  %3151 = vadd.xlane.f32.xlu0 %v3150_v20  ;;  %v3088_v60 = vmul.f32 %v5739_v22, %v5739_v22  ;;  %v3089_v61 = vmul.f32 %v5742_v11, %v5742_v11 }
 0x3ff   : > { %v5753_v27 = vsub.f32 %v5358_v31, %v2986_v28  ;;  %v5756_v18 = vsub.f32 %v5360_v16, %v2986_v28  ;;  %v5759_v17 = vsub.f32 %v5372_v50, %v2987_v36  ;;  %v5762_v51 = vsub.f32 %v5374_v5, %v2987_v36 }
 0x400   : > { %v2913_v4 = vpop.xlane.xlu0 %2912  ;;  %v3156_v37 = vadd.f32 %v3087_v55, %v3086_v3  ;;  %v2916_v45 = vpop.xlane.xlu1 %2915  ;;  %v3159_v16 = vadd.f32 %v3089_v61, %v3088_v60 }
 0x401   : > { %v2988_v13 = vmul.f32 0.00390625, %v2913_v4  ;;  %v2989_v20 = vmul.f32 0.00390625, %v2916_v45  ;;  %v3090_v21 = vmul.f32 %v5753_v27, %v5753_v27  ;;  %v3091_v31 = vmul.f32 %v5756_v18, %v5756_v18 }
 0x402   : > { %3154 = vadd.xlane.f32.xlu1 %v3153_v56  ;;  %3157 = vadd.xlane.f32.xlu0 %v3156_v37  ;;  %v3092_v50 = vmul.f32 %v5759_v17, %v5759_v17  ;;  %v3093_v5 = vmul.f32 %v5762_v51, %v5762_v51 }
 0x403   : > { %v5773_v28 = vsub.f32 %v5376_v32, %v2988_v13  ;;  %v5776_v36 = vsub.f32 %v5378_v38, %v2988_v13  ;;  %v5779_v3 = vsub.f32 %v5380_v39, %v2989_v20  ;;  %v5782_v55 = vsub.f32 %v5382_v40, %v2989_v20 }
 0x404   : > { %v2919_v56 = vpop.xlane.xlu0 %2918  ;;  %v3162_v60 = vadd.f32 %v3091_v31, %v3090_v21  ;;  %v2922_v61 = vpop.xlane.xlu1 %2921  ;;  %v3165_v38 = vadd.f32 %v3093_v5, %v3092_v50 }
 0x405   : > { %v2990_v4 = vmul.f32 0.00390625, %v2919_v56  ;;  %v2991_v37 = vmul.f32 0.00390625, %v2922_v61  ;;  %v3094_v45 = vmul.f32 %v5773_v28, %v5773_v28  ;;  %v3095_v32 = vmul.f32 %v5776_v36, %v5776_v36 }
 0x406   : > { %3160 = vadd.xlane.f32.xlu1 %v3159_v16  ;;  %3163 = vadd.xlane.f32.xlu0 %v3162_v60  ;;  %v3096_v39 = vmul.f32 %v5779_v3, %v5779_v3  ;;  %v3097_v40 = vmul.f32 %v5782_v55, %v5782_v55 }
 0x407   : > { %v5793_v13 = vsub.f32 %v5408_v9, %v2990_v4  ;;  %v5796_v20 = vsub.f32 %v5410_v12, %v2990_v4  ;;  %v5799_v21 = vsub.f32 %v5412_v14, %v2991_v37  ;;  %v5802_v31 = vsub.f32 %v5414_v15, %v2991_v37 }
 0x408   : > { %v2925_v16 = vpop.xlane.xlu0 %2924  ;;  %v3168_v50 = vadd.f32 %v3095_v32, %v3094_v45  ;;  %v2928_v5 = vpop.xlane.xlu1 %2927  ;;  %v3171_v12 = vadd.f32 %v3097_v40, %v3096_v39 }
 0x409   : > { %v2992_v56 = vmul.f32 0.00390625, %v2925_v16  ;;  %v2993_v60 = vmul.f32 0.00390625, %v2928_v5  ;;  %v3098_v61 = vmul.f32 %v5793_v13, %v5793_v13  ;;  %v3099_v9 = vmul.f32 %v5796_v20, %v5796_v20 }
 0x40a   : > { %3166 = vadd.xlane.f32.xlu1 %v3165_v38  ;;  %3169 = vadd.xlane.f32.xlu0 %v3168_v50  ;;  %v3100_v14 = vmul.f32 %v5799_v21, %v5799_v21  ;;  %v3101_v15 = vmul.f32 %v5802_v31, %v5802_v31 }
 0x40b   : > { %v5813_v4 = vsub.f32 %v5446_v46, %v2992_v56  ;;  %v5816_v37 = vsub.f32 %v5454_v41, %v2992_v56  ;;  %v5819_v45 = vsub.f32 %v5456_v62, %v2993_v60  ;;  %v5822_v32 = vsub.f32 %v5458_v58, %v2993_v60  ;;  %v6317_v56 = vld [vmem:[#allocation9_spill] sm:$0xff] }
 0x40c   : > { %v2931_v38 = vpop.xlane.xlu0 %2930  ;;  %v3174_v39 = vadd.f32 %v3099_v9, %v3098_v61  ;;  %v2934_v40 = vpop.xlane.xlu1 %2933  ;;  %v3177_v41 = vadd.f32 %v3101_v15, %v3100_v14  ;;  %v6318_v61 = vld [vmem:[#allocation10_spill] sm:$0xff] }
 0x40d   : > { %6313 = vst [vmem:[#allocation26_spill] sm:$0xff] %v5813_v4  ;;  %6314 = vst [vmem:[#allocation27_spill] sm:$0xff] %v5816_v37  ;;  %v2994_v16 = vmul.f32 0.00390625, %v2931_v38  ;;  %v2995_v50 = vmul.f32 0.00390625, %v2934_v40  ;;  %v3102_v5 = vmul.f32 %v5813_v4, %v5813_v4  ;;  %v3103_v46 = vmul.f32 %v5816_v37, %v5816_v37  ;;  %v6319_v38 = vld [vmem:[#allocation11_spill] sm:$0xff]  ;;  %v6321_v4 = vld [vmem:[#allocation12_spill] sm:$0xff] }
 0x40e   : > { %6315 = vst [vmem:[#allocation28_spill] sm:$0xff] %v5819_v45  ;;  %6316 = vst [vmem:[#allocation29_spill] sm:$0xff] %v5822_v32  ;;  %3172 = vadd.xlane.f32.xlu1 %v3171_v12  ;;  %3175 = vadd.xlane.f32.xlu0 %v3174_v39  ;;  %v3104_v62 = vmul.f32 %v5819_v45, %v5819_v45  ;;  %v3105_v58 = vmul.f32 %v5822_v32, %v5822_v32 }
 0x40f   : > { %v5833_v60 = vsub.f32 %v6317_v56, %v2994_v16  ;;  %v5836_v9 = vsub.f32 %v6318_v61, %v2994_v16  ;;  %v5839_v40 = vsub.f32 %v6319_v38, %v2995_v50  ;;  %v5842_v37 = vsub.f32 %v6321_v4, %v2995_v50  ;;  %v6323_v50 = vld [vmem:[#allocation13_spill] sm:$0xff] }
 0x410   : > { %v2937_v12 = vpop.xlane.xlu0 %2936  ;;  %v3180_v14 = vadd.f32 %v3103_v46, %v3102_v5  ;;  %v2940_v15 = vpop.xlane.xlu1 %2939  ;;  %v3183_v16 = vadd.f32 %v3105_v58, %v3104_v62  ;;  %v6324_v46 = vld [vmem:[#allocation14_spill] sm:$0xff] }
 0x411   : > { %6320 = vst [vmem:[#allocation9_spill] sm:$0xff] %v5839_v40  ;;  %6322 = vst [vmem:[#allocation10_spill] sm:$0xff] %v5842_v37  ;;  %v2996_v39 = vmul.f32 0.00390625, %v2937_v12  ;;  %v2997_v45 = vmul.f32 0.00390625, %v2940_v15  ;;  %v3106_v32 = vmul.f32 %v5833_v60, %v5833_v60  ;;  %v3107_v56 = vmul.f32 %v5836_v9, %v5836_v9 }
 0x412   : > { %3178 = vadd.xlane.f32.xlu1 %v3177_v41  ;;  %3181 = vadd.xlane.f32.xlu0 %v3180_v14  ;;  %v3108_v61 = vmul.f32 %v5839_v40, %v5839_v40  ;;  %v3109_v4 = vmul.f32 %v5842_v37, %v5842_v37 }
 0x413   : > { %v5853_v5 = vsub.f32 %v6323_v50, %v2996_v39  ;;  %v5856_v38 = vsub.f32 %v6324_v46, %v2996_v39  ;;  %v5859_v12 = vsub.f32 %v5496_v48, %v2997_v45  ;;  %v5862_v15 = vsub.f32 %v5500_v54, %v2997_v45  ;;  %v6331_v46 = vld [vmem:[#allocation16_spill] sm:$0xff] }
 0x414   : > { %v2943_v41 = vpop.xlane.xlu0 %2942  ;;  %v3186_v62 = vadd.f32 %v3107_v56, %v3106_v32  ;;  %v2946_v58 = vpop.xlane.xlu1 %2945  ;;  %v3189_v39 = vadd.f32 %v3109_v4, %v3108_v61  ;;  %v6329_v32 = vld [vmem:[#allocation15_spill] sm:$0xff] }
 0x415   : > { %6325 = vst [vmem:[#allocation11_spill] sm:$0xff] %v5856_v38  ;;  %6326 = vst [vmem:[#allocation12_spill] sm:$0xff] %v5859_v12  ;;  %v2998_v14 = vmul.f32 0.00390625, %v2943_v41  ;;  %v2999_v40 = vmul.f32 0.00390625, %v2946_v58  ;;  %v3110_v37 = vmul.f32 %v5853_v5, %v5853_v5  ;;  %v3111_v50 = vmul.f32 %v5856_v38, %v5856_v38  ;;  %v6333_v58 = vld [vmem:[#allocation17_spill] sm:$0xff] }
 0x416   : > { %6327 = vst [vmem:[#allocation13_spill] sm:$0xff] %v5862_v15  ;;  %3184 = vadd.xlane.f32.xlu1 %v3183_v16  ;;  %3187 = vadd.xlane.f32.xlu0 %v3186_v62  ;;  %v3112_v48 = vmul.f32 %v5859_v12, %v5859_v12  ;;  %v3113_v54 = vmul.f32 %v5862_v15, %v5862_v15 }
 0x417   : > { %v5873_v45 = vsub.f32 %v5524_v23, %v2998_v14  ;;  %v5876_v56 = vsub.f32 %v6329_v32, %v2998_v14  ;;  %v5879_v41 = vsub.f32 %v6331_v46, %v2999_v40  ;;  %v5882_v38 = vsub.f32 %v6333_v58, %v2999_v40  ;;  %v6335_v46 = vld [vmem:[#allocation18_spill] sm:$0xff] }
 0x418   : > { %v2949_v16 = vpop.xlane.xlu0 %2948  ;;  %v3192_v61 = vadd.f32 %v3111_v50, %v3110_v37  ;;  %v2952_v4 = vpop.xlane.xlu1 %2951  ;;  %v3195_v14 = vadd.f32 %v3113_v54, %v3112_v48  ;;  %v6336_v50 = vld [vmem:[#allocation19_spill] sm:$0xff] }
 0x419   : > { %6328 = vst [vmem:[#allocation14_spill] sm:$0xff] %v5873_v45  ;;  %6330 = vst [vmem:[#allocation15_spill] sm:$0xff] %v5876_v56  ;;  %v3000_v62 = vmul.f32 0.00390625, %v2949_v16  ;;  %v3001_v12 = vmul.f32 0.00390625, %v2952_v4  ;;  %v3114_v15 = vmul.f32 %v5873_v45, %v5873_v45  ;;  %v3115_v23 = vmul.f32 %v5876_v56, %v5876_v56  ;;  %v6338_v16 = vld [vmem:[#allocation20_spill] sm:$0xff]  ;;  %v6340_v45 = vld [vmem:[#allocation21_spill] sm:$0xff] }
 0x41a   : > { %6332 = vst [vmem:[#allocation16_spill] sm:$0xff] %v5879_v41  ;;  %6334 = vst [vmem:[#allocation17_spill] sm:$0xff] %v5882_v38  ;;  %3190 = vadd.xlane.f32.xlu1 %v3189_v39  ;;  %3193 = vadd.xlane.f32.xlu0 %v3192_v61  ;;  %v3116_v32 = vmul.f32 %v5879_v41, %v5879_v41  ;;  %v3117_v40 = vmul.f32 %v5882_v38, %v5882_v38 }
 0x41b   : > { %v5893_v37 = vsub.f32 %v6335_v46, %v3000_v62  ;;  %v5896_v58 = vsub.f32 %v6336_v50, %v3000_v62  ;;  %v5899_v4 = vsub.f32 %v6338_v16, %v3001_v12  ;;  %v5902_v56 = vsub.f32 %v6340_v45, %v3001_v12  ;;  %v6342_v45 = vld [vmem:[#allocation22_spill] sm:$0xff] }
 0x41c   : > { %v2955_v39 = vpop.xlane.xlu0 %2954  ;;  %v3198_v48 = vadd.f32 %v3115_v23, %v3114_v15  ;;  %v2958_v54 = vpop.xlane.xlu1 %2957  ;;  %v3201_v62 = vadd.f32 %v3117_v40, %v3116_v32  ;;  %v6343_v23 = vld [vmem:[#allocation23_spill] sm:$0xff] }
 0x41d   : > { %6337 = vst [vmem:[#allocation18_spill] sm:$0xff] %v5896_v58  ;;  %6339 = vst [vmem:[#allocation19_spill] sm:$0xff] %v5899_v4  ;;  %v3002_v61 = vmul.f32 0.00390625, %v2955_v39  ;;  %v3003_v41 = vmul.f32 0.00390625, %v2958_v54  ;;  %v3118_v38 = vmul.f32 %v5893_v37, %v5893_v37  ;;  %v3119_v46 = vmul.f32 %v5896_v58, %v5896_v58  ;;  %v6344_v54 = vld [vmem:[#allocation24_spill] sm:$0xff] }
 0x41e   : > { %6341 = vst [vmem:[#allocation20_spill] sm:$0xff] %v5902_v56  ;;  %3196 = vadd.xlane.f32.xlu1 %v3195_v14  ;;  %3199 = vadd.xlane.f32.xlu0 %v3198_v48  ;;  %v3120_v50 = vmul.f32 %v5899_v4, %v5899_v4  ;;  %v3121_v12 = vmul.f32 %v5902_v56, %v5902_v56 }
 0x41f   : > { %v5913_v15 = vsub.f32 %v6342_v45, %v3002_v61  ;;  %v5916_v16 = vsub.f32 %v6343_v23, %v3002_v61  ;;  %v5919_v39 = vsub.f32 %v5585_v57, %v3003_v41  ;;  %v5922_v58 = vsub.f32 %v6344_v54, %v3003_v41 }
 0x420   : > { %v2961_v14 = vpop.xlane.xlu0 %2960  ;;  %v3204_v32 = vadd.f32 %v3119_v46, %v3118_v38  ;;  %v2964_v40 = vpop.xlane.xlu1 %2963  ;;  %v3207_v61 = vadd.f32 %v3121_v12, %v3120_v50 }
 0x421   : > { %v3004_v48 = vmul.f32 0.00390625, %v2961_v14  ;;  %v3005_v4 = vmul.f32 0.00390625, %v2964_v40  ;;  %v3122_v56 = vmul.f32 %v5913_v15, %v5913_v15  ;;  %v3123_v45 = vmul.f32 %v5916_v16, %v5916_v16 }
 0x422   : > { %3202 = vadd.xlane.f32.xlu1 %v3201_v62  ;;  %3205 = vadd.xlane.f32.xlu0 %v3204_v32  ;;  %v3124_v57 = vmul.f32 %v5919_v39, %v5919_v39  ;;  %v3125_v41 = vmul.f32 %v5922_v58, %v5922_v58 }
 0x423   : > { %v5933_v38 = vsub.f32 %v5600_v29, %v3004_v48  ;;  %v5936_v46 = vsub.f32 %v5602_v8, %v3004_v48  ;;  %v5939_v23 = vsub.f32 %v5621_v49, %v3005_v4  ;;  %v5942_v54 = vsub.f32 %v5623_v42, %v3005_v4 }
 0x424   : > { %v2967_v62 = vpop.xlane.xlu0 %2966  ;;  %v3210_v50 = vadd.f32 %v3123_v45, %v3122_v56  ;;  %v2970_v12 = vpop.xlane.xlu1 %2969  ;;  %v3213_v8 = vadd.f32 %v3125_v41, %v3124_v57 }
 0x425   : > { %v3006_v14 = vmul.f32 0.00390625, %v2967_v62  ;;  %v3007_v32 = vmul.f32 0.00390625, %v2970_v12  ;;  %v3126_v40 = vmul.f32 %v5933_v38, %v5933_v38  ;;  %v3127_v29 = vmul.f32 %v5936_v46, %v5936_v46 }
 0x426   : > { %3208 = vadd.xlane.f32.xlu1 %v3207_v61  ;;  %3211 = vadd.xlane.f32.xlu0 %v3210_v50  ;;  %v3128_v49 = vmul.f32 %v5939_v23, %v5939_v23  ;;  %v3129_v42 = vmul.f32 %v5942_v54, %v5942_v54 }
 0x427   : > { %v5953_v56 = vsub.f32 %v5630_v0, %v3006_v14  ;;  %v5956_v4 = vsub.f32 %v5632_v52, %v3006_v14  ;;  %v5959_v48 = vsub.f32 %v5634_v7, %v3007_v32  ;;  %v5962_v45 = vsub.f32 %v5636_v33, %v3007_v32 }
 0x428   : > { %v2973_v61 = vpop.xlane.xlu0 %2972  ;;  %v3216_v57 = vadd.f32 %v3127_v29, %v3126_v40  ;;  %v2976_v41 = vpop.xlane.xlu1 %2975  ;;  %v3219_v52 = vadd.f32 %v3129_v42, %v3128_v49 }
 0x429   : > { %v3008_v62 = vmul.f32 0.00390625, %v2973_v61  ;;  %v3009_v50 = vmul.f32 0.00390625, %v2976_v41  ;;  %v3130_v12 = vmul.f32 %v5953_v56, %v5953_v56  ;;  %v3131_v0 = vmul.f32 %v5956_v4, %v5956_v4 }
 0x42a   : > { %3214 = vadd.xlane.f32.xlu1 %v3213_v8  ;;  %3217 = vadd.xlane.f32.xlu0 %v3216_v57  ;;  %v3132_v7 = vmul.f32 %v5959_v48, %v5959_v48  ;;  %v3133_v33 = vmul.f32 %v5962_v45, %v5962_v45 }
 0x42b   : > { %v5973_v14 = vsub.f32 %v5660_v24, %v3008_v62  ;;  %v5976_v32 = vsub.f32 %v5662_v53, %v3008_v62  ;;  %v5979_v40 = vsub.f32 %v5664_v30, %v3009_v50  ;;  %v5982_v29 = vsub.f32 %v5666_v10, %v3009_v50 }
 0x42c   : > { %v3222_v8 = vadd.f32 %v3131_v0, %v3130_v12  ;;  %v3225_v24 = vadd.f32 %v3133_v33, %v3132_v7 }
 0x42d   : > { %6345 = vst [vmem:[#allocation21_spill] sm:$0xff] %v5973_v14  ;;  %6346 = vst [vmem:[#allocation22_spill] sm:$0xff] %v5976_v32  ;;  %v3134_v49 = vmul.f32 %v5973_v14, %v5973_v14  ;;  %v3135_v42 = vmul.f32 %v5976_v32, %v5976_v32  ;;  %v3136_v53 = vmul.f32 %v5979_v40, %v5979_v40 }
 0x42e   : > { %6347 = vst [vmem:[#allocation23_spill] sm:$0xff] %v5979_v40  ;;  %6348 = vst [vmem:[#allocation24_spill] sm:$0xff] %v5982_v29  ;;  %3220 = vadd.xlane.f32.xlu1 %v3219_v52  ;;  %3223 = vadd.xlane.f32.xlu0 %v3222_v8  ;;  %v3137_v30 = vmul.f32 %v5982_v29, %v5982_v29 }
 0x42f   : > { %v3228_v61 = vadd.f32 %v3135_v42, %v3134_v49  ;;  %v3394_v49 = vld [vmem:[%s6250_s5] sm:$0x3] }
 0x430   : > { %v3231_v10 = vadd.f32 %v3137_v30, %v3136_v53 }
 0x432   : > { %3226 = vadd.xlane.f32.xlu1 %v3225_v24  ;;  %3229 = vadd.xlane.f32.xlu0 %v3228_v61  ;;  %v3470_v61 = vld [vmem:[%s6251_s6] sm:$0x3] }
 0x436   : > { %3232 = vadd.xlane.f32.xlu1 %v3231_v10 }
 0x483   : > { %v3140_v57 = vpop.xlane.xlu0 %3139 }
 0x484   : > { %v3234_v41 = vmul.f32 0.00390625, %v3140_v57 }
 0x486   : > { %v3266_v62 = vadd.f32 1e-05, %v3234_v41  ;;  %v6349_v41 = vld [vmem:[#allocation7_spill] sm:$0xff] }
 0x487   : > { %v3143_v50 = vpop.xlane.xlu1 %3142  ;;  %v3146_v12 = vpop.xlane.xlu0 %3145 }
 0x488   : > { %4170 = vrsqrt.f32 %v3266_v62  ;;  %v3235_v0 = vmul.f32 0.00390625, %v3143_v50  ;;  %v3236_v52 = vmul.f32 0.00390625, %v3146_v12  ;;  %v5999_v62 = vrot.slane %v3394_v49, %v6349_v41 }
 0x48a   : > { %v3267_v7 = vadd.f32 1e-05, %v3235_v0  ;;  %v3268_v33 = vadd.f32 1e-05, %v3236_v52 }
 0x48b   : > { %v3149_v8 = vpop.xlane.xlu1 %3148  ;;  %v3152_v40 = vpop.xlane.xlu0 %3151 }
 0x48c   : > { %4172 = vrsqrt.f32 %v3267_v7  ;;  %v3237_v32 = vmul.f32 0.00390625, %v3149_v8  ;;  %v3238_v29 = vmul.f32 0.00390625, %v3152_v40  ;;  %v6350_v40 = vld [vmem:[#allocation8_spill] sm:$0xff] }
 0x48d   : > { %4174 = vrsqrt.f32 %v3268_v33  ;;  %v6002_v50 = vrot.slane %v3394_v49, %v6350_v40  ;;  %v6008_v52 = vrot.slane %v3470_v61, %v6350_v40 }
 0x48e   : > { %v3269_v42 = vadd.f32 1e-05, %v3237_v32  ;;  %v3270_v24 = vadd.f32 1e-05, %v3238_v29  ;;  %v6005_v29 = vrot.slane %v3470_v61, %v6349_v41 }
 0x48f   : > { %v3155_v53 = vpop.xlane.xlu1 %3154  ;;  %v3158_v30 = vpop.xlane.xlu0 %3157 }
 0x490   : > { %4176 = vrsqrt.f32 %v3269_v42  ;;  %v3239_v10 = vmul.f32 0.00390625, %v3155_v53  ;;  %v3240_v57 = vmul.f32 0.00390625, %v3158_v30 }
 0x491   : > { %4178 = vrsqrt.f32 %v3270_v24 }
 0x492   : > { %v4171_v12 = vpop.eup %4170  ;;  %v3271_v0 = vadd.f32 1e-05, %v3239_v10  ;;  %v3272_v32 = vadd.f32 1e-05, %v3240_v57 }
 0x493   : > { %v3330_v7 = vmul.f32 %v4171_v12, %v5673_v47  ;;  %v3331_v33 = vmul.f32 %v4171_v12, %v5676_v26  ;;  %v3161_v8 = vpop.xlane.xlu1 %3160  ;;  %v3164_v42 = vpop.xlane.xlu0 %3163 }
 0x494   : > { %4180 = vrsqrt.f32 %v3271_v0  ;;  %v3241_v53 = vmul.f32 0.00390625, %v3161_v8  ;;  %v3242_v49 = vmul.f32 0.00390625, %v3164_v42 }
 0x495   : > { %v3406_v24 = vmul.f32 %v5999_v62, %v3330_v7  ;;  %v3407_v30 = vmul.f32 %v6002_v50, %v3331_v33  ;;  %4182 = vrsqrt.f32 %v3272_v32 }
 0x496   : > { %v4173_v10 = vpop.eup %4172  ;;  %v3273_v57 = vadd.f32 1e-05, %v3241_v53  ;;  %v3274_v41 = vadd.f32 1e-05, %v3242_v49 }
 0x497   : > { %v4175_v14 = vpop.eup %4174  ;;  %v3482_v61 = vadd.f32 %v6005_v29, %v3406_v24  ;;  %v3483_v47 = vadd.f32 %v6008_v52, %v3407_v30  ;;  %v3332_v26 = vmul.f32 %v4173_v10, %v5693_v44  ;;  %v3333_v40 = vmul.f32 %v4173_v10, %v5696_v6  ;;  %v3167_v12 = vpop.xlane.xlu1 %3166  ;;  %v6351_v10 = vld [vmem:[#allocation25_spill] sm:$0xff] }
 0x498   : > { %v3170_v0 = vpop.xlane.xlu0 %3169  ;;  %v3334_v8 = vmul.f32 %v4175_v14, %v5679_v43  ;;  %v3335_v7 = vmul.f32 %v4175_v14, %v5682_v34  ;;  %4184 = vrsqrt.f32 %v3273_v57  ;;  %v3243_v32 = vmul.f32 0.00390625, %v3167_v12 }
 0x499   : > { %3546 = vst [vmem:[#allocation4] sm:$0xff] %v3482_v61  ;;  %3547 = vst [vmem:[#allocation4 + $0x8] sm:$0xff] %v3483_v47  ;;  %v3408_v33 = vmul.f32 %v5999_v62, %v3332_v26  ;;  %v3409_v42 = vmul.f32 %v6002_v50, %v3333_v40  ;;  %4186 = vrsqrt.f32 %v3274_v41  ;;  %v3244_v53 = vmul.f32 0.00390625, %v3170_v0 }
 0x49a   : > { %v4177_v49 = vpop.eup %4176  ;;  %v3410_v44 = vmul.f32 %v5999_v62, %v3334_v8  ;;  %v3411_v6 = vmul.f32 %v6002_v50, %v3335_v7  ;;  %v3275_v24 = vadd.f32 1e-05, %v3243_v32 }
 0x49b   : > { %v4179_v30 = vpop.eup %4178  ;;  %v3484_v43 = vadd.f32 %v6005_v29, %v3408_v33  ;;  %v3485_v34 = vadd.f32 %v6008_v52, %v3409_v42  ;;  %v3336_v14 = vmul.f32 %v4177_v49, %v5699_v25  ;;  %v3337_v57 = vmul.f32 %v4177_v49, %v6351_v10  ;;  %v3173_v61 = vpop.xlane.xlu1 %3172 }
 0x49c   : > { %v3176_v47 = vpop.xlane.xlu0 %3175  ;;  %v3486_v41 = vadd.f32 %v6005_v29, %v3410_v44  ;;  %v3487_v26 = vadd.f32 %v6008_v52, %v3411_v6  ;;  %v3338_v40 = vmul.f32 %v4179_v30, %v5713_v1  ;;  %v3339_v12 = vmul.f32 %v4179_v30, %v5716_v19 }
 0x49d   : > { %3548 = vst [vmem:[#allocation4 + $0x10] sm:$0xff] %v3484_v43  ;;  %3549 = vst [vmem:[#allocation4 + $0x18] sm:$0xff] %v3485_v34  ;;  %v3412_v0 = vmul.f32 %v5999_v62, %v3336_v14  ;;  %v3413_v8 = vmul.f32 %v6002_v50, %v3337_v57  ;;  %4188 = vrsqrt.f32 %v3275_v24  ;;  %v3276_v25 = vadd.f32 1e-05, %v3244_v53 }
 0x49e   : > { %v4181_v7 = vpop.eup %4180  ;;  %3550 = vst [vmem:[#allocation4 + $0x20] sm:$0xff] %v3486_v41  ;;  %3551 = vst [vmem:[#allocation4 + $0x28] sm:$0xff] %v3487_v26  ;;  %v3414_v32 = vmul.f32 %v5999_v62, %v3338_v40  ;;  %v3415_v33 = vmul.f32 %v6002_v50, %v3339_v12  ;;  %v3245_v42 = vmul.f32 0.00390625, %v3173_v61  ;;  %v3246_v49 = vmul.f32 0.00390625, %v3176_v47 }
 0x49f   : > { %v4183_v1 = vpop.eup %4182  ;;  %v3488_v19 = vadd.f32 %v6005_v29, %v3412_v0  ;;  %v3489_v44 = vadd.f32 %v6008_v52, %v3413_v8  ;;  %v3340_v6 = vmul.f32 %v4181_v7, %v5719_v59  ;;  %v3341_v30 = vmul.f32 %v4181_v7, %v5722_v2  ;;  %v3179_v24 = vpop.xlane.xlu1 %3178 }
 0x4a0   : > { %v3182_v53 = vpop.xlane.xlu0 %3181  ;;  %v3490_v43 = vadd.f32 %v6005_v29, %v3414_v32  ;;  %v3491_v34 = vadd.f32 %v6008_v52, %v3415_v33  ;;  %v3342_v14 = vmul.f32 %v4183_v1, %v5733_v63  ;;  %v3343_v10 = vmul.f32 %v4183_v1, %v5736_v35 }
 0x4a1   : > { %3552 = vst [vmem:[#allocation4 + $0x30] sm:$0xff] %v3488_v19  ;;  %3553 = vst [vmem:[#allocation4 + $0x38] sm:$0xff] %v3489_v44  ;;  %v3416_v57 = vmul.f32 %v5999_v62, %v3340_v6  ;;  %v3417_v61 = vmul.f32 %v6002_v50, %v3341_v30  ;;  %4190 = vrsqrt.f32 %v3276_v25  ;;  %v3277_v59 = vadd.f32 1e-05, %v3245_v42 }
 0x4a2   : > { %v4185_v47 = vpop.eup %4184  ;;  %3554 = vst [vmem:[#allocation4 + $0x40] sm:$0xff] %v3490_v43  ;;  %3555 = vst [vmem:[#allocation4 + $0x48] sm:$0xff] %v3491_v34  ;;  %v3418_v2 = vmul.f32 %v5999_v62, %v3342_v14  ;;  %v3419_v41 = vmul.f32 %v6002_v50, %v3343_v10  ;;  %v3278_v26 = vadd.f32 1e-05, %v3246_v49  ;;  %v3247_v40 = vmul.f32 0.00390625, %v3179_v24 }
 0x4a3   : > { %v4187_v63 = vpop.eup %4186  ;;  %v3492_v35 = vadd.f32 %v6005_v29, %v3416_v57  ;;  %v3493_v12 = vadd.f32 %v6008_v52, %v3417_v61  ;;  %v3344_v0 = vmul.f32 %v4185_v47, %v5739_v22  ;;  %v3345_v8 = vmul.f32 %v4185_v47, %v5742_v11  ;;  %v3185_v25 = vpop.xlane.xlu1 %3184 }
 0x4a4   : > { %v3188_v7 = vpop.xlane.xlu0 %3187  ;;  %v3494_v32 = vadd.f32 %v6005_v29, %v3418_v2  ;;  %v3495_v33 = vadd.f32 %v6008_v52, %v3419_v41  ;;  %v3346_v42 = vmul.f32 %v4187_v63, %v5753_v27  ;;  %v3347_v49 = vmul.f32 %v4187_v63, %v5756_v18 }
 0x4a5   : > { %3556 = vst [vmem:[#allocation4 + $0x50] sm:$0xff] %v3492_v35  ;;  %3557 = vst [vmem:[#allocation4 + $0x58] sm:$0xff] %v3493_v12  ;;  %v3420_v1 = vmul.f32 %v5999_v62, %v3344_v0  ;;  %v3421_v19 = vmul.f32 %v6002_v50, %v3345_v8  ;;  %4192 = vrsqrt.f32 %v3277_v59  ;;  %v3279_v22 = vadd.f32 1e-05, %v3247_v40 }
 0x4a6   : > { %3558 = vst [vmem:[#allocation4 + $0x60] sm:$0xff] %v3494_v32  ;;  %3559 = vst [vmem:[#allocation4 + $0x68] sm:$0xff] %v3495_v33  ;;  %v3422_v11 = vmul.f32 %v5999_v62, %v3346_v42  ;;  %v3423_v44 = vmul.f32 %v6002_v50, %v3347_v49  ;;  %4194 = vrsqrt.f32 %v3278_v26  ;;  %v3248_v6 = vmul.f32 0.00390625, %v3182_v53 }
 0x4a7   : > { %v4189_v30 = vpop.eup %4188  ;;  %v3496_v27 = vadd.f32 %v6005_v29, %v3420_v1  ;;  %v3497_v18 = vadd.f32 %v6008_v52, %v3421_v19  ;;  %4196 = vrsqrt.f32 %v3279_v22  ;;  %v3249_v24 = vmul.f32 0.00390625, %v3185_v25  ;;  %v3191_v43 = vpop.xlane.xlu1 %3190 }
 0x4a8   : > { %v3194_v34 = vpop.xlane.xlu0 %3193  ;;  %v3498_v14 = vadd.f32 %v6005_v29, %v3422_v11  ;;  %v3499_v10 = vadd.f32 %v6008_v52, %v3423_v44  ;;  %v3348_v57 = vmul.f32 %v4189_v30, %v5759_v17  ;;  %v3349_v61 = vmul.f32 %v4189_v30, %v5762_v51 }
 0x4a9   : > { %3560 = vst [vmem:[#allocation4 + $0x70] sm:$0xff] %v3496_v27  ;;  %3561 = vst [vmem:[#allocation4 + $0x78] sm:$0xff] %v3497_v18  ;;  %v3280_v53 = vadd.f32 1e-05, %v3248_v6  ;;  %v3281_v59 = vadd.f32 1e-05, %v3249_v24 }
 0x4aa   : > { %v3250_v47 = vmul.f32 0.00390625, %v3188_v7  ;;  %v3251_v2 = vmul.f32 0.00390625, %v3191_v43  ;;  %3562 = vst [vmem:[#allocation4 + $0x80] sm:$0xff] %v3498_v14  ;;  %3563 = vst [vmem:[#allocation4 + $0x88] sm:$0xff] %v3499_v10  ;;  %v3424_v41 = vmul.f32 %v5999_v62, %v3348_v57  ;;  %v3425_v26 = vmul.f32 %v6002_v50, %v3349_v61 }
 0x4ab   : > { %v3252_v40 = vmul.f32 0.00390625, %v3194_v34  ;;  %v4191_v63 = vpop.eup %4190  ;;  %4198 = vrsqrt.f32 %v3280_v53  ;;  %v3197_v17 = vpop.xlane.xlu1 %3196 }
 0x4ac   : > { %v3282_v35 = vadd.f32 1e-05, %v3250_v47  ;;  %v3283_v12 = vadd.f32 1e-05, %v3251_v2  ;;  %v3200_v0 = vpop.xlane.xlu0 %3199  ;;  %v3500_v51 = vadd.f32 %v6005_v29, %v3424_v41  ;;  %v3501_v8 = vadd.f32 %v6008_v52, %v3425_v26 }
 0x4ad   : > { %v3350_v25 = vmul.f32 %v4191_v63, %v5773_v28  ;;  %v3351_v7 = vmul.f32 %v4191_v63, %v5776_v36  ;;  %4200 = vrsqrt.f32 %v3281_v59  ;;  %v3284_v32 = vadd.f32 1e-05, %v3252_v40 }
 0x4ae   : > { %v3253_v33 = vmul.f32 0.00390625, %v3197_v17  ;;  %v3254_v42 = vmul.f32 0.00390625, %v3200_v0  ;;  %3564 = vst [vmem:[#allocation4 + $0x90] sm:$0xff] %v3500_v51  ;;  %3565 = vst [vmem:[#allocation4 + $0x98] sm:$0xff] %v3501_v8  ;;  %4202 = vrsqrt.f32 %v3282_v35  ;;  %v6352_v17 = vld [vmem:[#allocation26_spill] sm:$0xff]  ;;  %v6353_v51 = vld [vmem:[#allocation27_spill] sm:$0xff] }
 0x4af   : > { %v3426_v49 = vmul.f32 %v5999_v62, %v3350_v25  ;;  %v3427_v1 = vmul.f32 %v6002_v50, %v3351_v7  ;;  %v4193_v19 = vpop.eup %4192  ;;  %4204 = vrsqrt.f32 %v3283_v12  ;;  %v3203_v44 = vpop.xlane.xlu1 %3202 }
 0x4b0   : > { %v3285_v22 = vadd.f32 1e-05, %v3253_v33  ;;  %v3286_v11 = vadd.f32 1e-05, %v3254_v42  ;;  %v3206_v6 = vpop.xlane.xlu0 %3205  ;;  %v4195_v28 = vpop.eup %4194  ;;  %v3352_v27 = vmul.f32 %v4193_v19, %v5779_v3  ;;  %v3353_v18 = vmul.f32 %v4193_v19, %v5782_v55 }
 0x4b1   : > { %v3502_v36 = vadd.f32 %v6005_v29, %v3426_v49  ;;  %v3503_v30 = vadd.f32 %v6008_v52, %v3427_v1  ;;  %v4197_v24 = vpop.eup %4196  ;;  %v3354_v43 = vmul.f32 %v4195_v28, %v5793_v13  ;;  %v3355_v34 = vmul.f32 %v4195_v28, %v5796_v20 }
 0x4b2   : > { %4206 = vrsqrt.f32 %v3284_v32  ;;  %v3255_v14 = vmul.f32 0.00390625, %v3203_v44  ;;  %v3428_v10 = vmul.f32 %v5999_v62, %v3352_v27  ;;  %v3429_v57 = vmul.f32 %v6002_v50, %v3353_v18  ;;  %v6355_v44 = vld [vmem:[#allocation29_spill] sm:$0xff] }
 0x4b3   : > { %3566 = vst [vmem:[#allocation4 + $0xa0] sm:$0xff] %v3502_v36  ;;  %3567 = vst [vmem:[#allocation4 + $0xa8] sm:$0xff] %v3503_v30  ;;  %v3356_v61 = vmul.f32 %v4197_v24, %v5799_v21  ;;  %v3357_v53 = vmul.f32 %v4197_v24, %v5802_v31  ;;  %v3430_v3 = vmul.f32 %v5999_v62, %v3354_v43  ;;  %4208 = vrsqrt.f32 %v3285_v22  ;;  %v3209_v59 = vpop.xlane.xlu1 %3208  ;;  %v6354_v22 = vld [vmem:[#allocation28_spill] sm:$0xff] }
 0x4b4   : > { %v3431_v55 = vmul.f32 %v6002_v50, %v3355_v34  ;;  %v3287_v13 = vadd.f32 1e-05, %v3255_v14  ;;  %v3504_v20 = vadd.f32 %v6005_v29, %v3428_v10  ;;  %v3505_v47 = vadd.f32 %v6008_v52, %v3429_v57  ;;  %v3212_v26 = vpop.xlane.xlu0 %3211 }
 0x4b5   : > { %v3432_v2 = vmul.f32 %v5999_v62, %v3356_v61  ;;  %v3433_v41 = vmul.f32 %v6002_v50, %v3357_v53  ;;  %v4199_v40 = vpop.eup %4198  ;;  %v3506_v21 = vadd.f32 %v6005_v29, %v3430_v3  ;;  %4210 = vrsqrt.f32 %v3286_v11  ;;  %v6356_v53 = vld [vmem:[#allocation9_spill] sm:$0xff]  ;;  %v6357_v3 = vld [vmem:[#allocation10_spill] sm:$0xff] }
 0x4b6   : > { %v3507_v31 = vadd.f32 %v6008_v52, %v3431_v55  ;;  %v3256_v63 = vmul.f32 0.00390625, %v3206_v6  ;;  %3568 = vst [vmem:[#allocation4 + $0xb0] sm:$0xff] %v3504_v20  ;;  %3569 = vst [vmem:[#allocation4 + $0xb8] sm:$0xff] %v3505_v47  ;;  %v3358_v0 = vmul.f32 %v4199_v40, %v6352_v17  ;;  %v3359_v8 = vmul.f32 %v4199_v40, %v6353_v51  ;;  %v6358_v20 = vld [vmem:[#allocation11_spill] sm:$0xff]  ;;  %v6360_v17 = vld [vmem:[#allocation13_spill] sm:$0xff] }
 0x4b7   : > { %v3508_v35 = vadd.f32 %v6005_v29, %v3432_v2  ;;  %v3509_v12 = vadd.f32 %v6008_v52, %v3433_v41  ;;  %v4201_v25 = vpop.eup %4200  ;;  %3570 = vst [vmem:[#allocation4 + $0xc0] sm:$0xff] %v3506_v21  ;;  %4212 = vrsqrt.f32 %v3287_v13  ;;  %v3257_v32 = vmul.f32 0.00390625, %v3209_v59  ;;  %v3215_v42 = vpop.xlane.xlu1 %3214 }
 0x4b8   : > { %3571 = vst [vmem:[#allocation4 + $0xc8] sm:$0xff] %v3507_v31  ;;  %v3288_v7 = vadd.f32 1e-05, %v3256_v63  ;;  %v3258_v33 = vmul.f32 0.00390625, %v3212_v26  ;;  %v4203_v49 = vpop.eup %4202  ;;  %v3434_v1 = vmul.f32 %v5999_v62, %v3358_v0  ;;  %v3435_v19 = vmul.f32 %v6002_v50, %v3359_v8  ;;  %v3218_v14 = vpop.xlane.xlu0 %3217 }
 0x4b9   : > { %3572 = vst [vmem:[#allocation4 + $0xd0] sm:$0xff] %v3508_v35  ;;  %3573 = vst [vmem:[#allocation4 + $0xd8] sm:$0xff] %v3509_v12  ;;  %v3360_v11 = vmul.f32 %v4201_v25, %v6354_v22  ;;  %v3361_v6 = vmul.f32 %v4201_v25, %v6355_v44  ;;  %v4205_v28 = vpop.eup %4204  ;;  %v3362_v36 = vmul.f32 %v4203_v49, %v5833_v60  ;;  %v3289_v27 = vadd.f32 1e-05, %v3257_v32  ;;  %v6359_v12 = vld [vmem:[#allocation12_spill] sm:$0xff]  ;;  %v6361_v44 = vld [vmem:[#allocation14_spill] sm:$0xff] }
 0x4ba   : > { %v3363_v30 = vmul.f32 %v4203_v49, %v5836_v9  ;;  %4214 = vrsqrt.f32 %v3288_v7  ;;  %v3510_v18 = vadd.f32 %v6005_v29, %v3434_v1  ;;  %v3511_v24 = vadd.f32 %v6008_v52, %v3435_v19 }
 0x4bb   : > { %v3436_v43 = vmul.f32 %v5999_v62, %v3360_v11  ;;  %v3437_v34 = vmul.f32 %v6002_v50, %v3361_v6  ;;  %v3438_v57 = vmul.f32 %v5999_v62, %v3362_v36  ;;  %v3364_v60 = vmul.f32 %v4205_v28, %v6356_v53  ;;  %v3221_v2 = vpop.xlane.xlu1 %3220 }
 0x4bc   : > { %v4207_v10 = vpop.eup %4206  ;;  %v3439_v61 = vmul.f32 %v6002_v50, %v3363_v30  ;;  %v3365_v9 = vmul.f32 %v4205_v28, %v6357_v3  ;;  %3574 = vst [vmem:[#allocation4 + $0xe0] sm:$0xff] %v3510_v18  ;;  %3575 = vst [vmem:[#allocation4 + $0xe8] sm:$0xff] %v3511_v24  ;;  %4216 = vrsqrt.f32 %v3289_v27  ;;  %v3290_v7 = vadd.f32 1e-05, %v3258_v33  ;;  %v3224_v22 = vpop.xlane.xlu0 %3223  ;;  %v6362_v28 = vld [vmem:[#allocation15_spill] sm:$0xff]  ;;  %v6363_v18 = vld [vmem:[#allocation16_spill] sm:$0xff] }
 0x4bd   : > { %v3512_v55 = vadd.f32 %v6005_v29, %v3436_v43  ;;  %v3513_v13 = vadd.f32 %v6008_v52, %v3437_v34  ;;  %v3366_v59 = vmul.f32 %v4207_v10, %v5853_v5  ;;  %v3367_v47 = vmul.f32 %v4207_v10, %v6358_v20  ;;  %v4209_v41 = vpop.eup %4208  ;;  %v6364_v43 = vld [vmem:[#allocation17_spill] sm:$0xff] }
 0x4be   : > { %v3514_v26 = vadd.f32 %v6005_v29, %v3438_v57  ;;  %v3515_v40 = vadd.f32 %v6008_v52, %v3439_v61  ;;  %v3440_v21 = vmul.f32 %v5999_v62, %v3364_v60  ;;  %v3441_v31 = vmul.f32 %v6002_v50, %v3365_v9 }
 0x4bf   : > { %3576 = vst [vmem:[#allocation4 + $0xf0] sm:$0xff] %v3512_v55  ;;  %3577 = vst [vmem:[#allocation4 + $0xf8] sm:$0xff] %v3513_v13  ;;  %v3442_v63 = vmul.f32 %v5999_v62, %v3366_v59  ;;  %v3443_v35 = vmul.f32 %v6002_v50, %v3367_v47  ;;  %v3368_v5 = vmul.f32 %v4209_v41, %v6359_v12  ;;  %v4211_v51 = vpop.eup %4210  ;;  %4218 = vrsqrt.f32 %v3290_v7  ;;  %v3227_v10 = vpop.xlane.xlu1 %3226  ;;  %v6365_v13 = vld [vmem:[#allocation18_spill] sm:$0xff]  ;;  %v6366_v7 = vld [vmem:[#allocation19_spill] sm:$0xff] }
 0x4c0   : > { %v3369_v0 = vmul.f32 %v4209_v41, %v6360_v17  ;;  %3578 = vst [vmem:[#allocation4 + $0x100] sm:$0xff] %v3514_v26  ;;  %3579 = vst [vmem:[#allocation4 + $0x108] sm:$0xff] %v3515_v40  ;;  %v3516_v8 = vadd.f32 %v6005_v29, %v3440_v21  ;;  %v3517_v25 = vadd.f32 %v6008_v52, %v3441_v31  ;;  %v3259_v30 = vmul.f32 0.00390625, %v3215_v42  ;;  %v3230_v31 = vpop.xlane.xlu0 %3229 }
 0x4c1   : > { %v3518_v32 = vadd.f32 %v6005_v29, %v3442_v63  ;;  %v3519_v49 = vadd.f32 %v6008_v52, %v3443_v35  ;;  %v3444_v1 = vmul.f32 %v5999_v62, %v3368_v5  ;;  %v4213_v11 = vpop.eup %4212  ;;  %v3370_v6 = vmul.f32 %v4211_v51, %v6361_v44 }
 0x4c2   : > { %v3445_v19 = vmul.f32 %v6002_v50, %v3369_v0  ;;  %3580 = vst [vmem:[#allocation4 + $0x110] sm:$0xff] %v3516_v8  ;;  %3581 = vst [vmem:[#allocation4 + $0x118] sm:$0xff] %v3517_v25  ;;  %v3371_v36 = vmul.f32 %v4211_v51, %v6362_v28  ;;  %v3372_v24 = vmul.f32 %v4213_v11, %v6363_v18  ;;  %v3291_v60 = vadd.f32 1e-05, %v3259_v30 }
 0x4c3   : > { %3582 = vst [vmem:[#allocation4 + $0x120] sm:$0xff] %v3518_v32  ;;  %3583 = vst [vmem:[#allocation4 + $0x128] sm:$0xff] %v3519_v49  ;;  %v3520_v33 = vadd.f32 %v6005_v29, %v3444_v1  ;;  %v3373_v34 = vmul.f32 %v4213_v11, %v6364_v43  ;;  %v3446_v61 = vmul.f32 %v5999_v62, %v3370_v6  ;;  %v3260_v3 = vmul.f32 0.00390625, %v3218_v14  ;;  %v3233_v17 = vpop.xlane.xlu1 %3232  ;;  %v6367_v49 = vld [vmem:[#allocation20_spill] sm:$0xff] }
 0x4c4   : > { %v3521_v27 = vadd.f32 %v6008_v52, %v3445_v19  ;;  %v4215_v57 = vpop.eup %4214  ;;  %v3447_v53 = vmul.f32 %v6002_v50, %v3371_v36  ;;  %v3448_v42 = vmul.f32 %v5999_v62, %v3372_v24  ;;  %4220 = vrsqrt.f32 %v3291_v60 }
 0x4c5   : > { %3584 = vst [vmem:[#allocation4 + $0x130] sm:$0xff] %v3520_v33  ;;  %v3449_v9 = vmul.f32 %v6002_v50, %v3373_v34  ;;  %v3374_v55 = vmul.f32 %v4215_v57, %v5893_v37  ;;  %v3375_v59 = vmul.f32 %v4215_v57, %v6365_v13  ;;  %v3522_v20 = vadd.f32 %v6005_v29, %v3446_v61 }
 0x4c6   : > { %3585 = vst [vmem:[#allocation4 + $0x138] sm:$0xff] %v3521_v27  ;;  %v3523_v47 = vadd.f32 %v6008_v52, %v3447_v53  ;;  %v3292_v41 = vadd.f32 1e-05, %v3260_v3  ;;  %v3524_v26 = vadd.f32 %v6005_v29, %v3448_v42  ;;  %v3261_v37 = vmul.f32 0.00390625, %v3221_v2  ;;  %v4217_v0 = vpop.eup %4216 }
 0x4c7   : > { %v3525_v14 = vadd.f32 %v6008_v52, %v3449_v9  ;;  %v3450_v40 = vmul.f32 %v5999_v62, %v3374_v55  ;;  %v3451_v21 = vmul.f32 %v6002_v50, %v3375_v59  ;;  %3586 = vst [vmem:[#allocation4 + $0x140] sm:$0xff] %v3522_v20  ;;  %v3262_v63 = vmul.f32 0.00390625, %v3224_v22 }
 0x4c8   : > { %3587 = vst [vmem:[#allocation4 + $0x148] sm:$0xff] %v3523_v47  ;;  %4222 = vrsqrt.f32 %v3292_v41  ;;  %v3263_v35 = vmul.f32 0.00390625, %v3227_v10  ;;  %3588 = vst [vmem:[#allocation4 + $0x150] sm:$0xff] %v3524_v26  ;;  %v3293_v51 = vadd.f32 1e-05, %v3261_v37  ;;  %v3264_v25 = vmul.f32 0.00390625, %v3230_v31 }
 0x4c9   : > { %3589 = vst [vmem:[#allocation4 + $0x158] sm:$0xff] %v3525_v14  ;;  %v3526_v12 = vadd.f32 %v6005_v29, %v3450_v40  ;;  %v3527_v5 = vadd.f32 %v6008_v52, %v3451_v21  ;;  %v3294_v8 = vadd.f32 1e-05, %v3262_v63  ;;  %v3376_v32 = vmul.f32 %v4217_v0, %v6366_v7  ;;  %v4219_v2 = vpop.eup %4218  ;;  %v6370_v7 = vld [vmem:[#allocation23_spill] sm:$0xff] }
 0x4ca   : > { %v3377_v1 = vmul.f32 %v4217_v0, %v6367_v49  ;;  %4224 = vrsqrt.f32 %v3293_v51  ;;  %v3295_v19 = vadd.f32 1e-05, %v3263_v35  ;;  %v3265_v22 = vmul.f32 0.00390625, %v3233_v17  ;;  %v6369_v17 = vld [vmem:[#allocation22_spill] sm:$0xff]  ;;  %v6371_v49 = vld [vmem:[#allocation24_spill] sm:$0xff] }
 0x4cb   : > { %3590 = vst [vmem:[#allocation4 + $0x160] sm:$0xff] %v3526_v12  ;;  %3591 = vst [vmem:[#allocation4 + $0x168] sm:$0xff] %v3527_v5  ;;  %v3452_v11 = vmul.f32 %v5999_v62, %v3376_v32  ;;  %v3378_v6 = vmul.f32 %v4219_v2, %v5913_v15  ;;  %v3379_v28 = vmul.f32 %v4219_v2, %v5916_v16  ;;  %4226 = vrsqrt.f32 %v3294_v8  ;;  %v6368_v12 = vld [vmem:[#allocation21_spill] sm:$0xff] }
 0x4cc   : > { %v3453_v44 = vmul.f32 %v6002_v50, %v3377_v1  ;;  %v3296_v36 = vadd.f32 1e-05, %v3264_v25  ;;  %4228 = vrsqrt.f32 %v3295_v19  ;;  %v3297_v43 = vadd.f32 1e-05, %v3265_v22 }
 0x4cd   : > { %v3528_v30 = vadd.f32 %v6005_v29, %v3452_v11  ;;  %v3454_v27 = vmul.f32 %v5999_v62, %v3378_v6  ;;  %v3455_v18 = vmul.f32 %v6002_v50, %v3379_v28 }
 0x4ce   : > { %v3529_v33 = vadd.f32 %v6008_v52, %v3453_v44  ;;  %v4221_v24 = vpop.eup %4220  ;;  %4230 = vrsqrt.f32 %v3296_v36 }
 0x4cf   : > { %3592 = vst [vmem:[#allocation4 + $0x170] sm:$0xff] %v3528_v30  ;;  %v3530_v34 = vadd.f32 %v6005_v29, %v3454_v27  ;;  %v3531_v15 = vadd.f32 %v6008_v52, %v3455_v18  ;;  %v3380_v16 = vmul.f32 %v4221_v24, %v5919_v39  ;;  %v3381_v10 = vmul.f32 %v4221_v24, %v5922_v58 }
 0x4d0   : > { %3593 = vst [vmem:[#allocation4 + $0x178] sm:$0xff] %v3529_v33  ;;  %4232 = vrsqrt.f32 %v3297_v43 }
 0x4d1   : > { %3594 = vst [vmem:[#allocation4 + $0x180] sm:$0xff] %v3530_v34  ;;  %3595 = vst [vmem:[#allocation4 + $0x188] sm:$0xff] %v3531_v15  ;;  %v3456_v61 = vmul.f32 %v5999_v62, %v3380_v16  ;;  %v3457_v53 = vmul.f32 %v6002_v50, %v3381_v10 }
 0x4d2   : > { %v4223_v57 = vpop.eup %4222 }
 0x4d3   : > { %v3382_v60 = vmul.f32 %v4223_v57, %v5933_v38  ;;  %v3383_v3 = vmul.f32 %v4223_v57, %v5936_v46  ;;  %v3532_v42 = vadd.f32 %v6005_v29, %v3456_v61  ;;  %v3533_v9 = vadd.f32 %v6008_v52, %v3457_v53 }
 0x4d4   : > { %v4225_v55 = vpop.eup %4224 }
 0x4d5   : > { %v3458_v39 = vmul.f32 %v5999_v62, %v3382_v60  ;;  %v3459_v58 = vmul.f32 %v6002_v50, %v3383_v3  ;;  %3596 = vst [vmem:[#allocation4 + $0x190] sm:$0xff] %v3532_v42  ;;  %3597 = vst [vmem:[#allocation4 + $0x198] sm:$0xff] %v3533_v9  ;;  %v3384_v38 = vmul.f32 %v4225_v55, %v5939_v23  ;;  %v4227_v20 = vpop.eup %4226 }
 0x4d6   : > { %v3385_v46 = vmul.f32 %v4225_v55, %v5942_v54  ;;  %v3386_v26 = vmul.f32 %v4227_v20, %v5953_v56  ;;  %v3387_v14 = vmul.f32 %v4227_v20, %v5956_v4  ;;  %v4229_v40 = vpop.eup %4228 }
 0x4d7   : > { %v3534_v13 = vadd.f32 %v6005_v29, %v3458_v39  ;;  %v3535_v59 = vadd.f32 %v6008_v52, %v3459_v58  ;;  %v3460_v47 = vmul.f32 %v5999_v62, %v3384_v38  ;;  %v3388_v63 = vmul.f32 %v4229_v40, %v5959_v48 }
 0x4d8   : > { %v3461_v41 = vmul.f32 %v6002_v50, %v3385_v46  ;;  %v3462_v23 = vmul.f32 %v5999_v62, %v3386_v26  ;;  %v3463_v54 = vmul.f32 %v6002_v50, %v3387_v14  ;;  %v4231_v37 = vpop.eup %4230  ;;  %v3389_v35 = vmul.f32 %v4229_v40, %v5962_v45 }
 0x4d9   : > { %3598 = vst [vmem:[#allocation4 + $0x1a0] sm:$0xff] %v3534_v13  ;;  %3599 = vst [vmem:[#allocation4 + $0x1a8] sm:$0xff] %v3535_v59  ;;  %v3536_v21 = vadd.f32 %v6005_v29, %v3460_v47  ;;  %v3390_v5 = vmul.f32 %v4231_v37, %v6368_v12  ;;  %v3391_v0 = vmul.f32 %v4231_v37, %v6369_v17 }
 0x4da   : > { %v3537_v31 = vadd.f32 %v6008_v52, %v3461_v41  ;;  %v3538_v56 = vadd.f32 %v6005_v29, %v3462_v23  ;;  %v3539_v4 = vadd.f32 %v6008_v52, %v3463_v54  ;;  %v4233_v51 = vpop.eup %4232  ;;  %v3464_v8 = vmul.f32 %v5999_v62, %v3388_v63 }
 0x4db   : > { %3600 = vst [vmem:[#allocation4 + $0x1b0] sm:$0xff] %v3536_v21  ;;  %v3465_v25 = vmul.f32 %v6002_v50, %v3389_v35  ;;  %v3466_v48 = vmul.f32 %v5999_v62, %v3390_v5  ;;  %v3467_v45 = vmul.f32 %v6002_v50, %v3391_v0  ;;  %v3392_v32 = vmul.f32 %v4233_v51, %v6370_v7 }
 0x4dc   : > { %3601 = vst [vmem:[#allocation4 + $0x1b8] sm:$0xff] %v3537_v31  ;;  %3602 = vst [vmem:[#allocation4 + $0x1c0] sm:$0xff] %v3538_v56  ;;  %v3393_v1 = vmul.f32 %v4233_v51, %v6371_v49  ;;  %v3540_v2 = vadd.f32 %v6005_v29, %v3464_v8 }
 0x4dd   : > { %3603 = vst [vmem:[#allocation4 + $0x1c8] sm:$0xff] %v3539_v4  ;;  %v3541_v19 = vadd.f32 %v6008_v52, %v3465_v25  ;;  %v3542_v22 = vadd.f32 %v6005_v29, %v3466_v48  ;;  %v3543_v11 = vadd.f32 %v6008_v52, %v3467_v45  ;;  %v3468_v44 = vmul.f32 %v5999_v62, %v3392_v32 }
 0x4de   : > { %v3469_v6 = vmul.f32 %v6002_v50, %v3393_v1  ;;  %3604 = vst [vmem:[#allocation4 + $0x1d0] sm:$0xff] %v3540_v2 }
 0x4df   : > { %3605 = vst [vmem:[#allocation4 + $0x1d8] sm:$0xff] %v3541_v19  ;;  %3606 = vst [vmem:[#allocation4 + $0x1e0] sm:$0xff] %v3542_v22  ;;  %v3544_v28 = vadd.f32 %v6005_v29, %v3468_v44 }
 0x4e0   : > { %3607 = vst [vmem:[#allocation4 + $0x1e8] sm:$0xff] %v3543_v11  ;;  %v3545_v36 = vadd.f32 %v6008_v52, %v3469_v6 }
 0x4e1   : > { %3608 = vst [vmem:[#allocation4 + $0x1f0] sm:$0xff] %v3544_v28 }
 0x4e2   : > { %3609 = vst [vmem:[#allocation4 + $0x1f8] sm:$0xff] %v3545_v36 }
 0x4e3 PF: > { %p6204_p13 = scmp.eq.s32.totalorder %s3715_s29, 1  ;;  %s4305_s18 = smov [#allocation4]  }
 0x4e4   : > { %s3620_s19 = sshll.u32 %s4305_s18, 4  ;;  %s3621_s19 = int_to_ptr.vmem [resolvable:$true] %s3620_s19 }
 0x4e5   : > { %s4234_s8 = scalar_lea.vmem %s3621_s19, 8192  ;;  %p4241_p3 = scmp.lt.s32.totalorder %s3621_s19, %s3621_s19 }
 0x4e6   : > { %p4235_p0 = scmp.ne.s32.totalorder %s3621_s19, %s4234_s8  ;;  %p4242_p4 = scmp.lt.s32.totalorder %s4234_s8, %s4234_s8 }
 0x4e8   : > { %p4236_p1 = pnand %p4235_p0, %p6204_p13  ;;  %p4243_p5 = por %p4242_p4, %p4241_p3 }
 0x4ea   : > { %p4237_p2 = pneg %p4236_p1 }
 0x4ec   : > { %p4244_p6 = pnand %p4243_p5, %p4237_p2 }
 0x4ee   : > { %4247 = shalt.err (!%p4244_p6)
}
 0x4ef   : > { %s4248_s29 = scalar_lea.hbm %s6252_s7, 8192 }
 0x4f0   : > { %p4249_p7 = scmp.ne.s32.totalorder %s6252_s7, %s4248_s29  ;;  %p4254_p10 = scmp.lt.u32.totalorder %s4248_s29, %s6252_s7 }
 0x4f2   : > { %p4250_p8 = pnand %p4249_p7, %p6204_p13 }
 0x4f4   : > { %p4251_p9 = pneg %p4250_p8 }
 0x4f6   : > { %p4256_p11 = pnand %p4254_p10, %p4251_p9 }
 0x4f8   : > { %4259 = shalt.err (!%p4256_p11)
}
 0x4f9   : > { %s4306_s9 = smov 256   ;;  %s4307_s11 = smov 16  }
 0x4fa   : > { %3929 = dma.vmem_to_hbm [thread:$0]  (%p6204_p13), %s3621_s19, 8192, %s6252_s7, [#allocation5], %s4306_s9, %s4306_s9, %s4307_s11  }
 0x4fb   : > { %4281 = dma.done.wait (%p6204_p13), [#allocation5], 8192  }
 0x4fc   : > { %4283 = vsyncadd (%p6204_p13), [#allocation5], 4294959104 }
 0x4fd PF: > { %s18_s28 = sadd.s32 1, %s4302_s28   ;;  %s6373_s24 = smov %s4290_s25 }
 0x4fe   : > { %p15_p12 = scmp.ge.s32.totalorder %s18_s28, 4   ;;  %s6374_s25 = smov %s4384_s10 }
 0x4ff   : > { %s6375_s26 = smov %s4298_s27  ;;  %s6376_s27 = smov %s6378_s30 }
 0x500   :  { %17 = sbr.rel (!%p15_p12) target bundleno = 3 (0x3), region = 121 }
 0x507   :  { %3636 = vsyncpa [#allocation5], 1 }
 0x508   :  { %3638 = vsyncpa [#allocation5 + $0x1], 1 }

</bundles_post_ra>
